<compile_context>
chip_gen: v5e
topology: v5e:2x2
jax: 0.10.0
libtpu: 0.0.40
codegen_flags: <defaults>
</compile_context>

<pallas_src>
import functools

import jax
import jax.numpy as jnp
from jax.experimental import pallas as pl
from jax.experimental.pallas import tpu as pltpu

KSIZE = 7
PAD = 3
ROW_OFF = 8      # sublane-aligned row offset of the map inside the padded scratch
LANE_OFF = 128   # lane-aligned column offset of the map inside the padded scratch


def _round_up(x, m):
    return (x + m - 1) // m * m


def _sa_kernel(w_ref, x_ref, o_ref, pad_ref, sh_ref, *, H, W, Wsh):
    # w_ref  : SMEM f32[2*7*7]           conv weight, (O=1, I=2, kh, kw) flattened
    # x_ref  : VMEM (Bn, C, H*W)         lane-dense input block
    # o_ref  : VMEM (Bn, C, H*W)         lane-dense output block
    # pad_ref: VMEM (2, Bn, Hp, Wpad)    zero-padded avg/max maps (aligned interior)
    # sh_ref : VMEM (2*7, Bn, Hp, Wsh)   7 lane-shifted copies of each padded map
    R0, L0 = ROW_OFF, LANE_OFF
    Bn = x_ref.shape[0]

    xf = x_ref[...].astype(jnp.float32)            # (Bn, C, HW)
    avg = jnp.mean(xf, axis=1, keepdims=True)      # (Bn, 1, HW)  channel mean
    mx = jnp.max(xf, axis=1, keepdims=True)        # (Bn, 1, HW)  channel max

    # Zeroed, aligned padded scratch; write the (H, W) maps into its interior
    # (row offset 8 = sublane aligned, lane offset 128 = lane aligned), one
    # lane-slice per image row.
    pad_ref[...] = jnp.zeros_like(pad_ref)
    for i in range(H):
        cols = slice(i * W, (i + 1) * W)
        rows = slice(R0 + i, R0 + i + 1)
        pad_ref[0, :, rows, L0:L0 + W] = avg[:, :, cols]
        pad_ref[1, :, rows, L0:L0 + W] = mx[:, :, cols]

    # Hoist the 7 lane (kw) shifts out of the 7x7 tap loop: materialize shifted
    # copies once; the tap loop then only needs sublane-offset vector loads.
    for m in range(2):
        pm = pad_ref[m]                            # (Bn, Hp, Wpad)
        for kw in range(KSIZE):
            s = L0 - PAD + kw
            sh_ref[m * KSIZE + kw] = pm[:, :, s:s + Wsh]

    # 7x7 depth-2 conv as scalar-weighted shifted adds on the VPU.
    acc = jnp.zeros((Bn, H, Wsh), jnp.float32)
    for kh in range(KSIZE):
        r = R0 - PAD + kh
        for kw in range(KSIZE):
            w_avg = w_ref[kh * KSIZE + kw]                     # weight[0, 0, kh, kw]
            w_max = w_ref[KSIZE * KSIZE + kh * KSIZE + kw]     # weight[0, 1, kh, kw]
            a = sh_ref[kw, :, r:r + H, :]                      # (Bn, H, Wsh) plain vld
            m_ = sh_ref[KSIZE + kw, :, r:r + H, :]
            acc = acc + (w_avg * a + w_max * m_)

    # Flatten the (H, W) attention map back to H*W lanes (lane-dense) and apply.
    att = jax.nn.sigmoid(
        jnp.concatenate([acc[:, i:i + 1, :W] for i in range(H)], axis=-1))  # (Bn,1,HW)
    o_ref[...] = (x_ref[...].astype(jnp.float32) * att).astype(o_ref.dtype)


def _pick_bn(N, C, HW, Hp, Wsh, Wpad, itemsize):
    """Largest divisor of N whose per-step VMEM footprint fits a conservative
    budget; very large batches still split into several multi-MiB I/O steps so
    the pipeline (and both v7x TensorCores) have work."""
    io = 2 * 2 * C * HW * itemsize                       # in + out, double-buffered
    scr = (2 * Hp * Wpad + 2 * KSIZE * Hp * Wsh) * 4     # padded + shifted scratch
    live = 6 * C * HW * 4                                # headroom for live values
    per_elem = io + scr + live
    budget = 20 * 1024 * 1024
    divisors = [d for d in range(1, N + 1) if N % d == 0]
    fit = [d for d in divisors if d * per_elem <= budget] or [1]
    bn = fit[-1]                                         # biggest block that fits
    for d in fit:                                        # keep several grid steps once
        if d * io >= (8 << 20):                          # per-step I/O is already large
            bn = d
            break
    return bn


@jax.jit
def spatial_attention(x, weight):
    """x: f32[N, C, H, W]; weight: f32[1, 2, 7, 7] (Conv2d(2, 1, 7, pad=3, bias=False))."""
    N, C, H, W = x.shape
    HW = H * W
    Hp = _round_up(ROW_OFF + H + PAD, 8)                 # padded map rows (sublane mult.)
    Wsh = max(128, _round_up(W, 128))                    # shifted-copy lane width
    Wpad = Wsh + 2 * LANE_OFF                            # padded map lane width

    w_flat = weight.reshape(-1).astype(jnp.float32)      # (98,) scalars -> SMEM
    x_flat = x.reshape(N, C, HW)                         # lane-dense layout (free reshape)

    Bn = _pick_bn(N, C, HW, Hp, Wsh, Wpad, x.dtype.itemsize)
    grid = (N // Bn,)

    kernel = functools.partial(_sa_kernel, H=H, W=W, Wsh=Wsh)
    out = pl.pallas_call(
        kernel,
        out_shape=jax.ShapeDtypeStruct((N, C, HW), x.dtype),
        grid=grid,
        in_specs=[
            pl.BlockSpec(memory_space=pltpu.SMEM),                 # conv weights (scalars)
            pl.BlockSpec((Bn, C, HW), lambda n: (n, 0, 0)),        # lane-dense input slab
        ],
        out_specs=pl.BlockSpec((Bn, C, HW), lambda n: (n, 0, 0)),  # dense (unmasked) store
        scratch_shapes=[
            pltpu.VMEM((2, Bn, Hp, Wpad), jnp.float32),            # padded avg/max maps
            pltpu.VMEM((2 * KSIZE, Bn, Hp, Wsh), jnp.float32),     # lane-shifted copies
        ],
        compiler_params=pltpu.CompilerParams(
            dimension_semantics=("parallel",),
            vmem_limit_bytes=48 * 1024 * 1024,
        ),
    )(w_flat, x_flat)
    return out.reshape(N, C, H, W)


def spatial_attention_ref(x, weight):
    # Pure-JAX reference matching the PyTorch forward.
    avg = jnp.mean(x, axis=1, keepdims=True)
    mx = jnp.max(x, axis=1, keepdims=True)
    x1 = jnp.concatenate([avg, mx], axis=1)
    y = jax.lax.conv_general_dilated(
        x1, weight, window_strides=(1, 1), padding=[(PAD, PAD), (PAD, PAD)],
        dimension_numbers=("NCHW", "OIHW", "NCHW"))
    return x * jax.nn.sigmoid(y)


if __name__ == "__main__":
    key = jax.random.PRNGKey(0)
    kx, kw = jax.random.split(key)

    N, C, H, W = 2, 4, 16, 16
    x = jax.random.normal(kx, (N, C, H, W), dtype=jnp.float32)

    # Deterministic Conv2d(2, 1, 7, bias=False) weight: PyTorch-style kaiming
    # uniform bound = 1/sqrt(fan_in), fan_in = 2*7*7 = 98.
    bound = 1.0 / jnp.sqrt(2.0 * KSIZE * KSIZE)
    weight = jax.random.uniform(kw, (1, 2, KSIZE, KSIZE), jnp.float32,
                                minval=-bound, maxval=bound)

    out = jax.block_until_ready(spatial_attention(x, weight))
    ref = jax.block_until_ready(spatial_attention_ref(x, weight))

    assert out.shape == (N, C, H, W) and out.dtype == jnp.float32
    err = jnp.max(jnp.abs(out - ref))
    assert jnp.allclose(out, ref, atol=2e-5, rtol=2e-5), f"max abs err = {err}"
    print("KERNEL_OK")
</pallas_src>

<mosaic_0001>
module attributes {stable_mosaic.version = 11 : i64} {
  func.func @_sa_kernel(%arg0: i32, %arg1: memref<98xf32, #tpu.memory_space<smem>>, %arg2: memref<2x4x256xf32, #tpu.memory_space<vmem>>, %arg3: memref<2x4x256xf32, #tpu.memory_space<vmem>>, %arg4: memref<2x2x32x384xf32, #tpu.memory_space<vmem>>, %arg5: memref<14x2x32x128xf32, #tpu.memory_space<vmem>>) attributes {dimension_semantics = [#tpu.dimension_semantics<parallel>], iteration_bounds = array<i64: 1>, scalar_prefetch = 0 : i64, scratch_operands = 2 : i64, tpu.core_type = #tpu.core_type<tc>, window_params = [{transform_indices = @transform_0, window_bounds = array<i64: 98>}, {transform_indices = @transform_1, window_bounds = array<i64: 2, 4, 256>}, {transform_indices = @transform_2, window_bounds = array<i64: 2, 4, 256>}]} {
    %c0 = arith.constant 0 : index
    %c0_0 = arith.constant 0 : index
    %c0_1 = arith.constant 0 : index
    %0 = vector.load %arg2[%c0, %c0_0, %c0_1] : memref<2x4x256xf32, #tpu.memory_space<vmem>>, vector<2x4x256xf32>
    %cst = arith.constant dense<0.000000e+00> : vector<2x256xf32>
    %1 = vector.multi_reduction <add>, %0, %cst [1] : vector<2x4x256xf32> to vector<2x256xf32>
    %2 = vector.shape_cast %1 : vector<2x256xf32> to vector<2x1x256xf32>
    %cst_2 = arith.constant 4.000000e+00 : f32
    %3 = vector.broadcast %cst_2 : f32 to vector<2x1x256xf32>
    %4 = arith.divf %2, %3 : vector<2x1x256xf32>
    %cst_3 = arith.constant dense<0xFF800000> : vector<2x256xf32>
    %5 = vector.multi_reduction <maximumf>, %0, %cst_3 [1] : vector<2x4x256xf32> to vector<2x256xf32>
    %6 = vector.shape_cast %5 : vector<2x256xf32> to vector<2x1x256xf32>
    %cst_4 = arith.constant 0.000000e+00 : f32
    %7 = vector.broadcast %cst_4 : f32 to vector<2x2x32x384xf32>
    %c0_5 = arith.constant 0 : index
    %c0_6 = arith.constant 0 : index
    %c0_7 = arith.constant 0 : index
    %c0_8 = arith.constant 0 : index
    %8 = vector.load %arg4[%c0_5, %c0_6, %c0_7, %c0_8] : memref<2x2x32x384xf32, #tpu.memory_space<vmem>>, vector<2x2x32x384xf32>
    tpu.vector_store %arg4[%c0_5, %c0_6, %c0_7, %c0_8], %7 {strides = array<i32>} : memref<2x2x32x384xf32, #tpu.memory_space<vmem>>, vector<2x2x32x384xf32>,
    %9 = vector.extract_strided_slice %4 {offsets = [0, 0, 0], sizes = [2, 1, 16], strides = [1, 1, 1]} : vector<2x1x256xf32> to vector<2x1x16xf32>
    %c0_9 = arith.constant 0 : index
    %c0_10 = arith.constant 0 : index
    %c8 = arith.constant 8 : index
    %c128 = arith.constant 128 : index
    %10 = vector.load %arg4[%c0_9, %c0_10, %c8, %c128] : memref<2x2x32x384xf32, #tpu.memory_space<vmem>>, vector<1x2x1x16xf32>
    %11 = vector.shape_cast %10 : vector<1x2x1x16xf32> to vector<2x1x16xf32>
    %12 = vector.shape_cast %9 : vector<2x1x16xf32> to vector<1x2x1x16xf32>
    tpu.vector_store %arg4[%c0_9, %c0_10, %c8, %c128], %12 {strides = array<i32>} : memref<2x2x32x384xf32, #tpu.memory_space<vmem>>, vector<1x2x1x16xf32>,
    %13 = vector.extract_strided_slice %6 {offsets = [0, 0, 0], sizes = [2, 1, 16], strides = [1, 1, 1]} : vector<2x1x256xf32> to vector<2x1x16xf32>
    %c1 = arith.constant 1 : index
    %c0_11 = arith.constant 0 : index
    %c8_12 = arith.constant 8 : index
    %c128_13 = arith.constant 128 : index
    %14 = vector.load %arg4[%c1, %c0_11, %c8_12, %c128_13] : memref<2x2x32x384xf32, #tpu.memory_space<vmem>>, vector<1x2x1x16xf32>
    %15 = vector.shape_cast %14 : vector<1x2x1x16xf32> to vector<2x1x16xf32>
    %16 = vector.shape_cast %13 : vector<2x1x16xf32> to vector<1x2x1x16xf32>
    tpu.vector_store %arg4[%c1, %c0_11, %c8_12, %c128_13], %16 {strides = array<i32>} : memref<2x2x32x384xf32, #tpu.memory_space<vmem>>, vector<1x2x1x16xf32>,
    %17 = vector.extract_strided_slice %4 {offsets = [0, 0, 16], sizes = [2, 1, 16], strides = [1, 1, 1]} : vector<2x1x256xf32> to vector<2x1x16xf32>
    %c0_14 = arith.constant 0 : index
    %c0_15 = arith.constant 0 : index
    %c9 = arith.constant 9 : index
    %c128_16 = arith.constant 128 : index
    %18 = vector.load %arg4[%c0_14, %c0_15, %c9, %c128_16] : memref<2x2x32x384xf32, #tpu.memory_space<vmem>>, vector<1x2x1x16xf32>
    %19 = vector.shape_cast %18 : vector<1x2x1x16xf32> to vector<2x1x16xf32>
    %20 = vector.shape_cast %17 : vector<2x1x16xf32> to vector<1x2x1x16xf32>
    tpu.vector_store %arg4[%c0_14, %c0_15, %c9, %c128_16], %20 {strides = array<i32>} : memref<2x2x32x384xf32, #tpu.memory_space<vmem>>, vector<1x2x1x16xf32>,
    %21 = vector.extract_strided_slice %6 {offsets = [0, 0, 16], sizes = [2, 1, 16], strides = [1, 1, 1]} : vector<2x1x256xf32> to vector<2x1x16xf32>
    %c1_17 = arith.constant 1 : index
    %c0_18 = arith.constant 0 : index
    %c9_19 = arith.constant 9 : index
    %c128_20 = arith.constant 128 : index
    %22 = vector.load %arg4[%c1_17, %c0_18, %c9_19, %c128_20] : memref<2x2x32x384xf32, #tpu.memory_space<vmem>>, vector<1x2x1x16xf32>
    %23 = vector.shape_cast %22 : vector<1x2x1x16xf32> to vector<2x1x16xf32>
    %24 = vector.shape_cast %21 : vector<2x1x16xf32> to vector<1x2x1x16xf32>
    tpu.vector_store %arg4[%c1_17, %c0_18, %c9_19, %c128_20], %24 {strides = array<i32>} : memref<2x2x32x384xf32, #tpu.memory_space<vmem>>, vector<1x2x1x16xf32>,
    %25 = vector.extract_strided_slice %4 {offsets = [0, 0, 32], sizes = [2, 1, 16], strides = [1, 1, 1]} : vector<2x1x256xf32> to vector<2x1x16xf32>
    %c0_21 = arith.constant 0 : index
    %c0_22 = arith.constant 0 : index
    %c10 = arith.constant 10 : index
    %c128_23 = arith.constant 128 : index
    %26 = vector.load %arg4[%c0_21, %c0_22, %c10, %c128_23] : memref<2x2x32x384xf32, #tpu.memory_space<vmem>>, vector<1x2x1x16xf32>
    %27 = vector.shape_cast %26 : vector<1x2x1x16xf32> to vector<2x1x16xf32>
    %28 = vector.shape_cast %25 : vector<2x1x16xf32> to vector<1x2x1x16xf32>
    tpu.vector_store %arg4[%c0_21, %c0_22, %c10, %c128_23], %28 {strides = array<i32>} : memref<2x2x32x384xf32, #tpu.memory_space<vmem>>, vector<1x2x1x16xf32>,
    %29 = vector.extract_strided_slice %6 {offsets = [0, 0, 32], sizes = [2, 1, 16], strides = [1, 1, 1]} : vector<2x1x256xf32> to vector<2x1x16xf32>
    %c1_24 = arith.constant 1 : index
    %c0_25 = arith.constant 0 : index
    %c10_26 = arith.constant 10 : index
    %c128_27 = arith.constant 128 : index
    %30 = vector.load %arg4[%c1_24, %c0_25, %c10_26, %c128_27] : memref<2x2x32x384xf32, #tpu.memory_space<vmem>>, vector<1x2x1x16xf32>
    %31 = vector.shape_cast %30 : vector<1x2x1x16xf32> to vector<2x1x16xf32>
    %32 = vector.shape_cast %29 : vector<2x1x16xf32> to vector<1x2x1x16xf32>
    tpu.vector_store %arg4[%c1_24, %c0_25, %c10_26, %c128_27], %32 {strides = array<i32>} : memref<2x2x32x384xf32, #tpu.memory_space<vmem>>, vector<1x2x1x16xf32>,
    %33 = vector.extract_strided_slice %4 {offsets = [0, 0, 48], sizes = [2, 1, 16], strides = [1, 1, 1]} : vector<2x1x256xf32> to vector<2x1x16xf32>
    %c0_28 = arith.constant 0 : index
    %c0_29 = arith.constant 0 : index
    %c11 = arith.constant 11 : index
    %c128_30 = arith.constant 128 : index
    %34 = vector.load %arg4[%c0_28, %c0_29, %c11, %c128_30] : memref<2x2x32x384xf32, #tpu.memory_space<vmem>>, vector<1x2x1x16xf32>
    %35 = vector.shape_cast %34 : vector<1x2x1x16xf32> to vector<2x1x16xf32>
    %36 = vector.shape_cast %33 : vector<2x1x16xf32> to vector<1x2x1x16xf32>
    tpu.vector_store %arg4[%c0_28, %c0_29, %c11, %c128_30], %36 {strides = array<i32>} : memref<2x2x32x384xf32, #tpu.memory_space<vmem>>, vector<1x2x1x16xf32>,
    %37 = vector.extract_strided_slice %6 {offsets = [0, 0, 48], sizes = [2, 1, 16], strides = [1, 1, 1]} : vector<2x1x256xf32> to vector<2x1x16xf32>
    %c1_31 = arith.constant 1 : index
    %c0_32 = arith.constant 0 : index
    %c11_33 = arith.constant 11 : index
    %c128_34 = arith.constant 128 : index
    %38 = vector.load %arg4[%c1_31, %c0_32, %c11_33, %c128_34] : memref<2x2x32x384xf32, #tpu.memory_space<vmem>>, vector<1x2x1x16xf32>
    %39 = vector.shape_cast %38 : vector<1x2x1x16xf32> to vector<2x1x16xf32>
    %40 = vector.shape_cast %37 : vector<2x1x16xf32> to vector<1x2x1x16xf32>
    tpu.vector_store %arg4[%c1_31, %c0_32, %c11_33, %c128_34], %40 {strides = array<i32>} : memref<2x2x32x384xf32, #tpu.memory_space<vmem>>, vector<1x2x1x16xf32>,
    %41 = vector.extract_strided_slice %4 {offsets = [0, 0, 64], sizes = [2, 1, 16], strides = [1, 1, 1]} : vector<2x1x256xf32> to vector<2x1x16xf32>
    %c0_35 = arith.constant 0 : index
    %c0_36 = arith.constant 0 : index
    %c12 = arith.constant 12 : index
    %c128_37 = arith.constant 128 : index
    %42 = vector.load %arg4[%c0_35, %c0_36, %c12, %c128_37] : memref<2x2x32x384xf32, #tpu.memory_space<vmem>>, vector<1x2x1x16xf32>
    %43 = vector.shape_cast %42 : vector<1x2x1x16xf32> to vector<2x1x16xf32>
    %44 = vector.shape_cast %41 : vector<2x1x16xf32> to vector<1x2x1x16xf32>
    tpu.vector_store %arg4[%c0_35, %c0_36, %c12, %c128_37], %44 {strides = array<i32>} : memref<2x2x32x384xf32, #tpu.memory_space<vmem>>, vector<1x2x1x16xf32>,
    %45 = vector.extract_strided_slice %6 {offsets = [0, 0, 64], sizes = [2, 1, 16], strides = [1, 1, 1]} : vector<2x1x256xf32> to vector<2x1x16xf32>
    %c1_38 = arith.constant 1 : index
    %c0_39 = arith.constant 0 : index
    %c12_40 = arith.constant 12 : index
    %c128_41 = arith.constant 128 : index
    %46 = vector.load %arg4[%c1_38, %c0_39, %c12_40, %c128_41] : memref<2x2x32x384xf32, #tpu.memory_space<vmem>>, vector<1x2x1x16xf32>
    %47 = vector.shape_cast %46 : vector<1x2x1x16xf32> to vector<2x1x16xf32>
    %48 = vector.shape_cast %45 : vector<2x1x16xf32> to vector<1x2x1x16xf32>
    tpu.vector_store %arg4[%c1_38, %c0_39, %c12_40, %c128_41], %48 {strides = array<i32>} : memref<2x2x32x384xf32, #tpu.memory_space<vmem>>, vector<1x2x1x16xf32>,
    %49 = vector.extract_strided_slice %4 {offsets = [0, 0, 80], sizes = [2, 1, 16], strides = [1, 1, 1]} : vector<2x1x256xf32> to vector<2x1x16xf32>
    %c0_42 = arith.constant 0 : index
    %c0_43 = arith.constant 0 : index
    %c13 = arith.constant 13 : index
    %c128_44 = arith.constant 128 : index
    %50 = vector.load %arg4[%c0_42, %c0_43, %c13, %c128_44] : memref<2x2x32x384xf32, #tpu.memory_space<vmem>>, vector<1x2x1x16xf32>
    %51 = vector.shape_cast %50 : vector<1x2x1x16xf32> to vector<2x1x16xf32>
    %52 = vector.shape_cast %49 : vector<2x1x16xf32> to vector<1x2x1x16xf32>
    tpu.vector_store %arg4[%c0_42, %c0_43, %c13, %c128_44], %52 {strides = array<i32>} : memref<2x2x32x384xf32, #tpu.memory_space<vmem>>, vector<1x2x1x16xf32>,
    %53 = vector.extract_strided_slice %6 {offsets = [0, 0, 80], sizes = [2, 1, 16], strides = [1, 1, 1]} : vector<2x1x256xf32> to vector<2x1x16xf32>
    %c1_45 = arith.constant 1 : index
    %c0_46 = arith.constant 0 : index
    %c13_47 = arith.constant 13 : index
    %c128_48 = arith.constant 128 : index
    %54 = vector.load %arg4[%c1_45, %c0_46, %c13_47, %c128_48] : memref<2x2x32x384xf32, #tpu.memory_space<vmem>>, vector<1x2x1x16xf32>
    %55 = vector.shape_cast %54 : vector<1x2x1x16xf32> to vector<2x1x16xf32>
    %56 = vector.shape_cast %53 : vector<2x1x16xf32> to vector<1x2x1x16xf32>
    tpu.vector_store %arg4[%c1_45, %c0_46, %c13_47, %c128_48], %56 {strides = array<i32>} : memref<2x2x32x384xf32, #tpu.memory_space<vmem>>, vector<1x2x1x16xf32>,
    %57 = vector.extract_strided_slice %4 {offsets = [0, 0, 96], sizes = [2, 1, 16], strides = [1, 1, 1]} : vector<2x1x256xf32> to vector<2x1x16xf32>
    %c0_49 = arith.constant 0 : index
    %c0_50 = arith.constant 0 : index
    %c14 = arith.constant 14 : index
    %c128_51 = arith.constant 128 : index
    %58 = vector.load %arg4[%c0_49, %c0_50, %c14, %c128_51] : memref<2x2x32x384xf32, #tpu.memory_space<vmem>>, vector<1x2x1x16xf32>
    %59 = vector.shape_cast %58 : vector<1x2x1x16xf32> to vector<2x1x16xf32>
    %60 = vector.shape_cast %57 : vector<2x1x16xf32> to vector<1x2x1x16xf32>
    tpu.vector_store %arg4[%c0_49, %c0_50, %c14, %c128_51], %60 {strides = array<i32>} : memref<2x2x32x384xf32, #tpu.memory_space<vmem>>, vector<1x2x1x16xf32>,
    %61 = vector.extract_strided_slice %6 {offsets = [0, 0, 96], sizes = [2, 1, 16], strides = [1, 1, 1]} : vector<2x1x256xf32> to vector<2x1x16xf32>
    %c1_52 = arith.constant 1 : index
    %c0_53 = arith.constant 0 : index
    %c14_54 = arith.constant 14 : index
    %c128_55 = arith.constant 128 : index
    %62 = vector.load %arg4[%c1_52, %c0_53, %c14_54, %c128_55] : memref<2x2x32x384xf32, #tpu.memory_space<vmem>>, vector<1x2x1x16xf32>
    %63 = vector.shape_cast %62 : vector<1x2x1x16xf32> to vector<2x1x16xf32>
    %64 = vector.shape_cast %61 : vector<2x1x16xf32> to vector<1x2x1x16xf32>
    tpu.vector_store %arg4[%c1_52, %c0_53, %c14_54, %c128_55], %64 {strides = array<i32>} : memref<2x2x32x384xf32, #tpu.memory_space<vmem>>, vector<1x2x1x16xf32>,
    %65 = vector.extract_strided_slice %4 {offsets = [0, 0, 112], sizes = [2, 1, 16], strides = [1, 1, 1]} : vector<2x1x256xf32> to vector<2x1x16xf32>
    %c0_56 = arith.constant 0 : index
    %c0_57 = arith.constant 0 : index
    %c15 = arith.constant 15 : index
    %c128_58 = arith.constant 128 : index
    %66 = vector.load %arg4[%c0_56, %c0_57, %c15, %c128_58] : memref<2x2x32x384xf32, #tpu.memory_space<vmem>>, vector<1x2x1x16xf32>
    %67 = vector.shape_cast %66 : vector<1x2x1x16xf32> to vector<2x1x16xf32>
    %68 = vector.shape_cast %65 : vector<2x1x16xf32> to vector<1x2x1x16xf32>
    tpu.vector_store %arg4[%c0_56, %c0_57, %c15, %c128_58], %68 {strides = array<i32>} : memref<2x2x32x384xf32, #tpu.memory_space<vmem>>, vector<1x2x1x16xf32>,
    %69 = vector.extract_strided_slice %6 {offsets = [0, 0, 112], sizes = [2, 1, 16], strides = [1, 1, 1]} : vector<2x1x256xf32> to vector<2x1x16xf32>
    %c1_59 = arith.constant 1 : index
    %c0_60 = arith.constant 0 : index
    %c15_61 = arith.constant 15 : index
    %c128_62 = arith.constant 128 : index
    %70 = vector.load %arg4[%c1_59, %c0_60, %c15_61, %c128_62] : memref<2x2x32x384xf32, #tpu.memory_space<vmem>>, vector<1x2x1x16xf32>
    %71 = vector.shape_cast %70 : vector<1x2x1x16xf32> to vector<2x1x16xf32>
    %72 = vector.shape_cast %69 : vector<2x1x16xf32> to vector<1x2x1x16xf32>
    tpu.vector_store %arg4[%c1_59, %c0_60, %c15_61, %c128_62], %72 {strides = array<i32>} : memref<2x2x32x384xf32, #tpu.memory_space<vmem>>, vector<1x2x1x16xf32>,
    %73 = vector.extract_strided_slice %4 {offsets = [0, 0, 128], sizes = [2, 1, 16], strides = [1, 1, 1]} : vector<2x1x256xf32> to vector<2x1x16xf32>
    %c0_63 = arith.constant 0 : index
    %c0_64 = arith.constant 0 : index
    %c16 = arith.constant 16 : index
    %c128_65 = arith.constant 128 : index
    %74 = vector.load %arg4[%c0_63, %c0_64, %c16, %c128_65] : memref<2x2x32x384xf32, #tpu.memory_space<vmem>>, vector<1x2x1x16xf32>
    %75 = vector.shape_cast %74 : vector<1x2x1x16xf32> to vector<2x1x16xf32>
    %76 = vector.shape_cast %73 : vector<2x1x16xf32> to vector<1x2x1x16xf32>
    tpu.vector_store %arg4[%c0_63, %c0_64, %c16, %c128_65], %76 {strides = array<i32>} : memref<2x2x32x384xf32, #tpu.memory_space<vmem>>, vector<1x2x1x16xf32>,
    %77 = vector.extract_strided_slice %6 {offsets = [0, 0, 128], sizes = [2, 1, 16], strides = [1, 1, 1]} : vector<2x1x256xf32> to vector<2x1x16xf32>
    %c1_66 = arith.constant 1 : index
    %c0_67 = arith.constant 0 : index
    %c16_68 = arith.constant 16 : index
    %c128_69 = arith.constant 128 : index
    %78 = vector.load %arg4[%c1_66, %c0_67, %c16_68, %c128_69] : memref<2x2x32x384xf32, #tpu.memory_space<vmem>>, vector<1x2x1x16xf32>
    %79 = vector.shape_cast %78 : vector<1x2x1x16xf32> to vector<2x1x16xf32>
    %80 = vector.shape_cast %77 : vector<2x1x16xf32> to vector<1x2x1x16xf32>
    tpu.vector_store %arg4[%c1_66, %c0_67, %c16_68, %c128_69], %80 {strides = array<i32>} : memref<2x2x32x384xf32, #tpu.memory_space<vmem>>, vector<1x2x1x16xf32>,
    %81 = vector.extract_strided_slice %4 {offsets = [0, 0, 144], sizes = [2, 1, 16], strides = [1, 1, 1]} : vector<2x1x256xf32> to vector<2x1x16xf32>
    %c0_70 = arith.constant 0 : index
    %c0_71 = arith.constant 0 : index
    %c17 = arith.constant 17 : index
    %c128_72 = arith.constant 128 : index
    %82 = vector.load %arg4[%c0_70, %c0_71, %c17, %c128_72] : memref<2x2x32x384xf32, #tpu.memory_space<vmem>>, vector<1x2x1x16xf32>
    %83 = vector.shape_cast %82 : vector<1x2x1x16xf32> to vector<2x1x16xf32>
    %84 = vector.shape_cast %81 : vector<2x1x16xf32> to vector<1x2x1x16xf32>
    tpu.vector_store %arg4[%c0_70, %c0_71, %c17, %c128_72], %84 {strides = array<i32>} : memref<2x2x32x384xf32, #tpu.memory_space<vmem>>, vector<1x2x1x16xf32>,
    %85 = vector.extract_strided_slice %6 {offsets = [0, 0, 144], sizes = [2, 1, 16], strides = [1, 1, 1]} : vector<2x1x256xf32> to vector<2x1x16xf32>
    %c1_73 = arith.constant 1 : index
    %c0_74 = arith.constant 0 : index
    %c17_75 = arith.constant 17 : index
    %c128_76 = arith.constant 128 : index
    %86 = vector.load %arg4[%c1_73, %c0_74, %c17_75, %c128_76] : memref<2x2x32x384xf32, #tpu.memory_space<vmem>>, vector<1x2x1x16xf32>
    %87 = vector.shape_cast %86 : vector<1x2x1x16xf32> to vector<2x1x16xf32>
    %88 = vector.shape_cast %85 : vector<2x1x16xf32> to vector<1x2x1x16xf32>
    tpu.vector_store %arg4[%c1_73, %c0_74, %c17_75, %c128_76], %88 {strides = array<i32>} : memref<2x2x32x384xf32, #tpu.memory_space<vmem>>, vector<1x2x1x16xf32>,
    %89 = vector.extract_strided_slice %4 {offsets = [0, 0, 160], sizes = [2, 1, 16], strides = [1, 1, 1]} : vector<2x1x256xf32> to vector<2x1x16xf32>
    %c0_77 = arith.constant 0 : index
    %c0_78 = arith.constant 0 : index
    %c18 = arith.constant 18 : index
    %c128_79 = arith.constant 128 : index
    %90 = vector.load %arg4[%c0_77, %c0_78, %c18, %c128_79] : memref<2x2x32x384xf32, #tpu.memory_space<vmem>>, vector<1x2x1x16xf32>
    %91 = vector.shape_cast %90 : vector<1x2x1x16xf32> to vector<2x1x16xf32>
    %92 = vector.shape_cast %89 : vector<2x1x16xf32> to vector<1x2x1x16xf32>
    tpu.vector_store %arg4[%c0_77, %c0_78, %c18, %c128_79], %92 {strides = array<i32>} : memref<2x2x32x384xf32, #tpu.memory_space<vmem>>, vector<1x2x1x16xf32>,
    %93 = vector.extract_strided_slice %6 {offsets = [0, 0, 160], sizes = [2, 1, 16], strides = [1, 1, 1]} : vector<2x1x256xf32> to vector<2x1x16xf32>
    %c1_80 = arith.constant 1 : index
    %c0_81 = arith.constant 0 : index
    %c18_82 = arith.constant 18 : index
    %c128_83 = arith.constant 128 : index
    %94 = vector.load %arg4[%c1_80, %c0_81, %c18_82, %c128_83] : memref<2x2x32x384xf32, #tpu.memory_space<vmem>>, vector<1x2x1x16xf32>
    %95 = vector.shape_cast %94 : vector<1x2x1x16xf32> to vector<2x1x16xf32>
    %96 = vector.shape_cast %93 : vector<2x1x16xf32> to vector<1x2x1x16xf32>
    tpu.vector_store %arg4[%c1_80, %c0_81, %c18_82, %c128_83], %96 {strides = array<i32>} : memref<2x2x32x384xf32, #tpu.memory_space<vmem>>, vector<1x2x1x16xf32>,
    %97 = vector.extract_strided_slice %4 {offsets = [0, 0, 176], sizes = [2, 1, 16], strides = [1, 1, 1]} : vector<2x1x256xf32> to vector<2x1x16xf32>
    %c0_84 = arith.constant 0 : index
    %c0_85 = arith.constant 0 : index
    %c19 = arith.constant 19 : index
    %c128_86 = arith.constant 128 : index
    %98 = vector.load %arg4[%c0_84, %c0_85, %c19, %c128_86] : memref<2x2x32x384xf32, #tpu.memory_space<vmem>>, vector<1x2x1x16xf32>
    %99 = vector.shape_cast %98 : vector<1x2x1x16xf32> to vector<2x1x16xf32>
    %100 = vector.shape_cast %97 : vector<2x1x16xf32> to vector<1x2x1x16xf32>
    tpu.vector_store %arg4[%c0_84, %c0_85, %c19, %c128_86], %100 {strides = array<i32>} : memref<2x2x32x384xf32, #tpu.memory_space<vmem>>, vector<1x2x1x16xf32>,
    %101 = vector.extract_strided_slice %6 {offsets = [0, 0, 176], sizes = [2, 1, 16], strides = [1, 1, 1]} : vector<2x1x256xf32> to vector<2x1x16xf32>
    %c1_87 = arith.constant 1 : index
    %c0_88 = arith.constant 0 : index
    %c19_89 = arith.constant 19 : index
    %c128_90 = arith.constant 128 : index
    %102 = vector.load %arg4[%c1_87, %c0_88, %c19_89, %c128_90] : memref<2x2x32x384xf32, #tpu.memory_space<vmem>>, vector<1x2x1x16xf32>
    %103 = vector.shape_cast %102 : vector<1x2x1x16xf32> to vector<2x1x16xf32>
    %104 = vector.shape_cast %101 : vector<2x1x16xf32> to vector<1x2x1x16xf32>
    tpu.vector_store %arg4[%c1_87, %c0_88, %c19_89, %c128_90], %104 {strides = array<i32>} : memref<2x2x32x384xf32, #tpu.memory_space<vmem>>, vector<1x2x1x16xf32>,
    %105 = vector.extract_strided_slice %4 {offsets = [0, 0, 192], sizes = [2, 1, 16], strides = [1, 1, 1]} : vector<2x1x256xf32> to vector<2x1x16xf32>
    %c0_91 = arith.constant 0 : index
    %c0_92 = arith.constant 0 : index
    %c20 = arith.constant 20 : index
    %c128_93 = arith.constant 128 : index
    %106 = vector.load %arg4[%c0_91, %c0_92, %c20, %c128_93] : memref<2x2x32x384xf32, #tpu.memory_space<vmem>>, vector<1x2x1x16xf32>
    %107 = vector.shape_cast %106 : vector<1x2x1x16xf32> to vector<2x1x16xf32>
    %108 = vector.shape_cast %105 : vector<2x1x16xf32> to vector<1x2x1x16xf32>
    tpu.vector_store %arg4[%c0_91, %c0_92, %c20, %c128_93], %108 {strides = array<i32>} : memref<2x2x32x384xf32, #tpu.memory_space<vmem>>, vector<1x2x1x16xf32>,
    %109 = vector.extract_strided_slice %6 {offsets = [0, 0, 192], sizes = [2, 1, 16], strides = [1, 1, 1]} : vector<2x1x256xf32> to vector<2x1x16xf32>
    %c1_94 = arith.constant 1 : index
    %c0_95 = arith.constant 0 : index
    %c20_96 = arith.constant 20 : index
    %c128_97 = arith.constant 128 : index
    %110 = vector.load %arg4[%c1_94, %c0_95, %c20_96, %c128_97] : memref<2x2x32x384xf32, #tpu.memory_space<vmem>>, vector<1x2x1x16xf32>
    %111 = vector.shape_cast %110 : vector<1x2x1x16xf32> to vector<2x1x16xf32>
    %112 = vector.shape_cast %109 : vector<2x1x16xf32> to vector<1x2x1x16xf32>
    tpu.vector_store %arg4[%c1_94, %c0_95, %c20_96, %c128_97], %112 {strides = array<i32>} : memref<2x2x32x384xf32, #tpu.memory_space<vmem>>, vector<1x2x1x16xf32>,
    %113 = vector.extract_strided_slice %4 {offsets = [0, 0, 208], sizes = [2, 1, 16], strides = [1, 1, 1]} : vector<2x1x256xf32> to vector<2x1x16xf32>
    %c0_98 = arith.constant 0 : index
    %c0_99 = arith.constant 0 : index
    %c21 = arith.constant 21 : index
    %c128_100 = arith.constant 128 : index
    %114 = vector.load %arg4[%c0_98, %c0_99, %c21, %c128_100] : memref<2x2x32x384xf32, #tpu.memory_space<vmem>>, vector<1x2x1x16xf32>
    %115 = vector.shape_cast %114 : vector<1x2x1x16xf32> to vector<2x1x16xf32>
    %116 = vector.shape_cast %113 : vector<2x1x16xf32> to vector<1x2x1x16xf32>
    tpu.vector_store %arg4[%c0_98, %c0_99, %c21, %c128_100], %116 {strides = array<i32>} : memref<2x2x32x384xf32, #tpu.memory_space<vmem>>, vector<1x2x1x16xf32>,
    %117 = vector.extract_strided_slice %6 {offsets = [0, 0, 208], sizes = [2, 1, 16], strides = [1, 1, 1]} : vector<2x1x256xf32> to vector<2x1x16xf32>
    %c1_101 = arith.constant 1 : index
    %c0_102 = arith.constant 0 : index
    %c21_103 = arith.constant 21 : index
    %c128_104 = arith.constant 128 : index
    %118 = vector.load %arg4[%c1_101, %c0_102, %c21_103, %c128_104] : memref<2x2x32x384xf32, #tpu.memory_space<vmem>>, vector<1x2x1x16xf32>
    %119 = vector.shape_cast %118 : vector<1x2x1x16xf32> to vector<2x1x16xf32>
    %120 = vector.shape_cast %117 : vector<2x1x16xf32> to vector<1x2x1x16xf32>
    tpu.vector_store %arg4[%c1_101, %c0_102, %c21_103, %c128_104], %120 {strides = array<i32>} : memref<2x2x32x384xf32, #tpu.memory_space<vmem>>, vector<1x2x1x16xf32>,
    %121 = vector.extract_strided_slice %4 {offsets = [0, 0, 224], sizes = [2, 1, 16], strides = [1, 1, 1]} : vector<2x1x256xf32> to vector<2x1x16xf32>
    %c0_105 = arith.constant 0 : index
    %c0_106 = arith.constant 0 : index
    %c22 = arith.constant 22 : index
    %c128_107 = arith.constant 128 : index
    %122 = vector.load %arg4[%c0_105, %c0_106, %c22, %c128_107] : memref<2x2x32x384xf32, #tpu.memory_space<vmem>>, vector<1x2x1x16xf32>
    %123 = vector.shape_cast %122 : vector<1x2x1x16xf32> to vector<2x1x16xf32>
    %124 = vector.shape_cast %121 : vector<2x1x16xf32> to vector<1x2x1x16xf32>
    tpu.vector_store %arg4[%c0_105, %c0_106, %c22, %c128_107], %124 {strides = array<i32>} : memref<2x2x32x384xf32, #tpu.memory_space<vmem>>, vector<1x2x1x16xf32>,
    %125 = vector.extract_strided_slice %6 {offsets = [0, 0, 224], sizes = [2, 1, 16], strides = [1, 1, 1]} : vector<2x1x256xf32> to vector<2x1x16xf32>
    %c1_108 = arith.constant 1 : index
    %c0_109 = arith.constant 0 : index
    %c22_110 = arith.constant 22 : index
    %c128_111 = arith.constant 128 : index
    %126 = vector.load %arg4[%c1_108, %c0_109, %c22_110, %c128_111] : memref<2x2x32x384xf32, #tpu.memory_space<vmem>>, vector<1x2x1x16xf32>
    %127 = vector.shape_cast %126 : vector<1x2x1x16xf32> to vector<2x1x16xf32>
    %128 = vector.shape_cast %125 : vector<2x1x16xf32> to vector<1x2x1x16xf32>
    tpu.vector_store %arg4[%c1_108, %c0_109, %c22_110, %c128_111], %128 {strides = array<i32>} : memref<2x2x32x384xf32, #tpu.memory_space<vmem>>, vector<1x2x1x16xf32>,
    %129 = vector.extract_strided_slice %4 {offsets = [0, 0, 240], sizes = [2, 1, 16], strides = [1, 1, 1]} : vector<2x1x256xf32> to vector<2x1x16xf32>
    %c0_112 = arith.constant 0 : index
    %c0_113 = arith.constant 0 : index
    %c23 = arith.constant 23 : index
    %c128_114 = arith.constant 128 : index
    %130 = vector.load %arg4[%c0_112, %c0_113, %c23, %c128_114] : memref<2x2x32x384xf32, #tpu.memory_space<vmem>>, vector<1x2x1x16xf32>
    %131 = vector.shape_cast %130 : vector<1x2x1x16xf32> to vector<2x1x16xf32>
    %132 = vector.shape_cast %129 : vector<2x1x16xf32> to vector<1x2x1x16xf32>
    tpu.vector_store %arg4[%c0_112, %c0_113, %c23, %c128_114], %132 {strides = array<i32>} : memref<2x2x32x384xf32, #tpu.memory_space<vmem>>, vector<1x2x1x16xf32>,
    %133 = vector.extract_strided_slice %6 {offsets = [0, 0, 240], sizes = [2, 1, 16], strides = [1, 1, 1]} : vector<2x1x256xf32> to vector<2x1x16xf32>
    %c1_115 = arith.constant 1 : index
    %c0_116 = arith.constant 0 : index
    %c23_117 = arith.constant 23 : index
    %c128_118 = arith.constant 128 : index
    %134 = vector.load %arg4[%c1_115, %c0_116, %c23_117, %c128_118] : memref<2x2x32x384xf32, #tpu.memory_space<vmem>>, vector<1x2x1x16xf32>
    %135 = vector.shape_cast %134 : vector<1x2x1x16xf32> to vector<2x1x16xf32>
    %136 = vector.shape_cast %133 : vector<2x1x16xf32> to vector<1x2x1x16xf32>
    tpu.vector_store %arg4[%c1_115, %c0_116, %c23_117, %c128_118], %136 {strides = array<i32>} : memref<2x2x32x384xf32, #tpu.memory_space<vmem>>, vector<1x2x1x16xf32>,
    %c0_119 = arith.constant 0 : index
    %c0_120 = arith.constant 0 : index
    %c0_121 = arith.constant 0 : index
    %c0_122 = arith.constant 0 : index
    %137 = vector.load %arg4[%c0_119, %c0_120, %c0_121, %c0_122] : memref<2x2x32x384xf32, #tpu.memory_space<vmem>>, vector<1x2x32x384xf32>
    %138 = vector.shape_cast %137 : vector<1x2x32x384xf32> to vector<2x32x384xf32>
    %139 = vector.extract_strided_slice %138 {offsets = [0, 0, 125], sizes = [2, 32, 128], strides = [1, 1, 1]} : vector<2x32x384xf32> to vector<2x32x128xf32>
    %c0_123 = arith.constant 0 : index
    %c0_124 = arith.constant 0 : index
    %c0_125 = arith.constant 0 : index
    %c0_126 = arith.constant 0 : index
    %140 = vector.load %arg5[%c0_123, %c0_124, %c0_125, %c0_126] : memref<14x2x32x128xf32, #tpu.memory_space<vmem>>, vector<1x2x32x128xf32>
    %141 = vector.shape_cast %140 : vector<1x2x32x128xf32> to vector<2x32x128xf32>
    %142 = vector.shape_cast %139 : vector<2x32x128xf32> to vector<1x2x32x128xf32>
    tpu.vector_store %arg5[%c0_123, %c0_124, %c0_125, %c0_126], %142 {strides = array<i32>} : memref<14x2x32x128xf32, #tpu.memory_space<vmem>>, vector<1x2x32x128xf32>,
    %143 = vector.extract_strided_slice %138 {offsets = [0, 0, 126], sizes = [2, 32, 128], strides = [1, 1, 1]} : vector<2x32x384xf32> to vector<2x32x128xf32>
    %c1_127 = arith.constant 1 : index
    %c0_128 = arith.constant 0 : index
    %c0_129 = arith.constant 0 : index
    %c0_130 = arith.constant 0 : index
    %144 = vector.load %arg5[%c1_127, %c0_128, %c0_129, %c0_130] : memref<14x2x32x128xf32, #tpu.memory_space<vmem>>, vector<1x2x32x128xf32>
    %145 = vector.shape_cast %144 : vector<1x2x32x128xf32> to vector<2x32x128xf32>
    %146 = vector.shape_cast %143 : vector<2x32x128xf32> to vector<1x2x32x128xf32>
    tpu.vector_store %arg5[%c1_127, %c0_128, %c0_129, %c0_130], %146 {strides = array<i32>} : memref<14x2x32x128xf32, #tpu.memory_space<vmem>>, vector<1x2x32x128xf32>,
    %147 = vector.extract_strided_slice %138 {offsets = [0, 0, 127], sizes = [2, 32, 128], strides = [1, 1, 1]} : vector<2x32x384xf32> to vector<2x32x128xf32>
    %c2 = arith.constant 2 : index
    %c0_131 = arith.constant 0 : index
    %c0_132 = arith.constant 0 : index
    %c0_133 = arith.constant 0 : index
    %148 = vector.load %arg5[%c2, %c0_131, %c0_132, %c0_133] : memref<14x2x32x128xf32, #tpu.memory_space<vmem>>, vector<1x2x32x128xf32>
    %149 = vector.shape_cast %148 : vector<1x2x32x128xf32> to vector<2x32x128xf32>
    %150 = vector.shape_cast %147 : vector<2x32x128xf32> to vector<1x2x32x128xf32>
    tpu.vector_store %arg5[%c2, %c0_131, %c0_132, %c0_133], %150 {strides = array<i32>} : memref<14x2x32x128xf32, #tpu.memory_space<vmem>>, vector<1x2x32x128xf32>,
    %151 = vector.extract_strided_slice %138 {offsets = [0, 0, 128], sizes = [2, 32, 128], strides = [1, 1, 1]} : vector<2x32x384xf32> to vector<2x32x128xf32>
    %c3 = arith.constant 3 : index
    %c0_134 = arith.constant 0 : index
    %c0_135 = arith.constant 0 : index
    %c0_136 = arith.constant 0 : index
    %152 = vector.load %arg5[%c3, %c0_134, %c0_135, %c0_136] : memref<14x2x32x128xf32, #tpu.memory_space<vmem>>, vector<1x2x32x128xf32>
    %153 = vector.shape_cast %152 : vector<1x2x32x128xf32> to vector<2x32x128xf32>
    %154 = vector.shape_cast %151 : vector<2x32x128xf32> to vector<1x2x32x128xf32>
    tpu.vector_store %arg5[%c3, %c0_134, %c0_135, %c0_136], %154 {strides = array<i32>} : memref<14x2x32x128xf32, #tpu.memory_space<vmem>>, vector<1x2x32x128xf32>,
    %155 = vector.extract_strided_slice %138 {offsets = [0, 0, 129], sizes = [2, 32, 128], strides = [1, 1, 1]} : vector<2x32x384xf32> to vector<2x32x128xf32>
    %c4 = arith.constant 4 : index
    %c0_137 = arith.constant 0 : index
    %c0_138 = arith.constant 0 : index
    %c0_139 = arith.constant 0 : index
    %156 = vector.load %arg5[%c4, %c0_137, %c0_138, %c0_139] : memref<14x2x32x128xf32, #tpu.memory_space<vmem>>, vector<1x2x32x128xf32>
    %157 = vector.shape_cast %156 : vector<1x2x32x128xf32> to vector<2x32x128xf32>
    %158 = vector.shape_cast %155 : vector<2x32x128xf32> to vector<1x2x32x128xf32>
    tpu.vector_store %arg5[%c4, %c0_137, %c0_138, %c0_139], %158 {strides = array<i32>} : memref<14x2x32x128xf32, #tpu.memory_space<vmem>>, vector<1x2x32x128xf32>,
    %159 = vector.extract_strided_slice %138 {offsets = [0, 0, 130], sizes = [2, 32, 128], strides = [1, 1, 1]} : vector<2x32x384xf32> to vector<2x32x128xf32>
    %c5 = arith.constant 5 : index
    %c0_140 = arith.constant 0 : index
    %c0_141 = arith.constant 0 : index
    %c0_142 = arith.constant 0 : index
    %160 = vector.load %arg5[%c5, %c0_140, %c0_141, %c0_142] : memref<14x2x32x128xf32, #tpu.memory_space<vmem>>, vector<1x2x32x128xf32>
    %161 = vector.shape_cast %160 : vector<1x2x32x128xf32> to vector<2x32x128xf32>
    %162 = vector.shape_cast %159 : vector<2x32x128xf32> to vector<1x2x32x128xf32>
    tpu.vector_store %arg5[%c5, %c0_140, %c0_141, %c0_142], %162 {strides = array<i32>} : memref<14x2x32x128xf32, #tpu.memory_space<vmem>>, vector<1x2x32x128xf32>,
    %163 = vector.extract_strided_slice %138 {offsets = [0, 0, 131], sizes = [2, 32, 128], strides = [1, 1, 1]} : vector<2x32x384xf32> to vector<2x32x128xf32>
    %c6 = arith.constant 6 : index
    %c0_143 = arith.constant 0 : index
    %c0_144 = arith.constant 0 : index
    %c0_145 = arith.constant 0 : index
    %164 = vector.load %arg5[%c6, %c0_143, %c0_144, %c0_145] : memref<14x2x32x128xf32, #tpu.memory_space<vmem>>, vector<1x2x32x128xf32>
    %165 = vector.shape_cast %164 : vector<1x2x32x128xf32> to vector<2x32x128xf32>
    %166 = vector.shape_cast %163 : vector<2x32x128xf32> to vector<1x2x32x128xf32>
    tpu.vector_store %arg5[%c6, %c0_143, %c0_144, %c0_145], %166 {strides = array<i32>} : memref<14x2x32x128xf32, #tpu.memory_space<vmem>>, vector<1x2x32x128xf32>,
    %c1_146 = arith.constant 1 : index
    %c0_147 = arith.constant 0 : index
    %c0_148 = arith.constant 0 : index
    %c0_149 = arith.constant 0 : index
    %167 = vector.load %arg4[%c1_146, %c0_147, %c0_148, %c0_149] : memref<2x2x32x384xf32, #tpu.memory_space<vmem>>, vector<1x2x32x384xf32>
    %168 = vector.shape_cast %167 : vector<1x2x32x384xf32> to vector<2x32x384xf32>
    %169 = vector.extract_strided_slice %168 {offsets = [0, 0, 125], sizes = [2, 32, 128], strides = [1, 1, 1]} : vector<2x32x384xf32> to vector<2x32x128xf32>
    %c7 = arith.constant 7 : index
    %c0_150 = arith.constant 0 : index
    %c0_151 = arith.constant 0 : index
    %c0_152 = arith.constant 0 : index
    %170 = vector.load %arg5[%c7, %c0_150, %c0_151, %c0_152] : memref<14x2x32x128xf32, #tpu.memory_space<vmem>>, vector<1x2x32x128xf32>
    %171 = vector.shape_cast %170 : vector<1x2x32x128xf32> to vector<2x32x128xf32>
    %172 = vector.shape_cast %169 : vector<2x32x128xf32> to vector<1x2x32x128xf32>
    tpu.vector_store %arg5[%c7, %c0_150, %c0_151, %c0_152], %172 {strides = array<i32>} : memref<14x2x32x128xf32, #tpu.memory_space<vmem>>, vector<1x2x32x128xf32>,
    %173 = vector.extract_strided_slice %168 {offsets = [0, 0, 126], sizes = [2, 32, 128], strides = [1, 1, 1]} : vector<2x32x384xf32> to vector<2x32x128xf32>
    %c8_153 = arith.constant 8 : index
    %c0_154 = arith.constant 0 : index
    %c0_155 = arith.constant 0 : index
    %c0_156 = arith.constant 0 : index
    %174 = vector.load %arg5[%c8_153, %c0_154, %c0_155, %c0_156] : memref<14x2x32x128xf32, #tpu.memory_space<vmem>>, vector<1x2x32x128xf32>
    %175 = vector.shape_cast %174 : vector<1x2x32x128xf32> to vector<2x32x128xf32>
    %176 = vector.shape_cast %173 : vector<2x32x128xf32> to vector<1x2x32x128xf32>
    tpu.vector_store %arg5[%c8_153, %c0_154, %c0_155, %c0_156], %176 {strides = array<i32>} : memref<14x2x32x128xf32, #tpu.memory_space<vmem>>, vector<1x2x32x128xf32>,
    %177 = vector.extract_strided_slice %168 {offsets = [0, 0, 127], sizes = [2, 32, 128], strides = [1, 1, 1]} : vector<2x32x384xf32> to vector<2x32x128xf32>
    %c9_157 = arith.constant 9 : index
    %c0_158 = arith.constant 0 : index
    %c0_159 = arith.constant 0 : index
    %c0_160 = arith.constant 0 : index
    %178 = vector.load %arg5[%c9_157, %c0_158, %c0_159, %c0_160] : memref<14x2x32x128xf32, #tpu.memory_space<vmem>>, vector<1x2x32x128xf32>
    %179 = vector.shape_cast %178 : vector<1x2x32x128xf32> to vector<2x32x128xf32>
    %180 = vector.shape_cast %177 : vector<2x32x128xf32> to vector<1x2x32x128xf32>
    tpu.vector_store %arg5[%c9_157, %c0_158, %c0_159, %c0_160], %180 {strides = array<i32>} : memref<14x2x32x128xf32, #tpu.memory_space<vmem>>, vector<1x2x32x128xf32>,
    %181 = vector.extract_strided_slice %168 {offsets = [0, 0, 128], sizes = [2, 32, 128], strides = [1, 1, 1]} : vector<2x32x384xf32> to vector<2x32x128xf32>
    %c10_161 = arith.constant 10 : index
    %c0_162 = arith.constant 0 : index
    %c0_163 = arith.constant 0 : index
    %c0_164 = arith.constant 0 : index
    %182 = vector.load %arg5[%c10_161, %c0_162, %c0_163, %c0_164] : memref<14x2x32x128xf32, #tpu.memory_space<vmem>>, vector<1x2x32x128xf32>
    %183 = vector.shape_cast %182 : vector<1x2x32x128xf32> to vector<2x32x128xf32>
    %184 = vector.shape_cast %181 : vector<2x32x128xf32> to vector<1x2x32x128xf32>
    tpu.vector_store %arg5[%c10_161, %c0_162, %c0_163, %c0_164], %184 {strides = array<i32>} : memref<14x2x32x128xf32, #tpu.memory_space<vmem>>, vector<1x2x32x128xf32>,
    %185 = vector.extract_strided_slice %168 {offsets = [0, 0, 129], sizes = [2, 32, 128], strides = [1, 1, 1]} : vector<2x32x384xf32> to vector<2x32x128xf32>
    %c11_165 = arith.constant 11 : index
    %c0_166 = arith.constant 0 : index
    %c0_167 = arith.constant 0 : index
    %c0_168 = arith.constant 0 : index
    %186 = vector.load %arg5[%c11_165, %c0_166, %c0_167, %c0_168] : memref<14x2x32x128xf32, #tpu.memory_space<vmem>>, vector<1x2x32x128xf32>
    %187 = vector.shape_cast %186 : vector<1x2x32x128xf32> to vector<2x32x128xf32>
    %188 = vector.shape_cast %185 : vector<2x32x128xf32> to vector<1x2x32x128xf32>
    tpu.vector_store %arg5[%c11_165, %c0_166, %c0_167, %c0_168], %188 {strides = array<i32>} : memref<14x2x32x128xf32, #tpu.memory_space<vmem>>, vector<1x2x32x128xf32>,
    %189 = vector.extract_strided_slice %168 {offsets = [0, 0, 130], sizes = [2, 32, 128], strides = [1, 1, 1]} : vector<2x32x384xf32> to vector<2x32x128xf32>
    %c12_169 = arith.constant 12 : index
    %c0_170 = arith.constant 0 : index
    %c0_171 = arith.constant 0 : index
    %c0_172 = arith.constant 0 : index
    %190 = vector.load %arg5[%c12_169, %c0_170, %c0_171, %c0_172] : memref<14x2x32x128xf32, #tpu.memory_space<vmem>>, vector<1x2x32x128xf32>
    %191 = vector.shape_cast %190 : vector<1x2x32x128xf32> to vector<2x32x128xf32>
    %192 = vector.shape_cast %189 : vector<2x32x128xf32> to vector<1x2x32x128xf32>
    tpu.vector_store %arg5[%c12_169, %c0_170, %c0_171, %c0_172], %192 {strides = array<i32>} : memref<14x2x32x128xf32, #tpu.memory_space<vmem>>, vector<1x2x32x128xf32>,
    %193 = vector.extract_strided_slice %168 {offsets = [0, 0, 131], sizes = [2, 32, 128], strides = [1, 1, 1]} : vector<2x32x384xf32> to vector<2x32x128xf32>
    %c13_173 = arith.constant 13 : index
    %c0_174 = arith.constant 0 : index
    %c0_175 = arith.constant 0 : index
    %c0_176 = arith.constant 0 : index
    %194 = vector.load %arg5[%c13_173, %c0_174, %c0_175, %c0_176] : memref<14x2x32x128xf32, #tpu.memory_space<vmem>>, vector<1x2x32x128xf32>
    %195 = vector.shape_cast %194 : vector<1x2x32x128xf32> to vector<2x32x128xf32>
    %196 = vector.shape_cast %193 : vector<2x32x128xf32> to vector<1x2x32x128xf32>
    tpu.vector_store %arg5[%c13_173, %c0_174, %c0_175, %c0_176], %196 {strides = array<i32>} : memref<14x2x32x128xf32, #tpu.memory_space<vmem>>, vector<1x2x32x128xf32>,
    %cst_177 = arith.constant 0.000000e+00 : f32
    %197 = vector.broadcast %cst_177 : f32 to vector<2x16x128xf32>
    %c0_178 = arith.constant 0 : index
    %198 = memref.load %arg1[%c0_178] : memref<98xf32, #tpu.memory_space<smem>>
    %c49 = arith.constant 49 : index
    %199 = memref.load %arg1[%c49] : memref<98xf32, #tpu.memory_space<smem>>
    %c0_179 = arith.constant 0 : index
    %c0_180 = arith.constant 0 : index
    %c5_181 = arith.constant 5 : index
    %c0_182 = arith.constant 0 : index
    %200 = vector.load %arg5[%c0_179, %c0_180, %c5_181, %c0_182] : memref<14x2x32x128xf32, #tpu.memory_space<vmem>>, vector<1x2x16x128xf32>
    %201 = vector.shape_cast %200 : vector<1x2x16x128xf32> to vector<2x16x128xf32>
    %c7_183 = arith.constant 7 : index
    %c0_184 = arith.constant 0 : index
    %c5_185 = arith.constant 5 : index
    %c0_186 = arith.constant 0 : index
    %202 = vector.load %arg5[%c7_183, %c0_184, %c5_185, %c0_186] : memref<14x2x32x128xf32, #tpu.memory_space<vmem>>, vector<1x2x16x128xf32>
    %203 = vector.shape_cast %202 : vector<1x2x16x128xf32> to vector<2x16x128xf32>
    %204 = vector.broadcast %198 : f32 to vector<2x16x128xf32>
    %205 = arith.mulf %204, %201 : vector<2x16x128xf32>
    %206 = vector.broadcast %199 : f32 to vector<2x16x128xf32>
    %207 = arith.mulf %206, %203 : vector<2x16x128xf32>
    %208 = arith.addf %205, %207 : vector<2x16x128xf32>
    %209 = arith.addf %197, %208 : vector<2x16x128xf32>
    %c1_187 = arith.constant 1 : index
    %210 = memref.load %arg1[%c1_187] : memref<98xf32, #tpu.memory_space<smem>>
    %c50 = arith.constant 50 : index
    %211 = memref.load %arg1[%c50] : memref<98xf32, #tpu.memory_space<smem>>
    %c1_188 = arith.constant 1 : index
    %c0_189 = arith.constant 0 : index
    %c5_190 = arith.constant 5 : index
    %c0_191 = arith.constant 0 : index
    %212 = vector.load %arg5[%c1_188, %c0_189, %c5_190, %c0_191] : memref<14x2x32x128xf32, #tpu.memory_space<vmem>>, vector<1x2x16x128xf32>
    %213 = vector.shape_cast %212 : vector<1x2x16x128xf32> to vector<2x16x128xf32>
    %c8_192 = arith.constant 8 : index
    %c0_193 = arith.constant 0 : index
    %c5_194 = arith.constant 5 : index
    %c0_195 = arith.constant 0 : index
    %214 = vector.load %arg5[%c8_192, %c0_193, %c5_194, %c0_195] : memref<14x2x32x128xf32, #tpu.memory_space<vmem>>, vector<1x2x16x128xf32>
    %215 = vector.shape_cast %214 : vector<1x2x16x128xf32> to vector<2x16x128xf32>
    %216 = vector.broadcast %210 : f32 to vector<2x16x128xf32>
    %217 = arith.mulf %216, %213 : vector<2x16x128xf32>
    %218 = vector.broadcast %211 : f32 to vector<2x16x128xf32>
    %219 = arith.mulf %218, %215 : vector<2x16x128xf32>
    %220 = arith.addf %217, %219 : vector<2x16x128xf32>
    %221 = arith.addf %209, %220 : vector<2x16x128xf32>
    %c2_196 = arith.constant 2 : index
    %222 = memref.load %arg1[%c2_196] : memref<98xf32, #tpu.memory_space<smem>>
    %c51 = arith.constant 51 : index
    %223 = memref.load %arg1[%c51] : memref<98xf32, #tpu.memory_space<smem>>
    %c2_197 = arith.constant 2 : index
    %c0_198 = arith.constant 0 : index
    %c5_199 = arith.constant 5 : index
    %c0_200 = arith.constant 0 : index
    %224 = vector.load %arg5[%c2_197, %c0_198, %c5_199, %c0_200] : memref<14x2x32x128xf32, #tpu.memory_space<vmem>>, vector<1x2x16x128xf32>
    %225 = vector.shape_cast %224 : vector<1x2x16x128xf32> to vector<2x16x128xf32>
    %c9_201 = arith.constant 9 : index
    %c0_202 = arith.constant 0 : index
    %c5_203 = arith.constant 5 : index
    %c0_204 = arith.constant 0 : index
    %226 = vector.load %arg5[%c9_201, %c0_202, %c5_203, %c0_204] : memref<14x2x32x128xf32, #tpu.memory_space<vmem>>, vector<1x2x16x128xf32>
    %227 = vector.shape_cast %226 : vector<1x2x16x128xf32> to vector<2x16x128xf32>
    %228 = vector.broadcast %222 : f32 to vector<2x16x128xf32>
    %229 = arith.mulf %228, %225 : vector<2x16x128xf32>
    %230 = vector.broadcast %223 : f32 to vector<2x16x128xf32>
    %231 = arith.mulf %230, %227 : vector<2x16x128xf32>
    %232 = arith.addf %229, %231 : vector<2x16x128xf32>
    %233 = arith.addf %221, %232 : vector<2x16x128xf32>
    %c3_205 = arith.constant 3 : index
    %234 = memref.load %arg1[%c3_205] : memref<98xf32, #tpu.memory_space<smem>>
    %c52 = arith.constant 52 : index
    %235 = memref.load %arg1[%c52] : memref<98xf32, #tpu.memory_space<smem>>
    %c3_206 = arith.constant 3 : index
    %c0_207 = arith.constant 0 : index
    %c5_208 = arith.constant 5 : index
    %c0_209 = arith.constant 0 : index
    %236 = vector.load %arg5[%c3_206, %c0_207, %c5_208, %c0_209] : memref<14x2x32x128xf32, #tpu.memory_space<vmem>>, vector<1x2x16x128xf32>
    %237 = vector.shape_cast %236 : vector<1x2x16x128xf32> to vector<2x16x128xf32>
    %c10_210 = arith.constant 10 : index
    %c0_211 = arith.constant 0 : index
    %c5_212 = arith.constant 5 : index
    %c0_213 = arith.constant 0 : index
    %238 = vector.load %arg5[%c10_210, %c0_211, %c5_212, %c0_213] : memref<14x2x32x128xf32, #tpu.memory_space<vmem>>, vector<1x2x16x128xf32>
    %239 = vector.shape_cast %238 : vector<1x2x16x128xf32> to vector<2x16x128xf32>
    %240 = vector.broadcast %234 : f32 to vector<2x16x128xf32>
    %241 = arith.mulf %240, %237 : vector<2x16x128xf32>
    %242 = vector.broadcast %235 : f32 to vector<2x16x128xf32>
    %243 = arith.mulf %242, %239 : vector<2x16x128xf32>
    %244 = arith.addf %241, %243 : vector<2x16x128xf32>
    %245 = arith.addf %233, %244 : vector<2x16x128xf32>
    %c4_214 = arith.constant 4 : index
    %246 = memref.load %arg1[%c4_214] : memref<98xf32, #tpu.memory_space<smem>>
    %c53 = arith.constant 53 : index
    %247 = memref.load %arg1[%c53] : memref<98xf32, #tpu.memory_space<smem>>
    %c4_215 = arith.constant 4 : index
    %c0_216 = arith.constant 0 : index
    %c5_217 = arith.constant 5 : index
    %c0_218 = arith.constant 0 : index
    %248 = vector.load %arg5[%c4_215, %c0_216, %c5_217, %c0_218] : memref<14x2x32x128xf32, #tpu.memory_space<vmem>>, vector<1x2x16x128xf32>
    %249 = vector.shape_cast %248 : vector<1x2x16x128xf32> to vector<2x16x128xf32>
    %c11_219 = arith.constant 11 : index
    %c0_220 = arith.constant 0 : index
    %c5_221 = arith.constant 5 : index
    %c0_222 = arith.constant 0 : index
    %250 = vector.load %arg5[%c11_219, %c0_220, %c5_221, %c0_222] : memref<14x2x32x128xf32, #tpu.memory_space<vmem>>, vector<1x2x16x128xf32>
    %251 = vector.shape_cast %250 : vector<1x2x16x128xf32> to vector<2x16x128xf32>
    %252 = vector.broadcast %246 : f32 to vector<2x16x128xf32>
    %253 = arith.mulf %252, %249 : vector<2x16x128xf32>
    %254 = vector.broadcast %247 : f32 to vector<2x16x128xf32>
    %255 = arith.mulf %254, %251 : vector<2x16x128xf32>
    %256 = arith.addf %253, %255 : vector<2x16x128xf32>
    %257 = arith.addf %245, %256 : vector<2x16x128xf32>
    %c5_223 = arith.constant 5 : index
    %258 = memref.load %arg1[%c5_223] : memref<98xf32, #tpu.memory_space<smem>>
    %c54 = arith.constant 54 : index
    %259 = memref.load %arg1[%c54] : memref<98xf32, #tpu.memory_space<smem>>
    %c5_224 = arith.constant 5 : index
    %c0_225 = arith.constant 0 : index
    %c5_226 = arith.constant 5 : index
    %c0_227 = arith.constant 0 : index
    %260 = vector.load %arg5[%c5_224, %c0_225, %c5_226, %c0_227] : memref<14x2x32x128xf32, #tpu.memory_space<vmem>>, vector<1x2x16x128xf32>
    %261 = vector.shape_cast %260 : vector<1x2x16x128xf32> to vector<2x16x128xf32>
    %c12_228 = arith.constant 12 : index
    %c0_229 = arith.constant 0 : index
    %c5_230 = arith.constant 5 : index
    %c0_231 = arith.constant 0 : index
    %262 = vector.load %arg5[%c12_228, %c0_229, %c5_230, %c0_231] : memref<14x2x32x128xf32, #tpu.memory_space<vmem>>, vector<1x2x16x128xf32>
    %263 = vector.shape_cast %262 : vector<1x2x16x128xf32> to vector<2x16x128xf32>
    %264 = vector.broadcast %258 : f32 to vector<2x16x128xf32>
    %265 = arith.mulf %264, %261 : vector<2x16x128xf32>
    %266 = vector.broadcast %259 : f32 to vector<2x16x128xf32>
    %267 = arith.mulf %266, %263 : vector<2x16x128xf32>
    %268 = arith.addf %265, %267 : vector<2x16x128xf32>
    %269 = arith.addf %257, %268 : vector<2x16x128xf32>
    %c6_232 = arith.constant 6 : index
    %270 = memref.load %arg1[%c6_232] : memref<98xf32, #tpu.memory_space<smem>>
    %c55 = arith.constant 55 : index
    %271 = memref.load %arg1[%c55] : memref<98xf32, #tpu.memory_space<smem>>
    %c6_233 = arith.constant 6 : index
    %c0_234 = arith.constant 0 : index
    %c5_235 = arith.constant 5 : index
    %c0_236 = arith.constant 0 : index
    %272 = vector.load %arg5[%c6_233, %c0_234, %c5_235, %c0_236] : memref<14x2x32x128xf32, #tpu.memory_space<vmem>>, vector<1x2x16x128xf32>
    %273 = vector.shape_cast %272 : vector<1x2x16x128xf32> to vector<2x16x128xf32>
    %c13_237 = arith.constant 13 : index
    %c0_238 = arith.constant 0 : index
    %c5_239 = arith.constant 5 : index
    %c0_240 = arith.constant 0 : index
    %274 = vector.load %arg5[%c13_237, %c0_238, %c5_239, %c0_240] : memref<14x2x32x128xf32, #tpu.memory_space<vmem>>, vector<1x2x16x128xf32>
    %275 = vector.shape_cast %274 : vector<1x2x16x128xf32> to vector<2x16x128xf32>
    %276 = vector.broadcast %270 : f32 to vector<2x16x128xf32>
    %277 = arith.mulf %276, %273 : vector<2x16x128xf32>
    %278 = vector.broadcast %271 : f32 to vector<2x16x128xf32>
    %279 = arith.mulf %278, %275 : vector<2x16x128xf32>
    %280 = arith.addf %277, %279 : vector<2x16x128xf32>
    %281 = arith.addf %269, %280 : vector<2x16x128xf32>
    %c7_241 = arith.constant 7 : index
    %282 = memref.load %arg1[%c7_241] : memref<98xf32, #tpu.memory_space<smem>>
    %c56 = arith.constant 56 : index
    %283 = memref.load %arg1[%c56] : memref<98xf32, #tpu.memory_space<smem>>
    %c0_242 = arith.constant 0 : index
    %c0_243 = arith.constant 0 : index
    %c6_244 = arith.constant 6 : index
    %c0_245 = arith.constant 0 : index
    %284 = vector.load %arg5[%c0_242, %c0_243, %c6_244, %c0_245] : memref<14x2x32x128xf32, #tpu.memory_space<vmem>>, vector<1x2x16x128xf32>
    %285 = vector.shape_cast %284 : vector<1x2x16x128xf32> to vector<2x16x128xf32>
    %c7_246 = arith.constant 7 : index
    %c0_247 = arith.constant 0 : index
    %c6_248 = arith.constant 6 : index
    %c0_249 = arith.constant 0 : index
    %286 = vector.load %arg5[%c7_246, %c0_247, %c6_248, %c0_249] : memref<14x2x32x128xf32, #tpu.memory_space<vmem>>, vector<1x2x16x128xf32>
    %287 = vector.shape_cast %286 : vector<1x2x16x128xf32> to vector<2x16x128xf32>
    %288 = vector.broadcast %282 : f32 to vector<2x16x128xf32>
    %289 = arith.mulf %288, %285 : vector<2x16x128xf32>
    %290 = vector.broadcast %283 : f32 to vector<2x16x128xf32>
    %291 = arith.mulf %290, %287 : vector<2x16x128xf32>
    %292 = arith.addf %289, %291 : vector<2x16x128xf32>
    %293 = arith.addf %281, %292 : vector<2x16x128xf32>
    %c8_250 = arith.constant 8 : index
    %294 = memref.load %arg1[%c8_250] : memref<98xf32, #tpu.memory_space<smem>>
    %c57 = arith.constant 57 : index
    %295 = memref.load %arg1[%c57] : memref<98xf32, #tpu.memory_space<smem>>
    %c1_251 = arith.constant 1 : index
    %c0_252 = arith.constant 0 : index
    %c6_253 = arith.constant 6 : index
    %c0_254 = arith.constant 0 : index
    %296 = vector.load %arg5[%c1_251, %c0_252, %c6_253, %c0_254] : memref<14x2x32x128xf32, #tpu.memory_space<vmem>>, vector<1x2x16x128xf32>
    %297 = vector.shape_cast %296 : vector<1x2x16x128xf32> to vector<2x16x128xf32>
    %c8_255 = arith.constant 8 : index
    %c0_256 = arith.constant 0 : index
    %c6_257 = arith.constant 6 : index
    %c0_258 = arith.constant 0 : index
    %298 = vector.load %arg5[%c8_255, %c0_256, %c6_257, %c0_258] : memref<14x2x32x128xf32, #tpu.memory_space<vmem>>, vector<1x2x16x128xf32>
    %299 = vector.shape_cast %298 : vector<1x2x16x128xf32> to vector<2x16x128xf32>
    %300 = vector.broadcast %294 : f32 to vector<2x16x128xf32>
    %301 = arith.mulf %300, %297 : vector<2x16x128xf32>
    %302 = vector.broadcast %295 : f32 to vector<2x16x128xf32>
    %303 = arith.mulf %302, %299 : vector<2x16x128xf32>
    %304 = arith.addf %301, %303 : vector<2x16x128xf32>
    %305 = arith.addf %293, %304 : vector<2x16x128xf32>
    %c9_259 = arith.constant 9 : index
    %306 = memref.load %arg1[%c9_259] : memref<98xf32, #tpu.memory_space<smem>>
    %c58 = arith.constant 58 : index
    %307 = memref.load %arg1[%c58] : memref<98xf32, #tpu.memory_space<smem>>
    %c2_260 = arith.constant 2 : index
    %c0_261 = arith.constant 0 : index
    %c6_262 = arith.constant 6 : index
    %c0_263 = arith.constant 0 : index
    %308 = vector.load %arg5[%c2_260, %c0_261, %c6_262, %c0_263] : memref<14x2x32x128xf32, #tpu.memory_space<vmem>>, vector<1x2x16x128xf32>
    %309 = vector.shape_cast %308 : vector<1x2x16x128xf32> to vector<2x16x128xf32>
    %c9_264 = arith.constant 9 : index
    %c0_265 = arith.constant 0 : index
    %c6_266 = arith.constant 6 : index
    %c0_267 = arith.constant 0 : index
    %310 = vector.load %arg5[%c9_264, %c0_265, %c6_266, %c0_267] : memref<14x2x32x128xf32, #tpu.memory_space<vmem>>, vector<1x2x16x128xf32>
    %311 = vector.shape_cast %310 : vector<1x2x16x128xf32> to vector<2x16x128xf32>
    %312 = vector.broadcast %306 : f32 to vector<2x16x128xf32>
    %313 = arith.mulf %312, %309 : vector<2x16x128xf32>
    %314 = vector.broadcast %307 : f32 to vector<2x16x128xf32>
    %315 = arith.mulf %314, %311 : vector<2x16x128xf32>
    %316 = arith.addf %313, %315 : vector<2x16x128xf32>
    %317 = arith.addf %305, %316 : vector<2x16x128xf32>
    %c10_268 = arith.constant 10 : index
    %318 = memref.load %arg1[%c10_268] : memref<98xf32, #tpu.memory_space<smem>>
    %c59 = arith.constant 59 : index
    %319 = memref.load %arg1[%c59] : memref<98xf32, #tpu.memory_space<smem>>
    %c3_269 = arith.constant 3 : index
    %c0_270 = arith.constant 0 : index
    %c6_271 = arith.constant 6 : index
    %c0_272 = arith.constant 0 : index
    %320 = vector.load %arg5[%c3_269, %c0_270, %c6_271, %c0_272] : memref<14x2x32x128xf32, #tpu.memory_space<vmem>>, vector<1x2x16x128xf32>
    %321 = vector.shape_cast %320 : vector<1x2x16x128xf32> to vector<2x16x128xf32>
    %c10_273 = arith.constant 10 : index
    %c0_274 = arith.constant 0 : index
    %c6_275 = arith.constant 6 : index
    %c0_276 = arith.constant 0 : index
    %322 = vector.load %arg5[%c10_273, %c0_274, %c6_275, %c0_276] : memref<14x2x32x128xf32, #tpu.memory_space<vmem>>, vector<1x2x16x128xf32>
    %323 = vector.shape_cast %322 : vector<1x2x16x128xf32> to vector<2x16x128xf32>
    %324 = vector.broadcast %318 : f32 to vector<2x16x128xf32>
    %325 = arith.mulf %324, %321 : vector<2x16x128xf32>
    %326 = vector.broadcast %319 : f32 to vector<2x16x128xf32>
    %327 = arith.mulf %326, %323 : vector<2x16x128xf32>
    %328 = arith.addf %325, %327 : vector<2x16x128xf32>
    %329 = arith.addf %317, %328 : vector<2x16x128xf32>
    %c11_277 = arith.constant 11 : index
    %330 = memref.load %arg1[%c11_277] : memref<98xf32, #tpu.memory_space<smem>>
    %c60 = arith.constant 60 : index
    %331 = memref.load %arg1[%c60] : memref<98xf32, #tpu.memory_space<smem>>
    %c4_278 = arith.constant 4 : index
    %c0_279 = arith.constant 0 : index
    %c6_280 = arith.constant 6 : index
    %c0_281 = arith.constant 0 : index
    %332 = vector.load %arg5[%c4_278, %c0_279, %c6_280, %c0_281] : memref<14x2x32x128xf32, #tpu.memory_space<vmem>>, vector<1x2x16x128xf32>
    %333 = vector.shape_cast %332 : vector<1x2x16x128xf32> to vector<2x16x128xf32>
    %c11_282 = arith.constant 11 : index
    %c0_283 = arith.constant 0 : index
    %c6_284 = arith.constant 6 : index
    %c0_285 = arith.constant 0 : index
    %334 = vector.load %arg5[%c11_282, %c0_283, %c6_284, %c0_285] : memref<14x2x32x128xf32, #tpu.memory_space<vmem>>, vector<1x2x16x128xf32>
    %335 = vector.shape_cast %334 : vector<1x2x16x128xf32> to vector<2x16x128xf32>
    %336 = vector.broadcast %330 : f32 to vector<2x16x128xf32>
    %337 = arith.mulf %336, %333 : vector<2x16x128xf32>
    %338 = vector.broadcast %331 : f32 to vector<2x16x128xf32>
    %339 = arith.mulf %338, %335 : vector<2x16x128xf32>
    %340 = arith.addf %337, %339 : vector<2x16x128xf32>
    %341 = arith.addf %329, %340 : vector<2x16x128xf32>
    %c12_286 = arith.constant 12 : index
    %342 = memref.load %arg1[%c12_286] : memref<98xf32, #tpu.memory_space<smem>>
    %c61 = arith.constant 61 : index
    %343 = memref.load %arg1[%c61] : memref<98xf32, #tpu.memory_space<smem>>
    %c5_287 = arith.constant 5 : index
    %c0_288 = arith.constant 0 : index
    %c6_289 = arith.constant 6 : index
    %c0_290 = arith.constant 0 : index
    %344 = vector.load %arg5[%c5_287, %c0_288, %c6_289, %c0_290] : memref<14x2x32x128xf32, #tpu.memory_space<vmem>>, vector<1x2x16x128xf32>
    %345 = vector.shape_cast %344 : vector<1x2x16x128xf32> to vector<2x16x128xf32>
    %c12_291 = arith.constant 12 : index
    %c0_292 = arith.constant 0 : index
    %c6_293 = arith.constant 6 : index
    %c0_294 = arith.constant 0 : index
    %346 = vector.load %arg5[%c12_291, %c0_292, %c6_293, %c0_294] : memref<14x2x32x128xf32, #tpu.memory_space<vmem>>, vector<1x2x16x128xf32>
    %347 = vector.shape_cast %346 : vector<1x2x16x128xf32> to vector<2x16x128xf32>
    %348 = vector.broadcast %342 : f32 to vector<2x16x128xf32>
    %349 = arith.mulf %348, %345 : vector<2x16x128xf32>
    %350 = vector.broadcast %343 : f32 to vector<2x16x128xf32>
    %351 = arith.mulf %350, %347 : vector<2x16x128xf32>
    %352 = arith.addf %349, %351 : vector<2x16x128xf32>
    %353 = arith.addf %341, %352 : vector<2x16x128xf32>
    %c13_295 = arith.constant 13 : index
    %354 = memref.load %arg1[%c13_295] : memref<98xf32, #tpu.memory_space<smem>>
    %c62 = arith.constant 62 : index
    %355 = memref.load %arg1[%c62] : memref<98xf32, #tpu.memory_space<smem>>
    %c6_296 = arith.constant 6 : index
    %c0_297 = arith.constant 0 : index
    %c6_298 = arith.constant 6 : index
    %c0_299 = arith.constant 0 : index
    %356 = vector.load %arg5[%c6_296, %c0_297, %c6_298, %c0_299] : memref<14x2x32x128xf32, #tpu.memory_space<vmem>>, vector<1x2x16x128xf32>
    %357 = vector.shape_cast %356 : vector<1x2x16x128xf32> to vector<2x16x128xf32>
    %c13_300 = arith.constant 13 : index
    %c0_301 = arith.constant 0 : index
    %c6_302 = arith.constant 6 : index
    %c0_303 = arith.constant 0 : index
    %358 = vector.load %arg5[%c13_300, %c0_301, %c6_302, %c0_303] : memref<14x2x32x128xf32, #tpu.memory_space<vmem>>, vector<1x2x16x128xf32>
    %359 = vector.shape_cast %358 : vector<1x2x16x128xf32> to vector<2x16x128xf32>
    %360 = vector.broadcast %354 : f32 to vector<2x16x128xf32>
    %361 = arith.mulf %360, %357 : vector<2x16x128xf32>
    %362 = vector.broadcast %355 : f32 to vector<2x16x128xf32>
    %363 = arith.mulf %362, %359 : vector<2x16x128xf32>
    %364 = arith.addf %361, %363 : vector<2x16x128xf32>
    %365 = arith.addf %353, %364 : vector<2x16x128xf32>
    %c14_304 = arith.constant 14 : index
    %366 = memref.load %arg1[%c14_304] : memref<98xf32, #tpu.memory_space<smem>>
    %c63 = arith.constant 63 : index
    %367 = memref.load %arg1[%c63] : memref<98xf32, #tpu.memory_space<smem>>
    %c0_305 = arith.constant 0 : index
    %c0_306 = arith.constant 0 : index
    %c7_307 = arith.constant 7 : index
    %c0_308 = arith.constant 0 : index
    %368 = vector.load %arg5[%c0_305, %c0_306, %c7_307, %c0_308] : memref<14x2x32x128xf32, #tpu.memory_space<vmem>>, vector<1x2x16x128xf32>
    %369 = vector.shape_cast %368 : vector<1x2x16x128xf32> to vector<2x16x128xf32>
    %c7_309 = arith.constant 7 : index
    %c0_310 = arith.constant 0 : index
    %c7_311 = arith.constant 7 : index
    %c0_312 = arith.constant 0 : index
    %370 = vector.load %arg5[%c7_309, %c0_310, %c7_311, %c0_312] : memref<14x2x32x128xf32, #tpu.memory_space<vmem>>, vector<1x2x16x128xf32>
    %371 = vector.shape_cast %370 : vector<1x2x16x128xf32> to vector<2x16x128xf32>
    %372 = vector.broadcast %366 : f32 to vector<2x16x128xf32>
    %373 = arith.mulf %372, %369 : vector<2x16x128xf32>
    %374 = vector.broadcast %367 : f32 to vector<2x16x128xf32>
    %375 = arith.mulf %374, %371 : vector<2x16x128xf32>
    %376 = arith.addf %373, %375 : vector<2x16x128xf32>
    %377 = arith.addf %365, %376 : vector<2x16x128xf32>
    %c15_313 = arith.constant 15 : index
    %378 = memref.load %arg1[%c15_313] : memref<98xf32, #tpu.memory_space<smem>>
    %c64 = arith.constant 64 : index
    %379 = memref.load %arg1[%c64] : memref<98xf32, #tpu.memory_space<smem>>
    %c1_314 = arith.constant 1 : index
    %c0_315 = arith.constant 0 : index
    %c7_316 = arith.constant 7 : index
    %c0_317 = arith.constant 0 : index
    %380 = vector.load %arg5[%c1_314, %c0_315, %c7_316, %c0_317] : memref<14x2x32x128xf32, #tpu.memory_space<vmem>>, vector<1x2x16x128xf32>
    %381 = vector.shape_cast %380 : vector<1x2x16x128xf32> to vector<2x16x128xf32>
    %c8_318 = arith.constant 8 : index
    %c0_319 = arith.constant 0 : index
    %c7_320 = arith.constant 7 : index
    %c0_321 = arith.constant 0 : index
    %382 = vector.load %arg5[%c8_318, %c0_319, %c7_320, %c0_321] : memref<14x2x32x128xf32, #tpu.memory_space<vmem>>, vector<1x2x16x128xf32>
    %383 = vector.shape_cast %382 : vector<1x2x16x128xf32> to vector<2x16x128xf32>
    %384 = vector.broadcast %378 : f32 to vector<2x16x128xf32>
    %385 = arith.mulf %384, %381 : vector<2x16x128xf32>
    %386 = vector.broadcast %379 : f32 to vector<2x16x128xf32>
    %387 = arith.mulf %386, %383 : vector<2x16x128xf32>
    %388 = arith.addf %385, %387 : vector<2x16x128xf32>
    %389 = arith.addf %377, %388 : vector<2x16x128xf32>
    %c16_322 = arith.constant 16 : index
    %390 = memref.load %arg1[%c16_322] : memref<98xf32, #tpu.memory_space<smem>>
    %c65 = arith.constant 65 : index
    %391 = memref.load %arg1[%c65] : memref<98xf32, #tpu.memory_space<smem>>
    %c2_323 = arith.constant 2 : index
    %c0_324 = arith.constant 0 : index
    %c7_325 = arith.constant 7 : index
    %c0_326 = arith.constant 0 : index
    %392 = vector.load %arg5[%c2_323, %c0_324, %c7_325, %c0_326] : memref<14x2x32x128xf32, #tpu.memory_space<vmem>>, vector<1x2x16x128xf32>
    %393 = vector.shape_cast %392 : vector<1x2x16x128xf32> to vector<2x16x128xf32>
    %c9_327 = arith.constant 9 : index
    %c0_328 = arith.constant 0 : index
    %c7_329 = arith.constant 7 : index
    %c0_330 = arith.constant 0 : index
    %394 = vector.load %arg5[%c9_327, %c0_328, %c7_329, %c0_330] : memref<14x2x32x128xf32, #tpu.memory_space<vmem>>, vector<1x2x16x128xf32>
    %395 = vector.shape_cast %394 : vector<1x2x16x128xf32> to vector<2x16x128xf32>
    %396 = vector.broadcast %390 : f32 to vector<2x16x128xf32>
    %397 = arith.mulf %396, %393 : vector<2x16x128xf32>
    %398 = vector.broadcast %391 : f32 to vector<2x16x128xf32>
    %399 = arith.mulf %398, %395 : vector<2x16x128xf32>
    %400 = arith.addf %397, %399 : vector<2x16x128xf32>
    %401 = arith.addf %389, %400 : vector<2x16x128xf32>
    %c17_331 = arith.constant 17 : index
    %402 = memref.load %arg1[%c17_331] : memref<98xf32, #tpu.memory_space<smem>>
    %c66 = arith.constant 66 : index
    %403 = memref.load %arg1[%c66] : memref<98xf32, #tpu.memory_space<smem>>
    %c3_332 = arith.constant 3 : index
    %c0_333 = arith.constant 0 : index
    %c7_334 = arith.constant 7 : index
    %c0_335 = arith.constant 0 : index
    %404 = vector.load %arg5[%c3_332, %c0_333, %c7_334, %c0_335] : memref<14x2x32x128xf32, #tpu.memory_space<vmem>>, vector<1x2x16x128xf32>
    %405 = vector.shape_cast %404 : vector<1x2x16x128xf32> to vector<2x16x128xf32>
    %c10_336 = arith.constant 10 : index
    %c0_337 = arith.constant 0 : index
    %c7_338 = arith.constant 7 : index
    %c0_339 = arith.constant 0 : index
    %406 = vector.load %arg5[%c10_336, %c0_337, %c7_338, %c0_339] : memref<14x2x32x128xf32, #tpu.memory_space<vmem>>, vector<1x2x16x128xf32>
    %407 = vector.shape_cast %406 : vector<1x2x16x128xf32> to vector<2x16x128xf32>
    %408 = vector.broadcast %402 : f32 to vector<2x16x128xf32>
    %409 = arith.mulf %408, %405 : vector<2x16x128xf32>
    %410 = vector.broadcast %403 : f32 to vector<2x16x128xf32>
    %411 = arith.mulf %410, %407 : vector<2x16x128xf32>
    %412 = arith.addf %409, %411 : vector<2x16x128xf32>
    %413 = arith.addf %401, %412 : vector<2x16x128xf32>
    %c18_340 = arith.constant 18 : index
    %414 = memref.load %arg1[%c18_340] : memref<98xf32, #tpu.memory_space<smem>>
    %c67 = arith.constant 67 : index
    %415 = memref.load %arg1[%c67] : memref<98xf32, #tpu.memory_space<smem>>
    %c4_341 = arith.constant 4 : index
    %c0_342 = arith.constant 0 : index
    %c7_343 = arith.constant 7 : index
    %c0_344 = arith.constant 0 : index
    %416 = vector.load %arg5[%c4_341, %c0_342, %c7_343, %c0_344] : memref<14x2x32x128xf32, #tpu.memory_space<vmem>>, vector<1x2x16x128xf32>
    %417 = vector.shape_cast %416 : vector<1x2x16x128xf32> to vector<2x16x128xf32>
    %c11_345 = arith.constant 11 : index
    %c0_346 = arith.constant 0 : index
    %c7_347 = arith.constant 7 : index
    %c0_348 = arith.constant 0 : index
    %418 = vector.load %arg5[%c11_345, %c0_346, %c7_347, %c0_348] : memref<14x2x32x128xf32, #tpu.memory_space<vmem>>, vector<1x2x16x128xf32>
    %419 = vector.shape_cast %418 : vector<1x2x16x128xf32> to vector<2x16x128xf32>
    %420 = vector.broadcast %414 : f32 to vector<2x16x128xf32>
    %421 = arith.mulf %420, %417 : vector<2x16x128xf32>
    %422 = vector.broadcast %415 : f32 to vector<2x16x128xf32>
    %423 = arith.mulf %422, %419 : vector<2x16x128xf32>
    %424 = arith.addf %421, %423 : vector<2x16x128xf32>
    %425 = arith.addf %413, %424 : vector<2x16x128xf32>
    %c19_349 = arith.constant 19 : index
    %426 = memref.load %arg1[%c19_349] : memref<98xf32, #tpu.memory_space<smem>>
    %c68 = arith.constant 68 : index
    %427 = memref.load %arg1[%c68] : memref<98xf32, #tpu.memory_space<smem>>
    %c5_350 = arith.constant 5 : index
    %c0_351 = arith.constant 0 : index
    %c7_352 = arith.constant 7 : index
    %c0_353 = arith.constant 0 : index
    %428 = vector.load %arg5[%c5_350, %c0_351, %c7_352, %c0_353] : memref<14x2x32x128xf32, #tpu.memory_space<vmem>>, vector<1x2x16x128xf32>
    %429 = vector.shape_cast %428 : vector<1x2x16x128xf32> to vector<2x16x128xf32>
    %c12_354 = arith.constant 12 : index
    %c0_355 = arith.constant 0 : index
    %c7_356 = arith.constant 7 : index
    %c0_357 = arith.constant 0 : index
    %430 = vector.load %arg5[%c12_354, %c0_355, %c7_356, %c0_357] : memref<14x2x32x128xf32, #tpu.memory_space<vmem>>, vector<1x2x16x128xf32>
    %431 = vector.shape_cast %430 : vector<1x2x16x128xf32> to vector<2x16x128xf32>
    %432 = vector.broadcast %426 : f32 to vector<2x16x128xf32>
    %433 = arith.mulf %432, %429 : vector<2x16x128xf32>
    %434 = vector.broadcast %427 : f32 to vector<2x16x128xf32>
    %435 = arith.mulf %434, %431 : vector<2x16x128xf32>
    %436 = arith.addf %433, %435 : vector<2x16x128xf32>
    %437 = arith.addf %425, %436 : vector<2x16x128xf32>
    %c20_358 = arith.constant 20 : index
    %438 = memref.load %arg1[%c20_358] : memref<98xf32, #tpu.memory_space<smem>>
    %c69 = arith.constant 69 : index
    %439 = memref.load %arg1[%c69] : memref<98xf32, #tpu.memory_space<smem>>
    %c6_359 = arith.constant 6 : index
    %c0_360 = arith.constant 0 : index
    %c7_361 = arith.constant 7 : index
    %c0_362 = arith.constant 0 : index
    %440 = vector.load %arg5[%c6_359, %c0_360, %c7_361, %c0_362] : memref<14x2x32x128xf32, #tpu.memory_space<vmem>>, vector<1x2x16x128xf32>
    %441 = vector.shape_cast %440 : vector<1x2x16x128xf32> to vector<2x16x128xf32>
    %c13_363 = arith.constant 13 : index
    %c0_364 = arith.constant 0 : index
    %c7_365 = arith.constant 7 : index
    %c0_366 = arith.constant 0 : index
    %442 = vector.load %arg5[%c13_363, %c0_364, %c7_365, %c0_366] : memref<14x2x32x128xf32, #tpu.memory_space<vmem>>, vector<1x2x16x128xf32>
    %443 = vector.shape_cast %442 : vector<1x2x16x128xf32> to vector<2x16x128xf32>
    %444 = vector.broadcast %438 : f32 to vector<2x16x128xf32>
    %445 = arith.mulf %444, %441 : vector<2x16x128xf32>
    %446 = vector.broadcast %439 : f32 to vector<2x16x128xf32>
    %447 = arith.mulf %446, %443 : vector<2x16x128xf32>
    %448 = arith.addf %445, %447 : vector<2x16x128xf32>
    %449 = arith.addf %437, %448 : vector<2x16x128xf32>
    %c21_367 = arith.constant 21 : index
    %450 = memref.load %arg1[%c21_367] : memref<98xf32, #tpu.memory_space<smem>>
    %c70 = arith.constant 70 : index
    %451 = memref.load %arg1[%c70] : memref<98xf32, #tpu.memory_space<smem>>
    %c0_368 = arith.constant 0 : index
    %c0_369 = arith.constant 0 : index
    %c8_370 = arith.constant 8 : index
    %c0_371 = arith.constant 0 : index
    %452 = vector.load %arg5[%c0_368, %c0_369, %c8_370, %c0_371] : memref<14x2x32x128xf32, #tpu.memory_space<vmem>>, vector<1x2x16x128xf32>
    %453 = vector.shape_cast %452 : vector<1x2x16x128xf32> to vector<2x16x128xf32>
    %c7_372 = arith.constant 7 : index
    %c0_373 = arith.constant 0 : index
    %c8_374 = arith.constant 8 : index
    %c0_375 = arith.constant 0 : index
    %454 = vector.load %arg5[%c7_372, %c0_373, %c8_374, %c0_375] : memref<14x2x32x128xf32, #tpu.memory_space<vmem>>, vector<1x2x16x128xf32>
    %455 = vector.shape_cast %454 : vector<1x2x16x128xf32> to vector<2x16x128xf32>
    %456 = vector.broadcast %450 : f32 to vector<2x16x128xf32>
    %457 = arith.mulf %456, %453 : vector<2x16x128xf32>
    %458 = vector.broadcast %451 : f32 to vector<2x16x128xf32>
    %459 = arith.mulf %458, %455 : vector<2x16x128xf32>
    %460 = arith.addf %457, %459 : vector<2x16x128xf32>
    %461 = arith.addf %449, %460 : vector<2x16x128xf32>
    %c22_376 = arith.constant 22 : index
    %462 = memref.load %arg1[%c22_376] : memref<98xf32, #tpu.memory_space<smem>>
    %c71 = arith.constant 71 : index
    %463 = memref.load %arg1[%c71] : memref<98xf32, #tpu.memory_space<smem>>
    %c1_377 = arith.constant 1 : index
    %c0_378 = arith.constant 0 : index
    %c8_379 = arith.constant 8 : index
    %c0_380 = arith.constant 0 : index
    %464 = vector.load %arg5[%c1_377, %c0_378, %c8_379, %c0_380] : memref<14x2x32x128xf32, #tpu.memory_space<vmem>>, vector<1x2x16x128xf32>
    %465 = vector.shape_cast %464 : vector<1x2x16x128xf32> to vector<2x16x128xf32>
    %c8_381 = arith.constant 8 : index
    %c0_382 = arith.constant 0 : index
    %c8_383 = arith.constant 8 : index
    %c0_384 = arith.constant 0 : index
    %466 = vector.load %arg5[%c8_381, %c0_382, %c8_383, %c0_384] : memref<14x2x32x128xf32, #tpu.memory_space<vmem>>, vector<1x2x16x128xf32>
    %467 = vector.shape_cast %466 : vector<1x2x16x128xf32> to vector<2x16x128xf32>
    %468 = vector.broadcast %462 : f32 to vector<2x16x128xf32>
    %469 = arith.mulf %468, %465 : vector<2x16x128xf32>
    %470 = vector.broadcast %463 : f32 to vector<2x16x128xf32>
    %471 = arith.mulf %470, %467 : vector<2x16x128xf32>
    %472 = arith.addf %469, %471 : vector<2x16x128xf32>
    %473 = arith.addf %461, %472 : vector<2x16x128xf32>
    %c23_385 = arith.constant 23 : index
    %474 = memref.load %arg1[%c23_385] : memref<98xf32, #tpu.memory_space<smem>>
    %c72 = arith.constant 72 : index
    %475 = memref.load %arg1[%c72] : memref<98xf32, #tpu.memory_space<smem>>
    %c2_386 = arith.constant 2 : index
    %c0_387 = arith.constant 0 : index
    %c8_388 = arith.constant 8 : index
    %c0_389 = arith.constant 0 : index
    %476 = vector.load %arg5[%c2_386, %c0_387, %c8_388, %c0_389] : memref<14x2x32x128xf32, #tpu.memory_space<vmem>>, vector<1x2x16x128xf32>
    %477 = vector.shape_cast %476 : vector<1x2x16x128xf32> to vector<2x16x128xf32>
    %c9_390 = arith.constant 9 : index
    %c0_391 = arith.constant 0 : index
    %c8_392 = arith.constant 8 : index
    %c0_393 = arith.constant 0 : index
    %478 = vector.load %arg5[%c9_390, %c0_391, %c8_392, %c0_393] : memref<14x2x32x128xf32, #tpu.memory_space<vmem>>, vector<1x2x16x128xf32>
    %479 = vector.shape_cast %478 : vector<1x2x16x128xf32> to vector<2x16x128xf32>
    %480 = vector.broadcast %474 : f32 to vector<2x16x128xf32>
    %481 = arith.mulf %480, %477 : vector<2x16x128xf32>
    %482 = vector.broadcast %475 : f32 to vector<2x16x128xf32>
    %483 = arith.mulf %482, %479 : vector<2x16x128xf32>
    %484 = arith.addf %481, %483 : vector<2x16x128xf32>
    %485 = arith.addf %473, %484 : vector<2x16x128xf32>
    %c24 = arith.constant 24 : index
    %486 = memref.load %arg1[%c24] : memref<98xf32, #tpu.memory_space<smem>>
    %c73 = arith.constant 73 : index
    %487 = memref.load %arg1[%c73] : memref<98xf32, #tpu.memory_space<smem>>
    %c3_394 = arith.constant 3 : index
    %c0_395 = arith.constant 0 : index
    %c8_396 = arith.constant 8 : index
    %c0_397 = arith.constant 0 : index
    %488 = vector.load %arg5[%c3_394, %c0_395, %c8_396, %c0_397] : memref<14x2x32x128xf32, #tpu.memory_space<vmem>>, vector<1x2x16x128xf32>
    %489 = vector.shape_cast %488 : vector<1x2x16x128xf32> to vector<2x16x128xf32>
    %c10_398 = arith.constant 10 : index
    %c0_399 = arith.constant 0 : index
    %c8_400 = arith.constant 8 : index
    %c0_401 = arith.constant 0 : index
    %490 = vector.load %arg5[%c10_398, %c0_399, %c8_400, %c0_401] : memref<14x2x32x128xf32, #tpu.memory_space<vmem>>, vector<1x2x16x128xf32>
    %491 = vector.shape_cast %490 : vector<1x2x16x128xf32> to vector<2x16x128xf32>
    %492 = vector.broadcast %486 : f32 to vector<2x16x128xf32>
    %493 = arith.mulf %492, %489 : vector<2x16x128xf32>
    %494 = vector.broadcast %487 : f32 to vector<2x16x128xf32>
    %495 = arith.mulf %494, %491 : vector<2x16x128xf32>
    %496 = arith.addf %493, %495 : vector<2x16x128xf32>
    %497 = arith.addf %485, %496 : vector<2x16x128xf32>
    %c25 = arith.constant 25 : index
    %498 = memref.load %arg1[%c25] : memref<98xf32, #tpu.memory_space<smem>>
    %c74 = arith.constant 74 : index
    %499 = memref.load %arg1[%c74] : memref<98xf32, #tpu.memory_space<smem>>
    %c4_402 = arith.constant 4 : index
    %c0_403 = arith.constant 0 : index
    %c8_404 = arith.constant 8 : index
    %c0_405 = arith.constant 0 : index
    %500 = vector.load %arg5[%c4_402, %c0_403, %c8_404, %c0_405] : memref<14x2x32x128xf32, #tpu.memory_space<vmem>>, vector<1x2x16x128xf32>
    %501 = vector.shape_cast %500 : vector<1x2x16x128xf32> to vector<2x16x128xf32>
    %c11_406 = arith.constant 11 : index
    %c0_407 = arith.constant 0 : index
    %c8_408 = arith.constant 8 : index
    %c0_409 = arith.constant 0 : index
    %502 = vector.load %arg5[%c11_406, %c0_407, %c8_408, %c0_409] : memref<14x2x32x128xf32, #tpu.memory_space<vmem>>, vector<1x2x16x128xf32>
    %503 = vector.shape_cast %502 : vector<1x2x16x128xf32> to vector<2x16x128xf32>
    %504 = vector.broadcast %498 : f32 to vector<2x16x128xf32>
    %505 = arith.mulf %504, %501 : vector<2x16x128xf32>
    %506 = vector.broadcast %499 : f32 to vector<2x16x128xf32>
    %507 = arith.mulf %506, %503 : vector<2x16x128xf32>
    %508 = arith.addf %505, %507 : vector<2x16x128xf32>
    %509 = arith.addf %497, %508 : vector<2x16x128xf32>
    %c26 = arith.constant 26 : index
    %510 = memref.load %arg1[%c26] : memref<98xf32, #tpu.memory_space<smem>>
    %c75 = arith.constant 75 : index
    %511 = memref.load %arg1[%c75] : memref<98xf32, #tpu.memory_space<smem>>
    %c5_410 = arith.constant 5 : index
    %c0_411 = arith.constant 0 : index
    %c8_412 = arith.constant 8 : index
    %c0_413 = arith.constant 0 : index
    %512 = vector.load %arg5[%c5_410, %c0_411, %c8_412, %c0_413] : memref<14x2x32x128xf32, #tpu.memory_space<vmem>>, vector<1x2x16x128xf32>
    %513 = vector.shape_cast %512 : vector<1x2x16x128xf32> to vector<2x16x128xf32>
    %c12_414 = arith.constant 12 : index
    %c0_415 = arith.constant 0 : index
    %c8_416 = arith.constant 8 : index
    %c0_417 = arith.constant 0 : index
    %514 = vector.load %arg5[%c12_414, %c0_415, %c8_416, %c0_417] : memref<14x2x32x128xf32, #tpu.memory_space<vmem>>, vector<1x2x16x128xf32>
    %515 = vector.shape_cast %514 : vector<1x2x16x128xf32> to vector<2x16x128xf32>
    %516 = vector.broadcast %510 : f32 to vector<2x16x128xf32>
    %517 = arith.mulf %516, %513 : vector<2x16x128xf32>
    %518 = vector.broadcast %511 : f32 to vector<2x16x128xf32>
    %519 = arith.mulf %518, %515 : vector<2x16x128xf32>
    %520 = arith.addf %517, %519 : vector<2x16x128xf32>
    %521 = arith.addf %509, %520 : vector<2x16x128xf32>
    %c27 = arith.constant 27 : index
    %522 = memref.load %arg1[%c27] : memref<98xf32, #tpu.memory_space<smem>>
    %c76 = arith.constant 76 : index
    %523 = memref.load %arg1[%c76] : memref<98xf32, #tpu.memory_space<smem>>
    %c6_418 = arith.constant 6 : index
    %c0_419 = arith.constant 0 : index
    %c8_420 = arith.constant 8 : index
    %c0_421 = arith.constant 0 : index
    %524 = vector.load %arg5[%c6_418, %c0_419, %c8_420, %c0_421] : memref<14x2x32x128xf32, #tpu.memory_space<vmem>>, vector<1x2x16x128xf32>
    %525 = vector.shape_cast %524 : vector<1x2x16x128xf32> to vector<2x16x128xf32>
    %c13_422 = arith.constant 13 : index
    %c0_423 = arith.constant 0 : index
    %c8_424 = arith.constant 8 : index
    %c0_425 = arith.constant 0 : index
    %526 = vector.load %arg5[%c13_422, %c0_423, %c8_424, %c0_425] : memref<14x2x32x128xf32, #tpu.memory_space<vmem>>, vector<1x2x16x128xf32>
    %527 = vector.shape_cast %526 : vector<1x2x16x128xf32> to vector<2x16x128xf32>
    %528 = vector.broadcast %522 : f32 to vector<2x16x128xf32>
    %529 = arith.mulf %528, %525 : vector<2x16x128xf32>
    %530 = vector.broadcast %523 : f32 to vector<2x16x128xf32>
    %531 = arith.mulf %530, %527 : vector<2x16x128xf32>
    %532 = arith.addf %529, %531 : vector<2x16x128xf32>
    %533 = arith.addf %521, %532 : vector<2x16x128xf32>
    %c28 = arith.constant 28 : index
    %534 = memref.load %arg1[%c28] : memref<98xf32, #tpu.memory_space<smem>>
    %c77 = arith.constant 77 : index
    %535 = memref.load %arg1[%c77] : memref<98xf32, #tpu.memory_space<smem>>
    %c0_426 = arith.constant 0 : index
    %c0_427 = arith.constant 0 : index
    %c9_428 = arith.constant 9 : index
    %c0_429 = arith.constant 0 : index
    %536 = vector.load %arg5[%c0_426, %c0_427, %c9_428, %c0_429] : memref<14x2x32x128xf32, #tpu.memory_space<vmem>>, vector<1x2x16x128xf32>
    %537 = vector.shape_cast %536 : vector<1x2x16x128xf32> to vector<2x16x128xf32>
    %c7_430 = arith.constant 7 : index
    %c0_431 = arith.constant 0 : index
    %c9_432 = arith.constant 9 : index
    %c0_433 = arith.constant 0 : index
    %538 = vector.load %arg5[%c7_430, %c0_431, %c9_432, %c0_433] : memref<14x2x32x128xf32, #tpu.memory_space<vmem>>, vector<1x2x16x128xf32>
    %539 = vector.shape_cast %538 : vector<1x2x16x128xf32> to vector<2x16x128xf32>
    %540 = vector.broadcast %534 : f32 to vector<2x16x128xf32>
    %541 = arith.mulf %540, %537 : vector<2x16x128xf32>
    %542 = vector.broadcast %535 : f32 to vector<2x16x128xf32>
    %543 = arith.mulf %542, %539 : vector<2x16x128xf32>
    %544 = arith.addf %541, %543 : vector<2x16x128xf32>
    %545 = arith.addf %533, %544 : vector<2x16x128xf32>
    %c29 = arith.constant 29 : index
    %546 = memref.load %arg1[%c29] : memref<98xf32, #tpu.memory_space<smem>>
    %c78 = arith.constant 78 : index
    %547 = memref.load %arg1[%c78] : memref<98xf32, #tpu.memory_space<smem>>
    %c1_434 = arith.constant 1 : index
    %c0_435 = arith.constant 0 : index
    %c9_436 = arith.constant 9 : index
    %c0_437 = arith.constant 0 : index
    %548 = vector.load %arg5[%c1_434, %c0_435, %c9_436, %c0_437] : memref<14x2x32x128xf32, #tpu.memory_space<vmem>>, vector<1x2x16x128xf32>
    %549 = vector.shape_cast %548 : vector<1x2x16x128xf32> to vector<2x16x128xf32>
    %c8_438 = arith.constant 8 : index
    %c0_439 = arith.constant 0 : index
    %c9_440 = arith.constant 9 : index
    %c0_441 = arith.constant 0 : index
    %550 = vector.load %arg5[%c8_438, %c0_439, %c9_440, %c0_441] : memref<14x2x32x128xf32, #tpu.memory_space<vmem>>, vector<1x2x16x128xf32>
    %551 = vector.shape_cast %550 : vector<1x2x16x128xf32> to vector<2x16x128xf32>
    %552 = vector.broadcast %546 : f32 to vector<2x16x128xf32>
    %553 = arith.mulf %552, %549 : vector<2x16x128xf32>
    %554 = vector.broadcast %547 : f32 to vector<2x16x128xf32>
    %555 = arith.mulf %554, %551 : vector<2x16x128xf32>
    %556 = arith.addf %553, %555 : vector<2x16x128xf32>
    %557 = arith.addf %545, %556 : vector<2x16x128xf32>
    %c30 = arith.constant 30 : index
    %558 = memref.load %arg1[%c30] : memref<98xf32, #tpu.memory_space<smem>>
    %c79 = arith.constant 79 : index
    %559 = memref.load %arg1[%c79] : memref<98xf32, #tpu.memory_space<smem>>
    %c2_442 = arith.constant 2 : index
    %c0_443 = arith.constant 0 : index
    %c9_444 = arith.constant 9 : index
    %c0_445 = arith.constant 0 : index
    %560 = vector.load %arg5[%c2_442, %c0_443, %c9_444, %c0_445] : memref<14x2x32x128xf32, #tpu.memory_space<vmem>>, vector<1x2x16x128xf32>
    %561 = vector.shape_cast %560 : vector<1x2x16x128xf32> to vector<2x16x128xf32>
    %c9_446 = arith.constant 9 : index
    %c0_447 = arith.constant 0 : index
    %c9_448 = arith.constant 9 : index
    %c0_449 = arith.constant 0 : index
    %562 = vector.load %arg5[%c9_446, %c0_447, %c9_448, %c0_449] : memref<14x2x32x128xf32, #tpu.memory_space<vmem>>, vector<1x2x16x128xf32>
    %563 = vector.shape_cast %562 : vector<1x2x16x128xf32> to vector<2x16x128xf32>
    %564 = vector.broadcast %558 : f32 to vector<2x16x128xf32>
    %565 = arith.mulf %564, %561 : vector<2x16x128xf32>
    %566 = vector.broadcast %559 : f32 to vector<2x16x128xf32>
    %567 = arith.mulf %566, %563 : vector<2x16x128xf32>
    %568 = arith.addf %565, %567 : vector<2x16x128xf32>
    %569 = arith.addf %557, %568 : vector<2x16x128xf32>
    %c31 = arith.constant 31 : index
    %570 = memref.load %arg1[%c31] : memref<98xf32, #tpu.memory_space<smem>>
    %c80 = arith.constant 80 : index
    %571 = memref.load %arg1[%c80] : memref<98xf32, #tpu.memory_space<smem>>
    %c3_450 = arith.constant 3 : index
    %c0_451 = arith.constant 0 : index
    %c9_452 = arith.constant 9 : index
    %c0_453 = arith.constant 0 : index
    %572 = vector.load %arg5[%c3_450, %c0_451, %c9_452, %c0_453] : memref<14x2x32x128xf32, #tpu.memory_space<vmem>>, vector<1x2x16x128xf32>
    %573 = vector.shape_cast %572 : vector<1x2x16x128xf32> to vector<2x16x128xf32>
    %c10_454 = arith.constant 10 : index
    %c0_455 = arith.constant 0 : index
    %c9_456 = arith.constant 9 : index
    %c0_457 = arith.constant 0 : index
    %574 = vector.load %arg5[%c10_454, %c0_455, %c9_456, %c0_457] : memref<14x2x32x128xf32, #tpu.memory_space<vmem>>, vector<1x2x16x128xf32>
    %575 = vector.shape_cast %574 : vector<1x2x16x128xf32> to vector<2x16x128xf32>
    %576 = vector.broadcast %570 : f32 to vector<2x16x128xf32>
    %577 = arith.mulf %576, %573 : vector<2x16x128xf32>
    %578 = vector.broadcast %571 : f32 to vector<2x16x128xf32>
    %579 = arith.mulf %578, %575 : vector<2x16x128xf32>
    %580 = arith.addf %577, %579 : vector<2x16x128xf32>
    %581 = arith.addf %569, %580 : vector<2x16x128xf32>
    %c32 = arith.constant 32 : index
    %582 = memref.load %arg1[%c32] : memref<98xf32, #tpu.memory_space<smem>>
    %c81 = arith.constant 81 : index
    %583 = memref.load %arg1[%c81] : memref<98xf32, #tpu.memory_space<smem>>
    %c4_458 = arith.constant 4 : index
    %c0_459 = arith.constant 0 : index
    %c9_460 = arith.constant 9 : index
    %c0_461 = arith.constant 0 : index
    %584 = vector.load %arg5[%c4_458, %c0_459, %c9_460, %c0_461] : memref<14x2x32x128xf32, #tpu.memory_space<vmem>>, vector<1x2x16x128xf32>
    %585 = vector.shape_cast %584 : vector<1x2x16x128xf32> to vector<2x16x128xf32>
    %c11_462 = arith.constant 11 : index
    %c0_463 = arith.constant 0 : index
    %c9_464 = arith.constant 9 : index
    %c0_465 = arith.constant 0 : index
    %586 = vector.load %arg5[%c11_462, %c0_463, %c9_464, %c0_465] : memref<14x2x32x128xf32, #tpu.memory_space<vmem>>, vector<1x2x16x128xf32>
    %587 = vector.shape_cast %586 : vector<1x2x16x128xf32> to vector<2x16x128xf32>
    %588 = vector.broadcast %582 : f32 to vector<2x16x128xf32>
    %589 = arith.mulf %588, %585 : vector<2x16x128xf32>
    %590 = vector.broadcast %583 : f32 to vector<2x16x128xf32>
    %591 = arith.mulf %590, %587 : vector<2x16x128xf32>
    %592 = arith.addf %589, %591 : vector<2x16x128xf32>
    %593 = arith.addf %581, %592 : vector<2x16x128xf32>
    %c33 = arith.constant 33 : index
    %594 = memref.load %arg1[%c33] : memref<98xf32, #tpu.memory_space<smem>>
    %c82 = arith.constant 82 : index
    %595 = memref.load %arg1[%c82] : memref<98xf32, #tpu.memory_space<smem>>
    %c5_466 = arith.constant 5 : index
    %c0_467 = arith.constant 0 : index
    %c9_468 = arith.constant 9 : index
    %c0_469 = arith.constant 0 : index
    %596 = vector.load %arg5[%c5_466, %c0_467, %c9_468, %c0_469] : memref<14x2x32x128xf32, #tpu.memory_space<vmem>>, vector<1x2x16x128xf32>
    %597 = vector.shape_cast %596 : vector<1x2x16x128xf32> to vector<2x16x128xf32>
    %c12_470 = arith.constant 12 : index
    %c0_471 = arith.constant 0 : index
    %c9_472 = arith.constant 9 : index
    %c0_473 = arith.constant 0 : index
    %598 = vector.load %arg5[%c12_470, %c0_471, %c9_472, %c0_473] : memref<14x2x32x128xf32, #tpu.memory_space<vmem>>, vector<1x2x16x128xf32>
    %599 = vector.shape_cast %598 : vector<1x2x16x128xf32> to vector<2x16x128xf32>
    %600 = vector.broadcast %594 : f32 to vector<2x16x128xf32>
    %601 = arith.mulf %600, %597 : vector<2x16x128xf32>
    %602 = vector.broadcast %595 : f32 to vector<2x16x128xf32>
    %603 = arith.mulf %602, %599 : vector<2x16x128xf32>
    %604 = arith.addf %601, %603 : vector<2x16x128xf32>
    %605 = arith.addf %593, %604 : vector<2x16x128xf32>
    %c34 = arith.constant 34 : index
    %606 = memref.load %arg1[%c34] : memref<98xf32, #tpu.memory_space<smem>>
    %c83 = arith.constant 83 : index
    %607 = memref.load %arg1[%c83] : memref<98xf32, #tpu.memory_space<smem>>
    %c6_474 = arith.constant 6 : index
    %c0_475 = arith.constant 0 : index
    %c9_476 = arith.constant 9 : index
    %c0_477 = arith.constant 0 : index
    %608 = vector.load %arg5[%c6_474, %c0_475, %c9_476, %c0_477] : memref<14x2x32x128xf32, #tpu.memory_space<vmem>>, vector<1x2x16x128xf32>
    %609 = vector.shape_cast %608 : vector<1x2x16x128xf32> to vector<2x16x128xf32>
    %c13_478 = arith.constant 13 : index
    %c0_479 = arith.constant 0 : index
    %c9_480 = arith.constant 9 : index
    %c0_481 = arith.constant 0 : index
    %610 = vector.load %arg5[%c13_478, %c0_479, %c9_480, %c0_481] : memref<14x2x32x128xf32, #tpu.memory_space<vmem>>, vector<1x2x16x128xf32>
    %611 = vector.shape_cast %610 : vector<1x2x16x128xf32> to vector<2x16x128xf32>
    %612 = vector.broadcast %606 : f32 to vector<2x16x128xf32>
    %613 = arith.mulf %612, %609 : vector<2x16x128xf32>
    %614 = vector.broadcast %607 : f32 to vector<2x16x128xf32>
    %615 = arith.mulf %614, %611 : vector<2x16x128xf32>
    %616 = arith.addf %613, %615 : vector<2x16x128xf32>
    %617 = arith.addf %605, %616 : vector<2x16x128xf32>
    %c35 = arith.constant 35 : index
    %618 = memref.load %arg1[%c35] : memref<98xf32, #tpu.memory_space<smem>>
    %c84 = arith.constant 84 : index
    %619 = memref.load %arg1[%c84] : memref<98xf32, #tpu.memory_space<smem>>
    %c0_482 = arith.constant 0 : index
    %c0_483 = arith.constant 0 : index
    %c10_484 = arith.constant 10 : index
    %c0_485 = arith.constant 0 : index
    %620 = vector.load %arg5[%c0_482, %c0_483, %c10_484, %c0_485] : memref<14x2x32x128xf32, #tpu.memory_space<vmem>>, vector<1x2x16x128xf32>
    %621 = vector.shape_cast %620 : vector<1x2x16x128xf32> to vector<2x16x128xf32>
    %c7_486 = arith.constant 7 : index
    %c0_487 = arith.constant 0 : index
    %c10_488 = arith.constant 10 : index
    %c0_489 = arith.constant 0 : index
    %622 = vector.load %arg5[%c7_486, %c0_487, %c10_488, %c0_489] : memref<14x2x32x128xf32, #tpu.memory_space<vmem>>, vector<1x2x16x128xf32>
    %623 = vector.shape_cast %622 : vector<1x2x16x128xf32> to vector<2x16x128xf32>
    %624 = vector.broadcast %618 : f32 to vector<2x16x128xf32>
    %625 = arith.mulf %624, %621 : vector<2x16x128xf32>
    %626 = vector.broadcast %619 : f32 to vector<2x16x128xf32>
    %627 = arith.mulf %626, %623 : vector<2x16x128xf32>
    %628 = arith.addf %625, %627 : vector<2x16x128xf32>
    %629 = arith.addf %617, %628 : vector<2x16x128xf32>
    %c36 = arith.constant 36 : index
    %630 = memref.load %arg1[%c36] : memref<98xf32, #tpu.memory_space<smem>>
    %c85 = arith.constant 85 : index
    %631 = memref.load %arg1[%c85] : memref<98xf32, #tpu.memory_space<smem>>
    %c1_490 = arith.constant 1 : index
    %c0_491 = arith.constant 0 : index
    %c10_492 = arith.constant 10 : index
    %c0_493 = arith.constant 0 : index
    %632 = vector.load %arg5[%c1_490, %c0_491, %c10_492, %c0_493] : memref<14x2x32x128xf32, #tpu.memory_space<vmem>>, vector<1x2x16x128xf32>
    %633 = vector.shape_cast %632 : vector<1x2x16x128xf32> to vector<2x16x128xf32>
    %c8_494 = arith.constant 8 : index
    %c0_495 = arith.constant 0 : index
    %c10_496 = arith.constant 10 : index
    %c0_497 = arith.constant 0 : index
    %634 = vector.load %arg5[%c8_494, %c0_495, %c10_496, %c0_497] : memref<14x2x32x128xf32, #tpu.memory_space<vmem>>, vector<1x2x16x128xf32>
    %635 = vector.shape_cast %634 : vector<1x2x16x128xf32> to vector<2x16x128xf32>
    %636 = vector.broadcast %630 : f32 to vector<2x16x128xf32>
    %637 = arith.mulf %636, %633 : vector<2x16x128xf32>
    %638 = vector.broadcast %631 : f32 to vector<2x16x128xf32>
    %639 = arith.mulf %638, %635 : vector<2x16x128xf32>
    %640 = arith.addf %637, %639 : vector<2x16x128xf32>
    %641 = arith.addf %629, %640 : vector<2x16x128xf32>
    %c37 = arith.constant 37 : index
    %642 = memref.load %arg1[%c37] : memref<98xf32, #tpu.memory_space<smem>>
    %c86 = arith.constant 86 : index
    %643 = memref.load %arg1[%c86] : memref<98xf32, #tpu.memory_space<smem>>
    %c2_498 = arith.constant 2 : index
    %c0_499 = arith.constant 0 : index
    %c10_500 = arith.constant 10 : index
    %c0_501 = arith.constant 0 : index
    %644 = vector.load %arg5[%c2_498, %c0_499, %c10_500, %c0_501] : memref<14x2x32x128xf32, #tpu.memory_space<vmem>>, vector<1x2x16x128xf32>
    %645 = vector.shape_cast %644 : vector<1x2x16x128xf32> to vector<2x16x128xf32>
    %c9_502 = arith.constant 9 : index
    %c0_503 = arith.constant 0 : index
    %c10_504 = arith.constant 10 : index
    %c0_505 = arith.constant 0 : index
    %646 = vector.load %arg5[%c9_502, %c0_503, %c10_504, %c0_505] : memref<14x2x32x128xf32, #tpu.memory_space<vmem>>, vector<1x2x16x128xf32>
    %647 = vector.shape_cast %646 : vector<1x2x16x128xf32> to vector<2x16x128xf32>
    %648 = vector.broadcast %642 : f32 to vector<2x16x128xf32>
    %649 = arith.mulf %648, %645 : vector<2x16x128xf32>
    %650 = vector.broadcast %643 : f32 to vector<2x16x128xf32>
    %651 = arith.mulf %650, %647 : vector<2x16x128xf32>
    %652 = arith.addf %649, %651 : vector<2x16x128xf32>
    %653 = arith.addf %641, %652 : vector<2x16x128xf32>
    %c38 = arith.constant 38 : index
    %654 = memref.load %arg1[%c38] : memref<98xf32, #tpu.memory_space<smem>>
    %c87 = arith.constant 87 : index
    %655 = memref.load %arg1[%c87] : memref<98xf32, #tpu.memory_space<smem>>
    %c3_506 = arith.constant 3 : index
    %c0_507 = arith.constant 0 : index
    %c10_508 = arith.constant 10 : index
    %c0_509 = arith.constant 0 : index
    %656 = vector.load %arg5[%c3_506, %c0_507, %c10_508, %c0_509] : memref<14x2x32x128xf32, #tpu.memory_space<vmem>>, vector<1x2x16x128xf32>
    %657 = vector.shape_cast %656 : vector<1x2x16x128xf32> to vector<2x16x128xf32>
    %c10_510 = arith.constant 10 : index
    %c0_511 = arith.constant 0 : index
    %c10_512 = arith.constant 10 : index
    %c0_513 = arith.constant 0 : index
    %658 = vector.load %arg5[%c10_510, %c0_511, %c10_512, %c0_513] : memref<14x2x32x128xf32, #tpu.memory_space<vmem>>, vector<1x2x16x128xf32>
    %659 = vector.shape_cast %658 : vector<1x2x16x128xf32> to vector<2x16x128xf32>
    %660 = vector.broadcast %654 : f32 to vector<2x16x128xf32>
    %661 = arith.mulf %660, %657 : vector<2x16x128xf32>
    %662 = vector.broadcast %655 : f32 to vector<2x16x128xf32>
    %663 = arith.mulf %662, %659 : vector<2x16x128xf32>
    %664 = arith.addf %661, %663 : vector<2x16x128xf32>
    %665 = arith.addf %653, %664 : vector<2x16x128xf32>
    %c39 = arith.constant 39 : index
    %666 = memref.load %arg1[%c39] : memref<98xf32, #tpu.memory_space<smem>>
    %c88 = arith.constant 88 : index
    %667 = memref.load %arg1[%c88] : memref<98xf32, #tpu.memory_space<smem>>
    %c4_514 = arith.constant 4 : index
    %c0_515 = arith.constant 0 : index
    %c10_516 = arith.constant 10 : index
    %c0_517 = arith.constant 0 : index
    %668 = vector.load %arg5[%c4_514, %c0_515, %c10_516, %c0_517] : memref<14x2x32x128xf32, #tpu.memory_space<vmem>>, vector<1x2x16x128xf32>
    %669 = vector.shape_cast %668 : vector<1x2x16x128xf32> to vector<2x16x128xf32>
    %c11_518 = arith.constant 11 : index
    %c0_519 = arith.constant 0 : index
    %c10_520 = arith.constant 10 : index
    %c0_521 = arith.constant 0 : index
    %670 = vector.load %arg5[%c11_518, %c0_519, %c10_520, %c0_521] : memref<14x2x32x128xf32, #tpu.memory_space<vmem>>, vector<1x2x16x128xf32>
    %671 = vector.shape_cast %670 : vector<1x2x16x128xf32> to vector<2x16x128xf32>
    %672 = vector.broadcast %666 : f32 to vector<2x16x128xf32>
    %673 = arith.mulf %672, %669 : vector<2x16x128xf32>
    %674 = vector.broadcast %667 : f32 to vector<2x16x128xf32>
    %675 = arith.mulf %674, %671 : vector<2x16x128xf32>
    %676 = arith.addf %673, %675 : vector<2x16x128xf32>
    %677 = arith.addf %665, %676 : vector<2x16x128xf32>
    %c40 = arith.constant 40 : index
    %678 = memref.load %arg1[%c40] : memref<98xf32, #tpu.memory_space<smem>>
    %c89 = arith.constant 89 : index
    %679 = memref.load %arg1[%c89] : memref<98xf32, #tpu.memory_space<smem>>
    %c5_522 = arith.constant 5 : index
    %c0_523 = arith.constant 0 : index
    %c10_524 = arith.constant 10 : index
    %c0_525 = arith.constant 0 : index
    %680 = vector.load %arg5[%c5_522, %c0_523, %c10_524, %c0_525] : memref<14x2x32x128xf32, #tpu.memory_space<vmem>>, vector<1x2x16x128xf32>
    %681 = vector.shape_cast %680 : vector<1x2x16x128xf32> to vector<2x16x128xf32>
    %c12_526 = arith.constant 12 : index
    %c0_527 = arith.constant 0 : index
    %c10_528 = arith.constant 10 : index
    %c0_529 = arith.constant 0 : index
    %682 = vector.load %arg5[%c12_526, %c0_527, %c10_528, %c0_529] : memref<14x2x32x128xf32, #tpu.memory_space<vmem>>, vector<1x2x16x128xf32>
    %683 = vector.shape_cast %682 : vector<1x2x16x128xf32> to vector<2x16x128xf32>
    %684 = vector.broadcast %678 : f32 to vector<2x16x128xf32>
    %685 = arith.mulf %684, %681 : vector<2x16x128xf32>
    %686 = vector.broadcast %679 : f32 to vector<2x16x128xf32>
    %687 = arith.mulf %686, %683 : vector<2x16x128xf32>
    %688 = arith.addf %685, %687 : vector<2x16x128xf32>
    %689 = arith.addf %677, %688 : vector<2x16x128xf32>
    %c41 = arith.constant 41 : index
    %690 = memref.load %arg1[%c41] : memref<98xf32, #tpu.memory_space<smem>>
    %c90 = arith.constant 90 : index
    %691 = memref.load %arg1[%c90] : memref<98xf32, #tpu.memory_space<smem>>
    %c6_530 = arith.constant 6 : index
    %c0_531 = arith.constant 0 : index
    %c10_532 = arith.constant 10 : index
    %c0_533 = arith.constant 0 : index
    %692 = vector.load %arg5[%c6_530, %c0_531, %c10_532, %c0_533] : memref<14x2x32x128xf32, #tpu.memory_space<vmem>>, vector<1x2x16x128xf32>
    %693 = vector.shape_cast %692 : vector<1x2x16x128xf32> to vector<2x16x128xf32>
    %c13_534 = arith.constant 13 : index
    %c0_535 = arith.constant 0 : index
    %c10_536 = arith.constant 10 : index
    %c0_537 = arith.constant 0 : index
    %694 = vector.load %arg5[%c13_534, %c0_535, %c10_536, %c0_537] : memref<14x2x32x128xf32, #tpu.memory_space<vmem>>, vector<1x2x16x128xf32>
    %695 = vector.shape_cast %694 : vector<1x2x16x128xf32> to vector<2x16x128xf32>
    %696 = vector.broadcast %690 : f32 to vector<2x16x128xf32>
    %697 = arith.mulf %696, %693 : vector<2x16x128xf32>
    %698 = vector.broadcast %691 : f32 to vector<2x16x128xf32>
    %699 = arith.mulf %698, %695 : vector<2x16x128xf32>
    %700 = arith.addf %697, %699 : vector<2x16x128xf32>
    %701 = arith.addf %689, %700 : vector<2x16x128xf32>
    %c42 = arith.constant 42 : index
    %702 = memref.load %arg1[%c42] : memref<98xf32, #tpu.memory_space<smem>>
    %c91 = arith.constant 91 : index
    %703 = memref.load %arg1[%c91] : memref<98xf32, #tpu.memory_space<smem>>
    %c0_538 = arith.constant 0 : index
    %c0_539 = arith.constant 0 : index
    %c11_540 = arith.constant 11 : index
    %c0_541 = arith.constant 0 : index
    %704 = vector.load %arg5[%c0_538, %c0_539, %c11_540, %c0_541] : memref<14x2x32x128xf32, #tpu.memory_space<vmem>>, vector<1x2x16x128xf32>
    %705 = vector.shape_cast %704 : vector<1x2x16x128xf32> to vector<2x16x128xf32>
    %c7_542 = arith.constant 7 : index
    %c0_543 = arith.constant 0 : index
    %c11_544 = arith.constant 11 : index
    %c0_545 = arith.constant 0 : index
    %706 = vector.load %arg5[%c7_542, %c0_543, %c11_544, %c0_545] : memref<14x2x32x128xf32, #tpu.memory_space<vmem>>, vector<1x2x16x128xf32>
    %707 = vector.shape_cast %706 : vector<1x2x16x128xf32> to vector<2x16x128xf32>
    %708 = vector.broadcast %702 : f32 to vector<2x16x128xf32>
    %709 = arith.mulf %708, %705 : vector<2x16x128xf32>
    %710 = vector.broadcast %703 : f32 to vector<2x16x128xf32>
    %711 = arith.mulf %710, %707 : vector<2x16x128xf32>
    %712 = arith.addf %709, %711 : vector<2x16x128xf32>
    %713 = arith.addf %701, %712 : vector<2x16x128xf32>
    %c43 = arith.constant 43 : index
    %714 = memref.load %arg1[%c43] : memref<98xf32, #tpu.memory_space<smem>>
    %c92 = arith.constant 92 : index
    %715 = memref.load %arg1[%c92] : memref<98xf32, #tpu.memory_space<smem>>
    %c1_546 = arith.constant 1 : index
    %c0_547 = arith.constant 0 : index
    %c11_548 = arith.constant 11 : index
    %c0_549 = arith.constant 0 : index
    %716 = vector.load %arg5[%c1_546, %c0_547, %c11_548, %c0_549] : memref<14x2x32x128xf32, #tpu.memory_space<vmem>>, vector<1x2x16x128xf32>
    %717 = vector.shape_cast %716 : vector<1x2x16x128xf32> to vector<2x16x128xf32>
    %c8_550 = arith.constant 8 : index
    %c0_551 = arith.constant 0 : index
    %c11_552 = arith.constant 11 : index
    %c0_553 = arith.constant 0 : index
    %718 = vector.load %arg5[%c8_550, %c0_551, %c11_552, %c0_553] : memref<14x2x32x128xf32, #tpu.memory_space<vmem>>, vector<1x2x16x128xf32>
    %719 = vector.shape_cast %718 : vector<1x2x16x128xf32> to vector<2x16x128xf32>
    %720 = vector.broadcast %714 : f32 to vector<2x16x128xf32>
    %721 = arith.mulf %720, %717 : vector<2x16x128xf32>
    %722 = vector.broadcast %715 : f32 to vector<2x16x128xf32>
    %723 = arith.mulf %722, %719 : vector<2x16x128xf32>
    %724 = arith.addf %721, %723 : vector<2x16x128xf32>
    %725 = arith.addf %713, %724 : vector<2x16x128xf32>
    %c44 = arith.constant 44 : index
    %726 = memref.load %arg1[%c44] : memref<98xf32, #tpu.memory_space<smem>>
    %c93 = arith.constant 93 : index
    %727 = memref.load %arg1[%c93] : memref<98xf32, #tpu.memory_space<smem>>
    %c2_554 = arith.constant 2 : index
    %c0_555 = arith.constant 0 : index
    %c11_556 = arith.constant 11 : index
    %c0_557 = arith.constant 0 : index
    %728 = vector.load %arg5[%c2_554, %c0_555, %c11_556, %c0_557] : memref<14x2x32x128xf32, #tpu.memory_space<vmem>>, vector<1x2x16x128xf32>
    %729 = vector.shape_cast %728 : vector<1x2x16x128xf32> to vector<2x16x128xf32>
    %c9_558 = arith.constant 9 : index
    %c0_559 = arith.constant 0 : index
    %c11_560 = arith.constant 11 : index
    %c0_561 = arith.constant 0 : index
    %730 = vector.load %arg5[%c9_558, %c0_559, %c11_560, %c0_561] : memref<14x2x32x128xf32, #tpu.memory_space<vmem>>, vector<1x2x16x128xf32>
    %731 = vector.shape_cast %730 : vector<1x2x16x128xf32> to vector<2x16x128xf32>
    %732 = vector.broadcast %726 : f32 to vector<2x16x128xf32>
    %733 = arith.mulf %732, %729 : vector<2x16x128xf32>
    %734 = vector.broadcast %727 : f32 to vector<2x16x128xf32>
    %735 = arith.mulf %734, %731 : vector<2x16x128xf32>
    %736 = arith.addf %733, %735 : vector<2x16x128xf32>
    %737 = arith.addf %725, %736 : vector<2x16x128xf32>
    %c45 = arith.constant 45 : index
    %738 = memref.load %arg1[%c45] : memref<98xf32, #tpu.memory_space<smem>>
    %c94 = arith.constant 94 : index
    %739 = memref.load %arg1[%c94] : memref<98xf32, #tpu.memory_space<smem>>
    %c3_562 = arith.constant 3 : index
    %c0_563 = arith.constant 0 : index
    %c11_564 = arith.constant 11 : index
    %c0_565 = arith.constant 0 : index
    %740 = vector.load %arg5[%c3_562, %c0_563, %c11_564, %c0_565] : memref<14x2x32x128xf32, #tpu.memory_space<vmem>>, vector<1x2x16x128xf32>
    %741 = vector.shape_cast %740 : vector<1x2x16x128xf32> to vector<2x16x128xf32>
    %c10_566 = arith.constant 10 : index
    %c0_567 = arith.constant 0 : index
    %c11_568 = arith.constant 11 : index
    %c0_569 = arith.constant 0 : index
    %742 = vector.load %arg5[%c10_566, %c0_567, %c11_568, %c0_569] : memref<14x2x32x128xf32, #tpu.memory_space<vmem>>, vector<1x2x16x128xf32>
    %743 = vector.shape_cast %742 : vector<1x2x16x128xf32> to vector<2x16x128xf32>
    %744 = vector.broadcast %738 : f32 to vector<2x16x128xf32>
    %745 = arith.mulf %744, %741 : vector<2x16x128xf32>
    %746 = vector.broadcast %739 : f32 to vector<2x16x128xf32>
    %747 = arith.mulf %746, %743 : vector<2x16x128xf32>
    %748 = arith.addf %745, %747 : vector<2x16x128xf32>
    %749 = arith.addf %737, %748 : vector<2x16x128xf32>
    %c46 = arith.constant 46 : index
    %750 = memref.load %arg1[%c46] : memref<98xf32, #tpu.memory_space<smem>>
    %c95 = arith.constant 95 : index
    %751 = memref.load %arg1[%c95] : memref<98xf32, #tpu.memory_space<smem>>
    %c4_570 = arith.constant 4 : index
    %c0_571 = arith.constant 0 : index
    %c11_572 = arith.constant 11 : index
    %c0_573 = arith.constant 0 : index
    %752 = vector.load %arg5[%c4_570, %c0_571, %c11_572, %c0_573] : memref<14x2x32x128xf32, #tpu.memory_space<vmem>>, vector<1x2x16x128xf32>
    %753 = vector.shape_cast %752 : vector<1x2x16x128xf32> to vector<2x16x128xf32>
    %c11_574 = arith.constant 11 : index
    %c0_575 = arith.constant 0 : index
    %c11_576 = arith.constant 11 : index
    %c0_577 = arith.constant 0 : index
    %754 = vector.load %arg5[%c11_574, %c0_575, %c11_576, %c0_577] : memref<14x2x32x128xf32, #tpu.memory_space<vmem>>, vector<1x2x16x128xf32>
    %755 = vector.shape_cast %754 : vector<1x2x16x128xf32> to vector<2x16x128xf32>
    %756 = vector.broadcast %750 : f32 to vector<2x16x128xf32>
    %757 = arith.mulf %756, %753 : vector<2x16x128xf32>
    %758 = vector.broadcast %751 : f32 to vector<2x16x128xf32>
    %759 = arith.mulf %758, %755 : vector<2x16x128xf32>
    %760 = arith.addf %757, %759 : vector<2x16x128xf32>
    %761 = arith.addf %749, %760 : vector<2x16x128xf32>
    %c47 = arith.constant 47 : index
    %762 = memref.load %arg1[%c47] : memref<98xf32, #tpu.memory_space<smem>>
    %c96 = arith.constant 96 : index
    %763 = memref.load %arg1[%c96] : memref<98xf32, #tpu.memory_space<smem>>
    %c5_578 = arith.constant 5 : index
    %c0_579 = arith.constant 0 : index
    %c11_580 = arith.constant 11 : index
    %c0_581 = arith.constant 0 : index
    %764 = vector.load %arg5[%c5_578, %c0_579, %c11_580, %c0_581] : memref<14x2x32x128xf32, #tpu.memory_space<vmem>>, vector<1x2x16x128xf32>
    %765 = vector.shape_cast %764 : vector<1x2x16x128xf32> to vector<2x16x128xf32>
    %c12_582 = arith.constant 12 : index
    %c0_583 = arith.constant 0 : index
    %c11_584 = arith.constant 11 : index
    %c0_585 = arith.constant 0 : index
    %766 = vector.load %arg5[%c12_582, %c0_583, %c11_584, %c0_585] : memref<14x2x32x128xf32, #tpu.memory_space<vmem>>, vector<1x2x16x128xf32>
    %767 = vector.shape_cast %766 : vector<1x2x16x128xf32> to vector<2x16x128xf32>
    %768 = vector.broadcast %762 : f32 to vector<2x16x128xf32>
    %769 = arith.mulf %768, %765 : vector<2x16x128xf32>
    %770 = vector.broadcast %763 : f32 to vector<2x16x128xf32>
    %771 = arith.mulf %770, %767 : vector<2x16x128xf32>
    %772 = arith.addf %769, %771 : vector<2x16x128xf32>
    %773 = arith.addf %761, %772 : vector<2x16x128xf32>
    %c48 = arith.constant 48 : index
    %774 = memref.load %arg1[%c48] : memref<98xf32, #tpu.memory_space<smem>>
    %c97 = arith.constant 97 : index
    %775 = memref.load %arg1[%c97] : memref<98xf32, #tpu.memory_space<smem>>
    %c6_586 = arith.constant 6 : index
    %c0_587 = arith.constant 0 : index
    %c11_588 = arith.constant 11 : index
    %c0_589 = arith.constant 0 : index
    %776 = vector.load %arg5[%c6_586, %c0_587, %c11_588, %c0_589] : memref<14x2x32x128xf32, #tpu.memory_space<vmem>>, vector<1x2x16x128xf32>
    %777 = vector.shape_cast %776 : vector<1x2x16x128xf32> to vector<2x16x128xf32>
    %c13_590 = arith.constant 13 : index
    %c0_591 = arith.constant 0 : index
    %c11_592 = arith.constant 11 : index
    %c0_593 = arith.constant 0 : index
    %778 = vector.load %arg5[%c13_590, %c0_591, %c11_592, %c0_593] : memref<14x2x32x128xf32, #tpu.memory_space<vmem>>, vector<1x2x16x128xf32>
    %779 = vector.shape_cast %778 : vector<1x2x16x128xf32> to vector<2x16x128xf32>
    %780 = vector.broadcast %774 : f32 to vector<2x16x128xf32>
    %781 = arith.mulf %780, %777 : vector<2x16x128xf32>
    %782 = vector.broadcast %775 : f32 to vector<2x16x128xf32>
    %783 = arith.mulf %782, %779 : vector<2x16x128xf32>
    %784 = arith.addf %781, %783 : vector<2x16x128xf32>
    %785 = arith.addf %773, %784 : vector<2x16x128xf32>
    %786 = vector.extract_strided_slice %785 {offsets = [0, 0, 0], sizes = [2, 1, 16], strides = [1, 1, 1]} : vector<2x16x128xf32> to vector<2x1x16xf32>
    %787 = vector.extract_strided_slice %785 {offsets = [0, 1, 0], sizes = [2, 1, 16], strides = [1, 1, 1]} : vector<2x16x128xf32> to vector<2x1x16xf32>
    %788 = vector.extract_strided_slice %785 {offsets = [0, 2, 0], sizes = [2, 1, 16], strides = [1, 1, 1]} : vector<2x16x128xf32> to vector<2x1x16xf32>
    %789 = vector.extract_strided_slice %785 {offsets = [0, 3, 0], sizes = [2, 1, 16], strides = [1, 1, 1]} : vector<2x16x128xf32> to vector<2x1x16xf32>
    %790 = vector.extract_strided_slice %785 {offsets = [0, 4, 0], sizes = [2, 1, 16], strides = [1, 1, 1]} : vector<2x16x128xf32> to vector<2x1x16xf32>
    %791 = vector.extract_strided_slice %785 {offsets = [0, 5, 0], sizes = [2, 1, 16], strides = [1, 1, 1]} : vector<2x16x128xf32> to vector<2x1x16xf32>
    %792 = vector.extract_strided_slice %785 {offsets = [0, 6, 0], sizes = [2, 1, 16], strides = [1, 1, 1]} : vector<2x16x128xf32> to vector<2x1x16xf32>
    %793 = vector.extract_strided_slice %785 {offsets = [0, 7, 0], sizes = [2, 1, 16], strides = [1, 1, 1]} : vector<2x16x128xf32> to vector<2x1x16xf32>
    %794 = vector.extract_strided_slice %785 {offsets = [0, 8, 0], sizes = [2, 1, 16], strides = [1, 1, 1]} : vector<2x16x128xf32> to vector<2x1x16xf32>
    %795 = vector.extract_strided_slice %785 {offsets = [0, 9, 0], sizes = [2, 1, 16], strides = [1, 1, 1]} : vector<2x16x128xf32> to vector<2x1x16xf32>
    %796 = vector.extract_strided_slice %785 {offsets = [0, 10, 0], sizes = [2, 1, 16], strides = [1, 1, 1]} : vector<2x16x128xf32> to vector<2x1x16xf32>
    %797 = vector.extract_strided_slice %785 {offsets = [0, 11, 0], sizes = [2, 1, 16], strides = [1, 1, 1]} : vector<2x16x128xf32> to vector<2x1x16xf32>
    %798 = vector.extract_strided_slice %785 {offsets = [0, 12, 0], sizes = [2, 1, 16], strides = [1, 1, 1]} : vector<2x16x128xf32> to vector<2x1x16xf32>
    %799 = vector.extract_strided_slice %785 {offsets = [0, 13, 0], sizes = [2, 1, 16], strides = [1, 1, 1]} : vector<2x16x128xf32> to vector<2x1x16xf32>
    %800 = vector.extract_strided_slice %785 {offsets = [0, 14, 0], sizes = [2, 1, 16], strides = [1, 1, 1]} : vector<2x16x128xf32> to vector<2x1x16xf32>
    %801 = vector.extract_strided_slice %785 {offsets = [0, 15, 0], sizes = [2, 1, 16], strides = [1, 1, 1]} : vector<2x16x128xf32> to vector<2x1x16xf32>
    %802 = tpu.concatenate %786, %787, %788, %789, %790, %791, %792, %793, %794, %795, %796, %797, %798, %799, %800, %801 in 2 : vector<2x1x16xf32>, vector<2x1x16xf32>, vector<2x1x16xf32>, vector<2x1x16xf32>, vector<2x1x16xf32>, vector<2x1x16xf32>, vector<2x1x16xf32>, vector<2x1x16xf32>, vector<2x1x16xf32>, vector<2x1x16xf32>, vector<2x1x16xf32>, vector<2x1x16xf32>, vector<2x1x16xf32>, vector<2x1x16xf32>, vector<2x1x16xf32>, vector<2x1x16xf32> -> vector<2x1x256xf32>
    %803 = arith.negf %802 : vector<2x1x256xf32>
    %804 = math.exp %803 : vector<2x1x256xf32>
    %cst_594 = arith.constant 1.000000e+00 : f32
    %805 = vector.broadcast %cst_594 : f32 to vector<2x1x256xf32>
    %806 = arith.addf %805, %804 : vector<2x1x256xf32>
    %807 = arith.divf %805, %806 : vector<2x1x256xf32>
    %c0_595 = arith.constant 0 : index
    %c0_596 = arith.constant 0 : index
    %c0_597 = arith.constant 0 : index
    %808 = vector.load %arg2[%c0_595, %c0_596, %c0_597] : memref<2x4x256xf32, #tpu.memory_space<vmem>>, vector<2x4x256xf32>
    %809 = vector.broadcast %807 : vector<2x1x256xf32> to vector<2x4x256xf32>
    %810 = arith.mulf %808, %809 : vector<2x4x256xf32>
    %c0_598 = arith.constant 0 : index
    %c0_599 = arith.constant 0 : index
    %c0_600 = arith.constant 0 : index
    %811 = vector.load %arg3[%c0_598, %c0_599, %c0_600] : memref<2x4x256xf32, #tpu.memory_space<vmem>>, vector<2x4x256xf32>
    tpu.vector_store %arg3[%c0_598, %c0_599, %c0_600], %810 {strides = array<i32>} : memref<2x4x256xf32, #tpu.memory_space<vmem>>, vector<2x4x256xf32>,
    return
  }
  func.func @transform_0(%arg0: i32) -> i32 {
    %c0_i32 = arith.constant 0 : i32
    %c0_i32_0 = arith.constant 0 : i32
    return %c0_i32 : i32
  }
  func.func @transform_1(%arg0: i32) -> (i32, i32, i32) {
    %c0_i32 = arith.constant 0 : i32
    %c0_i32_0 = arith.constant 0 : i32
    %c0_i32_1 = arith.constant 0 : i32
    return %arg0, %c0_i32, %c0_i32_0 : i32, i32, i32
  }
  func.func @transform_2(%arg0: i32) -> (i32, i32, i32) {
    %c0_i32 = arith.constant 0 : i32
    %c0_i32_0 = arith.constant 0 : i32
    %c0_i32_1 = arith.constant 0 : i32
    return %arg0, %c0_i32, %c0_i32_0 : i32, i32, i32
  }
}

</mosaic_0001>

<bundles_post_ra>
// kernel: spatial_attention.1
= control target key start
LH: loop header
LB: loop body
LE: loop exit
PB: predicated region body
PF: predicated region fallthrough
CT: control target
= control target key end

     0   :  { %7 = vsyncpa [#allocation5], 0  ;;  %s3368_s12 = smov [#allocation4]   ;;  %s5889_s0 = inlined_call_operand.vmem [shape: f32[98], index: 0, kind: input, shape index: {}]   ;;  %s5890_s1 = inlined_call_operand.vmem [shape: f32[2,4,256], index: 1, kind: input, shape index: {}]   ;;  %s5891_s2 = inlined_call_operand.vmem [shape: f32[2,4,256], index: 2, kind: output, shape index: {}]  }
   0x1   :  { %s13_s11 = sshll.u32 %s5889_s0, 4  ;;  %s14_s11 = int_to_ptr.vmem [resolvable:$true] %s13_s11 }
   0x2   :  { %16 = dma.vmem_to_smem %s14_s11, 16, %s3368_s12, [#allocation5]  }
   0x3   :  { %3366 = dma.done.wait [#allocation5], 16  }
   0x4   :  { %3367 = vsyncadd [#allocation5], 4294967280 }
   0x5   :  { %23 = sfence }
   0x6   :  { %v24_v0 = vld [vmem:[%s5890_s1] sm:$0xff]  ;;  %v25_v1 = vld [vmem:[%s5890_s1 + $0x8] sm:$0xff]  ;;  %v3369_v2 = vmov 4.0   ;;  %vm39_vm0 = vcmask 1043456   ;;  %s3370_s0 = smov 112   ;;  %s3371_s17 = smov 96  }
   0x7   :  { %28 = vst [vmem:[#allocation1] ss:$2 sm:$0xff] %v24_v0  ;;  %3312 = vrcp.f32 %v3369_v2  ;;  %s3372_s18 = smov 80   ;;  %s3373_s19 = smov 64   ;;  %vm166_vm2 = vcmask 122880   ;;  %vm480_vm3 = vcmask 23552  }
   0x8   :  { %32 = vst [vmem:[#allocation1 + $0x10] ss:$2 sm:$0xff] %v25_v1  ;;  %s3374_s20 = smov 48   ;;  %s3375_s21 = smov 32   ;;  %vm537_vm4 = vcmask 15360   ;;  %vm595_vm5 = vcmask 7168  }
   0x9   :  { %s3376_s22 = smov 16   ;;  %s3378_s23 = smov 3   ;;  %vm670_vm6 = vcmask 1039360   ;;  %vm728_vm7 = vcmask 1031168   ;;  %vm786_vm8 = vcmask 1022976   ;;  %vm2699_vm9 = vcmask 130048  }
   0xa   :  { %s3379_s24 = smov 2   ;;  %s3380_s25 = smov 1   ;;  %vm2702_vm10 = vcmask 261120   ;;  %vm2705_vm11 = vcmask 392192   ;;  %vm2708_vm12 = vcmask 523264   ;;  %vm2711_vm13 = vcmask 654336  }
   0xb   :  { %s3381_s26 = smov 127   ;;  %s3382_s27 = smov 126   ;;  %vm2714_vm14 = vcmask 785408   ;;  %vm2717_vm15 = vcmask 916480  }
   0xc   :  { %s3383_s28 = smov 125   ;;  %s2882_s29 = sld [smem:[#allocation4 + $0x18]] }
   0xd   :  { %v3313_v3 = vpop.eup %3312  ;;  %s2883_s30 = sld [smem:[#allocation4 + $0x49]] }
   0xe   :  { %v29_v4 = vld.sshfl [vmem:[#allocation1] sm:$0xff pattern:$0x75316420]  ;;  %v30_v5 = vld.sshfl [vmem:[#allocation1 + $0x8] sm:$0xff pattern:$0x75316420]  ;;  %vm73_vm1 = vweird.f32 %v3313_v3 }
   0xf   :  { %v40_v6 = vsel %vm39_vm0, %v29_v4, 0.0  ;;  %v69_v7 = vmul.f32 4.0, %v3313_v3  ;;  %79 = vst [vmem:[#allocation1] ss:$2 sm:$0xff] %v24_v0  ;;  %v47_v45 = vsel %vm39_vm0, %v30_v5, 0.0  ;;  %s3908_s3 = sld [smem:[#allocation4 + $0x34]] }
  0x10   :  { %v41_v8 = vrot.slane %v40_v6, 4  ;;  %v33_v9 = vld.sshfl [vmem:[#allocation1 + $0x10] sm:$0xff pattern:$0x75316420]  ;;  %v48_v46 = vrot.slane %v47_v45, 4  ;;  %s2840_s4 = sld [smem:[#allocation4 + $0x3]] }
  0x11   :  { %v70_v10 = vsub.f32 1.0, %v69_v7  ;;  %v3409_v11 = vld.sshfl [vmem:[#allocation1 + $0x18] sm:$0xff pattern:$0x75316420]  ;;  %v54_v12 = vsel %vm39_vm0, %v33_v9, 0.0  ;;  %s3916_s5 = sld [smem:[#allocation4 + $0xa]] }
  0x12   :  { %v42_v13 = vadd.f32 %v41_v8, %v40_v6  ;;  %v55_v14 = vrot.slane %v54_v12, 4  ;;  %83 = vst [vmem:[#allocation1 + $0x10] ss:$2 sm:$0xff] %v25_v1  ;;  %v49_v47 = vadd.f32 %v48_v46, %v47_v45  ;;  %v61_v51 = vsel %vm39_vm0, %v3409_v11, 0.0  ;;  %s3918_s6 = sld [smem:[#allocation4 + $0x11]] }
  0x13   :  { %v71_v15 = vmul.f32 %v3313_v3, %v70_v10  ;;  %v62_v53 = vrot.slane %v61_v51, 4  ;;  %s3920_s7 = sld [smem:[#allocation4 + $0x3b]] }
  0x14   :  { %v43_v16 = vrot.slane %v42_v13, 2  ;;  %v56_v17 = vadd.f32 %v55_v14, %v54_v12  ;;  %v50_v48 = vrot.slane %v49_v47, 2  ;;  %v5892_v12 = vmov 0.0   ;;  %s3923_s8 = sld [smem:[#allocation4 + $0x42]] }
  0x15   :  { %v72_v18 = vadd.f32 %v3313_v3, %v71_v15  ;;  %v63_v55 = vadd.f32 %v62_v53, %v61_v51  ;;  %122 = vst [vmem:[#allocation2 + $0x20] sm:$0xff] %v5892_v12  ;;  %s3929_s9 = sld [smem:[#allocation4 + $0x1f]] }
  0x16   :  { %v44_v19 = vadd.f32 %v43_v16, %v42_v13  ;;  %v80_v20 = vld.sshfl [vmem:[#allocation1] sm:$0xff pattern:$0x75316420]  ;;  %v57_v21 = vrot.slane %v56_v17, 2  ;;  %v51_v49 = vadd.f32 %v50_v48, %v49_v47  ;;  %118 = vst [vmem:[#allocation2] sm:$0xff] %v5892_v12  ;;  %s3931_s10 = sld [smem:[#allocation4 + $0x26]] }
  0x17   :  { %v90_v22 = vsel %vm39_vm0, %v80_v20, -inf  ;;  %v3413_v26 = vsel %vm73_vm1, %v3313_v3, %v72_v18  ;;  %v64_v56 = vrot.slane %v63_v55, 2  ;;  %v81_v58 = vld.sshfl [vmem:[#allocation1 + $0x8] sm:$0xff pattern:$0x75316420]  ;;  %125 = vst [vmem:[#allocation2 + $0x38] sm:$0xff] %v5892_v12 }
  0x18   :  { %v45_v23 = vrot.slane %v44_v19, 1  ;;  %v91_v24 = vrot.slane %v90_v22, 4  ;;  %v58_v25 = vadd.f32 %v57_v21, %v56_v17  ;;  %v52_v50 = vrot.slane %v51_v49, 1  ;;  %134 = vst [vmem:[#allocation2 + $0x80] sm:$0xff] %v5892_v12  ;;  %s3935_s11 = sld [smem:[#allocation4 + $0x2d]] }
  0x19   :  { %v84_v27 = vld.sshfl [vmem:[#allocation1 + $0x10] sm:$0xff pattern:$0x75316420]  ;;  %v65_v57 = vadd.f32 %v64_v56, %v63_v55  ;;  %v97_v61 = vsel %vm39_vm0, %v81_v58, -inf  ;;  %137 = vst [vmem:[#allocation2 + $0x98] sm:$0xff] %v5892_v12  ;;  %s3943_s12 = sld [smem:[#allocation4 + $0x50]] }
  0x1a   :  { %v46_v28 = vadd.f32 %v45_v23, %v44_v19  ;;  %v92_v29 = vmax.f32 %v90_v22, %v91_v24  ;;  %v59_v30 = vrot.slane %v58_v25, 1  ;;  %v104_v31 = vsel %vm39_vm0, %v84_v27, -inf  ;;  %v85_v0 = vld.sshfl [vmem:[#allocation1 + $0x18] sm:$0xff pattern:$0x75316420]  ;;  %146 = vst [vmem:[#allocation2 + $0xe0] sm:$0xff] %v5892_v12 }
  0x1b   :  { %v105_v32 = vrot.slane %v104_v31, 4  ;;  %v53_v52 = vadd.f32 %v52_v50, %v51_v49  ;;  %v66_v59 = vrot.slane %v65_v57, 1  ;;  %v98_v63 = vrot.slane %v97_v61, 4  ;;  %149 = vst [vmem:[#allocation2 + $0xf8] sm:$0xff] %v5892_v12  ;;  %s3949_s13 = sld [smem:[#allocation4 + $0x57]] }
  0x1c   :  { %v3417_v33 = vmul.f32 %v3413_v26, %v46_v28  ;;  %v93_v34 = vrot.slane %v92_v29, 2  ;;  %v60_v37 = vadd.f32 %v59_v30, %v58_v25  ;;  %v111_v1 = vsel %vm39_vm0, %v85_v0, -inf  ;;  %158 = vst [vmem:[#allocation2 + $0x140] sm:$0xff] %v5892_v12  ;;  %s3959_s14 = sld [smem:[#allocation4 + $0x5e]] }
  0x1d   :  { %v106_v35 = vmax.f32 %v104_v31, %v105_v32  ;;  %v3464_v54 = vmul.f32 %v3413_v26, %v53_v52  ;;  %v67_v60 = vadd.f32 %v66_v59, %v65_v57  ;;  %v99_v2 = vmax.f32 %v97_v61, %v98_v63  ;;  %161 = vst [vmem:[#allocation2 + $0x158] sm:$0xff] %v5892_v12  ;;  %s3961_s15 = sld [smem:[#allocation4]] }
  0x1e   :  { %174 = vrot.lane.b32.xlu0 %v3417_v33, %s3370_s0  ;;  %v94_v36 = vmax.f32 %v92_v29, %v93_v34  ;;  %192 = vrot.lane.b32.xlu2 %v3417_v33, %s3371_s17  ;;  %v3426_v42 = vmul.f32 %v3413_v26, %v60_v37  ;;  %v112_v3 = vrot.slane %v111_v1, 4  ;;  %167 = vst.msk [vmem:[#allocation2 + $0x20] sm:$0x1] %vm166_vm2, %v3417_v33  ;;  %s3969_s16 = sld [smem:[#allocation4 + $0x7]] }
  0x1f   :  { %v107_v38 = vrot.slane %v106_v35, 2  ;;  %v3476_v62 = vmul.f32 %v3413_v26, %v67_v60  ;;  %v100_v4 = vrot.slane %v99_v2, 2  ;;  %288 = vst.msk [vmem:[#allocation2 + $0x38] sm:$0x1] %vm166_vm2, %v3464_v54 }
  0x20   :  { %v95_v39 = vrot.slane %v94_v36, 1  ;;  %v113_v5 = vmax.f32 %v111_v1, %v112_v3  ;;  %168 = vst.msk [vmem:[#allocation2 + $0x80] sm:$0x1] %vm166_vm2, %v3426_v42 }
  0x21   :  { %v108_v40 = vmax.f32 %v106_v35, %v107_v38  ;;  %v101_v6 = vmax.f32 %v99_v2, %v100_v4  ;;  %289 = vst.msk [vmem:[#allocation2 + $0x98] sm:$0x1] %vm166_vm2, %v3476_v62 }
  0x22   :  { %v3423_v41 = vmax.f32 %v94_v36, %v95_v39  ;;  %v114_v7 = vrot.slane %v113_v5, 2  ;;  %625 = vst [vmem:[#allocation3 + $0xd8] sm:$0xff] %v5892_v12 }
  0x23   :  { %v109_v43 = vrot.slane %v108_v40, 1  ;;  %v102_v8 = vrot.slane %v101_v6, 1  ;;  %622 = vst [vmem:[#allocation3 + $0xc0] sm:$0xff] %v5892_v12 }
  0x24   :  { %184 = vrot.lane.b32.xlu1 %v3423_v41, %s3370_s0  ;;  %v115_v9 = vmax.f32 %v113_v5, %v114_v7  ;;  %170 = vst.msk [vmem:[#allocation2 + $0xe0] sm:$0x1] %vm166_vm2, %v3423_v41 }
  0x25   :  { %v3434_v44 = vmax.f32 %v108_v40, %v109_v43  ;;  %v3495_v10 = vmax.f32 %v101_v6, %v102_v8  ;;  %626 = vst [vmem:[#allocation3 + $0xe0] sm:$0xff] %v5892_v12 }
  0x26   :  { %176 = vrot.lane.b32.xlu0 %v3426_v42, %s3370_s0  ;;  %194 = vrot.lane.b32.xlu2 %v3426_v42, %s3371_s17  ;;  %v116_v11 = vrot.slane %v115_v9, 1  ;;  %629 = vst [vmem:[#allocation3 + $0xf8] sm:$0xff] %v5892_v12 }
  0x27   :  { %171 = vst.msk [vmem:[#allocation2 + $0x140] sm:$0x1] %vm166_vm2, %v3434_v44 }
  0x28   :  { %v3507_v13 = vmax.f32 %v115_v9, %v116_v11  ;;  %290 = vst.msk [vmem:[#allocation2 + $0xf8] sm:$0x1] %vm166_vm2, %v3495_v10 }
  0x29   :  { %1027 = vst [vmem:[#allocation3 + $0x298] sm:$0xff] %v5892_v12 }
  0x2a   :  { %291 = vst.msk [vmem:[#allocation2 + $0x158] sm:$0x1] %vm166_vm2, %v3507_v13 }
  0x2b   :  { %1028 = vst [vmem:[#allocation3 + $0x2a0] sm:$0xff] %v5892_v12 }
  0x2c   :  { %186 = vrot.lane.b32.xlu1 %v3434_v44, %s3370_s0  ;;  %1024 = vst [vmem:[#allocation3 + $0x280] sm:$0xff] %v5892_v12 }
  0x2d   :  { %1031 = vst [vmem:[#allocation3 + $0x2b8] sm:$0xff] %v5892_v12 }
  0x2e   :  { %210 = vrot.lane.b32.xlu0 %v3426_v42, %s3372_s18  ;;  %208 = vrot.lane.b32.xlu2 %v3417_v33, %s3372_s18 }
  0x34   :  { %202 = vrot.lane.b32.xlu1 %v3434_v44, %s3371_s17 }
  0x36   :  { %200 = vrot.lane.b32.xlu0 %v3423_v41, %s3371_s17  ;;  %218 = vrot.lane.b32.xlu2 %v3434_v44, %s3372_s18 }
  0x3c   :  { %216 = vrot.lane.b32.xlu1 %v3423_v41, %s3372_s18 }
  0x3e   :  { %224 = vrot.lane.b32.xlu0 %v3417_v33, %s3373_s19  ;;  %232 = vrot.lane.b32.xlu2 %v3423_v41, %s3373_s19 }
  0x44   :  { %226 = vrot.lane.b32.xlu1 %v3426_v42, %s3373_s19 }
  0x46   :  { %234 = vrot.lane.b32.xlu0 %v3434_v44, %s3373_s19  ;;  %242 = vrot.lane.b32.xlu2 %v3426_v42, %s3374_s20 }
  0x4c   :  { %240 = vrot.lane.b32.xlu1 %v3417_v33, %s3374_s20 }
  0x4e   :  { %248 = vrot.lane.b32.xlu0 %v3423_v41, %s3374_s20  ;;  %256 = vrot.lane.b32.xlu2 %v3417_v33, %s3375_s21 }
  0x54   :  { %250 = vrot.lane.b32.xlu1 %v3434_v44, %s3374_s20 }
  0x56   :  { %258 = vrot.lane.b32.xlu0 %v3426_v42, %s3375_s21  ;;  %266 = vrot.lane.b32.xlu2 %v3434_v44, %s3375_s21 }
  0x5c   :  { %264 = vrot.lane.b32.xlu1 %v3423_v41, %s3375_s21 }
  0x5e   :  { %272 = vrot.lane.b32.xlu0 %v3417_v33, %s3376_s22  ;;  %280 = vrot.lane.b32.xlu2 %v3423_v41, %s3376_s22 }
  0x64   :  { %274 = vrot.lane.b32.xlu1 %v3426_v42, %s3376_s22 }
  0x66   :  { %282 = vrot.lane.b32.xlu0 %v3434_v44, %s3376_s22  ;;  %296 = vrot.lane.b32.xlu2 %v3476_v62, %s3370_s0 }
  0x6c   :  { %294 = vrot.lane.b32.xlu1 %v3464_v54, %s3370_s0 }
  0x6e   :  { %304 = vrot.lane.b32.xlu0 %v3495_v10, %s3370_s0  ;;  %312 = vrot.lane.b32.xlu2 %v3464_v54, %s3371_s17 }
  0x74   :  { %306 = vrot.lane.b32.xlu1 %v3507_v13, %s3370_s0 }
  0x76   :  { %314 = vrot.lane.b32.xlu0 %v3476_v62, %s3371_s17  ;;  %322 = vrot.lane.b32.xlu2 %v3507_v13, %s3371_s17 }
  0x78   :  { %v193_v14 = vpop.permute.xlu2 %192 }
  0x79   :  { %198 = vst.msk [vmem:[#allocation2 + $0x22] sm:$0x1] %vm166_vm2, %v193_v14 }
  0x7c   :  { %320 = vrot.lane.b32.xlu1 %v3495_v10, %s3371_s17 }
  0x7e   :  { %328 = vrot.lane.b32.xlu0 %v3464_v54, %s3372_s18  ;;  %336 = vrot.lane.b32.xlu2 %v3495_v10, %s3372_s18 }
  0x80   :  { %v195_v15 = vpop.permute.xlu2 %194 }
  0x81   :  { %199 = vst.msk [vmem:[#allocation2 + $0x82] sm:$0x1] %vm166_vm2, %v195_v15 }
  0x84   :  { %330 = vrot.lane.b32.xlu1 %v3476_v62, %s3372_s18 }
  0x86   :  { %338 = vrot.lane.b32.xlu0 %v3507_v13, %s3372_s18  ;;  %346 = vrot.lane.b32.xlu2 %v3476_v62, %s3373_s19 }
  0x88   :  { %v209_v16 = vpop.permute.xlu2 %208 }
  0x89   :  { %214 = vst.msk [vmem:[#allocation2 + $0x23] sm:$0x1] %vm166_vm2, %v209_v16 }
  0x8c   :  { %344 = vrot.lane.b32.xlu1 %v3464_v54, %s3373_s19 }
  0x8e   :  { %352 = vrot.lane.b32.xlu0 %v3495_v10, %s3373_s19  ;;  %360 = vrot.lane.b32.xlu2 %v3464_v54, %s3374_s20 }
  0x90   :  { %v175_v17 = vpop.permute.xlu0 %174  ;;  %v219_v19 = vpop.permute.xlu2 %218 }
  0x91   :  { %180 = vst.msk [vmem:[#allocation2 + $0x21] sm:$0x1] %vm166_vm2, %v175_v17 }
  0x92   :  { %223 = vst.msk [vmem:[#allocation2 + $0x143] sm:$0x1] %vm166_vm2, %v219_v19 }
  0x94   :  { %354 = vrot.lane.b32.xlu1 %v3507_v13, %s3373_s19 }
  0x96   :  { %v185_v18 = vpop.permute.xlu1 %184  ;;  %362 = vrot.lane.b32.xlu0 %v3476_v62, %s3374_s20  ;;  %370 = vrot.lane.b32.xlu2 %v3507_v13, %s3374_s20 }
  0x97   :  { %190 = vst.msk [vmem:[#allocation2 + $0xe1] sm:$0x1] %vm166_vm2, %v185_v18 }
  0x98   :  { %v177_v20 = vpop.permute.xlu0 %176  ;;  %v233_v22 = vpop.permute.xlu2 %232 }
  0x99   :  { %181 = vst.msk [vmem:[#allocation2 + $0x81] sm:$0x1] %vm166_vm2, %v177_v20 }
  0x9a   :  { %238 = vst.msk [vmem:[#allocation2 + $0xe4] sm:$0x1] %vm166_vm2, %v233_v22 }
  0x9c   :  { %368 = vrot.lane.b32.xlu1 %v3495_v10, %s3374_s20 }
  0x9e   :  { %v187_v21 = vpop.permute.xlu1 %186  ;;  %376 = vrot.lane.b32.xlu0 %v3464_v54, %s3375_s21  ;;  %384 = vrot.lane.b32.xlu2 %v3495_v10, %s3375_s21 }
  0x9f   :  { %191 = vst.msk [vmem:[#allocation2 + $0x141] sm:$0x1] %vm166_vm2, %v187_v21 }
  0xa0   :  { %v211_v23 = vpop.permute.xlu0 %210  ;;  %v243_v25 = vpop.permute.xlu2 %242 }
  0xa1   :  { %215 = vst.msk [vmem:[#allocation2 + $0x83] sm:$0x1] %vm166_vm2, %v211_v23 }
  0xa2   :  { %247 = vst.msk [vmem:[#allocation2 + $0x85] sm:$0x1] %vm166_vm2, %v243_v25 }
  0xa4   :  { %378 = vrot.lane.b32.xlu1 %v3476_v62, %s3375_s21 }
  0xa6   :  { %v203_v24 = vpop.permute.xlu1 %202  ;;  %386 = vrot.lane.b32.xlu0 %v3507_v13, %s3375_s21  ;;  %394 = vrot.lane.b32.xlu2 %v3476_v62, %s3376_s22 }
  0xa7   :  { %207 = vst.msk [vmem:[#allocation2 + $0x142] sm:$0x1] %vm166_vm2, %v203_v24 }
  0xa8   :  { %v201_v26 = vpop.permute.xlu0 %200  ;;  %v257_v28 = vpop.permute.xlu2 %256 }
  0xa9   :  { %206 = vst.msk [vmem:[#allocation2 + $0xe2] sm:$0x1] %vm166_vm2, %v201_v26 }
  0xaa   :  { %262 = vst.msk [vmem:[#allocation2 + $0x26] sm:$0x1] %vm166_vm2, %v257_v28 }
  0xac   :  { %392 = vrot.lane.b32.xlu1 %v3464_v54, %s3376_s22 }
  0xae   :  { %v217_v27 = vpop.permute.xlu1 %216  ;;  %400 = vrot.lane.b32.xlu0 %v3495_v10, %s3376_s22  ;;  %2953 = vrot.lane.b32.xlu2 %v5892_v12, %s3378_s23 }
  0xaf   :  { %222 = vst.msk [vmem:[#allocation2 + $0xe3] sm:$0x1] %vm166_vm2, %v217_v27 }
  0xb0   :  { %v225_v29 = vpop.permute.xlu0 %224  ;;  %v267_v31 = vpop.permute.xlu2 %266 }
  0xb1   :  { %230 = vst.msk [vmem:[#allocation2 + $0x24] sm:$0x1] %vm166_vm2, %v225_v29 }
  0xb2   :  { %271 = vst.msk [vmem:[#allocation2 + $0x146] sm:$0x1] %vm166_vm2, %v267_v31 }
  0xb4   :  { %402 = vrot.lane.b32.xlu1 %v3507_v13, %s3376_s22 }
  0xb6   :  { %v227_v30 = vpop.permute.xlu1 %226  ;;  %2958 = vrot.lane.b32.xlu0 %v5892_v12, %s3378_s23 }
  0xb7   :  { %231 = vst.msk [vmem:[#allocation2 + $0x84] sm:$0x1] %vm166_vm2, %v227_v30 }
  0xb8   :  { %v235_v32 = vpop.permute.xlu0 %234  ;;  %v281_v34 = vpop.permute.xlu2 %280 }
  0xb9   :  { %239 = vst.msk [vmem:[#allocation2 + $0x144] sm:$0x1] %vm166_vm2, %v235_v32 }
  0xba   :  { %286 = vst.msk [vmem:[#allocation2 + $0xe7] sm:$0x1] %vm166_vm2, %v281_v34 }
  0xbe   :  { %v241_v33 = vpop.permute.xlu1 %240  ;;  %2963 = vrot.lane.b32.xlu0 %v5892_v12, %s3378_s23 }
  0xbf   :  { %246 = vst.msk [vmem:[#allocation2 + $0x25] sm:$0x1] %vm166_vm2, %v241_v33 }
  0xc0   :  { %v249_v35 = vpop.permute.xlu0 %248  ;;  %v297_v37 = vpop.permute.xlu2 %296 }
  0xc1   :  { %254 = vst.msk [vmem:[#allocation2 + $0xe5] sm:$0x1] %vm166_vm2, %v249_v35 }
  0xc2   :  { %301 = vst.msk [vmem:[#allocation2 + $0x99] sm:$0x1] %vm166_vm2, %v297_v37 }
  0xc6   :  { %v251_v36 = vpop.permute.xlu1 %250 }
  0xc7   :  { %255 = vst.msk [vmem:[#allocation2 + $0x145] sm:$0x1] %vm166_vm2, %v251_v36 }
  0xc8   :  { %v259_v38 = vpop.permute.xlu0 %258  ;;  %v313_v40 = vpop.permute.xlu2 %312 }
  0xc9   :  { %263 = vst.msk [vmem:[#allocation2 + $0x86] sm:$0x1] %vm166_vm2, %v259_v38 }
  0xca   :  { %318 = vst.msk [vmem:[#allocation2 + $0x3a] sm:$0x1] %vm166_vm2, %v313_v40 }
  0xce   :  { %v265_v39 = vpop.permute.xlu1 %264 }
  0xcf   :  { %270 = vst.msk [vmem:[#allocation2 + $0xe6] sm:$0x1] %vm166_vm2, %v265_v39 }
  0xd0   :  { %v273_v41 = vpop.permute.xlu0 %272  ;;  %v323_v43 = vpop.permute.xlu2 %322 }
  0xd1   :  { %278 = vst.msk [vmem:[#allocation2 + $0x27] sm:$0x1] %vm166_vm2, %v273_v41 }
  0xd2   :  { %327 = vst.msk [vmem:[#allocation2 + $0x15a] sm:$0x1] %vm166_vm2, %v323_v43 }
  0xd6   :  { %v275_v42 = vpop.permute.xlu1 %274  ;;  %v3624_v46 = vld [vmem:[#allocation2 + $0xe0] sm:$0xff] }
  0xd7   :  { %279 = vst.msk [vmem:[#allocation2 + $0x87] sm:$0x1] %vm166_vm2, %v275_v42 }
  0xd8   :  { %v283_v44 = vpop.permute.xlu0 %282  ;;  %v3621_v45 = vld [vmem:[#allocation2 + $0x20] sm:$0xff]  ;;  %1025 = vst [vmem:[#allocation3 + $0x288] sm:$0xff] %v3624_v46  ;;  %v337_v49 = vpop.permute.xlu2 %336 }
  0xd9   :  { %287 = vst.msk [vmem:[#allocation2 + $0x147] sm:$0x1] %vm166_vm2, %v283_v44  ;;  %454 = vrot.lane.b32.xlu1 %v3621_v45, %s3378_s23 }
  0xda   :  { %623 = vst [vmem:[#allocation3 + $0xc8] sm:$0xff] %v3621_v45 }
  0xdb   :  { %342 = vst.msk [vmem:[#allocation2 + $0xfb] sm:$0x1] %vm166_vm2, %v337_v49 }
  0xde   :  { %v295_v47 = vpop.permute.xlu1 %294  ;;  %v3631_v48 = vld [vmem:[#allocation2 + $0x80] sm:$0xff] }
  0xdf   :  { %300 = vst.msk [vmem:[#allocation2 + $0x39] sm:$0x1] %vm166_vm2, %v295_v47  ;;  %470 = vrot.lane.b32.xlu0 %v3631_v48, %s3378_s23 }
  0xe0   :  { %627 = vst [vmem:[#allocation3 + $0xe8] sm:$0xff] %v3631_v48  ;;  %v305_v50 = vpop.permute.xlu0 %304  ;;  %v3637_v51 = vld [vmem:[#allocation2 + $0x140] sm:$0xff]  ;;  %v347_v53 = vpop.permute.xlu2 %346 }
  0xe1   :  { %310 = vst.msk [vmem:[#allocation2 + $0xf9] sm:$0x1] %vm166_vm2, %v305_v50  ;;  %2968 = vrot.lane.b32.xlu1 %v5892_v12, %s3378_s23 }
  0xe2   :  { %1029 = vst [vmem:[#allocation3 + $0x2a8] sm:$0xff] %v3637_v51 }
  0xe3   :  { %351 = vst.msk [vmem:[#allocation2 + $0x9c] sm:$0x1] %vm166_vm2, %v347_v53 }
  0xe6   :  { %v307_v52 = vpop.permute.xlu1 %306 }
  0xe7   :  { %311 = vst.msk [vmem:[#allocation2 + $0x159] sm:$0x1] %vm166_vm2, %v307_v52  ;;  %2983 = vrot.lane.b32.xlu0 %v5892_v12, %s3379_s24 }
  0xe8   :  { %v315_v54 = vpop.permute.xlu0 %314  ;;  %v361_v56 = vpop.permute.xlu2 %360 }
  0xe9   :  { %319 = vst.msk [vmem:[#allocation2 + $0x9a] sm:$0x1] %vm166_vm2, %v315_v54 }
  0xea   :  { %366 = vst.msk [vmem:[#allocation2 + $0x3d] sm:$0x1] %vm166_vm2, %v361_v56 }
  0xee   :  { %v321_v55 = vpop.permute.xlu1 %320 }
  0xef   :  { %326 = vst.msk [vmem:[#allocation2 + $0xfa] sm:$0x1] %vm166_vm2, %v321_v55 }
  0xf0   :  { %v329_v57 = vpop.permute.xlu0 %328  ;;  %v371_v59 = vpop.permute.xlu2 %370 }
  0xf1   :  { %334 = vst.msk [vmem:[#allocation2 + $0x3b] sm:$0x1] %vm166_vm2, %v329_v57 }
  0xf2   :  { %375 = vst.msk [vmem:[#allocation2 + $0x15d] sm:$0x1] %vm166_vm2, %v371_v59 }
  0xf6   :  { %v331_v58 = vpop.permute.xlu1 %330 }
  0xf7   :  { %335 = vst.msk [vmem:[#allocation2 + $0x9b] sm:$0x1] %vm166_vm2, %v331_v58 }
  0xf8   :  { %v339_v60 = vpop.permute.xlu0 %338  ;;  %v385_v62 = vpop.permute.xlu2 %384 }
  0xf9   :  { %343 = vst.msk [vmem:[#allocation2 + $0x15b] sm:$0x1] %vm166_vm2, %v339_v60 }
  0xfa   :  { %390 = vst.msk [vmem:[#allocation2 + $0xfe] sm:$0x1] %vm166_vm2, %v385_v62 }
  0xfe   :  { %v345_v61 = vpop.permute.xlu1 %344 }
  0xff   :  { %350 = vst.msk [vmem:[#allocation2 + $0x3c] sm:$0x1] %vm166_vm2, %v345_v61 }
 0x100   :  { %v353_v63 = vpop.permute.xlu0 %352  ;;  %v395_v1 = vpop.permute.xlu2 %394 }
 0x101   :  { %358 = vst.msk [vmem:[#allocation2 + $0xfc] sm:$0x1] %vm166_vm2, %v353_v63 }
 0x102   :  { %399 = vst.msk [vmem:[#allocation2 + $0x9f] sm:$0x1] %vm166_vm2, %v395_v1 }
 0x106   :  { %v355_v0 = vpop.permute.xlu1 %354 }
 0x107   :  { %359 = vst.msk [vmem:[#allocation2 + $0x15c] sm:$0x1] %vm166_vm2, %v355_v0 }
 0x108   :  { %v363_v2 = vpop.permute.xlu0 %362  ;;  %v2954_v14 = vpop.permute.xlu2 %2953 }
 0x109   :  { %367 = vst.msk [vmem:[#allocation2 + $0x9d] sm:$0x1] %vm166_vm2, %v363_v2  ;;  %v2956_v16 = vunpack.i.h.bf16 %v2954_v14  ;;  %v2955_v17 = vunpack.i.l.bf16 %v2954_v14 }
 0x10b   :  { %v481_v18 = vsel %vm480_vm3, %v2955_v17, %v2956_v16 }
 0x10c   :  { %497 = vst [vmem:[#allocation3] sm:$0xff] %v481_v18 }
 0x10e   :  { %v369_v3 = vpop.permute.xlu1 %368 }
 0x10f   :  { %374 = vst.msk [vmem:[#allocation2 + $0xfd] sm:$0x1] %vm166_vm2, %v369_v3 }
 0x110   :  { %v377_v4 = vpop.permute.xlu0 %376 }
 0x111   :  { %382 = vst.msk [vmem:[#allocation2 + $0x3e] sm:$0x1] %vm166_vm2, %v377_v4 }
 0x116   :  { %v379_v5 = vpop.permute.xlu1 %378 }
 0x117   :  { %383 = vst.msk [vmem:[#allocation2 + $0x9e] sm:$0x1] %vm166_vm2, %v379_v5 }
 0x118   :  { %v387_v6 = vpop.permute.xlu0 %386 }
 0x119   :  { %391 = vst.msk [vmem:[#allocation2 + $0x15e] sm:$0x1] %vm166_vm2, %v387_v6 }
 0x11e   :  { %v393_v7 = vpop.permute.xlu1 %392  ;;  %v3665_v8 = vld [vmem:[#allocation2 + $0x98] sm:$0xff] }
 0x11f   :  { %398 = vst.msk [vmem:[#allocation2 + $0x3f] sm:$0x1] %vm166_vm2, %v393_v7  ;;  %474 = vrot.lane.b32.xlu1 %v3665_v8, %s3378_s23 }
 0x120   :  { %628 = vst [vmem:[#allocation3 + $0xf0] sm:$0xff] %v3665_v8  ;;  %v401_v9 = vpop.permute.xlu0 %400 }
 0x121   :  { %406 = vst.msk [vmem:[#allocation2 + $0xff] sm:$0x1] %vm166_vm2, %v401_v9 }
 0x126   :  { %v403_v10 = vpop.permute.xlu1 %402  ;;  %v3672_v11 = vld [vmem:[#allocation2 + $0x38] sm:$0xff] }
 0x127   :  { %407 = vst.msk [vmem:[#allocation2 + $0x15f] sm:$0x1] %vm166_vm2, %v403_v10  ;;  %515 = vrot.lane.b32.xlu0 %v3672_v11, %s3379_s24  ;;  %458 = vrot.lane.b32.xlu2 %v3672_v11, %s3378_s23 }
 0x128   :  { %624 = vst [vmem:[#allocation3 + $0xd0] sm:$0xff] %v3672_v11  ;;  %2988 = vrot.lane.b32.xlu1 %v5892_v12, %s3379_s24  ;;  %v3682_v13 = vpop.permute.xlu0 %2958  ;;  %v3684_v15 = vld [vmem:[#allocation2 + $0xf8] sm:$0xff] }
 0x129   :  { %1026 = vst [vmem:[#allocation3 + $0x290] sm:$0xff] %v3684_v15  ;;  %v2960_v24 = vunpack.i.l.bf16 %v3682_v13  ;;  %v2961_v36 = vunpack.i.h.bf16 %v3682_v13 }
 0x12e   :  { %v3688_v19 = vld [vmem:[#allocation2 + $0x158] sm:$0xff] }
 0x12f   :  { %3003 = vrot.lane.b32.xlu0 %v5892_v12, %s3379_s24  ;;  %2973 = vrot.lane.b32.xlu2 %v5892_v12, %s3378_s23  ;;  %1030 = vst [vmem:[#allocation3 + $0x2b0] sm:$0xff] %v3688_v19 }
 0x130   :  { %2993 = vrot.lane.b32.xlu1 %v5892_v12, %s3379_s24  ;;  %v2964_v20 = vpop.permute.xlu0 %2963 }
 0x131   :  { %v2966_v21 = vunpack.i.h.bf16 %v2964_v20  ;;  %v2965_v22 = vunpack.i.l.bf16 %v2964_v20 }
 0x133   :  { %v484_v23 = vsel %vm480_vm3, %v2965_v22, %v2966_v21 }
 0x134   :  { %500 = vst [vmem:[#allocation3 + $0x18] sm:$0xff] %v484_v23 }
 0x137   :  { %3008 = vrot.lane.b32.xlu0 %v5892_v12, %s3379_s24  ;;  %2978 = vrot.lane.b32.xlu2 %v5892_v12, %s3378_s23 }
 0x138   :  { %527 = vrot.lane.b32.xlu1 %v3631_v48, %s3379_s24 }
 0x13f   :  { %569 = vrot.lane.b32.xlu0 %v3621_v45, %s3380_s25  ;;  %511 = vrot.lane.b32.xlu2 %v3621_v45, %s3379_s24 }
 0x140   :  { %3013 = vrot.lane.b32.xlu1 %v5892_v12, %s3380_s25 }
 0x147   :  { %3028 = vrot.lane.b32.xlu0 %v5892_v12, %s3380_s25  ;;  %2998 = vrot.lane.b32.xlu2 %v5892_v12, %s3379_s24 }
 0x148   :  { %573 = vrot.lane.b32.xlu1 %v3672_v11, %s3380_s25 }
 0x14b   :  { %v455_v25 = vpop.permute.xlu1 %454 }
 0x14c   :  { %v3718_v26 = vsel %vm480_vm3, %v2960_v24, %v455_v25 }
 0x14d   :  { %498 = vst [vmem:[#allocation3 + $0x8] sm:$0xff] %v3718_v26 }
 0x14f   :  { %589 = vrot.lane.b32.xlu0 %v3665_v8, %s3380_s25  ;;  %531 = vrot.lane.b32.xlu2 %v3665_v8, %s3379_s24 }
 0x150   :  { %3033 = vrot.lane.b32.xlu1 %v5892_v12, %s3380_s25 }
 0x151   :  { %v471_v27 = vpop.permute.xlu0 %470 }
 0x153   :  { %v2969_v28 = vpop.permute.xlu1 %2968 }
 0x154   :  { %v2971_v29 = vunpack.i.h.bf16 %v2969_v28  ;;  %v2970_v30 = vunpack.i.l.bf16 %v2969_v28 }
 0x156   :  { %v485_v31 = vsel %vm480_vm3, %v2970_v30, %v2971_v29 }
 0x157   :  { %642 = vrot.lane.b32.xlu0 %v3621_v45, %s3381_s26  ;;  %3018 = vrot.lane.b32.xlu2 %v5892_v12, %s3380_s25  ;;  %501 = vst [vmem:[#allocation3 + $0x20] sm:$0xff] %v485_v31 }
 0x158   :  { %3038 = vrot.lane.b32.xlu1 %v5892_v12, %s3380_s25 }
 0x159   :  { %v2984_v32 = vpop.permute.xlu0 %2983 }
 0x15a   :  { %v2986_v33 = vunpack.i.h.bf16 %v2984_v32  ;;  %v2985_v34 = vunpack.i.l.bf16 %v2984_v32 }
 0x15c   :  { %v538_v35 = vsel %vm537_vm4, %v2985_v34, %v2986_v33 }
 0x15d   :  { %555 = vst [vmem:[#allocation3 + $0x40] sm:$0xff] %v538_v35 }
 0x15f   :  { %3053 = vrot.lane.b32.xlu0 %v5892_v12, %s3381_s26  ;;  %3023 = vrot.lane.b32.xlu2 %v5892_v12, %s3380_s25 }
 0x160   :  { %3048 = vrot.lane.b32.xlu1 %v5892_v12, %s3381_s26 }
 0x167   :  { %3063 = vrot.lane.b32.xlu0 %v5892_v12, %s3381_s26  ;;  %585 = vrot.lane.b32.xlu2 %v3631_v48, %s3380_s25 }
 0x168   :  { %3058 = vrot.lane.b32.xlu1 %v5892_v12, %s3381_s26 }
 0x16f   :  { %3073 = vrot.lane.b32.xlu0 %v5892_v12, %s3382_s27  ;;  %3043 = vrot.lane.b32.xlu2 %v5892_v12, %s3381_s26 }
 0x170   :  { %662 = vrot.lane.b32.xlu1 %v3665_v8, %s3381_s26 }
 0x177   :  { %704 = vrot.lane.b32.xlu0 %v3672_v11, %s3382_s27  ;;  %646 = vrot.lane.b32.xlu2 %v3672_v11, %s3381_s26 }
 0x178   :  { %700 = vrot.lane.b32.xlu1 %v3621_v45, %s3382_s27 }
 0x17f   :  { %716 = vrot.lane.b32.xlu0 %v3631_v48, %s3382_s27  ;;  %658 = vrot.lane.b32.xlu2 %v3631_v48, %s3381_s26 }
 0x180   :  { %3083 = vrot.lane.b32.xlu1 %v5892_v12, %s3382_s27 }
 0x181   :  { %v459_v37 = vpop.permute.xlu2 %458 }
 0x182   :  { %v3767_v38 = vsel %vm480_vm3, %v2961_v36, %v459_v37 }
 0x183   :  { %499 = vst [vmem:[#allocation3 + $0x10] sm:$0xff] %v3767_v38 }
 0x187   :  { %3098 = vrot.lane.b32.xlu0 %v5892_v12, %s3382_s27  ;;  %3068 = vrot.lane.b32.xlu2 %v5892_v12, %s3381_s26 }
 0x188   :  { %3093 = vrot.lane.b32.xlu1 %v5892_v12, %s3382_s27 }
 0x189   :  { %v2974_v39 = vpop.permute.xlu2 %2973 }
 0x18a   :  { %v2975_v40 = vunpack.i.l.bf16 %v2974_v39  ;;  %v2976_v42 = vunpack.i.h.bf16 %v2974_v39 }
 0x18c   :  { %v3777_v41 = vsel %vm480_vm3, %v2975_v40, %v471_v27 }
 0x18d   :  { %502 = vst [vmem:[#allocation3 + $0x28] sm:$0xff] %v3777_v41 }
 0x18f   :  { %3108 = vrot.lane.b32.xlu0 %v5892_v12, %s3383_s28  ;;  %3078 = vrot.lane.b32.xlu2 %v5892_v12, %s3382_s27 }
 0x190   :  { %3103 = vrot.lane.b32.xlu1 %v5892_v12, %s3383_s28 }
 0x191   :  { %v2979_v43 = vpop.permute.xlu2 %2978  ;;  %v475_v44 = vpop.permute.xlu1 %474 }
 0x192   :  { %v2981_v47 = vunpack.i.h.bf16 %v2979_v43  ;;  %v2980_v49 = vunpack.i.l.bf16 %v2979_v43  ;;  %v3787_v50 = vsel %vm480_vm3, %v2976_v42, %v475_v44 }
 0x193   :  { %503 = vst [vmem:[#allocation3 + $0x30] sm:$0xff] %v3787_v50 }
 0x194   :  { %v488_v52 = vsel %vm480_vm3, %v2980_v49, %v2981_v47 }
 0x195   :  { %504 = vst [vmem:[#allocation3 + $0x38] sm:$0xff] %v488_v52 }
 0x197   :  { %3118 = vrot.lane.b32.xlu0 %v5892_v12, %s3383_s28  ;;  %3088 = vrot.lane.b32.xlu2 %v5892_v12, %s3382_s27 }
 0x198   :  { %762 = vrot.lane.b32.xlu1 %v3672_v11, %s3383_s28 }
 0x199   :  { %v516_v53 = vpop.permute.xlu0 %515  ;;  %v512_v54 = vpop.permute.xlu2 %511 }
 0x19a   :  { %v2989_v55 = vpop.permute.xlu1 %2988 }
 0x19b   :  { %v2991_v56 = vunpack.i.h.bf16 %v2989_v55  ;;  %v2990_v57 = vunpack.i.l.bf16 %v2989_v55 }
 0x19d   :  { %v540_v58 = vsel %vm537_vm4, %v2991_v56, %v516_v53  ;;  %v539_v59 = vsel %vm537_vm4, %v2990_v57, %v512_v54 }
 0x19e   :  { %557 = vst [vmem:[#allocation3 + $0x50] sm:$0xff] %v540_v58 }
 0x19f   :  { %556 = vst [vmem:[#allocation3 + $0x48] sm:$0xff] %v539_v59  ;;  %778 = vrot.lane.b32.xlu0 %v3665_v8, %s3383_s28  ;;  %720 = vrot.lane.b32.xlu2 %v3665_v8, %s3382_s27 }
 0x1a0   :  { %774 = vrot.lane.b32.xlu1 %v3631_v48, %s3383_s28 }
 0x1a1   :  { %v3004_v60 = vpop.permute.xlu0 %3003  ;;  %v2999_v61 = vpop.permute.xlu2 %2998 }
 0x1a2   :  { %v3001_v62 = vunpack.i.h.bf16 %v2999_v61  ;;  %v3000_v63 = vunpack.i.l.bf16 %v2999_v61  ;;  %v2994_v0 = vpop.permute.xlu1 %2993  ;;  %v3006_v5 = vunpack.i.h.bf16 %v3004_v60  ;;  %v3005_v6 = vunpack.i.l.bf16 %v3004_v60 }
 0x1a3   :  { %v2996_v1 = vunpack.i.h.bf16 %v2994_v0  ;;  %v2995_v2 = vunpack.i.l.bf16 %v2994_v0 }
 0x1a4   :  { %v542_v3 = vsel %vm537_vm4, %v3000_v63, %v3001_v62 }
 0x1a5   :  { %559 = vst [vmem:[#allocation3 + $0x60] sm:$0xff] %v542_v3  ;;  %v541_v4 = vsel %vm537_vm4, %v2995_v2, %v2996_v1 }
 0x1a6   :  { %558 = vst [vmem:[#allocation3 + $0x58] sm:$0xff] %v541_v4 }
 0x1a7   :  { %3138 = vrot.lane.b32.xlu0 %v5892_v12, %s3378_s23  ;;  %758 = vrot.lane.b32.xlu2 %v3621_v45, %s3383_s28 }
 0x1a8   :  { %3128 = vrot.lane.b32.xlu1 %v5892_v12, %s3383_s28 }
 0x1a9   :  { %v3009_v7 = vpop.permute.xlu0 %3008  ;;  %v532_v8 = vpop.permute.xlu2 %531 }
 0x1aa   :  { %v3011_v9 = vunpack.i.h.bf16 %v3009_v7  ;;  %v3010_v10 = vunpack.i.l.bf16 %v3009_v7  ;;  %v544_v11 = vsel %vm537_vm4, %v3006_v5, %v532_v8  ;;  %v528_v13 = vpop.permute.xlu1 %527 }
 0x1ab   :  { %561 = vst [vmem:[#allocation3 + $0x70] sm:$0xff] %v544_v11  ;;  %v543_v14 = vsel %vm537_vm4, %v3005_v6, %v528_v13 }
 0x1ac   :  { %v545_v16 = vsel %vm537_vm4, %v3010_v10, %v3011_v9  ;;  %560 = vst [vmem:[#allocation3 + $0x68] sm:$0xff] %v543_v14 }
 0x1ad   :  { %562 = vst [vmem:[#allocation3 + $0x78] sm:$0xff] %v545_v16 }
 0x1af   :  { %3143 = vrot.lane.b32.xlu0 %v5892_v12, %s3378_s23  ;;  %3113 = vrot.lane.b32.xlu2 %v5892_v12, %s3383_s28 }
 0x1b0   :  { %858 = vrot.lane.b32.xlu1 %v3624_v46, %s3378_s23 }
 0x1b1   :  { %v570_v17 = vpop.permute.xlu0 %569  ;;  %v3019_v18 = vpop.permute.xlu2 %3018 }
 0x1b2   :  { %v3020_v20 = vunpack.i.l.bf16 %v3019_v18  ;;  %v3014_v21 = vpop.permute.xlu1 %3013  ;;  %v3021_v27 = vunpack.i.h.bf16 %v3019_v18 }
 0x1b3   :  { %v3016_v22 = vunpack.i.h.bf16 %v3014_v21  ;;  %v3015_v23 = vunpack.i.l.bf16 %v3014_v21 }
 0x1b4   :  { %v597_v24 = vsel %vm595_vm5, %v3020_v20, %v570_v17 }
 0x1b5   :  { %614 = vst [vmem:[#allocation3 + $0x88] sm:$0xff] %v597_v24  ;;  %v596_v25 = vsel %vm595_vm5, %v3015_v23, %v3016_v22 }
 0x1b6   :  { %613 = vst [vmem:[#allocation3 + $0x80] sm:$0xff] %v596_v25 }
 0x1b7   :  { %874 = vrot.lane.b32.xlu0 %v3637_v51, %s3378_s23  ;;  %3123 = vrot.lane.b32.xlu2 %v5892_v12, %s3383_s28 }
 0x1b8   :  { %3148 = vrot.lane.b32.xlu1 %v5892_v12, %s3378_s23 }
 0x1b9   :  { %v3029_v28 = vpop.permute.xlu0 %3028  ;;  %v3024_v29 = vpop.permute.xlu2 %3023 }
 0x1ba   :  { %v3031_v30 = vunpack.i.h.bf16 %v3029_v28  ;;  %v3030_v31 = vunpack.i.l.bf16 %v3029_v28  ;;  %v3026_v32 = vunpack.i.h.bf16 %v3024_v29  ;;  %v3025_v33 = vunpack.i.l.bf16 %v3024_v29  ;;  %v574_v34 = vpop.permute.xlu1 %573 }
 0x1bb   :  { %v598_v35 = vsel %vm595_vm5, %v3021_v27, %v574_v34 }
 0x1bc   :  { %v600_v36 = vsel %vm595_vm5, %v3030_v31, %v3031_v30  ;;  %v599_v37 = vsel %vm595_vm5, %v3025_v33, %v3026_v32  ;;  %615 = vst [vmem:[#allocation3 + $0x90] sm:$0xff] %v598_v35 }
 0x1bd   :  { %617 = vst [vmem:[#allocation3 + $0xa0] sm:$0xff] %v600_v36 }
 0x1be   :  { %616 = vst [vmem:[#allocation3 + $0x98] sm:$0xff] %v599_v37 }
 0x1bf   :  { %3163 = vrot.lane.b32.xlu0 %v5892_v12, %s3379_s24  ;;  %3133 = vrot.lane.b32.xlu2 %v5892_v12, %s3378_s23 }
 0x1c0   :  { %878 = vrot.lane.b32.xlu1 %v3688_v19, %s3378_s23 }
 0x1c1   :  { %v590_v39 = vpop.permute.xlu0 %589  ;;  %v586_v40 = vpop.permute.xlu2 %585 }
 0x1c2   :  { %v3034_v42 = vpop.permute.xlu1 %3033 }
 0x1c3   :  { %v3036_v43 = vunpack.i.h.bf16 %v3034_v42  ;;  %v3035_v44 = vunpack.i.l.bf16 %v3034_v42 }
 0x1c5   :  { %v602_v47 = vsel %vm595_vm5, %v3036_v43, %v590_v39  ;;  %v601_v49 = vsel %vm595_vm5, %v3035_v44, %v586_v40 }
 0x1c6   :  { %619 = vst [vmem:[#allocation3 + $0xb0] sm:$0xff] %v602_v47 }
 0x1c7   :  { %919 = vrot.lane.b32.xlu0 %v3684_v15, %s3379_s24  ;;  %862 = vrot.lane.b32.xlu2 %v3684_v15, %s3378_s23  ;;  %618 = vst [vmem:[#allocation3 + $0xa8] sm:$0xff] %v601_v49 }
 0x1c8   :  { %3168 = vrot.lane.b32.xlu1 %v5892_v12, %s3379_s24 }
 0x1c9   :  { %v643_v52 = vpop.permute.xlu0 %642  ;;  %v3044_v53 = vpop.permute.xlu2 %3043 }
 0x1ca   :  { %v3046_v54 = vunpack.i.h.bf16 %v3044_v53  ;;  %v3045_v55 = vunpack.i.l.bf16 %v3044_v53  ;;  %v3039_v56 = vpop.permute.xlu1 %3038 }
 0x1cb   :  { %v3041_v57 = vunpack.i.h.bf16 %v3039_v56  ;;  %v3040_v58 = vunpack.i.l.bf16 %v3039_v56 }
 0x1cc   :  { %v671_v59 = vsel %vm670_vm6, %v3045_v55, %v3046_v54 }
 0x1cd   :  { %688 = vst [vmem:[#allocation3 + $0x100] sm:$0xff] %v671_v59  ;;  %v603_v60 = vsel %vm595_vm5, %v3040_v58, %v3041_v57 }
 0x1ce   :  { %620 = vst [vmem:[#allocation3 + $0xb8] sm:$0xff] %v603_v60 }
 0x1cf   :  { %3183 = vrot.lane.b32.xlu0 %v5892_v12, %s3379_s24  ;;  %3153 = vrot.lane.b32.xlu2 %v5892_v12, %s3378_s23 }
 0x1d0   :  { %3173 = vrot.lane.b32.xlu1 %v5892_v12, %s3379_s24 }
 0x1d1   :  { %v3054_v61 = vpop.permute.xlu0 %3053  ;;  %v647_v62 = vpop.permute.xlu2 %646 }
 0x1d2   :  { %v3056_v63 = vunpack.i.h.bf16 %v3054_v61  ;;  %v3049_v0 = vpop.permute.xlu1 %3048  ;;  %v3055_v1 = vunpack.i.l.bf16 %v3054_v61 }
 0x1d3   :  { %v3051_v2 = vunpack.i.h.bf16 %v3049_v0  ;;  %v3050_v3 = vunpack.i.l.bf16 %v3049_v0 }
 0x1d4   :  { %v674_v4 = vsel %vm670_vm6, %v3055_v1, %v3056_v63 }
 0x1d5   :  { %v673_v5 = vsel %vm670_vm6, %v647_v62, %v3051_v2  ;;  %v672_v6 = vsel %vm670_vm6, %v643_v52, %v3050_v3  ;;  %691 = vst [vmem:[#allocation3 + $0x118] sm:$0xff] %v674_v4 }
 0x1d6   :  { %690 = vst [vmem:[#allocation3 + $0x110] sm:$0xff] %v673_v5 }
 0x1d7   :  { %3188 = vrot.lane.b32.xlu0 %v5892_v12, %s3379_s24  ;;  %3158 = vrot.lane.b32.xlu2 %v5892_v12, %s3378_s23  ;;  %689 = vst [vmem:[#allocation3 + $0x108] sm:$0xff] %v672_v6  ;;  %s3979_s23 = sld [smem:[#allocation4 + $0x15]] }
 0x1d8   :  { %931 = vrot.lane.b32.xlu1 %v3637_v51, %s3379_s24 }
 0x1d9   :  { %v3064_v7 = vpop.permute.xlu0 %3063  ;;  %v659_v8 = vpop.permute.xlu2 %658 }
 0x1da   :  { %v3065_v9 = vunpack.i.l.bf16 %v3064_v7  ;;  %v3059_v10 = vpop.permute.xlu1 %3058  ;;  %v3066_v17 = vunpack.i.h.bf16 %v3064_v7 }
 0x1db   :  { %v3061_v11 = vunpack.i.h.bf16 %v3059_v10  ;;  %v3060_v13 = vunpack.i.l.bf16 %v3059_v10 }
 0x1dc   :  { %v676_v14 = vsel %vm670_vm6, %v659_v8, %v3065_v9 }
 0x1dd   :  { %693 = vst [vmem:[#allocation3 + $0x128] sm:$0xff] %v676_v14  ;;  %v675_v16 = vsel %vm670_vm6, %v3060_v13, %v3061_v11 }
 0x1de   :  { %692 = vst [vmem:[#allocation3 + $0x120] sm:$0xff] %v675_v16 }
 0x1df   :  { %972 = vrot.lane.b32.xlu0 %v3624_v46, %s3380_s25  ;;  %915 = vrot.lane.b32.xlu2 %v3624_v46, %s3379_s24 }
 0x1e0   :  { %3193 = vrot.lane.b32.xlu1 %v5892_v12, %s3380_s25 }
 0x1e1   :  { %v3074_v18 = vpop.permute.xlu0 %3073  ;;  %v3069_v20 = vpop.permute.xlu2 %3068 }
 0x1e2   :  { %v3076_v21 = vunpack.i.h.bf16 %v3074_v18  ;;  %v3075_v22 = vunpack.i.l.bf16 %v3074_v18  ;;  %v3071_v23 = vunpack.i.h.bf16 %v3069_v20  ;;  %v3070_v24 = vunpack.i.l.bf16 %v3069_v20  ;;  %v663_v25 = vpop.permute.xlu1 %662 }
 0x1e3   :  { %v677_v27 = vsel %vm670_vm6, %v663_v25, %v3066_v17  ;;  %v1297_v25 = vld [vmem:[#allocation3 + $0xc5] sm:$0xff] }
 0x1e4   :  { %v729_v28 = vsel %vm728_vm7, %v3075_v22, %v3076_v21  ;;  %v678_v29 = vsel %vm670_vm6, %v3070_v24, %v3071_v23  ;;  %694 = vst [vmem:[#allocation3 + $0x130] sm:$0xff] %v677_v27  ;;  %v3927_v21 = vstv %s2882_s29  ;;  %v3933_v22 = vstv %s2883_s30  ;;  %s4134_s29 = sld [smem:[#allocation4 + $0x1c]] }
 0x1e5   :  { %746 = vst [vmem:[#allocation3 + $0x140] sm:$0xff] %v729_v28  ;;  %v1894_v23 = vmul.f32 %v3927_v21, %v3621_v45  ;;  %v3947_v24 = vstv %s2840_s4  ;;  %v1303_v28 = vld [vmem:[#allocation3 + $0x2a5] sm:$0xff]  ;;  %v1899_v45 = vmul.f32 %v3933_v22, %v3624_v46  ;;  %s4144_s30 = sld [smem:[#allocation4 + $0x23]] }
 0x1e6   :  { %695 = vst [vmem:[#allocation3 + $0x138] sm:$0xff] %v678_v29  ;;  %v3952_v29 = vstv %s3916_s5  ;;  %s4159_s4 = sld [smem:[#allocation4 + $0x16]] }
 0x1e7   :  { %3208 = vrot.lane.b32.xlu0 %v5892_v12, %s3380_s25  ;;  %3178 = vrot.lane.b32.xlu2 %v5892_v12, %s3379_s24  ;;  %s4168_s5 = sld [smem:[#allocation4 + $0x1d]] }
 0x1e8   :  { %976 = vrot.lane.b32.xlu1 %v3684_v15, %s3380_s25 }
 0x1e9   :  { %v705_v30 = vpop.permute.xlu0 %704  ;;  %v3079_v31 = vpop.permute.xlu2 %3078 }
 0x1ea   :  { %v3081_v32 = vunpack.i.h.bf16 %v3079_v31  ;;  %v3080_v33 = vunpack.i.l.bf16 %v3079_v31  ;;  %v701_v34 = vpop.permute.xlu1 %700  ;;  %v1493_v31 = vld [vmem:[#allocation3 + $0xc6] sm:$0xff] }
 0x1ec   :  { %v731_v35 = vsel %vm728_vm7, %v705_v30, %v3081_v32  ;;  %v730_v36 = vsel %vm728_vm7, %v701_v34, %v3080_v33  ;;  %v3955_v30 = vstv %s3918_s6  ;;  %v1689_v32 = vld [vmem:[#allocation3 + $0xc7] sm:$0xff]  ;;  %s4176_s6 = sld [smem:[#allocation4 + $0x24]] }
 0x1ed   :  { %748 = vst [vmem:[#allocation3 + $0x150] sm:$0xff] %v731_v35 }
 0x1ee   :  { %747 = vst [vmem:[#allocation3 + $0x148] sm:$0xff] %v730_v36  ;;  %v3964_v36 = vstv %s3908_s3  ;;  %s4153_s3 = sld [smem:[#allocation4 + $0x2a]] }
 0x1ef   :  { %992 = vrot.lane.b32.xlu0 %v3688_v19, %s3380_s25  ;;  %935 = vrot.lane.b32.xlu2 %v3688_v19, %s3379_s24  ;;  %s4004_s24 = sld [smem:[#allocation4 + $0x46]] }
 0x1f0   :  { %3213 = vrot.lane.b32.xlu1 %v5892_v12, %s3380_s25 }
 0x1f1   :  { %v717_v37 = vpop.permute.xlu0 %716  ;;  %v3089_v39 = vpop.permute.xlu2 %3088 }
 0x1f2   :  { %v3091_v40 = vunpack.i.h.bf16 %v3089_v39  ;;  %v3090_v42 = vunpack.i.l.bf16 %v3089_v39  ;;  %v3084_v43 = vpop.permute.xlu1 %3083  ;;  %v3967_v39 = vstv %s3920_s7  ;;  %s4182_s7 = sld [smem:[#allocation4 + $0x2b]] }
 0x1f3   :  { %v3086_v44 = vunpack.i.h.bf16 %v3084_v43  ;;  %v3085_v47 = vunpack.i.l.bf16 %v3084_v43  ;;  %v1299_v43 = vld [vmem:[#allocation3 + $0xe5] sm:$0xff] }
 0x1f4   :  { %v733_v49 = vsel %vm728_vm7, %v3090_v42, %v3091_v40  ;;  %v1499_v40 = vld [vmem:[#allocation3 + $0x2a6] sm:$0xff] }
 0x1f5   :  { %750 = vst [vmem:[#allocation3 + $0x160] sm:$0xff] %v733_v49  ;;  %v732_v52 = vsel %vm728_vm7, %v3085_v47, %v3086_v44  ;;  %v1695_v42 = vld [vmem:[#allocation3 + $0x2a7] sm:$0xff]  ;;  %v1306_v44 = vmul.f32 %v3947_v24, %v1297_v25  ;;  %v3973_v47 = vstv %s3923_s8  ;;  %s4195_s8 = sld [smem:[#allocation4 + $0x1]] }
 0x1f6   :  { %749 = vst [vmem:[#allocation3 + $0x158] sm:$0xff] %v732_v52  ;;  %v1497_v49 = vld [vmem:[#allocation3 + $0x286] sm:$0xff] }
 0x1f7   :  { %1044 = vrot.lane.b32.xlu0 %v3624_v46, %s3381_s26  ;;  %3198 = vrot.lane.b32.xlu2 %v5892_v12, %s3380_s25  ;;  %v1693_v52 = vld [vmem:[#allocation3 + $0x287] sm:$0xff] }
 0x1f8   :  { %3218 = vrot.lane.b32.xlu1 %v5892_v12, %s3380_s25  ;;  %v1300_v25 = vld [vmem:[#allocation3 + $0xed] sm:$0xff] }
 0x1f9   :  { %v3099_v53 = vpop.permute.xlu0 %3098  ;;  %v721_v54 = vpop.permute.xlu2 %720 }
 0x1fa   :  { %v3101_v55 = vunpack.i.h.bf16 %v3099_v53  ;;  %v3100_v56 = vunpack.i.l.bf16 %v3099_v53  ;;  %v3094_v57 = vpop.permute.xlu1 %3093  ;;  %v3975_v53 = vadd.f32 %v1899_v45, %v1894_v23  ;;  %v4030_v45 = vstv %s3935_s11  ;;  %s4243_s11 = sld [smem:[#allocation4 + $0x2]] }
 0x1fb   :  { %v3096_v58 = vunpack.i.h.bf16 %v3094_v57  ;;  %v3095_v59 = vunpack.i.l.bf16 %v3094_v57  ;;  %v1502_v57 = vmul.f32 %v3952_v29, %v1493_v31  ;;  %5921 = vst [vmem:[#allocation15_spill] sm:$0xff] %v4030_v45  ;;  %v2279_v31 = vld [vmem:[#allocation3 + $0xea] sm:$0xff] }
 0x1fc   :  { %v736_v60 = vsel %vm728_vm7, %v3100_v56, %v3101_v55  ;;  %5913 = vst [vmem:[#allocation7_spill] sm:$0xff] %v3975_v53  ;;  %v1313_v56 = vmul.f32 %v3964_v36, %v1303_v28  ;;  %v4027_v28 = vstv %s3943_s12  ;;  %s4246_s12 = sld [smem:[#allocation4 + $0x9]] }
 0x1fd   :  { %753 = vst [vmem:[#allocation3 + $0x178] sm:$0xff] %v736_v60  ;;  %v735_v61 = vsel %vm728_vm7, %v721_v54, %v3096_v58  ;;  %v734_v62 = vsel %vm728_vm7, %v717_v37, %v3095_v59  ;;  %v1301_v37 = vld [vmem:[#allocation3 + $0x285] sm:$0xff]  ;;  %v1901_v54 = vmul.f32 %v3933_v22, %v3637_v51  ;;  %v1698_v58 = vmul.f32 %v3955_v30, %v1689_v32 }
 0x1fe   :  { %752 = vst [vmem:[#allocation3 + $0x170] sm:$0xff] %v735_v61  ;;  %v1495_v59 = vld [vmem:[#allocation3 + $0xe6] sm:$0xff]  ;;  %v1311_v61 = vmul.f32 %v3964_v36, %v1301_v37  ;;  %v4033_v37 = vstv %s3949_s13  ;;  %s4259_s13 = sld [smem:[#allocation4 + $0x10]] }
 0x1ff   :  { %751 = vst [vmem:[#allocation3 + $0x168] sm:$0xff] %v734_v62  ;;  %1060 = vrot.lane.b32.xlu0 %v3637_v51, %s3381_s26  ;;  %3203 = vrot.lane.b32.xlu2 %v5892_v12, %s3380_s25  ;;  %v1691_v60 = vld [vmem:[#allocation3 + $0xe7] sm:$0xff]  ;;  %v1509_v62 = vmul.f32 %v3967_v39, %v1499_v40  ;;  %v4036_v40 = vstv %s3959_s14  ;;  %s4264_s14 = sld [smem:[#allocation4 + $0x17]] }
 0x200   :  { %1048 = vrot.lane.b32.xlu1 %v3684_v15, %s3381_s26  ;;  %5922 = vst [vmem:[#allocation16_spill] sm:$0xff] %v4036_v40 }
 0x201   :  { %v3109_v63 = vpop.permute.xlu0 %3108  ;;  %v759_v0 = vpop.permute.xlu2 %758 }
 0x202   :  { %v3110_v1 = vunpack.i.l.bf16 %v3109_v63  ;;  %v3104_v2 = vpop.permute.xlu1 %3103  ;;  %v3111_v7 = vunpack.i.h.bf16 %v3109_v63  ;;  %v1705_v63 = vmul.f32 %v3973_v47, %v1695_v42  ;;  %v2081_v42 = vld [vmem:[#allocation3 + $0xc9] sm:$0xff] }
 0x203   :  { %v3106_v3 = vunpack.i.h.bf16 %v3104_v2  ;;  %v3105_v4 = vunpack.i.l.bf16 %v3104_v2  ;;  %v1308_v2 = vmul.f32 %v3947_v24, %v1299_v43  ;;  %v4039_v43 = vstv %s3961_s15  ;;  %s4281_s15 = sld [smem:[#allocation4 + $0x47]] }
 0x204   :  { %v788_v5 = vsel %vm786_vm8, %v759_v0, %v3110_v1  ;;  %v1896_v0 = vmul.f32 %v3927_v21, %v3631_v48  ;;  %v1700_v48 = vmul.f32 %v3955_v30, %v1691_v60  ;;  %v4050_v60 = vmul.f32 %v3947_v24, %v1300_v25 }
 0x205   :  { %805 = vst [vmem:[#allocation3 + $0x188] sm:$0xff] %v788_v5  ;;  %v787_v6 = vsel %vm786_vm8, %v3105_v4, %v3106_v3  ;;  %v1507_v3 = vmul.f32 %v3967_v39, %v1497_v49  ;;  %v1703_v4 = vmul.f32 %v3973_v47, %v1693_v52  ;;  %v1504_v5 = vmul.f32 %v3952_v29, %v1495_v59  ;;  %v1298_v59 = vld [vmem:[#allocation3 + $0xcd] sm:$0xff] }
 0x206   :  { %804 = vst [vmem:[#allocation3 + $0x180] sm:$0xff] %v787_v6  ;;  %v4000_v6 = vadd.f32 %v1901_v54, %v1896_v0  ;;  %v4045_v49 = vstv %s3979_s23  ;;  %v2280_v54 = vld [vmem:[#allocation3 + $0xf2] sm:$0xff]  ;;  %s4321_s23 = sld [smem:[#allocation4 + $0x25]] }
 0x207   :  { %3238 = vrot.lane.b32.xlu0 %v5892_v12, %s3381_s26  ;;  %988 = vrot.lane.b32.xlu2 %v3637_v51, %s3380_s25  ;;  %v1302_v0 = vld [vmem:[#allocation3 + $0x28d] sm:$0xff]  ;;  %s4068_s25 = sld [smem:[#allocation4 + $0xe]] }
 0x208   :  { %1064 = vrot.lane.b32.xlu1 %v3688_v19, %s3381_s26  ;;  %5914 = vst [vmem:[#allocation8_spill] sm:$0xff] %v4000_v6  ;;  %v2082_v6 = vld [vmem:[#allocation3 + $0xd1] sm:$0xff] }
 0x209   :  { %v3119_v8 = vpop.permute.xlu0 %3118  ;;  %v3114_v9 = vpop.permute.xlu2 %3113 }
 0x20a   :  { %v3121_v10 = vunpack.i.h.bf16 %v3119_v8  ;;  %v3120_v11 = vunpack.i.l.bf16 %v3119_v8  ;;  %v3116_v13 = vunpack.i.h.bf16 %v3114_v9  ;;  %v3115_v14 = vunpack.i.l.bf16 %v3114_v9  ;;  %v763_v16 = vpop.permute.xlu1 %762 }
 0x20b   :  { %v789_v17 = vsel %vm786_vm8, %v763_v16, %v3111_v7  ;;  %v4006_v7 = vadd.f32 %v1313_v56, %v1308_v2  ;;  %v4008_v8 = vadd.f32 %v1311_v61, %v1306_v44  ;;  %v4012_v9 = vadd.f32 %v1703_v4, %v1698_v58  ;;  %v2277_v56 = vld [vmem:[#allocation3 + $0xca] sm:$0xff] }
 0x20c   :  { %v791_v18 = vsel %vm786_vm8, %v3120_v11, %v3121_v10  ;;  %v790_v20 = vsel %vm786_vm8, %v3115_v14, %v3116_v13  ;;  %806 = vst [vmem:[#allocation3 + $0x190] sm:$0xff] %v789_v17  ;;  %v2083_v10 = vld [vmem:[#allocation3 + $0xe9] sm:$0xff]  ;;  %v4017_v14 = vstv %s3929_s9  ;;  %v4019_v16 = vadd.f32 %v1509_v62, %v1504_v5  ;;  %s4212_s9 = sld [smem:[#allocation4 + $0x8]] }
 0x20d   :  { %808 = vst [vmem:[#allocation3 + $0x1a0] sm:$0xff] %v791_v18  ;;  %v4024_v17 = vstv %s3931_s10  ;;  %v4042_v44 = vstv %s3969_s16  ;;  %v1694_v2 = vld [vmem:[#allocation3 + $0x28f] sm:$0xff]  ;;  %v4063_v4 = vmul.f32 %v4017_v14, %v2083_v10  ;;  %v2090_v25 = vmul.f32 %v4017_v14, %v2081_v42  ;;  %s4230_s10 = sld [smem:[#allocation4 + $0xf]] }
 0x20e   :  { %807 = vst [vmem:[#allocation3 + $0x198] sm:$0xff] %v790_v20  ;;  %v4079_v10 = vmul.f32 %v4024_v17, %v2280_v54  ;;  %s4289_s16 = sld [smem:[#allocation4 + $0x1e]] }
 0x20f   :  { %1105 = vrot.lane.b32.xlu0 %v3684_v15, %s3382_s27  ;;  %3223 = vrot.lane.b32.xlu2 %v5892_v12, %s3381_s26  ;;  %5915 = vst [vmem:[#allocation9_spill] sm:$0xff] %v4006_v7 }
 0x210   :  { %1101 = vrot.lane.b32.xlu1 %v3624_v46, %s3382_s27  ;;  %5916 = vst [vmem:[#allocation10_spill] sm:$0xff] %v4008_v8  ;;  %v1243_v8 = vld [vmem:[#allocation3 + $0x65] sm:$0xff] }
 0x211   :  { %v779_v27 = vpop.permute.xlu0 %778  ;;  %v3124_v15 = vpop.permute.xlu2 %3123  ;;  %5918 = vst [vmem:[#allocation12_spill] sm:$0xff] %v4012_v9 }
 0x212   :  { %v3126_v33 = vunpack.i.h.bf16 %v3124_v15  ;;  %v3125_v34 = vunpack.i.l.bf16 %v3124_v15  ;;  %v775_v35 = vpop.permute.xlu1 %774  ;;  %5919 = vst [vmem:[#allocation13_spill] sm:$0xff] %v4019_v16  ;;  %v1692_v15 = vld [vmem:[#allocation3 + $0xef] sm:$0xff] }
 0x213   :  { %v4056_v62 = vmul.f32 %v3955_v30, %v1692_v15  ;;  %v2281_v15 = vld [vmem:[#allocation3 + $0x28a] sm:$0xff]  ;;  %v2474_v16 = vld [vmem:[#allocation3 + $0xd3] sm:$0xff] }
 0x214   :  { %v793_v55 = vsel %vm786_vm8, %v779_v27, %v3126_v33  ;;  %v792_v1 = vsel %vm786_vm8, %v775_v35, %v3125_v34  ;;  %v1496_v27 = vld [vmem:[#allocation3 + $0xee] sm:$0xff] }
 0x215   :  { %810 = vst [vmem:[#allocation3 + $0x1b0] sm:$0xff] %v793_v55  ;;  %v1888_v34 = vld [vmem:[#allocation3 + $0xf0] sm:$0xff]  ;;  %v4053_v61 = vmul.f32 %v3952_v29, %v1496_v27  ;;  %v4092_v27 = vmul.f32 %v4024_v17, %v2277_v56 }
 0x216   :  { %809 = vst [vmem:[#allocation3 + $0x1a8] sm:$0xff] %v792_v1  ;;  %v2084_v35 = vld [vmem:[#allocation3 + $0xf1] sm:$0xff] }
 0x217   :  { %1121 = vrot.lane.b32.xlu0 %v3688_v19, %s3382_s27  ;;  %3228 = vrot.lane.b32.xlu2 %v5892_v12, %s3381_s26  ;;  %v4010_v19 = vadd.f32 %v1507_v3, %v1502_v57  ;;  %v2476_v55 = vld [vmem:[#allocation3 + $0xf3] sm:$0xff]  ;;  %v2085_v57 = vld [vmem:[#allocation3 + $0x289] sm:$0xff]  ;;  %v4060_v3 = vmul.f32 %v3927_v21, %v1888_v34  ;;  %v4066_v5 = vmul.f32 %v4017_v14, %v2084_v35 }
 0x218   :  { %1117 = vrot.lane.b32.xlu1 %v3637_v51, %s3382_s27  ;;  %v4021_v51 = vadd.f32 %v1705_v63, %v1700_v48  ;;  %v1498_v1 = vld [vmem:[#allocation3 + $0x28e] sm:$0xff]  ;;  %v1704_v35 = vmul.f32 %v3973_v47, %v1694_v2 }
 0x219   :  { %5917 = vst [vmem:[#allocation11_spill] sm:$0xff] %v4010_v19  ;;  %v4014_v11 = vpop.permute.xlu0 %3138  ;;  %v3134_v13 = vpop.permute.xlu2 %3133  ;;  %v1508_v34 = vmul.f32 %v3967_v39, %v1498_v1  ;;  %v1494_v56 = vld [vmem:[#allocation3 + $0xce] sm:$0xff] }
 0x21a   :  { %5920 = vst [vmem:[#allocation14_spill] sm:$0xff] %v4021_v51  ;;  %v3136_v18 = vunpack.i.h.bf16 %v3134_v13  ;;  %v3135_v20 = vunpack.i.l.bf16 %v3134_v13  ;;  %v3129_v23 = vpop.permute.xlu1 %3128  ;;  %v3141_v63 = vunpack.i.h.bf16 %v4014_v11  ;;  %v3140_v48 = vunpack.i.l.bf16 %v4014_v11  ;;  %v1886_v13 = vld [vmem:[#allocation3 + $0xd0] sm:$0xff] }
 0x21b   :  { %v3131_v32 = vunpack.i.h.bf16 %v3129_v23  ;;  %v3130_v33 = vunpack.i.l.bf16 %v3129_v23  ;;  %v4087_v11 = vstv %s4004_s24  ;;  %v1890_v23 = vld [vmem:[#allocation3 + $0x290] sm:$0xff]  ;;  %v1895_v42 = vmul.f32 %v3927_v21, %v1886_v13  ;;  %s4371_s24 = sld [smem:[#allocation4 + $0x2c]] }
 0x21c   :  { %v884_v52 = vsel %vm480_vm3, %v3135_v20, %v3136_v18  ;;  %v4076_v18 = vmul.f32 %v4024_v17, %v2279_v31  ;;  %v4082_v20 = vmul.f32 %v4030_v45, %v2476_v55  ;;  %v1900_v2 = vmul.f32 %v3933_v22, %v1890_v23  ;;  %v1304_v13 = vld [vmem:[#allocation3 + $0x2ad] sm:$0xff] }
 0x21d   :  { %901 = vst [vmem:[#allocation3 + $0x1c0] sm:$0xff] %v884_v52  ;;  %v794_v58 = vsel %vm786_vm8, %v3130_v33, %v3131_v32  ;;  %v1312_v33 = vmul.f32 %v3964_v36, %v1302_v0  ;;  %v2095_v52 = vmul.f32 %v4027_v28, %v2085_v57  ;;  %v1690_v57 = vld [vmem:[#allocation3 + $0xcf] sm:$0xff] }
 0x21e   :  { %811 = vst [vmem:[#allocation3 + $0x1b8] sm:$0xff] %v794_v58  ;;  %v1500_v51 = vld [vmem:[#allocation3 + $0x2ae] sm:$0xff] }
 0x21f   :  { %1158 = vrot.lane.b32.xlu0 %v3624_v46, %s3383_s28  ;;  %3233 = vrot.lane.b32.xlu2 %v5892_v12, %s3381_s26  ;;  %v1307_v46 = vmul.f32 %v3947_v24, %v1298_v59  ;;  %v2086_v59 = vld [vmem:[#allocation3 + $0x291] sm:$0xff]  ;;  %v4121_v53 = vadd.f32 %v2095_v52, %v2090_v25 }
 0x220   :  { %3253 = vrot.lane.b32.xlu1 %v5892_v12, %s3382_s27  ;;  %v1811_v12 = vmul.f32 %v4045_v49, %v3767_v38  ;;  %v4110_v38 = vmul.f32 %v4033_v37, %v2281_v15  ;;  %v2091_v15 = vmul.f32 %v4017_v14, %v2082_v6  ;;  %v1892_v25 = vld [vmem:[#allocation3 + $0x2b0] sm:$0xff] }
 0x221   :  { %v3144_v31 = vpop.permute.xlu0 %3143  ;;  %v863_v32 = vpop.permute.xlu2 %862  ;;  %v4114_v23 = vadd.f32 %v1312_v33, %v1307_v46  ;;  %5926 = vst [vmem:[#allocation20_spill] sm:$0xff] %v4121_v53  ;;  %v2283_v46 = vld [vmem:[#allocation3 + $0x2aa] sm:$0xff]  ;;  %v2418_v19 = vld [vmem:[#allocation3 + $0x53] sm:$0xff] }
 0x222   :  { %v3146_v54 = vunpack.i.h.bf16 %v3144_v31  ;;  %v3145_v55 = vunpack.i.l.bf16 %v3144_v31  ;;  %v886_v24 = vsel %vm480_vm3, %v3141_v63, %v863_v32  ;;  %v859_v58 = vpop.permute.xlu1 %858  ;;  %v1810_v63 = vmul.f32 %v4045_v49, %v3718_v26  ;;  %v2282_v32 = vld [vmem:[#allocation3 + $0x292] sm:$0xff]  ;;  %v3330_v33 = vld [vmem:[#allocation3 + $0x2a8] sm:$0xff] }
 0x223   :  { %903 = vst [vmem:[#allocation3 + $0x1d0] sm:$0xff] %v886_v24  ;;  %v1816_v0 = vmul.f32 %v4087_v11, %v886_v24  ;;  %v885_v1 = vsel %vm480_vm3, %v3140_v48, %v859_v58  ;;  %v2087_v24 = vld [vmem:[#allocation3 + $0x2a9] sm:$0xff]  ;;  %v1503_v58 = vmul.f32 %v3952_v29, %v1494_v56  ;;  %v2096_v26 = vmul.f32 %v4027_v28, %v2086_v59 }
 0x224   :  { %v887_v31 = vsel %vm480_vm3, %v3145_v55, %v3146_v54  ;;  %902 = vst [vmem:[#allocation3 + $0x1c8] sm:$0xff] %v885_v1  ;;  %v1815_v21 = vmul.f32 %v4087_v11, %v885_v1  ;;  %v2278_v54 = vld [vmem:[#allocation3 + $0xd2] sm:$0xff]  ;;  %v1699_v1 = vmul.f32 %v3955_v30, %v1690_v57  ;;  %v5927_v29 = vmov 0.0  }
 0x225   :  { %904 = vst [vmem:[#allocation3 + $0x1d8] sm:$0xff] %v887_v31  ;;  %v4112_v48 = vadd.f32 %v1816_v0, %v1811_v12  ;;  %v2478_v31 = vld [vmem:[#allocation3 + $0x293] sm:$0xff]  ;;  %v4125_v12 = vstv %s4068_s25  ;;  %v1314_v56 = vmul.f32 %v3964_v36, %v1304_v13  ;;  %v4131_v59 = vadd.f32 %v1900_v2, %v1895_v42  ;;  %s4387_s25 = sld [smem:[#allocation4 + $0x19]] }
 0x226   :  { %5924 = vst [vmem:[#allocation18_spill] sm:$0xff] %v4114_v23  ;;  %v4118_v55 = vadd.f32 %v1815_v21, %v1810_v63  ;;  %v1696_v30 = vld [vmem:[#allocation3 + $0x2af] sm:$0xff]  ;;  %v2292_v52 = vmul.f32 %v4033_v37, %v2282_v32  ;;  %v4138_v6 = vadd.f32 %v1508_v34, %v1503_v58  ;;  %v4140_v14 = vadd.f32 %v1704_v35, %v1699_v1 }
 0x227   :  { %5923 = vst [vmem:[#allocation17_spill] sm:$0xff] %v4112_v48  ;;  %1174 = vrot.lane.b32.xlu0 %v3330_v33, %s3383_s28  ;;  %3243 = vrot.lane.b32.xlu2 %v5927_v29, %s3382_s27  ;;  %v2088_v0 = vld [vmem:[#allocation3 + $0x2b1] sm:$0xff]  ;;  %v2097_v57 = vmul.f32 %v4027_v28, %v2087_v24  ;;  %v2287_v36 = vmul.f32 %v4024_v17, %v2278_v54 }
 0x228   :  { %5925 = vst [vmem:[#allocation19_spill] sm:$0xff] %v4118_v55  ;;  %3263 = vrot.lane.b32.xlu1 %v5927_v29, %s3383_s28  ;;  %v2284_v42 = vld [vmem:[#allocation3 + $0x2b2] sm:$0xff]  ;;  %v1510_v21 = vmul.f32 %v3967_v39, %v1500_v51  ;;  %v4149_v13 = vadd.f32 %v2096_v26, %v2091_v15  ;;  %v2483_v34 = vmul.f32 %v4030_v45, %v2474_v16  ;;  %v4385_v55 = vstv %s4289_s16  ;;  %s4693_s16 = sld [smem:[#allocation4 + $0x14]] }
 0x229   :  { %5928 = vst [vmem:[#allocation21_spill] sm:$0xff] %v4131_v59  ;;  %v875_v2 = vpop.permute.xlu0 %874  ;;  %v4146_v63 = vpop.permute.xlu2 %3153  ;;  %v2488_v35 = vmul.f32 %v4036_v40, %v2478_v31  ;;  %v2480_v32 = vld [vmem:[#allocation3 + $0x2b3] sm:$0xff]  ;;  %v2477_v58 = vld [vmem:[#allocation3 + $0x28b] sm:$0xff]  ;;  %v1706_v54 = vmul.f32 %v3973_v47, %v1696_v30  ;;  %v1902_v1 = vmul.f32 %v3933_v22, %v1892_v25  ;;  %v2293_v33 = vmul.f32 %v4033_v37, %v2283_v46 }
 0x22a   :  { %5929 = vst [vmem:[#allocation22_spill] sm:$0xff] %v4138_v6  ;;  %v3155_v17 = vunpack.i.l.bf16 %v4146_v63  ;;  %v3149_v24 = vpop.permute.xlu1 %3148  ;;  %v4162_v39 = vadd.f32 %v1314_v56, %v4050_v60  ;;  %v2098_v16 = vmul.f32 %v4027_v28, %v2088_v0  ;;  %v4165_v51 = vadd.f32 %v2292_v52, %v2287_v36  ;;  %v2473_v15 = vld [vmem:[#allocation3 + $0xcb] sm:$0xff] }
 0x22b   :  { %5930 = vst [vmem:[#allocation23_spill] sm:$0xff] %v4140_v14  ;;  %v2294_v26 = vmul.f32 %v4033_v37, %v2284_v42  ;;  %v4172_v22 = vadd.f32 %v2097_v57, %v4063_v4  ;;  %v2490_v31 = vmul.f32 %v4036_v40, %v2480_v32  ;;  %v2487_v46 = vmul.f32 %v4036_v40, %v2477_v58  ;;  %v1213_v60 = vld [vmem:[#allocation3 + $0x5] sm:$0xff]  ;;  %v2026_v48 = vld [vmem:[#allocation3 + $0x51] sm:$0xff] }
 0x22c   :  { %5931 = vst [vmem:[#allocation24_spill] sm:$0xff] %v4149_v13  ;;  %v889_v47 = vsel %vm480_vm3, %v3155_v17, %v875_v2  ;;  %v3151_v56 = vunpack.i.h.bf16 %v3149_v24  ;;  %v3150_v37 = vunpack.i.l.bf16 %v3149_v24  ;;  %v4180_v30 = vadd.f32 %v1510_v21, %v4053_v61  ;;  %v1409_v25 = vld [vmem:[#allocation3 + $0x6] sm:$0xff]  ;;  %v1606_v24 = vld [vmem:[#allocation3 + $0xf] sm:$0xff] }
 0x22d   :  { %5932 = vst [vmem:[#allocation25_spill] sm:$0xff] %v4162_v39  ;;  %v1817_v28 = vmul.f32 %v4087_v11, %v889_v47  ;;  %v1605_v52 = vld [vmem:[#allocation3 + $0x7] sm:$0xff]  ;;  %v4185_v4 = vadd.f32 %v1706_v54, %v4056_v62  ;;  %v4188_v0 = vadd.f32 %v1902_v1, %v4060_v3  ;;  %v4190_v57 = vadd.f32 %v2488_v35, %v2483_v34  ;;  %v3332_v13 = vld [vmem:[#allocation3 + $0x50] sm:$0xff] }
 0x22e   :  { %5933 = vst [vmem:[#allocation26_spill] sm:$0xff] %v4165_v51  ;;  %v2482_v36 = vmul.f32 %v4030_v45, %v2473_v15  ;;  %v1812_v42 = vmul.f32 %v4045_v49, %v3777_v41  ;;  %v4200_v61 = vadd.f32 %v2098_v16, %v4066_v5  ;;  %v4203_v62 = vadd.f32 %v2294_v26, %v4079_v10  ;;  %v1214_v21 = vld [vmem:[#allocation3 + $0xd] sm:$0xff] }
 0x22f   :  { %5934 = vst [vmem:[#allocation27_spill] sm:$0xff] %v4172_v22  ;;  %3273 = vrot.lane.b32.xlu0 %v5927_v29, %s3383_s28  ;;  %v4207_v3 = vadd.f32 %v4110_v38, %v4092_v27  ;;  %v4210_v2 = vmul.f32 %v4039_v43, %v1213_v60  ;;  %3248 = vrot.lane.b32.xlu2 %v5927_v29, %s3382_s27  ;;  %v1410_v34 = vld [vmem:[#allocation3 + $0xe] sm:$0xff]  ;;  %v4238_v58 = vstv %s4134_s29  ;;  %v4241_v17 = vstv %s4144_s30  ;;  %s4401_s29 = sld [smem:[#allocation4 + $0x4]] }
 0x230   :  { %906 = vst [vmem:[#allocation3 + $0x1e8] sm:$0xff] %v889_v47  ;;  %v4217_v41 = vadd.f32 %v2490_v31, %v4082_v20  ;;  %v4219_v5 = vadd.f32 %v2487_v46, %v2482_v36  ;;  %v4222_v10 = vadd.f32 %v2293_v33, %v4076_v18  ;;  %v4225_v27 = vmul.f32 %v4042_v44, %v1409_v25  ;;  %v1997_v16 = vld [vmem:[#allocation3 + $0x9] sm:$0xff]  ;;  %v1998_v26 = vld [vmem:[#allocation3 + $0x11] sm:$0xff]  ;;  %v3331_v46 = vld [vmem:[#allocation2] sm:$0xff]  ;;  %s4414_s30 = sld [smem:[#allocation4 + $0xb]] }
 0x231   :  { %5935 = vst [vmem:[#allocation28_spill] sm:$0xff] %v4180_v30  ;;  %v4228_v38 = vmul.f32 %v4125_v12, %v1605_v52  ;;  %v4232_v35 = vadd.f32 %v1817_v28, %v1812_v42  ;;  %v888_v20 = vsel %vm480_vm3, %v3150_v37, %v3151_v56  ;;  %3268 = vrot.lane.b32.xlu1 %v5927_v29, %s3383_s28  ;;  %v3164_v32 = vpop.permute.xlu0 %3163  ;;  %v3159_v18 = vpop.permute.xlu2 %3158  ;;  %v3156_v54 = vunpack.i.h.bf16 %v4146_v63  ;;  %v2193_v15 = vld [vmem:[#allocation3 + $0xa] sm:$0xff]  ;;  %v2194_v37 = vld [vmem:[#allocation3 + $0x12] sm:$0xff] }
 0x232   :  { %5936 = vst [vmem:[#allocation29_spill] sm:$0xff] %v4185_v4  ;;  %v3166_v1 = vunpack.i.h.bf16 %v3164_v32  ;;  %v879_v33 = vpop.permute.xlu1 %878  ;;  %v3165_v29 = vunpack.i.l.bf16 %v3164_v32  ;;  %v3161_v47 = vunpack.i.h.bf16 %v3159_v18  ;;  %v3160_v31 = vunpack.i.l.bf16 %v3159_v18  ;;  %v2389_v25 = vld [vmem:[#allocation3 + $0xb] sm:$0xff]  ;;  %v2390_v36 = vld [vmem:[#allocation3 + $0x13] sm:$0xff] }
 0x233   :  { %5937 = vst [vmem:[#allocation30_spill] sm:$0xff] %v4188_v0  ;;  %v4248_v60 = vpack.i.bf16 %v3331_v46, %v3331_v46  ;;  %v4251_v28 = vstv %s4153_s3  ;;  %v4254_v56 = vmul.f32 %v4039_v43, %v1214_v21  ;;  %v4257_v63 = vmul.f32 %v4042_v44, %v1410_v34  ;;  %v2417_v0 = vld [vmem:[#allocation3 + $0x4b] sm:$0xff]  ;;  %s4434_s3 = sld [smem:[#allocation4 + $0x12]] }
 0x234   :  { %5938 = vst [vmem:[#allocation31_spill] sm:$0xff] %v4190_v57  ;;  %v890_v52 = vsel %vm480_vm3, %v3156_v54, %v879_v33  ;;  %v1813_v42 = vmul.f32 %v4045_v49, %v3787_v50  ;;  %v891_v21 = vsel %vm480_vm3, %v3160_v31, %v3161_v47  ;;  %v4270_v32 = vmul.f32 %v4125_v12, %v1606_v24  ;;  %v1215_v49 = vld [vmem:[#allocation3 + $0x25] sm:$0xff]  ;;  %v1608_v47 = vld [vmem:[#allocation3 + $0x2f] sm:$0xff] }
 0x235   :  { %5939 = vst [vmem:[#allocation32_spill] sm:$0xff] %v4200_v61  ;;  %v1818_v34 = vmul.f32 %v4087_v11, %v890_v52  ;;  %v4273_v18 = vmul.f32 %v4238_v58, %v1997_v16  ;;  %v4276_v54 = vmul.f32 %v4238_v58, %v1998_v26  ;;  %v4279_v50 = vmul.f32 %v4241_v17, %v2193_v15  ;;  %v1607_v33 = vld [vmem:[#allocation3 + $0x27] sm:$0xff]  ;;  %v3335_v6 = vld [vmem:[#allocation3 + $0x70] sm:$0xff] }
 0x236   :  { %5940 = vst [vmem:[#allocation33_spill] sm:$0xff] %v4203_v62  ;;  %v4284_v11 = vmul.f32 %v4241_v17, %v2194_v37  ;;  %v4287_v24 = vmul.f32 %v4251_v28, %v2389_v25  ;;  %v1216_v16 = vld [vmem:[#allocation3 + $0x2d] sm:$0xff]  ;;  %v4296_v15 = vmul.f32 %v4251_v28, %v2390_v36  ;;  %v4299_v46 = vstv %s4159_s4  ;;  %s4436_s4 = sld [smem:[#allocation4 + $0x20]] }
 0x237   :  { %5941 = vst [vmem:[#allocation34_spill] sm:$0xff] %v4207_v3  ;;  %v4291_v26 = vadd.f32 %v1818_v34, %v1813_v42  ;;  %3288 = vrot.lane.b32.xlu0 %v4248_v60, %s3381_s26  ;;  %v1999_v31 = vld [vmem:[#allocation3 + $0x29] sm:$0xff]  ;;  %v4302_v37 = vstv %s4168_s5  ;;  %v4305_v25 = vstv %s4176_s6  ;;  %3258 = vrot.lane.b32.xlu2 %v4248_v60, %s3382_s27  ;;  %v4316_v42 = vmul.f32 %v4125_v12, %v1607_v33  ;;  %s4444_s5 = sld [smem:[#allocation4 + $0x27]] }
 0x238   :  { %5942 = vst [vmem:[#allocation35_spill] sm:$0xff] %v4217_v41  ;;  %v2391_v34 = vld [vmem:[#allocation3 + $0x2b] sm:$0xff]  ;;  %v4319_v45 = vstv %s4182_s7  ;;  %v4326_v41 = vmul.f32 %v4039_v43, %v1216_v16  ;;  %v4332_v33 = vstv %s4212_s9  ;;  %v4335_v57 = vstv %s4230_s10  ;;  %s4455_s6 = sld [smem:[#allocation4 + $0x2e]] }
 0x239   :  { %5943 = vst [vmem:[#allocation36_spill] sm:$0xff] %v4219_v5  ;;  %3278 = vrot.lane.b32.xlu1 %v4248_v60, %s3383_s28  ;;  %v920_v40 = vpop.permute.xlu0 %919  ;;  %v4329_v5 = vstv %s4195_s8  ;;  %v4341_v3 = vmul.f32 %v4125_v12, %v1608_v47  ;;  %v1437_v47 = vld [vmem:[#allocation3 + $0x46] sm:$0xff]  ;;  %v4382_v59 = vstv %s4264_s14  ;;  %s4465_s7 = sld [smem:[#allocation4 + $0x5]] }
 0x23a   :  { %5944 = vst [vmem:[#allocation37_spill] sm:$0xff] %v4222_v10  ;;  %v2392_v10 = vld [vmem:[#allocation3 + $0x33] sm:$0xff]  ;;  %v3169_v62 = vpop.permute.xlu1 %3168  ;;  %v4396_v4 = vmul.f32 %v4332_v33, %v1437_v47  ;;  %s4483_s8 = sld [smem:[#allocation4 + $0xc]] }
 0x23b   :  { %5945 = vst [vmem:[#allocation38_spill] sm:$0xff] %v4232_v35  ;;  %v3171_v51 = vunpack.i.h.bf16 %v3169_v62  ;;  %v3170_v61 = vunpack.i.l.bf16 %v3169_v62  ;;  %v4353_v35 = vmul.f32 %v4251_v28, %v2391_v34  ;;  %v4359_v62 = vmul.f32 %v4251_v28, %v2392_v10  ;;  %v1634_v34 = vld [vmem:[#allocation3 + $0x4f] sm:$0xff]  ;;  %s4494_s9 = sld [smem:[#allocation4 + $0x13]] }
 0x23c   :  { %905 = vst [vmem:[#allocation3 + $0x1e0] sm:$0xff] %v888_v20  ;;  %v941_v20 = vsel %vm537_vm4, %v3165_v29, %v3166_v1  ;;  %v1411_v1 = vld [vmem:[#allocation3 + $0x26] sm:$0xff]  ;;  %v1412_v29 = vld [vmem:[#allocation3 + $0x2e] sm:$0xff]  ;;  %v4375_v28 = vstv %s4281_s15  ;;  %s4509_s10 = sld [smem:[#allocation4 + $0x1a]] }
 0x23d   :  { %907 = vst [vmem:[#allocation3 + $0x1f0] sm:$0xff] %v890_v52  ;;  %v4310_v52 = vmul.f32 %v4039_v43, %v1215_v49  ;;  %v4313_v36 = vmul.f32 %v4042_v44, %v1411_v1  ;;  %v916_v49 = vpop.permute.xlu2 %915  ;;  %v2196_v1 = vld [vmem:[#allocation3 + $0x32] sm:$0xff]  ;;  %v4338_v22 = vmul.f32 %v4042_v44, %v1412_v29  ;;  %v4344_v43 = vmul.f32 %v4238_v58, %v1999_v31  ;;  %v1241_v44 = vld [vmem:[#allocation3 + $0x45] sm:$0xff]  ;;  %s4668_s14 = sld [smem:[#allocation4 + $0x6]] }
 0x23e   :  { %958 = vst [vmem:[#allocation3 + $0x200] sm:$0xff] %v941_v20  ;;  %v2000_v20 = vld [vmem:[#allocation3 + $0x31] sm:$0xff]  ;;  %v4356_v12 = vmul.f32 %v4241_v17, %v2196_v1  ;;  %v942_v10 = vsel %vm537_vm4, %v3170_v61, %v916_v49  ;;  %v2025_v1 = vld [vmem:[#allocation3 + $0x49] sm:$0xff]  ;;  %v4390_v61 = vmul.f32 %v4329_v5, %v1241_v44  ;;  %v4409_v44 = vmul.f32 %v4335_v57, %v1634_v34  ;;  %s4679_s15 = sld [smem:[#allocation4 + $0xd]] }
 0x23f   :  { %908 = vst [vmem:[#allocation3 + $0x1f8] sm:$0xff] %v891_v21  ;;  %v2195_v21 = vld [vmem:[#allocation3 + $0x2a] sm:$0xff]  ;;  %v4347_v16 = vmul.f32 %v4238_v58, %v2000_v20  ;;  %v4362_v58 = vmul.f32 %v3332_v13, %v4299_v46  ;;  %v943_v20 = vsel %vm537_vm4, %v3171_v51, %v920_v40  ;;  %v4379_v51 = vstv %s4259_s13  ;;  %3303 = vrot.lane.b32.xlu0 %v4248_v60, %s3383_s28  ;;  %s4564_s13 = sld [smem:[#allocation4 + $0x48]] }
 0x240   :  { %5946 = vst [vmem:[#allocation39_spill] sm:$0xff] %v4291_v26  ;;  %v4350_v53 = vmul.f32 %v4241_v17, %v2195_v21  ;;  %v1242_v29 = vld [vmem:[#allocation3 + $0x4d] sm:$0xff]  ;;  %v4369_v17 = vstv %s4246_s12  ;;  %v1843_v30 = vmul.f32 %v4375_v28, %v942_v10  ;;  %v4423_v34 = vmul.f32 %v3335_v6, %v4299_v46  ;;  %s4549_s12 = sld [smem:[#allocation4 + $0x2f]] }
 0x241   :  { %5947 = vst [vmem:[#allocation40_spill] sm:$0xff] %v4319_v45  ;;  %v1438_v31 = vld [vmem:[#allocation3 + $0x4e] sm:$0xff]  ;;  %v4393_v49 = vmul.f32 %v4329_v5, %v1242_v29  ;;  %v4412_v29 = vstv %s4321_s23  ;;  %3293 = vrot.lane.b32.xlu1 %v4248_v60, %s3382_s27  ;;  %v4426_v39 = vmul.f32 %v4302_v37, %v2025_v1  ;;  %s4701_s23 = sld [smem:[#allocation4 + $0x22]] }
 0x242   :  { %5948 = vst [vmem:[#allocation41_spill] sm:$0xff] %v4341_v3  ;;  %v1633_v21 = vld [vmem:[#allocation3 + $0x47] sm:$0xff]  ;;  %v3334_v47 = vld [vmem:[#allocation3 + $0x290] sm:$0xff]  ;;  %v3174_v23 = vpop.permute.xlu1 %3173 }
 0x243   :  { %5949 = vst [vmem:[#allocation42_spill] sm:$0xff] %v4344_v43  ;;  %v2221_v13 = vld [vmem:[#allocation3 + $0x4a] sm:$0xff]  ;;  %v4406_v9 = vmul.f32 %v4335_v57, %v1633_v21  ;;  %1162 = vrot.lane.b32.xlu2 %v3334_v47, %s3383_s28  ;;  %v2222_v21 = vld [vmem:[#allocation3 + $0x52] sm:$0xff]  ;;  %v4432_v47 = vmul.f32 %v4319_v45, %v2417_v0 }
 0x244   :  { %5950 = vst [vmem:[#allocation43_spill] sm:$0xff] %v4347_v16  ;;  %v3333_v26 = vld [vmem:[#allocation3 + $0x48] sm:$0xff]  ;;  %v4429_v7 = vmul.f32 %v4305_v25, %v2221_v13  ;;  %v2028_v1 = vld [vmem:[#allocation3 + $0x71] sm:$0xff] }
 0x245   :  { %5951 = vst [vmem:[#allocation44_spill] sm:$0xff] %v4350_v53  ;;  %v1838_v40 = vmul.f32 %v3333_v26, %v4299_v46  ;;  %v4399_v26 = vmul.f32 %v4332_v33, %v1438_v31  ;;  %v4419_v31 = vpop.permute.xlu0 %3183  ;;  %v3179_v14 = vpop.permute.xlu2 %3178  ;;  %v2224_v13 = vld [vmem:[#allocation3 + $0x72] sm:$0xff]  ;;  %v3336_v0 = vld [vmem:[#allocation3 + $0x68] sm:$0xff] }
 0x246   :  { %5952 = vst [vmem:[#allocation45_spill] sm:$0xff] %v4353_v35  ;;  %v4366_v35 = vstv %s4243_s11  ;;  %v3180_v6 = vunpack.i.l.bf16 %v3179_v14  ;;  %s4517_s11 = sld [smem:[#allocation4 + $0x21]]  ;;  %v2448_v53 = vld [vmem:[#allocation3 + $0xb3] sm:$0xff] }
 0x247   :  { %5953 = vst [vmem:[#allocation46_spill] sm:$0xff] %v4356_v12  ;;  %v4460_v12 = vmul.f32 %v4329_v5, %v1243_v8  ;;  %v2502_v3 = vld [vmem:[#allocation3 + $0x113] sm:$0xff] }
 0x248   :  { %5954 = vst [vmem:[#allocation47_spill] sm:$0xff] %v4359_v62  ;;  %v1636_v62 = vld [vmem:[#allocation3 + $0x6f] sm:$0xff] }
 0x249   :  { %960 = vst [vmem:[#allocation3 + $0x210] sm:$0xff] %v943_v20  ;;  %3308 = vrot.lane.b32.xlu1 %v4248_v60, %s3383_s28 }
 0x24a   :  { %959 = vst [vmem:[#allocation3 + $0x208] sm:$0xff] %v942_v10  ;;  %v1244_v10 = vld [vmem:[#allocation3 + $0x6d] sm:$0xff] }
 0x24b   :  { %5955 = vst [vmem:[#allocation48_spill] sm:$0xff] %v4390_v61  ;;  %v4447_v61 = vadd.f32 %v1843_v30, %v1838_v40  ;;  %v4463_v30 = vmul.f32 %v4329_v5, %v1244_v10  ;;  %v2223_v40 = vld [vmem:[#allocation3 + $0x6a] sm:$0xff] }
 0x24c   :  { %5956 = vst [vmem:[#allocation49_spill] sm:$0xff] %v4393_v49  ;;  %v1439_v49 = vld [vmem:[#allocation3 + $0x66] sm:$0xff] }
 0x24d   :  { %5957 = vst [vmem:[#allocation50_spill] sm:$0xff] %v4396_v4  ;;  %v4439_v4 = vmul.f32 %v4302_v37, %v2026_v48  ;;  %v1440_v48 = vld [vmem:[#allocation3 + $0x6e] sm:$0xff]  ;;  %v4481_v5 = vmul.f32 %v4332_v33, %v1439_v49  ;;  %v1269_v10 = vld [vmem:[#allocation3 + $0x85] sm:$0xff]  ;;  %v3185_v49 = vunpack.i.l.bf16 %v4419_v31 }
 0x24e   :  { %5958 = vst [vmem:[#allocation51_spill] sm:$0xff] %v4399_v26  ;;  %v3175_v26 = vunpack.i.l.bf16 %v3174_v23 }
 0x24f   :  { %5959 = vst [vmem:[#allocation52_spill] sm:$0xff] %v4406_v9  ;;  %v3176_v9 = vunpack.i.h.bf16 %v3174_v23  ;;  %v4453_v23 = vmul.f32 %v4319_v45, %v2418_v19  ;;  %v3186_v19 = vunpack.i.h.bf16 %v4419_v31  ;;  %v936_v31 = vpop.permute.xlu2 %935 }
 0x250   :  { %5960 = vst [vmem:[#allocation53_spill] sm:$0xff] %v4409_v44  ;;  %v3181_v44 = vunpack.i.h.bf16 %v3179_v14  ;;  %v4450_v14 = vmul.f32 %v4305_v25, %v2222_v21 }
 0x251   :  { %5961 = vst [vmem:[#allocation54_spill] sm:$0xff] %v4426_v39  ;;  %v1844_v39 = vmul.f32 %v4375_v28, %v943_v20  ;;  %v2027_v20 = vld [vmem:[#allocation3 + $0x69] sm:$0xff] }
 0x252   :  { %5962 = vst [vmem:[#allocation55_spill] sm:$0xff] %v4429_v7  ;;  %v2420_v7 = vld [vmem:[#allocation3 + $0x73] sm:$0xff] }
 0x253   :  { %5963 = vst [vmem:[#allocation56_spill] sm:$0xff] %v4432_v47  ;;  %v4442_v47 = vmul.f32 %v3336_v0, %v4299_v46  ;;  %v945_v46 = vsel %vm537_vm4, %v3180_v6, %v3181_v44  ;;  %v944_v0 = vsel %vm537_vm4, %v3175_v26, %v3176_v9  ;;  %v4469_v21 = vadd.f32 %v1844_v39, %v4362_v58  ;;  %v1465_v6 = vld [vmem:[#allocation3 + $0x86] sm:$0xff] }
 0x254   :  { %5964 = vst [vmem:[#allocation57_spill] sm:$0xff] %v4439_v4  ;;  %v1635_v4 = vld [vmem:[#allocation3 + $0x67] sm:$0xff]  ;;  %v4472_v44 = vmul.f32 %v4302_v37, %v2028_v1  ;;  %v4475_v9 = vmul.f32 %v4305_v25, %v2224_v13  ;;  %v4478_v8 = vmul.f32 %v4319_v45, %v2420_v7  ;;  %v4486_v26 = vmul.f32 %v4332_v33, %v1440_v48 }
 0x255   :  { %5965 = vst [vmem:[#allocation58_spill] sm:$0xff] %v4447_v61  ;;  %v4489_v39 = vmul.f32 %v4335_v57, %v1635_v4  ;;  %v4492_v58 = vmul.f32 %v4335_v57, %v1636_v62  ;;  %v1661_v7 = vld [vmem:[#allocation3 + $0x87] sm:$0xff]  ;;  %v4498_v1 = vmul.f32 %v4302_v37, %v2027_v20  ;;  %v4501_v13 = vmul.f32 %v4305_v25, %v2223_v40  ;;  %v3338_v62 = vld [vmem:[#allocation3 + $0x2b0] sm:$0xff]  ;;  %v3189_v37 = vpop.permute.xlu0 %3188 }
 0x256   :  { %5966 = vst [vmem:[#allocation59_spill] sm:$0xff] %v4450_v14  ;;  %v3337_v33 = vld [vmem:[#allocation3 + $0x88] sm:$0xff]  ;;  %v4507_v48 = vstv %s4371_s24  ;;  %1178 = vrot.lane.b32.xlu2 %v3338_v62, %s3383_s28  ;;  %v3190_v45 = vunpack.i.l.bf16 %v3189_v37  ;;  %v947_v61 = vsel %vm537_vm4, %v3186_v19, %v936_v31  ;;  %v932_v62 = vpop.permute.xlu1 %931  ;;  %s4529_s28 = sld [smem:[#allocation4 + $0x28]]  ;;  %v2250_v31 = vld [vmem:[#allocation3 + $0x92] sm:$0xff] }
 0x257   :  { %5967 = vst [vmem:[#allocation60_spill] sm:$0xff] %v4453_v23  ;;  %v4504_v4 = vmul.f32 %v3337_v33, %v4382_v59  ;;  %v1270_v57 = vld [vmem:[#allocation3 + $0x8d] sm:$0xff]  ;;  %v3191_v33 = vunpack.i.h.bf16 %v3189_v37  ;;  %v1846_v37 = vmul.f32 %v4375_v28, %v947_v61  ;;  %s4721_s24 = sld [smem:[#allocation4 + $0x30]] }
 0x258   :  { %5968 = vst [vmem:[#allocation61_spill] sm:$0xff] %v4460_v12  ;;  %v1662_v25 = vld [vmem:[#allocation3 + $0x8f] sm:$0xff]  ;;  %v4533_v19 = vmul.f32 %v4366_v35, %v1270_v57 }
 0x259   :  { %5969 = vst [vmem:[#allocation62_spill] sm:$0xff] %v4463_v30  ;;  %v2053_v40 = vld [vmem:[#allocation3 + $0x89] sm:$0xff]  ;;  %v2056_v30 = vld [vmem:[#allocation3 + $0xb1] sm:$0xff] }
 0x25a   :  { %962 = vst [vmem:[#allocation3 + $0x220] sm:$0xff] %v945_v46  ;;  %v1466_v46 = vld [vmem:[#allocation3 + $0x8e] sm:$0xff] }
 0x25b   :  { %5970 = vst [vmem:[#allocation63_spill] sm:$0xff] %v4469_v21  ;;  %v4521_v21 = vmul.f32 %v4366_v35, %v1269_v10  ;;  %v2446_v10 = vld [vmem:[#allocation3 + $0x93] sm:$0xff] }
 0x25c   :  { %5971 = vst [vmem:[#allocation64_spill] sm:$0xff] %v4472_v44  ;;  %v2252_v12 = vld [vmem:[#allocation3 + $0xb2] sm:$0xff] }
 0x25d   :  { %5972 = vst [vmem:[#allocation65_spill] sm:$0xff] %v4475_v9 }
 0x25e   :  { %5973 = vst [vmem:[#allocation66_spill] sm:$0xff] %v4478_v8  ;;  %3283 = vrot.lane.b32.xlu2 %v4248_v60, %s3381_s26  ;;  %s4651_s26 = sld [smem:[#allocation4 + $0x1b]] }
 0x25f   :  { %5974 = vst [vmem:[#allocation67_spill] sm:$0xff] %v4481_v5  ;;  %v4620_v5 = vstv %s4529_s28  ;;  %s5042_s28 = sld [smem:[#allocation4 + $0x4b]] }
 0x260   :  { %961 = vst [vmem:[#allocation3 + $0x218] sm:$0xff] %v944_v0  ;;  %v3339_v0 = vld [vmem:[#allocation3 + $0x90] sm:$0xff] }
 0x261   :  { %5975 = vst [vmem:[#allocation68_spill] sm:$0xff] %v4486_v26  ;;  %v4515_v20 = vmul.f32 %v3339_v0, %v4382_v59  ;;  %v2054_v0 = vld [vmem:[#allocation3 + $0x91] sm:$0xff]  ;;  %v4617_v26 = vstv %s4517_s11  ;;  %s5028_s11 = sld [smem:[#allocation4 + $0x39]] }
 0x262   :  { %5976 = vst [vmem:[#allocation69_spill] sm:$0xff] %v4489_v39  ;;  %v2445_v39 = vld [vmem:[#allocation3 + $0x8b] sm:$0xff] }
 0x263   :  { %5977 = vst [vmem:[#allocation70_spill] sm:$0xff] %v4492_v58  ;;  %v2249_v58 = vld [vmem:[#allocation3 + $0x8a] sm:$0xff] }
 0x264   :  { %5978 = vst [vmem:[#allocation71_spill] sm:$0xff] %v4498_v1  ;;  %v4527_v1 = vmul.f32 %v4379_v51, %v1661_v7  ;;  %v946_v7 = vsel %vm537_vm4, %v3185_v49, %v932_v62  ;;  %v4555_v49 = vmul.f32 %v4385_v55, %v2054_v0  ;;  %v4558_v57 = vmul.f32 %v4412_v29, %v2249_v58 }
 0x265   :  { %5979 = vst [vmem:[#allocation72_spill] sm:$0xff] %v4501_v13  ;;  %v4524_v13 = vmul.f32 %v4369_v17, %v1465_v6  ;;  %v948_v6 = vsel %vm537_vm4, %v3190_v45, %v3191_v33  ;;  %v4552_v45 = vadd.f32 %v1846_v37, %v4423_v34  ;;  %v4570_v34 = vmul.f32 %v4507_v48, %v2446_v10  ;;  %v3340_v33 = vld [vmem:[#allocation3 + $0xb0] sm:$0xff] }
 0x266   :  { %5980 = vst [vmem:[#allocation73_spill] sm:$0xff] %v4507_v48  ;;  %v4573_v58 = vmul.f32 %v3340_v33, %v4382_v59  ;;  %v4579_v62 = vstv %s4414_s30  ;;  %v4585_v0 = vstv %s4436_s4  ;;  %v1272_v10 = vld [vmem:[#allocation3 + $0xad] sm:$0xff]  ;;  %3298 = vrot.lane.b32.xlu2 %v4248_v60, %s3382_s27  ;;  %s4712_s27 = sld [smem:[#allocation4 + $0x29]] }
 0x267   :  { %5981 = vst [vmem:[#allocation74_spill] sm:$0xff] %v4521_v21  ;;  %v4536_v21 = vstv %s4387_s25  ;;  %v4626_v14 = vmul.f32 %v4366_v35, %v1272_v10  ;;  %v1523_v60 = vld [vmem:[#allocation3 + $0x126] sm:$0xff]  ;;  %s4775_s25 = sld [smem:[#allocation4 + $0x4d]] }
 0x268   :  { %5982 = vst [vmem:[#allocation75_spill] sm:$0xff] %v4524_v13  ;;  %v4544_v13 = vmul.f32 %v4379_v51, %v1662_v25  ;;  %v1845_v25 = vmul.f32 %v4375_v28, %v946_v7  ;;  %v4582_v28 = vstv %s4434_s3  ;;  %s4800_s30 = sld [smem:[#allocation4 + $0x4a]] }
 0x269   :  { %5983 = vst [vmem:[#allocation76_spill] sm:$0xff] %v4527_v1  ;;  %v4541_v1 = vmul.f32 %v4369_v17, %v1466_v46  ;;  %v4561_v46 = vmul.f32 %v4507_v48, %v2445_v39  ;;  %v4576_v39 = vstv %s4401_s29  ;;  %s4792_s29 = sld [smem:[#allocation4 + $0x54]] }
 0x26a   :  { %964 = vst [vmem:[#allocation3 + $0x230] sm:$0xff] %v947_v61  ;;  %v4547_v61 = vmul.f32 %v4385_v55, %v2053_v40  ;;  %v4567_v40 = vmul.f32 %v4412_v29, %v2250_v31  ;;  %v4588_v37 = vadd.f32 %v1845_v25, %v4442_v47  ;;  %v1271_v31 = vld [vmem:[#allocation3 + $0xa5] sm:$0xff]  ;;  %v973_v47 = vpop.permute.xlu0 %972  ;;  %v4604_v25 = vpop.permute.xlu2 %3198  ;;  %s4814_s3 = sld [smem:[#allocation4 + $0x5b]] }
 0x26b   :  { %5984 = vst [vmem:[#allocation77_spill] sm:$0xff] %v4533_v19  ;;  %v2251_v19 = vld [vmem:[#allocation3 + $0xaa] sm:$0xff]  ;;  %v4623_v23 = vmul.f32 %v4366_v35, %v1271_v31  ;;  %v4639_v35 = vstv %s4549_s12  ;;  %s4836_s4 = sld [smem:[#allocation4 + $0x31]] }
 0x26c   :  { %5985 = vst [vmem:[#allocation78_spill] sm:$0xff] %v4541_v1  ;;  %v2055_v1 = vld [vmem:[#allocation3 + $0xa9] sm:$0xff]  ;;  %v2110_v31 = vld [vmem:[#allocation3 + $0x111] sm:$0xff]  ;;  %s5053_s12 = sld [smem:[#allocation4 + $0x40]] }
 0x26d   :  { %5986 = vst [vmem:[#allocation79_spill] sm:$0xff] %v4544_v13  ;;  %v1664_v13 = vld [vmem:[#allocation3 + $0xaf] sm:$0xff] }
 0x26e   :  { %5987 = vst [vmem:[#allocation80_spill] sm:$0xff] %v4547_v61  ;;  %v3194_v61 = vpop.permute.xlu1 %3193 }
 0x26f   :  { %965 = vst [vmem:[#allocation3 + $0x238] sm:$0xff] %v948_v6  ;;  %v1467_v6 = vld [vmem:[#allocation3 + $0xa6] sm:$0xff]  ;;  %v3196_v8 = vunpack.i.h.bf16 %v3194_v61  ;;  %v3195_v9 = vunpack.i.l.bf16 %v3194_v61 }
 0x270   :  { %5988 = vst [vmem:[#allocation81_spill] sm:$0xff] %v4552_v45  ;;  %v4607_v45 = vstv %s4483_s8  ;;  %v4629_v44 = vmul.f32 %v4369_v17, %v1467_v6  ;;  %v4643_v6 = vmul.f32 %v4379_v51, %v1664_v13  ;;  %v1718_v13 = vld [vmem:[#allocation3 + $0x10f] sm:$0xff]  ;;  %s5006_s8 = sld [smem:[#allocation4 + $0x55]] }
 0x271   :  { %5989 = vst [vmem:[#allocation82_spill] sm:$0xff] %v4555_v49  ;;  %v1663_v49 = vld [vmem:[#allocation3 + $0xa7] sm:$0xff]  ;;  %v998_v10 = vsel %vm595_vm5, %v3195_v9, %v3196_v8  ;;  %v4663_v9 = vmul.f32 %v4507_v48, %v2448_v53 }
 0x272   :  { %5990 = vst [vmem:[#allocation83_spill] sm:$0xff] %v4558_v57  ;;  %v3200_v57 = vunpack.i.l.bf16 %v4604_v25  ;;  %v4636_v61 = vmul.f32 %v4379_v51, %v1663_v49  ;;  %v1326_v49 = vld [vmem:[#allocation3 + $0x10d] sm:$0xff]  ;;  %v4660_v51 = vmul.f32 %v4412_v29, %v2252_v12  ;;  %v4674_v12 = vmul.f32 %v4585_v0, %v2110_v31  ;;  %v3204_v31 = vpop.permute.xlu2 %3203 }
 0x273   :  { %5991 = vst [vmem:[#allocation84_spill] sm:$0xff] %v4561_v46  ;;  %v4597_v46 = vstv %s4455_s6  ;;  %v1522_v8 = vld [vmem:[#allocation3 + $0x10e] sm:$0xff]  ;;  %s4857_s6 = sld [smem:[#allocation4 + $0x3f]] }
 0x274   :  { %963 = vst [vmem:[#allocation3 + $0x228] sm:$0xff] %v946_v7  ;;  %v3341_v7 = vld [vmem:[#allocation3 + $0xa8] sm:$0xff]  ;;  %v999_v16 = vsel %vm595_vm5, %v3200_v57, %v973_v47  ;;  %v4646_v57 = vmul.f32 %v4385_v55, %v2055_v1 }
 0x275   :  { %5992 = vst [vmem:[#allocation85_spill] sm:$0xff] %v4567_v40  ;;  %v4591_v33 = vmul.f32 %v3341_v7, %v4382_v59  ;;  %v4600_v40 = vstv %s4465_s7  ;;  %v4610_v59 = vstv %s4494_s9  ;;  %v4613_v7 = vstv %s4509_s10  ;;  %v1521_v47 = vld [vmem:[#allocation3 + $0x106] sm:$0xff]  ;;  %s4997_s7 = sld [smem:[#allocation4 + $0x4e]] }
 0x276   :  { %5993 = vst [vmem:[#allocation86_spill] sm:$0xff] %v4570_v34  ;;  %v4594_v34 = vstv %s4444_s5  ;;  %v1717_v1 = vld [vmem:[#allocation3 + $0x107] sm:$0xff]  ;;  %s4844_s5 = sld [smem:[#allocation4 + $0x38]] }
 0x277   :  { %5994 = vst [vmem:[#allocation87_spill] sm:$0xff] %v4588_v37  ;;  %v1468_v37 = vld [vmem:[#allocation3 + $0xae] sm:$0xff]  ;;  %s5015_s9 = sld [smem:[#allocation4 + $0x5c]] }
 0x278   :  { %5995 = vst [vmem:[#allocation88_spill] sm:$0xff] %v4597_v46  ;;  %v4633_v43 = vmul.f32 %v4369_v17, %v1468_v37  ;;  %v4649_v17 = vmul.f32 %v4412_v29, %v2251_v19  ;;  %v1325_v37 = vld [vmem:[#allocation3 + $0x105] sm:$0xff]  ;;  %v3344_v29 = vld [vmem:[#allocation3 + $0x110] sm:$0xff]  ;;  %s5021_s10 = sld [smem:[#allocation4 + $0x32]] }
 0x279   :  { %5996 = vst [vmem:[#allocation89_spill] sm:$0xff] %v4623_v23  ;;  %v2306_v23 = vld [vmem:[#allocation3 + $0x112] sm:$0xff]  ;;  %v3342_v19 = vld [vmem:[#allocation3 + $0x108] sm:$0xff]  ;;  %v4685_v48 = vmul.f32 %v4576_v39, %v1325_v37  ;;  %v977_v37 = vpop.permute.xlu1 %976 }
 0x27a   :  { %5997 = vst [vmem:[#allocation90_spill] sm:$0xff] %v4626_v14  ;;  %v4677_v53 = vmul.f32 %v4594_v34, %v2306_v23  ;;  %v3209_v23 = vpop.permute.xlu0 %3208  ;;  %v3351_v14 = vld [vmem:[#allocation3 + $0x190] sm:$0xff] }
 0x27b   :  { %5998 = vst [vmem:[#allocation91_spill] sm:$0xff] %v4629_v44  ;;  %v4657_v44 = vmul.f32 %v4385_v55, %v2056_v30  ;;  %v4682_v30 = vmul.f32 %v3344_v29, %v4536_v21 }
 0x27c   :  { %5999 = vst [vmem:[#allocation92_spill] sm:$0xff] %v4633_v43  ;;  %v3345_v43 = vld [vmem:[#allocation3 + $0x130] sm:$0xff] }
 0x27d   :  { %6000 = vst [vmem:[#allocation93_spill] sm:$0xff] %v4636_v61  ;;  %v4654_v61 = vstv %s4564_s13  ;;  %s5077_s13 = sld [smem:[#allocation4 + $0x33]] }
 0x27e   :  { %6001 = vst [vmem:[#allocation94_spill] sm:$0xff] %v4639_v35  ;;  %v1871_v29 = vmul.f32 %v4654_v61, %v999_v16 }
 0x27f   :  { %1016 = vst [vmem:[#allocation3 + $0x248] sm:$0xff] %v999_v16  ;;  %v3201_v16 = vunpack.i.h.bf16 %v4604_v25  ;;  %v1720_v25 = vld [vmem:[#allocation3 + $0x12f] sm:$0xff] }
 0x280   :  { %6002 = vst [vmem:[#allocation95_spill] sm:$0xff] %v4643_v6  ;;  %v3343_v6 = vld [vmem:[#allocation3 + $0x128] sm:$0xff] }
 0x281   :  { %6003 = vst [vmem:[#allocation96_spill] sm:$0xff] %v4646_v57  ;;  %v2305_v57 = vld [vmem:[#allocation3 + $0x10a] sm:$0xff]  ;;  %v4671_v55 = vmul.f32 %v3343_v6, %v4536_v21  ;;  %v4691_v6 = vmul.f32 %v4597_v46, %v2502_v3  ;;  %v4707_v3 = vmul.f32 %v4579_v62, %v1522_v8  ;;  %v3210_v8 = vunpack.i.l.bf16 %v3209_v23 }
 0x282   :  { %6004 = vst [vmem:[#allocation97_spill] sm:$0xff] %v4649_v17  ;;  %v4666_v17 = vmul.f32 %v3342_v19, %v4536_v21  ;;  %v2501_v19 = vld [vmem:[#allocation3 + $0x10b] sm:$0xff] }
 0x283   :  { %1015 = vst [vmem:[#allocation3 + $0x240] sm:$0xff] %v998_v10  ;;  %v2109_v10 = vld [vmem:[#allocation3 + $0x109] sm:$0xff] }
 0x284   :  { %6005 = vst [vmem:[#allocation98_spill] sm:$0xff] %v4657_v44  ;;  %v1719_v44 = vld [vmem:[#allocation3 + $0x127] sm:$0xff] }
 0x285   :  { %6006 = vst [vmem:[#allocation99_spill] sm:$0xff] %v4660_v51  ;;  %v1327_v51 = vld [vmem:[#allocation3 + $0x125] sm:$0xff] }
 0x286   :  { %6007 = vst [vmem:[#allocation100_spill] sm:$0xff] %v4663_v9  ;;  %v4688_v9 = vmul.f32 %v4579_v62, %v1521_v47  ;;  %v4704_v47 = vmul.f32 %v4576_v39, %v1326_v49  ;;  %v1328_v49 = vld [vmem:[#allocation3 + $0x12d] sm:$0xff] }
 0x287   :  { %6008 = vst [vmem:[#allocation101_spill] sm:$0xff] %v4674_v12  ;;  %v4716_v12 = vmul.f32 %v4585_v0, %v2109_v10  ;;  %v4730_v10 = vmul.f32 %v3345_v43, %v4536_v21  ;;  %v4745_v21 = vmul.f32 %v4576_v39, %v1328_v49 }
 0x288   :  { %6009 = vst [vmem:[#allocation102_spill] sm:$0xff] %v4677_v53  ;;  %v4699_v53 = vmul.f32 %v4582_v28, %v1717_v1  ;;  %v3211_v1 = vunpack.i.h.bf16 %v3209_v23  ;;  %v1000_v23 = vsel %vm595_vm5, %v3201_v16, %v977_v37  ;;  %v4755_v37 = vmul.f32 %v4582_v28, %v1720_v25  ;;  %v3346_v16 = vld [vmem:[#allocation3 + $0x150] sm:$0xff]  ;;  %v1745_v25 = vld [vmem:[#allocation3 + $0x147] sm:$0xff] }
 0x289   :  { %6010 = vst [vmem:[#allocation103_spill] sm:$0xff] %v4685_v48  ;;  %v4727_v48 = vmul.f32 %v4576_v39, %v1327_v51  ;;  %v2112_v51 = vld [vmem:[#allocation3 + $0x131] sm:$0xff]  ;;  %v4764_v39 = vmul.f32 %v3346_v16, %v4613_v7 }
 0x28a   :  { %6011 = vst [vmem:[#allocation104_spill] sm:$0xff] %v4688_v9  ;;  %v1524_v9 = vld [vmem:[#allocation3 + $0x12e] sm:$0xff] }
 0x28b   :  { %6012 = vst [vmem:[#allocation105_spill] sm:$0xff] %v4691_v6  ;;  %v4710_v6 = vmul.f32 %v4582_v28, %v1718_v13  ;;  %v3206_v13 = vunpack.i.h.bf16 %v3204_v31  ;;  %v2529_v16 = vld [vmem:[#allocation3 + $0x14b] sm:$0xff] }
 0x28c   :  { %6013 = vst [vmem:[#allocation106_spill] sm:$0xff] %v4699_v53  ;;  %v4719_v53 = vmul.f32 %v4594_v34, %v2305_v57  ;;  %v2111_v57 = vld [vmem:[#allocation3 + $0x129] sm:$0xff] }
 0x28d   :  { %6014 = vst [vmem:[#allocation107_spill] sm:$0xff] %v4704_v47  ;;  %v1002_v47 = vsel %vm595_vm5, %v3210_v8, %v3211_v1  ;;  %v1549_v1 = vld [vmem:[#allocation3 + $0x146] sm:$0xff]  ;;  %v993_v8 = vpop.permute.xlu0 %992 }
 0x28e   :  { %6015 = vst [vmem:[#allocation108_spill] sm:$0xff] %v4707_v3  ;;  %v4724_v3 = vmul.f32 %v4597_v46, %v2501_v19  ;;  %v4740_v19 = vmul.f32 %v4582_v28, %v1719_v44  ;;  %v1872_v44 = vmul.f32 %v4654_v61, %v1000_v23 }
 0x28f   :  { %6016 = vst [vmem:[#allocation109_spill] sm:$0xff] %v4710_v6  ;;  %v3205_v6 = vunpack.i.l.bf16 %v3204_v31  ;;  %v4737_v31 = vmul.f32 %v4579_v62, %v1523_v60  ;;  %v4758_v60 = vmul.f32 %v4585_v0, %v2111_v57 }
 0x290   :  { %6017 = vst [vmem:[#allocation110_spill] sm:$0xff] %v4716_v12  ;;  %v4733_v12 = vadd.f32 %v1871_v29, %v4504_v4  ;;  %v4748_v4 = vmul.f32 %v4579_v62, %v1524_v9  ;;  %v4751_v29 = vstv %s4651_s26  ;;  %v4767_v62 = vmul.f32 %v4585_v0, %v2112_v51  ;;  %v989_v0 = vpop.permute.xlu2 %988  ;;  %s5094_s26 = sld [smem:[#allocation4 + $0x3a]] }
 0x291   :  { %6018 = vst [vmem:[#allocation111_spill] sm:$0xff] %v4719_v53  ;;  %v2307_v53 = vld [vmem:[#allocation3 + $0x12a] sm:$0xff]  ;;  %v1001_v43 = vsel %vm595_vm5, %v3205_v6, %v3206_v13  ;;  %v4778_v49 = vadd.f32 %v1872_v44, %v4515_v20  ;;  %v4790_v51 = vstv %s4693_s16  ;;  %v3214_v20 = vpop.permute.xlu1 %3213  ;;  %s5130_s16 = sld [smem:[#allocation4 + $0x56]] }
 0x292   :  { %6019 = vst [vmem:[#allocation112_spill] sm:$0xff] %v4724_v3  ;;  %v2308_v3 = vld [vmem:[#allocation3 + $0x132] sm:$0xff]  ;;  %v4761_v6 = vmul.f32 %v4594_v34, %v2307_v53  ;;  %v2333_v44 = vld [vmem:[#allocation3 + $0x14a] sm:$0xff] }
 0x293   :  { %6020 = vst [vmem:[#allocation113_spill] sm:$0xff] %v4727_v48  ;;  %v2504_v48 = vld [vmem:[#allocation3 + $0x133] sm:$0xff]  ;;  %v4770_v9 = vmul.f32 %v4594_v34, %v2308_v3  ;;  %v3347_v3 = vld [vmem:[#allocation3 + $0x148] sm:$0xff] }
 0x294   :  { %6021 = vst [vmem:[#allocation114_spill] sm:$0xff] %v4733_v12  ;;  %v4773_v28 = vmul.f32 %v4597_v46, %v2504_v48  ;;  %v1354_v53 = vld [vmem:[#allocation3 + $0x14d] sm:$0xff]  ;;  %v4781_v57 = vmul.f32 %v3347_v3, %v4613_v7  ;;  %v4784_v48 = vstv %s4668_s14  ;;  %v4795_v46 = vstv %s4701_s23  ;;  %s5106_s14 = sld [smem:[#allocation4 + $0x41]] }
 0x295   :  { %6022 = vst [vmem:[#allocation115_spill] sm:$0xff] %v4737_v31  ;;  %v1550_v13 = vld [vmem:[#allocation3 + $0x14e] sm:$0xff]  ;;  %v3215_v3 = vunpack.i.l.bf16 %v3214_v20  ;;  %s5141_s23 = sld [smem:[#allocation4 + $0x5d]] }
 0x296   :  { %6023 = vst [vmem:[#allocation116_spill] sm:$0xff] %v4740_v19  ;;  %v1746_v34 = vld [vmem:[#allocation3 + $0x14f] sm:$0xff] }
 0x297   :  { %1017 = vst [vmem:[#allocation3 + $0x250] sm:$0xff] %v1000_v23  ;;  %v4787_v23 = vstv %s4679_s15  ;;  %v2138_v19 = vld [vmem:[#allocation3 + $0x151] sm:$0xff]  ;;  %s5111_s15 = sld [smem:[#allocation4 + $0x4f]] }
 0x298   :  { %6024 = vst [vmem:[#allocation117_spill] sm:$0xff] %v4745_v21  ;;  %v2334_v12 = vld [vmem:[#allocation3 + $0x152] sm:$0xff]  ;;  %v4831_v21 = vmul.f32 %v4620_v5, %v2333_v44 }
 0x299   :  { %6025 = vst [vmem:[#allocation118_spill] sm:$0xff] %v4748_v4  ;;  %v2140_v31 = vld [vmem:[#allocation3 + $0x171] sm:$0xff]  ;;  %v1003_v4 = vsel %vm595_vm5, %v3215_v3, %v989_v0  ;;  %v1551_v0 = vld [vmem:[#allocation3 + $0x166] sm:$0xff] }
 0x29a   :  { %1019 = vst [vmem:[#allocation3 + $0x260] sm:$0xff] %v1002_v47  ;;  %v1353_v47 = vld [vmem:[#allocation3 + $0x145] sm:$0xff] }
 0x29b   :  { %6026 = vst [vmem:[#allocation119_spill] sm:$0xff] %v4755_v37  ;;  %v4817_v37 = vmul.f32 %v4607_v45, %v1550_v13  ;;  %v4834_v13 = vmul.f32 %v4639_v35, %v2529_v16  ;;  %v3348_v16 = vld [vmem:[#allocation3 + $0x170] sm:$0xff] }
 0x29c   :  { %6027 = vst [vmem:[#allocation120_spill] sm:$0xff] %v4758_v60  ;;  %v4806_v60 = vmul.f32 %v4600_v40, %v1354_v53  ;;  %v4852_v3 = vmul.f32 %v3348_v16, %v4613_v7  ;;  %v1356_v16 = vld [vmem:[#allocation3 + $0x16d] sm:$0xff] }
 0x29d   :  { %6028 = vst [vmem:[#allocation121_spill] sm:$0xff] %v4761_v6  ;;  %v3216_v6 = vunpack.i.h.bf16 %v3214_v20  ;;  %v4820_v20 = vmul.f32 %v4610_v59, %v1745_v25  ;;  %v2336_v25 = vld [vmem:[#allocation3 + $0x172] sm:$0xff] }
 0x29e   :  { %1018 = vst [vmem:[#allocation3 + $0x258] sm:$0xff] %v1001_v43  ;;  %v2137_v43 = vld [vmem:[#allocation3 + $0x149] sm:$0xff] }
 0x29f   :  { %6029 = vst [vmem:[#allocation122_spill] sm:$0xff] %v4767_v62  ;;  %v4809_v62 = vmul.f32 %v4607_v45, %v1549_v1  ;;  %v1004_v53 = vsel %vm595_vm5, %v3216_v6, %v993_v8  ;;  %v4825_v1 = vmul.f32 %v4610_v59, %v1746_v34  ;;  %v4839_v6 = vmul.f32 %v4617_v26, %v2138_v19  ;;  %v1747_v19 = vld [vmem:[#allocation3 + $0x167] sm:$0xff] }
 0x2a0   :  { %6030 = vst [vmem:[#allocation123_spill] sm:$0xff] %v4770_v9  ;;  %v4803_v9 = vmul.f32 %v4600_v40, %v1353_v47  ;;  %v2530_v47 = vld [vmem:[#allocation3 + $0x153] sm:$0xff]  ;;  %v4842_v8 = vmul.f32 %v4620_v5, %v2334_v12  ;;  %v1874_v34 = vmul.f32 %v4654_v61, %v1004_v53 }
 0x2a1   :  { %6031 = vst [vmem:[#allocation124_spill] sm:$0xff] %v4773_v28  ;;  %v4798_v28 = vstv %s4712_s27  ;;  %v4849_v44 = vmul.f32 %v4639_v35, %v2530_v47  ;;  %s5245_s27 = sld [smem:[#allocation4 + $0x35]] }
 0x2a2   :  { %6032 = vst [vmem:[#allocation125_spill] sm:$0xff] %v4778_v49  ;;  %v4812_v49 = vstv %s4721_s24  ;;  %s5253_s24 = sld [smem:[#allocation4 + $0x3c]] }
 0x2a3   :  { %6033 = vst [vmem:[#allocation126_spill] sm:$0xff] %v4803_v9 }
 0x2a4   :  { %6034 = vst [vmem:[#allocation127_spill] sm:$0xff] %v4806_v60  ;;  %v1774_v60 = vld [vmem:[#allocation3 + $0x18f] sm:$0xff] }
 0x2a5   :  { %6035 = vst [vmem:[#allocation128_spill] sm:$0xff] %v4809_v62  ;;  %v4828_v62 = vmul.f32 %v4617_v26, %v2137_v43  ;;  %v1873_v43 = vmul.f32 %v4654_v61, %v1003_v4  ;;  %v4863_v61 = vmul.f32 %v4617_v26, %v2140_v31  ;;  %v1748_v31 = vld [vmem:[#allocation3 + $0x16f] sm:$0xff] }
 0x2a6   :  { %6036 = vst [vmem:[#allocation129_spill] sm:$0xff] %v4812_v49 }
 0x2a7   :  { %6037 = vst [vmem:[#allocation130_spill] sm:$0xff] %v4817_v37  ;;  %v1355_v37 = vld [vmem:[#allocation3 + $0x165] sm:$0xff] }
 0x2a8   :  { %6038 = vst [vmem:[#allocation131_spill] sm:$0xff] %v4820_v20  ;;  %v2532_v20 = vld [vmem:[#allocation3 + $0x173] sm:$0xff] }
 0x2a9   :  { %6039 = vst [vmem:[#allocation132_spill] sm:$0xff] %v4825_v1  ;;  %v4869_v47 = vmul.f32 %v4639_v35, %v2532_v20  ;;  %v4886_v20 = vadd.f32 %v1873_v43, %v4591_v33  ;;  %v3219_v35 = vpop.permute.xlu1 %3218  ;;  %v1773_v1 = vld [vmem:[#allocation3 + $0x187] sm:$0xff]  ;;  %v4902_v43 = vmul.f32 %v4600_v40, %v1356_v16 }
 0x2aa   :  { %6040 = vst [vmem:[#allocation133_spill] sm:$0xff] %v4828_v62  ;;  %v1552_v62 = vld [vmem:[#allocation3 + $0x16e] sm:$0xff]  ;;  %v3221_v9 = vunpack.i.h.bf16 %v3219_v35  ;;  %v3220_v33 = vunpack.i.l.bf16 %v3219_v35  ;;  %v4915_v35 = vmul.f32 %v3351_v14, %v4751_v29  ;;  %v4929_v14 = vmul.f32 %v4790_v51, %v1773_v1 }
 0x2ab   :  { %6041 = vst [vmem:[#allocation134_spill] sm:$0xff] %v4831_v21  ;;  %v2361_v16 = vld [vmem:[#allocation3 + $0x18a] sm:$0xff] }
 0x2ac   :  { %6042 = vst [vmem:[#allocation135_spill] sm:$0xff] %v4834_v13  ;;  %v3349_v13 = vld [vmem:[#allocation3 + $0x188] sm:$0xff] }
 0x2ad   :  { %1021 = vst [vmem:[#allocation3 + $0x270] sm:$0xff] %v1004_v53  ;;  %v4855_v12 = vmul.f32 %v3349_v13, %v4751_v29  ;;  %v3350_v53 = vld [vmem:[#allocation3 + $0x168] sm:$0xff]  ;;  %v4872_v13 = vmul.f32 %v4600_v40, %v1355_v37  ;;  %v4889_v37 = vmul.f32 %v4610_v59, %v1747_v19 }
 0x2ae   :  { %6043 = vst [vmem:[#allocation136_spill] sm:$0xff] %v4839_v6  ;;  %v4860_v21 = vmul.f32 %v3350_v53, %v4613_v7  ;;  %v4877_v7 = vmul.f32 %v4607_v45, %v1551_v0  ;;  %v2139_v53 = vld [vmem:[#allocation3 + $0x169] sm:$0xff]  ;;  %v4896_v6 = vstv %s4800_s30  ;;  %s5282_s30 = sld [smem:[#allocation4 + $0x51]] }
 0x2af   :  { %6044 = vst [vmem:[#allocation137_spill] sm:$0xff] %v4842_v8  ;;  %v4874_v8 = vpop.permute.xlu2 %3223  ;;  %v1382_v19 = vld [vmem:[#allocation3 + $0x18d] sm:$0xff] }
 0x2b0   :  { %1020 = vst [vmem:[#allocation3 + $0x268] sm:$0xff] %v1003_v4  ;;  %v4866_v4 = vmul.f32 %v4620_v5, %v2336_v25  ;;  %v4880_v25 = vstv %s4775_s25  ;;  %v3226_v0 = vunpack.i.h.bf16 %v4874_v8  ;;  %v2165_v40 = vld [vmem:[#allocation3 + $0x189] sm:$0xff]  ;;  %s5261_s25 = sld [smem:[#allocation4 + $0x43]] }
 0x2b1   :  { %6045 = vst [vmem:[#allocation138_spill] sm:$0xff] %v4849_v44  ;;  %v1045_v44 = vpop.permute.xlu0 %1044 }
 0x2b2   :  { %6046 = vst [vmem:[#allocation139_spill] sm:$0xff] %v4855_v12  ;;  %v1381_v12 = vld [vmem:[#allocation3 + $0x185] sm:$0xff] }
 0x2b3   :  { %6047 = vst [vmem:[#allocation140_spill] sm:$0xff] %v4863_v61  ;;  %v4892_v61 = vadd.f32 %v1874_v34, %v4573_v58  ;;  %v4906_v58 = vmul.f32 %v4607_v45, %v1552_v62  ;;  %v4909_v34 = vmul.f32 %v4610_v59, %v1748_v31  ;;  %v1005_v45 = vsel %vm595_vm5, %v3220_v33, %v3221_v9  ;;  %v2166_v31 = vld [vmem:[#allocation3 + $0x191] sm:$0xff] }
 0x2b4   :  { %6048 = vst [vmem:[#allocation141_spill] sm:$0xff] %v4866_v4  ;;  %v4883_v4 = vstv %s4792_s29  ;;  %v4935_v9 = vmul.f32 %v4784_v48, %v1382_v19  ;;  %v4950_v33 = vmul.f32 %v4790_v51, %v1774_v60  ;;  %v4956_v19 = vmul.f32 %v4798_v28, %v2361_v16  ;;  %v1775_v16 = vld [vmem:[#allocation3 + $0x1a7] sm:$0xff]  ;;  %s5270_s29 = sld [smem:[#allocation4 + $0x36]] }
 0x2b5   :  { %6049 = vst [vmem:[#allocation142_spill] sm:$0xff] %v4869_v47  ;;  %v2335_v47 = vld [vmem:[#allocation3 + $0x16a] sm:$0xff] }
 0x2b6   :  { %6050 = vst [vmem:[#allocation143_spill] sm:$0xff] %v4872_v13  ;;  %v4899_v13 = vstv %s4814_s3  ;;  %v4920_v59 = vmul.f32 %v4620_v5, %v2335_v47  ;;  %v2558_v5 = vld [vmem:[#allocation3 + $0x193] sm:$0xff]  ;;  %v1383_v47 = vld [vmem:[#allocation3 + $0x1a5] sm:$0xff]  ;;  %s5296_s3 = sld [smem:[#allocation4 + $0x58]] }
 0x2b7   :  { %6051 = vst [vmem:[#allocation144_spill] sm:$0xff] %v4877_v7  ;;  %v1577_v7 = vld [vmem:[#allocation3 + $0x186] sm:$0xff] }
 0x2b8   :  { %6052 = vst [vmem:[#allocation145_spill] sm:$0xff] %v4886_v20  ;;  %v1578_v20 = vld [vmem:[#allocation3 + $0x18e] sm:$0xff] }
 0x2b9   :  { %6053 = vst [vmem:[#allocation146_spill] sm:$0xff] %v4889_v37  ;;  %v1073_v37 = vsel %vm670_vm6, %v1045_v44, %v3226_v0  ;;  %v4926_v44 = vmul.f32 %v4787_v23, %v1577_v7  ;;  %v2557_v0 = vld [vmem:[#allocation3 + $0x18b] sm:$0xff]  ;;  %v4947_v1 = vmul.f32 %v4787_v23, %v1578_v20 }
 0x2ba   :  { %6054 = vst [vmem:[#allocation147_spill] sm:$0xff] %v4892_v61  ;;  %v4912_v61 = vmul.f32 %v4617_v26, %v2139_v53  ;;  %v1927_v62 = vmul.f32 %v4896_v6, %v1073_v37  ;;  %v4923_v26 = vmul.f32 %v4784_v48, %v1381_v12  ;;  %v2362_v53 = vld [vmem:[#allocation3 + $0x192] sm:$0xff]  ;;  %v4941_v12 = vstv %s4857_s6  ;;  %s5344_s6 = sld [smem:[#allocation4 + $0x44]] }
 0x2bb   :  { %6055 = vst [vmem:[#allocation148_spill] sm:$0xff] %v4906_v58  ;;  %v4962_v20 = vmul.f32 %v4798_v28, %v2362_v53  ;;  %v4965_v60 = vmul.f32 %v4812_v49, %v2557_v0  ;;  %v2363_v0 = vld [vmem:[#allocation3 + $0x1aa] sm:$0xff] }
 0x2bc   :  { %6056 = vst [vmem:[#allocation149_spill] sm:$0xff] %v4909_v34  ;;  %v4944_v7 = vadd.f32 %v1927_v62, %v4666_v17  ;;  %v1061_v34 = vpop.permute.xlu0 %1060  ;;  %v4959_v17 = vmul.f32 %v4795_v46, %v2166_v31  ;;  %v3352_v62 = vld [vmem:[#allocation3 + $0x1b0] sm:$0xff]  ;;  %v4974_v31 = vmul.f32 %v4784_v48, %v1383_v47 }
 0x2bd   :  { %6057 = vst [vmem:[#allocation150_spill] sm:$0xff] %v4912_v61  ;;  %v4932_v61 = vstv %s4836_s4  ;;  %v1218_v47 = vld [vmem:[#allocation3 + $0x1cd] sm:$0xff]  ;;  %s5323_s4 = sld [smem:[#allocation4 + $0x37]] }
 0x2be   :  { %6058 = vst [vmem:[#allocation151_spill] sm:$0xff] %v4915_v35  ;;  %v1579_v35 = vld [vmem:[#allocation3 + $0x1a6] sm:$0xff] }
 0x2bf   :  { %1090 = vst [vmem:[#allocation3 + $0x2c8] sm:$0xff] %v1073_v37  ;;  %v4938_v37 = vstv %s4844_s5  ;;  %s5336_s5 = sld [smem:[#allocation4 + $0x3d]] }
 0x2c0   :  { %6059 = vst [vmem:[#allocation152_spill] sm:$0xff] %v4920_v59  ;;  %v1384_v59 = vld [vmem:[#allocation3 + $0x1ad] sm:$0xff] }
 0x2c1   :  { %6060 = vst [vmem:[#allocation153_spill] sm:$0xff] %v4926_v44  ;;  %v3229_v44 = vpop.permute.xlu2 %3228 }
 0x2c2   :  { %6061 = vst [vmem:[#allocation154_spill] sm:$0xff] %v4929_v14  ;;  %v1580_v14 = vld [vmem:[#allocation3 + $0x1ae] sm:$0xff] }
 0x2c3   :  { %1022 = vst [vmem:[#allocation3 + $0x278] sm:$0xff] %v1005_v45  ;;  %v4953_v45 = vmul.f32 %v4795_v46, %v2165_v40  ;;  %v4968_v40 = vmul.f32 %v3352_v62, %v4751_v29  ;;  %v4980_v62 = vmul.f32 %v4784_v48, %v1384_v59  ;;  %v4986_v58 = vmul.f32 %v4787_v23, %v1580_v14  ;;  %v2002_v48 = vld [vmem:[#allocation3 + $0x1d1] sm:$0xff] }
 0x2c4   :  { %6062 = vst [vmem:[#allocation155_spill] sm:$0xff] %v4944_v7  ;;  %v1049_v7 = vpop.permute.xlu1 %1048  ;;  %v2198_v59 = vld [vmem:[#allocation3 + $0x1d2] sm:$0xff]  ;;  %v5001_v14 = vmul.f32 %v4798_v28, %v2363_v0  ;;  %v1609_v0 = vld [vmem:[#allocation3 + $0x1c7] sm:$0xff] }
 0x2c5   :  { %6063 = vst [vmem:[#allocation156_spill] sm:$0xff] %v4950_v33  ;;  %v4971_v33 = vmul.f32 %v4812_v49, %v2558_v5  ;;  %v2364_v5 = vld [vmem:[#allocation3 + $0x1b2] sm:$0xff]  ;;  %v1217_v49 = vld [vmem:[#allocation3 + $0x1c5] sm:$0xff] }
 0x2c6   :  { %6064 = vst [vmem:[#allocation157_spill] sm:$0xff] %v4953_v45  ;;  %v2167_v45 = vld [vmem:[#allocation3 + $0x1a9] sm:$0xff] }
 0x2c7   :  { %6065 = vst [vmem:[#allocation158_spill] sm:$0xff] %v4956_v19  ;;  %v1776_v19 = vld [vmem:[#allocation3 + $0x1af] sm:$0xff] }
 0x2c8   :  { %6066 = vst [vmem:[#allocation159_spill] sm:$0xff] %v4959_v17  ;;  %v3353_v17 = vld [vmem:[#allocation3 + $0x1a8] sm:$0xff] }
 0x2c9   :  { %6067 = vst [vmem:[#allocation160_spill] sm:$0xff] %v4962_v20  ;;  %v4977_v53 = vmul.f32 %v3353_v17, %v4751_v29  ;;  %v3231_v20 = vunpack.i.h.bf16 %v3229_v44  ;;  %v4992_v29 = vmul.f32 %v4790_v51, %v1776_v19  ;;  %v4995_v17 = vmul.f32 %v4795_v46, %v2167_v45 }
 0x2ca   :  { %6068 = vst [vmem:[#allocation161_spill] sm:$0xff] %v4965_v60  ;;  %v2168_v60 = vld [vmem:[#allocation3 + $0x1b1] sm:$0xff]  ;;  %v5011_v19 = vmul.f32 %v4798_v28, %v2364_v5 }
 0x2cb   :  { %6069 = vst [vmem:[#allocation162_spill] sm:$0xff] %v4968_v40  ;;  %v4983_v40 = vmul.f32 %v4787_v23, %v1579_v35  ;;  %v1413_v35 = vld [vmem:[#allocation3 + $0x1c6] sm:$0xff]  ;;  %v1077_v23 = vsel %vm670_vm6, %v1061_v34, %v3231_v20  ;;  %v1227_v34 = vmul.f32 %v4932_v61, %v1217_v49  ;;  %v1228_v20 = vmul.f32 %v4932_v61, %v1218_v47 }
 0x2cc   :  { %6070 = vst [vmem:[#allocation163_spill] sm:$0xff] %v4971_v33  ;;  %v3230_v33 = vunpack.i.l.bf16 %v3229_v44  ;;  %v5004_v44 = vmul.f32 %v4795_v46, %v2168_v60  ;;  %v2012_v60 = vmul.f32 %v4880_v25, %v2002_v48  ;;  %v2197_v28 = vld [vmem:[#allocation3 + $0x1ca] sm:$0xff]  ;;  %v3225_v48 = vunpack.i.l.bf16 %v4874_v8 }
 0x2cd   :  { %6071 = vst [vmem:[#allocation164_spill] sm:$0xff] %v4974_v31  ;;  %v4989_v31 = vmul.f32 %v4790_v51, %v1775_v16  ;;  %v2394_v16 = vld [vmem:[#allocation3 + $0x1d3] sm:$0xff]  ;;  %v1929_v51 = vmul.f32 %v4896_v6, %v1077_v23 }
 0x2ce   :  { %6072 = vst [vmem:[#allocation165_spill] sm:$0xff] %v4977_v53  ;;  %v1414_v53 = vld [vmem:[#allocation3 + $0x1ce] sm:$0xff]  ;;  %v1074_v45 = vsel %vm670_vm6, %v1049_v7, %v3230_v33  ;;  %v2404_v5 = vmul.f32 %v4899_v13, %v2394_v16 }
 0x2cf   :  { %6073 = vst [vmem:[#allocation166_spill] sm:$0xff] %v4983_v40  ;;  %v1928_v46 = vmul.f32 %v4896_v6, %v1074_v45  ;;  %v1610_v7 = vld [vmem:[#allocation3 + $0x1cf] sm:$0xff]  ;;  %v5024_v49 = vadd.f32 %v1929_v51, %v4671_v55  ;;  %v1424_v47 = vmul.f32 %v4938_v37, %v1414_v53  ;;  %v1065_v55 = vpop.permute.xlu1 %1064  ;;  %v1619_v51 = vmul.f32 %v4941_v12, %v1609_v0 }
 0x2d0   :  { %6074 = vst [vmem:[#allocation167_spill] sm:$0xff] %v4989_v31  ;;  %v2001_v33 = vld [vmem:[#allocation3 + $0x1c9] sm:$0xff]  ;;  %v1620_v16 = vmul.f32 %v4941_v12, %v1610_v7  ;;  %v5048_v0 = vadd.f32 %v1228_v20, %v4254_v56  ;;  %v5089_v20 = vstv %s4997_s7  ;;  %s5418_s7 = sld [smem:[#allocation4 + $0x3e]] }
 0x2d1   :  { %6075 = vst [vmem:[#allocation168_spill] sm:$0xff] %v4992_v29  ;;  %v2011_v53 = vmul.f32 %v4880_v25, %v2001_v33  ;;  %v5066_v56 = vadd.f32 %v1424_v47, %v4257_v63  ;;  %v2004_v33 = vld [vmem:[#allocation3 + $0x1f1] sm:$0xff] }
 0x2d2   :  { %6076 = vst [vmem:[#allocation169_spill] sm:$0xff] %v4995_v17 }
 0x2d3   :  { %6077 = vst [vmem:[#allocation170_spill] sm:$0xff] %v5001_v14  ;;  %v2208_v14 = vmul.f32 %v4883_v4, %v2198_v59  ;;  %v5032_v59 = vadd.f32 %v1928_v46, %v4682_v30 }
 0x2d4   :  { %6078 = vst [vmem:[#allocation171_spill] sm:$0xff] %v5004_v44 }
 0x2d5   :  { %1094 = vst [vmem:[#allocation3 + $0x2e8] sm:$0xff] %v1077_v23  ;;  %v1423_v23 = vmul.f32 %v4938_v37, %v1413_v35  ;;  %v3239_v35 = vpop.permute.xlu0 %3238 }
 0x2d6   :  { %6079 = vst [vmem:[#allocation172_spill] sm:$0xff] %v5011_v19  ;;  %v2393_v19 = vld [vmem:[#allocation3 + $0x1cb] sm:$0xff]  ;;  %v3241_v17 = vunpack.i.h.bf16 %v3239_v35  ;;  %v3240_v44 = vunpack.i.l.bf16 %v3239_v35  ;;  %v5045_v35 = vadd.f32 %v1227_v34, %v4210_v2  ;;  %v5063_v2 = vadd.f32 %v2404_v5, %v4296_v15 }
 0x2d7   :  { %1091 = vst [vmem:[#allocation3 + $0x2d0] sm:$0xff] %v1074_v45  ;;  %v3234_v45 = vpop.permute.xlu2 %3233  ;;  %v2403_v8 = vmul.f32 %v4899_v13, %v2393_v19  ;;  %v5051_v7 = vadd.f32 %v1423_v23, %v4225_v27  ;;  %v5069_v27 = vadd.f32 %v1619_v51, %v4228_v38  ;;  %v1220_v15 = vld [vmem:[#allocation3 + $0x1ed] sm:$0xff] }
 0x2d8   :  { %6080 = vst [vmem:[#allocation173_spill] sm:$0xff] %v5024_v49  ;;  %v3236_v31 = vunpack.i.h.bf16 %v3234_v45  ;;  %v3235_v29 = vunpack.i.l.bf16 %v3234_v45  ;;  %v2207_v49 = vmul.f32 %v4883_v4, %v2197_v28  ;;  %v1076_v30 = vsel %vm670_vm6, %v3240_v44, %v3241_v17  ;;  %v1415_v44 = vld [vmem:[#allocation3 + $0x1e6] sm:$0xff]  ;;  %v1612_v19 = vld [vmem:[#allocation3 + $0x1ef] sm:$0xff] }
 0x2d9   :  { %6081 = vst [vmem:[#allocation174_spill] sm:$0xff] %v5032_v59  ;;  %v2003_v34 = vld [vmem:[#allocation3 + $0x1e9] sm:$0xff]  ;;  %v1425_v23 = vmul.f32 %v4938_v37, %v1415_v44  ;;  %v5098_v28 = vstv %s5015_s9  ;;  %v2200_v45 = vld [vmem:[#allocation3 + $0x1f2] sm:$0xff]  ;;  %v2014_v44 = vmul.f32 %v4880_v25, %v2004_v33  ;;  %s5498_s9 = sld [smem:[#allocation4 + $0x5f]] }
 0x2da   :  { %v1072_v46 = vsel %vm670_vm6, %v3225_v48, %v3236_v31  ;;  %v1078_v59 = vsel %vm670_vm6, %v1065_v55, %v3235_v29  ;;  %1093 = vst [vmem:[#allocation3 + $0x2e0] sm:$0xff] %v1076_v30  ;;  %v5057_v31 = vadd.f32 %v2012_v60, %v4276_v54  ;;  %v5060_v29 = vadd.f32 %v2208_v14, %v4284_v11  ;;  %v1219_v11 = vld [vmem:[#allocation3 + $0x1e5] sm:$0xff]  ;;  %v2396_v55 = vld [vmem:[#allocation3 + $0x1f3] sm:$0xff] }
 0x2db   :  { %v1930_v17 = vmul.f32 %v4896_v6, %v1078_v59  ;;  %6084 = vst [vmem:[#allocation177_spill] sm:$0xff] %v5063_v2  ;;  %v5072_v6 = vadd.f32 %v1620_v16, %v4270_v32  ;;  %v5075_v54 = vadd.f32 %v2011_v53, %v4273_v18  ;;  %v1611_v14 = vld [vmem:[#allocation3 + $0x1e7] sm:$0xff]  ;;  %v5083_v38 = vadd.f32 %v2207_v49, %v4279_v50  ;;  %v1102_v16 = vpop.permute.xlu1 %1101 }
 0x2dc   :  { %6082 = vst [vmem:[#allocation175_spill] sm:$0xff] %v5057_v31  ;;  %v5086_v32 = vadd.f32 %v2403_v8, %v4287_v24  ;;  %v1416_v18 = vld [vmem:[#allocation3 + $0x1ee] sm:$0xff]  ;;  %v5092_v60 = vstv %s5006_s8  ;;  %v5101_v50 = vstv %s5021_s10  ;;  %v5104_v49 = vstv %s5028_s11  ;;  %v1441_v33 = vld [vmem:[#allocation3 + $0x206] sm:$0xff]  ;;  %s5422_s8 = sld [smem:[#allocation4 + $0x45]] }
 0x2dd   :  { %6083 = vst [vmem:[#allocation176_spill] sm:$0xff] %v5060_v29  ;;  %v5080_v63 = vadd.f32 %v1930_v17, %v4730_v10  ;;  %v2199_v10 = vld [vmem:[#allocation3 + $0x1ea] sm:$0xff]  ;;  %v1106_v24 = vpop.permute.xlu0 %1105  ;;  %v1229_v47 = vmul.f32 %v4932_v61, %v1219_v11  ;;  %v1621_v48 = vmul.f32 %v4941_v12, %v1611_v14  ;;  %v1426_v53 = vmul.f32 %v4938_v37, %v1416_v18  ;;  %s5509_s10 = sld [smem:[#allocation4 + $0x4c]] }
 0x2de   :  { %1089 = vst [vmem:[#allocation3 + $0x2c0] sm:$0xff] %v1072_v46  ;;  %v1622_v8 = vmul.f32 %v4941_v12, %v1612_v19  ;;  %v2013_v30 = vmul.f32 %v4880_v25, %v2003_v34  ;;  %v2395_v46 = vld [vmem:[#allocation3 + $0x1eb] sm:$0xff]  ;;  %v2209_v11 = vmul.f32 %v4883_v4, %v2199_v10  ;;  %v2210_v37 = vmul.f32 %v4883_v4, %v2200_v45  ;;  %s5555_s11 = sld [smem:[#allocation4 + $0x52]] }
 0x2df   :  { %6085 = vst [vmem:[#allocation178_spill] sm:$0xff] %v5075_v54  ;;  %v3244_v5 = vpop.permute.xlu2 %3243  ;;  %v2406_v12 = vmul.f32 %v4899_v13, %v2396_v55  ;;  %v5128_v18 = vstv %s5053_s12  ;;  %v5133_v25 = vadd.f32 %v1621_v48, %v4316_v42  ;;  %v5136_v19 = vmul.f32 %v4899_v13, %v2395_v46  ;;  %v2029_v42 = vld [vmem:[#allocation3 + $0x209] sm:$0xff]  ;;  %s5573_s12 = sld [smem:[#allocation4 + $0x53]] }
 0x2e0   :  { %1095 = vst [vmem:[#allocation3 + $0x2f0] sm:$0xff] %v1078_v59  ;;  %v1230_v59 = vmul.f32 %v4932_v61, %v1220_v15  ;;  %v3246_v51 = vunpack.i.h.bf16 %v3244_v5  ;;  %v3245_v17 = vunpack.i.l.bf16 %v3244_v5  ;;  %v1245_v61 = vld [vmem:[#allocation3 + $0x205] sm:$0xff]  ;;  %v5120_v15 = vstv %s5042_s28  ;;  %v6093_v5 = vld [vmem:[#allocation42_spill] sm:$0xff]  ;;  %s5564_s28 = sld [smem:[#allocation4 + $0x59]] }
 0x2e1   :  { %6086 = vst [vmem:[#allocation179_spill] sm:$0xff] %v5080_v63  ;;  %v5139_v34 = vadd.f32 %v1229_v47, %v4310_v52  ;;  %v1255_v13 = vmul.f32 %v5101_v50, %v1245_v61  ;;  %v6092_v52 = vld [vmem:[#allocation41_spill] sm:$0xff]  ;;  %v5156_v47 = vadd.f32 %v2013_v30, %v6093_v5  ;;  %v5171_v30 = vstv %s5077_s13  ;;  %v1639_v31 = vld [vmem:[#allocation3 + $0x227] sm:$0xff]  ;;  %s5633_s13 = sld [smem:[#allocation4 + $0x60]] }
 0x2e2   :  { %6087 = vst [vmem:[#allocation180_spill] sm:$0xff] %v5083_v38  ;;  %v1131_v14 = vsel %vm728_vm7, %v1106_v24, %v3246_v51  ;;  %v5145_v4 = vadd.f32 %v1230_v59, %v4326_v41  ;;  %v5153_v24 = vadd.f32 %v1622_v8, %v6092_v52  ;;  %v6095_v41 = vld [vmem:[#allocation43_spill] sm:$0xff]  ;;  %v2225_v45 = vld [vmem:[#allocation3 + $0x20a] sm:$0xff]  ;;  %v6099_v51 = vld [vmem:[#allocation46_spill] sm:$0xff]  ;;  %v5174_v61 = vstv %s5094_s26  ;;  %s5639_s26 = sld [smem:[#allocation4 + $0x5a]] }
 0x2e3   :  { %6088 = vst [vmem:[#allocation181_spill] sm:$0xff] %v5086_v32  ;;  %v5123_v32 = vadd.f32 %v1425_v23, %v4313_v36  ;;  %v1130_v36 = vsel %vm728_vm7, %v1102_v16, %v3245_v17  ;;  %v5148_v23 = vadd.f32 %v1426_v53, %v4338_v22  ;;  %v1956_v10 = vmul.f32 %v5120_v15, %v1131_v14  ;;  %v6097_v22 = vld [vmem:[#allocation44_spill] sm:$0xff]  ;;  %v6101_v53 = vld [vmem:[#allocation47_spill] sm:$0xff] }
 0x2e4   :  { %6089 = vst [vmem:[#allocation182_spill] sm:$0xff] %v5098_v28  ;;  %v5159_v48 = vadd.f32 %v2014_v44, %v6095_v41  ;;  %v5162_v59 = vadd.f32 %v2209_v11, %v6097_v22  ;;  %v2421_v55 = vld [vmem:[#allocation3 + $0x20b] sm:$0xff]  ;;  %v5165_v16 = vadd.f32 %v2210_v37, %v6099_v51  ;;  %v5168_v46 = vadd.f32 %v2406_v12, %v6101_v53  ;;  %v1118_v22 = vpop.permute.xlu1 %1117 }
 0x2e5   :  { %1148 = vst [vmem:[#allocation3 + $0x310] sm:$0xff] %v1131_v14  ;;  %v1442_v8 = vld [vmem:[#allocation3 + $0x20e] sm:$0xff]  ;;  %v1122_v44 = vpop.permute.xlu0 %1121  ;;  %v2039_v11 = vmul.f32 %v5089_v20, %v2029_v42  ;;  %v1451_v5 = vmul.f32 %v5104_v49, %v1441_v33  ;;  %v5179_v41 = vstv %s5106_s14  ;;  %v5182_v37 = vstv %s5111_s15  ;;  %s5690_s14 = sld [smem:[#allocation4 + $0x61]] }
 0x2e6   :  { %6090 = vst [vmem:[#allocation183_spill] sm:$0xff] %v5133_v25  ;;  %v1637_v17 = vld [vmem:[#allocation3 + $0x207] sm:$0xff]  ;;  %v1638_v52 = vld [vmem:[#allocation3 + $0x20f] sm:$0xff]  ;;  %v2235_v51 = vmul.f32 %v5092_v60, %v2225_v45  ;;  %v2431_v53 = vmul.f32 %v5098_v28, %v2421_v55  ;;  %v1452_v42 = vmul.f32 %v5104_v49, %v1442_v8  ;;  %v1955_v2 = vmul.f32 %v5120_v15, %v1130_v36 }
 0x2e7   :  { %6091 = vst [vmem:[#allocation184_spill] sm:$0xff] %v5136_v19  ;;  %v1246_v14 = vld [vmem:[#allocation3 + $0x20d] sm:$0xff]  ;;  %v3249_v12 = vpop.permute.xlu2 %3248  ;;  %v1647_v33 = vmul.f32 %v5128_v18, %v1637_v17  ;;  %v1648_v38 = vmul.f32 %v5128_v18, %v1638_v52  ;;  %v5196_v29 = vstv %s5130_s16  ;;  %v6112_v17 = vld [vmem:[#allocation55_spill] sm:$0xff] }
 0x2e8   :  { %1147 = vst [vmem:[#allocation3 + $0x308] sm:$0xff] %v1130_v36  ;;  %v6105_v19 = vld [vmem:[#allocation48_spill] sm:$0xff]  ;;  %v3250_v45 = vunpack.i.l.bf16 %v3249_v12  ;;  %v2030_v55 = vld [vmem:[#allocation3 + $0x211] sm:$0xff] }
 0x2e9   :  { %6094 = vst [vmem:[#allocation41_spill] sm:$0xff] %v5156_v47  ;;  %v1256_v47 = vmul.f32 %v5101_v50, %v1246_v14  ;;  %v2226_v36 = vld [vmem:[#allocation3 + $0x212] sm:$0xff]  ;;  %v5209_v14 = vadd.f32 %v2235_v51, %v6112_v17  ;;  %v6114_v52 = vld [vmem:[#allocation56_spill] sm:$0xff] }
 0x2ea   :  { %6096 = vst [vmem:[#allocation42_spill] sm:$0xff] %v5159_v48  ;;  %v6108_v48 = vld [vmem:[#allocation54_spill] sm:$0xff]  ;;  %v5212_v54 = vadd.f32 %v2431_v53, %v6114_v52  ;;  %v1134_v53 = vsel %vm728_vm7, %v1118_v22, %v3250_v45  ;;  %v2040_v52 = vmul.f32 %v5089_v20, %v2030_v55  ;;  %v1443_v55 = vld [vmem:[#allocation3 + $0x226] sm:$0xff] }
 0x2eb   :  { %6098 = vst [vmem:[#allocation43_spill] sm:$0xff] %v5162_v59  ;;  %v5188_v59 = vadd.f32 %v1956_v10, %v4764_v39  ;;  %v5202_v39 = vstv %s5141_s23  ;;  %v2422_v8 = vld [vmem:[#allocation3 + $0x213] sm:$0xff] }
 0x2ec   :  { %6100 = vst [vmem:[#allocation44_spill] sm:$0xff] %v5165_v16  ;;  %v3251_v16 = vunpack.i.h.bf16 %v3249_v12  ;;  %v1247_v12 = vld [vmem:[#allocation3 + $0x225] sm:$0xff]  ;;  %v2032_v17 = vld [vmem:[#allocation3 + $0x231] sm:$0xff]  ;;  %v2432_v22 = vmul.f32 %v5098_v28, %v2422_v8 }
 0x2ed   :  { %6102 = vst [vmem:[#allocation46_spill] sm:$0xff] %v5168_v46  ;;  %v1259_v46 = vadd.f32 %v1255_v13, %v6105_v19  ;;  %v5199_v19 = vadd.f32 %v2039_v11, %v6108_v48  ;;  %v5205_v13 = vadd.f32 %v1955_v2, %v4781_v57  ;;  %v1248_v11 = vld [vmem:[#allocation3 + $0x22d] sm:$0xff]  ;;  %v6116_v57 = vld [vmem:[#allocation50_spill] sm:$0xff]  ;;  %v1257_v45 = vmul.f32 %v5101_v50, %v1247_v12 }
 0x2ee   :  { %6103 = vst [vmem:[#allocation47_spill] sm:$0xff] %v5179_v41  ;;  %v1135_v10 = vsel %vm728_vm7, %v1122_v44, %v3251_v16  ;;  %v5219_v2 = vadd.f32 %v1451_v5, %v6116_v57  ;;  %v6117_v16 = vld [vmem:[#allocation51_spill] sm:$0xff]  ;;  %v1444_v57 = vld [vmem:[#allocation3 + $0x22e] sm:$0xff] }
 0x2ef   :  { %6104 = vst [vmem:[#allocation185_spill] sm:$0xff] %v5182_v37  ;;  %v5215_v63 = vadd.f32 %v1259_v46, %v5045_v35  ;;  %v1958_v48 = vmul.f32 %v5120_v15, %v1135_v10  ;;  %v5222_v44 = vadd.f32 %v1452_v42, %v6117_v16  ;;  %v2228_v35 = vld [vmem:[#allocation3 + $0x232] sm:$0xff]  ;;  %v5236_v42 = vpop.permute.xlu0 %1158  ;;  %v3259_v16 = vpop.permute.xlu2 %3258 }
 0x2f0   :  { %6106 = vst [vmem:[#allocation48_spill] sm:$0xff] %v5188_v59  ;;  %v6119_v46 = vld [vmem:[#allocation53_spill] sm:$0xff] }
 0x2f1   :  { %6107 = vst [vmem:[#allocation186_spill] sm:$0xff] %v5196_v29  ;;  %v5234_v5 = vadd.f32 %v1958_v48, %v4852_v3  ;;  %v1273_v3 = vld [vmem:[#allocation3 + $0x245] sm:$0xff]  ;;  %v3261_v48 = vunpack.i.h.bf16 %v3259_v16  ;;  %v1640_v8 = vld [vmem:[#allocation3 + $0x22f] sm:$0xff] }
 0x2f2   :  { %6109 = vst [vmem:[#allocation54_spill] sm:$0xff] %v5199_v19  ;;  %v6118_v19 = vld [vmem:[#allocation52_spill] sm:$0xff]  ;;  %v6169_v29 = vld [vmem:[#allocation117_spill] sm:$0xff] }
 0x2f3   :  { %6110 = vst [vmem:[#allocation187_spill] sm:$0xff] %v5202_v39  ;;  %v5225_v51 = vadd.f32 %v1647_v33, %v6118_v19  ;;  %v2236_v33 = vmul.f32 %v5092_v60, %v2226_v36  ;;  %v2424_v19 = vld [vmem:[#allocation3 + $0x233] sm:$0xff]  ;;  %v2238_v36 = vmul.f32 %v5092_v60, %v2228_v35 }
 0x2f4   :  { %6111 = vst [vmem:[#allocation188_spill] sm:$0xff] %v5205_v13  ;;  %v2042_v13 = vmul.f32 %v5089_v20, %v2032_v17  ;;  %v6123_v35 = vld [vmem:[#allocation61_spill] sm:$0xff] }
 0x2f5   :  { %6113 = vst [vmem:[#allocation55_spill] sm:$0xff] %v5209_v14  ;;  %v1261_v59 = vadd.f32 %v1257_v45, %v6123_v35  ;;  %v2227_v45 = vld [vmem:[#allocation3 + $0x22a] sm:$0xff]  ;;  %v6137_v35 = vld [vmem:[#allocation67_spill] sm:$0xff] }
 0x2f6   :  { %6115 = vst [vmem:[#allocation56_spill] sm:$0xff] %v5212_v54  ;;  %v5230_v54 = vadd.f32 %v1648_v38, %v6119_v46  ;;  %v1957_v38 = vmul.f32 %v5120_v15, %v1134_v53  ;;  %v3254_v46 = vpop.permute.xlu1 %3253  ;;  %v6167_v39 = vld [vmem:[#allocation25_spill] sm:$0xff] }
 0x2f7   :  { %1152 = vst [vmem:[#allocation3 + $0x330] sm:$0xff] %v1135_v10  ;;  %v6120_v10 = vld [vmem:[#allocation49_spill] sm:$0xff]  ;;  %v3255_v15 = vunpack.i.l.bf16 %v3254_v46 }
 0x2f8   :  { %v1260_v14 = vadd.f32 %v1256_v47, %v6120_v10  ;;  %6121 = vst [vmem:[#allocation50_spill] sm:$0xff] %v5234_v5  ;;  %v1258_v47 = vmul.f32 %v5101_v50, %v1248_v11  ;;  %v3260_v10 = vunpack.i.l.bf16 %v3259_v16  ;;  %v3256_v5 = vunpack.i.h.bf16 %v3254_v46  ;;  %v2031_v16 = vld [vmem:[#allocation3 + $0x229] sm:$0xff] }
 0x2f9   :  { %1151 = vst [vmem:[#allocation3 + $0x328] sm:$0xff] %v1134_v53  ;;  %v5248_v12 = vadd.f32 %v1957_v38, %v4860_v21  ;;  %v2434_v53 = vmul.f32 %v5098_v28, %v2424_v19  ;;  %v1453_v50 = vmul.f32 %v5104_v49, %v1443_v55  ;;  %v1454_v11 = vmul.f32 %v5104_v49, %v1444_v57  ;;  %v6124_v55 = vld [vmem:[#allocation57_spill] sm:$0xff]  ;;  %v6126_v49 = vld [vmem:[#allocation62_spill] sm:$0xff] }
 0x2fa   :  { %v1133_v17 = vsel %vm728_vm7, %v3260_v10, %v3261_v48  ;;  %v5258_v25 = vadd.f32 %v1260_v14, %v5048_v0  ;;  %v1283_v21 = vmul.f32 %v5171_v30, %v1273_v3  ;;  %v1129_v19 = vsel %vm728_vm7, %v3255_v15, %v3256_v5  ;;  %v1274_v10 = vld [vmem:[#allocation3 + $0x24d] sm:$0xff]  ;;  %v6129_v3 = vld [vmem:[#allocation59_spill] sm:$0xff] }
 0x2fb   :  { %6122 = vst [vmem:[#allocation51_spill] sm:$0xff] %v5248_v12  ;;  %v5265_v38 = vadd.f32 %v2040_v52, %v6124_v55  ;;  %v1262_v57 = vadd.f32 %v1258_v47, %v6126_v49  ;;  %v1649_v46 = vmul.f32 %v5128_v18, %v1639_v31  ;;  %v1650_v48 = vmul.f32 %v5128_v18, %v1640_v8  ;;  %v6127_v0 = vld [vmem:[#allocation64_spill] sm:$0xff]  ;;  %v6133_v31 = vld [vmem:[#allocation65_spill] sm:$0xff]  ;;  %v6135_v8 = vld [vmem:[#allocation66_spill] sm:$0xff] }
 0x2fc   :  { %1150 = vst [vmem:[#allocation3 + $0x320] sm:$0xff] %v1133_v17  ;;  %v5273_v14 = vadd.f32 %v2042_v13, %v6127_v0  ;;  %v5276_v17 = vadd.f32 %v2236_v33, %v6129_v3  ;;  %v6131_v5 = vld [vmem:[#allocation60_spill] sm:$0xff]  ;;  %v2041_v47 = vmul.f32 %v5089_v20, %v2031_v16  ;;  %v5285_v18 = vadd.f32 %v2238_v36, %v6133_v31  ;;  %v6139_v49 = vld [vmem:[#allocation74_spill] sm:$0xff]  ;;  %v6140_v31 = vld [vmem:[#allocation69_spill] sm:$0xff] }
 0x2fd   :  { %6125 = vst [vmem:[#allocation52_spill] sm:$0xff] %v5265_v38  ;;  %v5279_v52 = vadd.f32 %v2432_v22, %v6131_v5  ;;  %v5288_v15 = vadd.f32 %v2434_v53, %v6135_v8  ;;  %v6138_v13 = vld [vmem:[#allocation68_spill] sm:$0xff]  ;;  %v5298_v22 = vpop.permute.xlu0 %1174  ;;  %v5301_v20 = vadd.f32 %v1261_v59, %v5139_v34  ;;  %v2237_v36 = vmul.f32 %v5092_v60, %v2227_v45  ;;  %v1163_v34 = vpop.permute.xlu2 %1162  ;;  %v6143_v60 = vld [vmem:[#allocation71_spill] sm:$0xff] }
 0x2fe   :  { %1146 = vst [vmem:[#allocation3 + $0x300] sm:$0xff] %v1129_v19  ;;  %v5291_v19 = vadd.f32 %v1453_v50, %v6137_v35  ;;  %v5294_v55 = vadd.f32 %v1454_v11, %v6138_v13  ;;  %v1469_v33 = vld [vmem:[#allocation3 + $0x246] sm:$0xff]  ;;  %v1284_v53 = vmul.f32 %v5171_v30, %v1274_v10  ;;  %v1287_v50 = vadd.f32 %v1283_v21, %v6139_v49  ;;  %v3264_v11 = vpop.permute.xlu1 %3263  ;;  %v6142_v35 = vld [vmem:[#allocation70_spill] sm:$0xff]  ;;  %v1470_v10 = vld [vmem:[#allocation3 + $0x24e] sm:$0xff] }
 0x2ff   :  { %6128 = vst [vmem:[#allocation53_spill] sm:$0xff] %v5273_v14  ;;  %v1665_v16 = vld [vmem:[#allocation3 + $0x247] sm:$0xff]  ;;  %v1266_v5 = vadd.f32 %v1262_v57, %v5145_v4  ;;  %v5308_v8 = vadd.f32 %v1649_v46, %v6140_v31  ;;  %v5311_v13 = vadd.f32 %v1650_v48, %v6142_v35  ;;  %v3266_v59 = vunpack.i.h.bf16 %v3264_v11  ;;  %v1666_v49 = vld [vmem:[#allocation3 + $0x24f] sm:$0xff] }
 0x300   :  { %6130 = vst [vmem:[#allocation49_spill] sm:$0xff] %v5276_v17  ;;  %v1275_v0 = vld [vmem:[#allocation3 + $0x265] sm:$0xff]  ;;  %v1276_v3 = vld [vmem:[#allocation3 + $0x26d] sm:$0xff]  ;;  %v5314_v45 = vadd.f32 %v2041_v47, %v6143_v60  ;;  %v1479_v21 = vmul.f32 %v5174_v61, %v1469_v33  ;;  %v5318_v28 = vstv %s5245_s27  ;;  %v3265_v4 = vunpack.i.l.bf16 %v3264_v11 }
 0x301   :  { %6132 = vst [vmem:[#allocation61_spill] sm:$0xff] %v5279_v52  ;;  %v1675_v57 = vmul.f32 %v5179_v41, %v1665_v16  ;;  %v1285_v46 = vmul.f32 %v5171_v30, %v1275_v0  ;;  %v1286_v48 = vmul.f32 %v5171_v30, %v1276_v3  ;;  %v1330_v31 = vld [vmem:[#allocation3 + $0x2cd] sm:$0xff]  ;;  %v5326_v47 = vsel %vm786_vm8, %v1163_v34, %v3266_v59 }
 0x302   :  { %6134 = vst [vmem:[#allocation57_spill] sm:$0xff] %v5285_v18  ;;  %v6146_v35 = vld [vmem:[#allocation72_spill] sm:$0xff]  ;;  %v6148_v60 = vld [vmem:[#allocation77_spill] sm:$0xff]  ;;  %v1291_v11 = vadd.f32 %v1287_v50, %v5215_v63  ;;  %v5334_v16 = vstv %s5253_s24  ;;  %v1480_v30 = vmul.f32 %v5174_v61, %v1470_v10  ;;  %v1676_v0 = vmul.f32 %v5179_v41, %v1666_v49  ;;  %v6150_v63 = vld [vmem:[#allocation75_spill] sm:$0xff] }
 0x303   :  { %6136 = vst [vmem:[#allocation62_spill] sm:$0xff] %v5288_v15  ;;  %v5329_v33 = vadd.f32 %v2237_v36, %v6146_v35  ;;  %v1288_v15 = vadd.f32 %v1284_v53, %v6148_v60  ;;  %v5342_v3 = vstv %s5270_s29  ;;  %v1358_v36 = vld [vmem:[#allocation3 + $0x30d] sm:$0xff]  ;;  %v5348_v53 = vsel %vm786_vm8, %v5236_v42, %v3265_v4  ;;  %v6154_v18 = vld [vmem:[#allocation90_spill] sm:$0xff] }
 0x304   :  { %6141 = vst [vmem:[#allocation64_spill] sm:$0xff] %v5308_v8  ;;  %v5351_v50 = vadd.f32 %v1479_v21, %v6150_v63  ;;  %v1472_v34 = vld [vmem:[#allocation3 + $0x26e] sm:$0xff]  ;;  %v5354_v59 = vstv %s5261_s25  ;;  %v5357_v35 = vstv %s5282_s30  ;;  %v1340_v10 = vmul.f32 %v5318_v28, %v1330_v31  ;;  %v6156_v31 = vld [vmem:[#allocation78_spill] sm:$0xff] }
 0x305   :  { %6144 = vst [vmem:[#allocation59_spill] sm:$0xff] %v5314_v45  ;;  %v6152_v49 = vld [vmem:[#allocation76_spill] sm:$0xff]  ;;  %v1290_v42 = vadd.f32 %v1286_v48, %v6154_v18  ;;  %v5367_v4 = vstv %s5296_s3  ;;  %v3274_v21 = vpop.permute.xlu0 %3273  ;;  %v1292_v63 = vadd.f32 %v1288_v15, %v5258_v25  ;;  %v1368_v17 = vmul.f32 %v5342_v3, %v1358_v36  ;;  %v6158_v18 = vld [vmem:[#allocation10_spill] sm:$0xff]  ;;  %v6159_v25 = vld [vmem:[#allocation107_spill] sm:$0xff] }
 0x306   :  { %6145 = vst [vmem:[#allocation60_spill] sm:$0xff] %v5326_v47  ;;  %v5362_v60 = vadd.f32 %v1675_v57, %v6152_v49  ;;  %v1329_v45 = vld [vmem:[#allocation3 + $0x2c5] sm:$0xff]  ;;  %v3276_v12 = vunpack.i.h.bf16 %v3274_v21  ;;  %v3275_v14 = vunpack.i.l.bf16 %v3274_v21  ;;  %v5372_v38 = vadd.f32 %v1480_v30, %v6156_v31  ;;  %v3269_v49 = vpop.permute.xlu1 %3268  ;;  %v1332_v8 = vld [vmem:[#allocation3 + $0x2ed] sm:$0xff] }
 0x307   :  { %6147 = vst [vmem:[#allocation65_spill] sm:$0xff] %v5329_v33  ;;  %v6153_v33 = vld [vmem:[#allocation89_spill] sm:$0xff]  ;;  %v1319_v48 = vadd.f32 %v6158_v18, %v1291_v11  ;;  %v1344_v15 = vadd.f32 %v1340_v10, %v6159_v25  ;;  %v3271_v21 = vunpack.i.h.bf16 %v3269_v49  ;;  %v3270_v30 = vunpack.i.l.bf16 %v3269_v49  ;;  %v6160_v18 = vld [vmem:[#allocation18_spill] sm:$0xff]  ;;  %v6161_v10 = vld [vmem:[#allocation127_spill] sm:$0xff] }
 0x308   :  { %1205 = vst [vmem:[#allocation3 + $0x350] sm:$0xff] %v5326_v47  ;;  %v1289_v52 = vadd.f32 %v1285_v46, %v6153_v33  ;;  %v1482_v46 = vmul.f32 %v5174_v61, %v1472_v34  ;;  %v1179_v33 = vpop.permute.xlu2 %1178  ;;  %v1186_v36 = vsel %vm786_vm8, %v3275_v14, %v3276_v12  ;;  %v1339_v31 = vmul.f32 %v5318_v28, %v1329_v45 }
 0x309   :  { %6149 = vst [vmem:[#allocation66_spill] sm:$0xff] %v5348_v53  ;;  %v1294_v34 = vadd.f32 %v1290_v42, %v1266_v5  ;;  %v5384_v11 = vstv %s5323_s4  ;;  %v1320_v47 = vadd.f32 %v6160_v18, %v1292_v63  ;;  %v1372_v25 = vadd.f32 %v1368_v17, %v6161_v10  ;;  %v1360_v42 = vld [vmem:[#allocation3 + $0x32d] sm:$0xff] }
 0x30a   :  { %6151 = vst [vmem:[#allocation67_spill] sm:$0xff] %v5357_v35  ;;  %v6157_v35 = vld [vmem:[#allocation79_spill] sm:$0xff]  ;;  %v5389_v12 = vsel %vm786_vm8, %v1179_v33, %v3271_v21  ;;  %v5393_v14 = vsel %vm786_vm8, %v5298_v22, %v3270_v30  ;;  %v5399_v5 = vstv %s5336_s5  ;;  %v5402_v45 = vstv %s5344_s6  ;;  %v6165_v30 = vld [vmem:[#allocation9_spill] sm:$0xff] }
 0x30b   :  { %1204 = vst [vmem:[#allocation3 + $0x348] sm:$0xff] %v5348_v53  ;;  %v5375_v57 = vadd.f32 %v1676_v0, %v6157_v35  ;;  %v1357_v53 = vld [vmem:[#allocation3 + $0x305] sm:$0xff]  ;;  %v1293_v0 = vadd.f32 %v1289_v52, %v5301_v20  ;;  %v1668_v35 = vld [vmem:[#allocation3 + $0x26f] sm:$0xff]  ;;  %v1348_v33 = vadd.f32 %v1344_v15, %v1320_v47 }
 0x30c   :  { %6155 = vst [vmem:[#allocation68_spill] sm:$0xff] %v5367_v4  ;;  %v1471_v4 = vld [vmem:[#allocation3 + $0x266] sm:$0xff]  ;;  %v1526_v20 = vld [vmem:[#allocation3 + $0x2ce] sm:$0xff]  ;;  %v1367_v63 = vmul.f32 %v5342_v3, %v1357_v53  ;;  %v5407_v17 = vmul.f32 %v5179_v41, %v1668_v35 }
 0x30d   :  { %1203 = vst [vmem:[#allocation3 + $0x340] sm:$0xff] %v1186_v36  ;;  %v5396_v52 = vmul.f32 %v5174_v61, %v1471_v4  ;;  %v1331_v22 = vld [vmem:[#allocation3 + $0x2e5] sm:$0xff]  ;;  %v1342_v36 = vmul.f32 %v5318_v28, %v1332_v8  ;;  %v1321_v18 = vadd.f32 %v6165_v30, %v1293_v0  ;;  %v3289_v35 = vpop.permute.xlu0 %3288  ;;  %v1536_v47 = vmul.f32 %v5334_v16, %v1526_v20  ;;  %v1722_v15 = vld [vmem:[#allocation3 + $0x2cf] sm:$0xff]  ;;  %v6168_v30 = vld [vmem:[#allocation126_spill] sm:$0xff] }
 0x30e   :  { %6162 = vst [vmem:[#allocation74_spill] sm:$0xff] %v5389_v12  ;;  %v6164_v4 = vld [vmem:[#allocation92_spill] sm:$0xff]  ;;  %v6166_v53 = vld [vmem:[#allocation103_spill] sm:$0xff]  ;;  %v1376_v8 = vadd.f32 %v1372_v25, %v1348_v33 }
 0x30f   :  { %6163 = vst [vmem:[#allocation69_spill] sm:$0xff] %v5393_v14  ;;  %v5413_v21 = vadd.f32 %v1482_v46, %v6164_v4  ;;  %v1343_v10 = vadd.f32 %v1339_v31, %v6166_v53  ;;  %v1341_v4 = vmul.f32 %v5318_v28, %v1331_v22  ;;  %v1525_v0 = vld [vmem:[#allocation3 + $0x2c6] sm:$0xff]  ;;  %v1371_v31 = vadd.f32 %v1367_v63, %v6168_v30  ;;  %v1554_v22 = vld [vmem:[#allocation3 + $0x30e] sm:$0xff] }
 0x310   :  { %1209 = vst [vmem:[#allocation3 + $0x370] sm:$0xff] %v5389_v12  ;;  %v1322_v12 = vadd.f32 %v6167_v39, %v1294_v34  ;;  %v3291_v53 = vunpack.i.h.bf16 %v3289_v35  ;;  %v3290_v39 = vunpack.i.l.bf16 %v3289_v35  ;;  %v3284_v34 = vpop.permute.xlu2 %3283  ;;  %v1346_v41 = vadd.f32 %v1342_v36, %v6169_v29  ;;  %v1528_v30 = vld [vmem:[#allocation3 + $0x2ee] sm:$0xff] }
 0x311   :  { %1208 = vst [vmem:[#allocation3 + $0x368] sm:$0xff] %v5393_v14  ;;  %v3279_v14 = vpop.permute.xlu1 %3278  ;;  %v3286_v25 = vunpack.i.h.bf16 %v3284_v34  ;;  %v3285_v33 = vunpack.i.l.bf16 %v3284_v34  ;;  %v1347_v40 = vadd.f32 %v1343_v10, %v1319_v48  ;;  %v1535_v63 = vmul.f32 %v5334_v16, %v1525_v0  ;;  %v6170_v10 = vld [vmem:[#allocation113_spill] sm:$0xff] }
 0x312   :  { %v1386_v49 = vld [vmem:[#allocation3 + $0x34d] sm:$0xff]  ;;  %v1079_v28 = vsel %vm670_vm6, %v3290_v39, %v3291_v53  ;;  %v3280_v48 = vunpack.i.l.bf16 %v3279_v14  ;;  %v1350_v0 = vadd.f32 %v1346_v41, %v1322_v12  ;;  %v1564_v39 = vmul.f32 %v5399_v5, %v1554_v22 }
 0x313   :  { %v1396_v61 = vmul.f32 %v5384_v11, %v1386_v49  ;;  %v1370_v49 = vmul.f32 %v5342_v3, %v1360_v42  ;;  %v5429_v42 = vmul.f32 %v5354_v59, %v1722_v15  ;;  %1096 = vst [vmem:[#allocation3 + $0x2f8] sm:$0xff] %v1079_v28  ;;  %v1075_v29 = vsel %vm670_vm6, %v3285_v33, %v3286_v25  ;;  %v1359_v25 = vld [vmem:[#allocation3 + $0x325] sm:$0xff] }
 0x314   :  { %v1385_v37 = vld [vmem:[#allocation3 + $0x345] sm:$0xff]  ;;  %v1375_v36 = vadd.f32 %v1371_v31, %v1347_v40  ;;  %1092 = vst [vmem:[#allocation3 + $0x2d8] sm:$0xff] %v1075_v29  ;;  %v5444_v40 = vstv %s5418_s7  ;;  %v1538_v33 = vmul.f32 %v5334_v16, %v1528_v30  ;;  %v6173_v29 = vld [vmem:[#allocation22_spill] sm:$0xff] }
 0x315   :  { %v1400_v46 = vadd.f32 %v1396_v61, %v4935_v9  ;;  %v1395_v9 = vmul.f32 %v5384_v11, %v1385_v37  ;;  %v1374_v61 = vadd.f32 %v1370_v49, %v4902_v43  ;;  %v3281_v37 = vunpack.i.h.bf16 %v3279_v14  ;;  %v6171_v49 = vld [vmem:[#allocation108_spill] sm:$0xff]  ;;  %v3304_v28 = vpop.permute.xlu0 %3303 }
 0x316   :  { %v1540_v53 = vadd.f32 %v1536_v47, %v6171_v49  ;;  %v5447_v14 = vstv %s5422_s8  ;;  %v3305_v30 = vunpack.i.l.bf16 %v3304_v28 }
 0x317   :  { %v1404_v20 = vadd.f32 %v1400_v46, %v1376_v8  ;;  %v1399_v15 = vadd.f32 %v1395_v9, %v4923_v26  ;;  %v1345_v46 = vadd.f32 %v1341_v4, %v6170_v10  ;;  %v1582_v26 = vld [vmem:[#allocation3 + $0x34e] sm:$0xff]  ;;  %v1378_v34 = vadd.f32 %v1374_v61, %v1350_v0  ;;  %v1553_v61 = vld [vmem:[#allocation3 + $0x306] sm:$0xff] }
 0x318   :  { %v1388_v8 = vld [vmem:[#allocation3 + $0x36d] sm:$0xff]  ;;  %v1190_v9 = vsel %vm786_vm8, %v3280_v48, %v3281_v37  ;;  %v1369_v0 = vmul.f32 %v5342_v3, %v1359_v25  ;;  %v6177_v25 = vld [vmem:[#allocation11_spill] sm:$0xff] }
 0x319   :  { %v1432_v35 = vadd.f32 %v5066_v56, %v1404_v20  ;;  %v1398_v56 = vmul.f32 %v5384_v11, %v1388_v8  ;;  %v1403_v31 = vadd.f32 %v1399_v15, %v1375_v36  ;;  %v1556_v20 = vld [vmem:[#allocation3 + $0x32e] sm:$0xff]  ;;  %v3294_v22 = vpop.permute.xlu1 %3293  ;;  %v1592_v15 = vmul.f32 %v5444_v40, %v1582_v26  ;;  %1207 = vst [vmem:[#allocation3 + $0x360] sm:$0xff] %v1190_v9  ;;  %v1581_v48 = vld [vmem:[#allocation3 + $0x346] sm:$0xff] }
 0x31b   :  { %v1460_v43 = vadd.f32 %v5222_v44, %v1432_v35  ;;  %v1402_v12 = vadd.f32 %v1398_v56, %v4980_v62  ;;  %v6172_v44 = vld [vmem:[#allocation104_spill] sm:$0xff]  ;;  %v1431_v47 = vadd.f32 %v5051_v7, %v1403_v31  ;;  %v1349_v35 = vadd.f32 %v1345_v46, %v1321_v18  ;;  %v6174_v62 = vld [vmem:[#allocation130_spill] sm:$0xff] }
 0x31c   :  { %v1539_v4 = vadd.f32 %v1535_v63, %v6172_v44  ;;  %v1568_v10 = vadd.f32 %v1564_v39, %v6174_v62  ;;  %v1566_v63 = vmul.f32 %v5399_v5, %v1556_v20  ;;  %v3306_v46 = vunpack.i.h.bf16 %v3304_v28  ;;  %v6175_v31 = vld [vmem:[#allocation118_spill] sm:$0xff]  ;;  %v1750_v62 = vld [vmem:[#allocation3 + $0x30f] sm:$0xff] }
 0x31d   :  { %v1488_v41 = vadd.f32 %v5372_v38, %v1460_v43  ;;  %v1406_v8 = vadd.f32 %v1402_v12, %v1378_v34  ;;  %v3299_v38 = vpop.permute.xlu2 %3298  ;;  %v1459_v7 = vadd.f32 %v5219_v2, %v1431_v47  ;;  %v1563_v43 = vmul.f32 %v5399_v5, %v1553_v61  ;;  %v6176_v2 = vld [vmem:[#allocation143_spill] sm:$0xff]  ;;  %v1584_v12 = vld [vmem:[#allocation3 + $0x36e] sm:$0xff] }
 0x31e   :  { %v3301_v49 = vunpack.i.h.bf16 %v3299_v38  ;;  %v3300_v26 = vunpack.i.l.bf16 %v3299_v38  ;;  %v1542_v39 = vadd.f32 %v1538_v33, %v6175_v31  ;;  %v1596_v20 = vadd.f32 %v1592_v15, %v4947_v1  ;;  %v6178_v47 = vld [vmem:[#allocation148_spill] sm:$0xff] }
 0x31f   :  { %v1516_v36 = vadd.f32 %v6173_v29, %v1488_v41  ;;  %v1434_v18 = vadd.f32 %v5148_v23, %v1406_v8  ;;  %v1487_v56 = vadd.f32 %v5351_v50, %v1459_v7  ;;  %v1591_v23 = vmul.f32 %v5444_v40, %v1581_v48  ;;  %v6179_v61 = vld [vmem:[#allocation128_spill] sm:$0xff] }
 0x320   :  { %v3296_v44 = vunpack.i.h.bf16 %v3294_v22  ;;  %v1570_v9 = vadd.f32 %v1566_v63, %v6178_v47  ;;  %v1189_v33 = vsel %vm786_vm8, %v3305_v30, %v3306_v46  ;;  %v1567_v29 = vadd.f32 %v1563_v43, %v6179_v61  ;;  %v1527_v38 = vld [vmem:[#allocation3 + $0x2e6] sm:$0xff]  ;;  %v1778_v31 = vld [vmem:[#allocation3 + $0x34f] sm:$0xff] }
 0x321   :  { %v1544_v37 = vadd.f32 %v1540_v53, %v1516_v36  ;;  %v1462_v3 = vadd.f32 %v5294_v55, %v1434_v18  ;;  %v1373_v53 = vadd.f32 %v1369_v0, %v6176_v2  ;;  %v1515_v41 = vadd.f32 %v6177_v25, %v1487_v56  ;;  %v1387_v36 = vld [vmem:[#allocation3 + $0x365] sm:$0xff]  ;;  %1206 = vst [vmem:[#allocation3 + $0x358] sm:$0xff] %v1189_v33  ;;  %v3309_v8 = vpop.permute.xlu1 %3308  ;;  %v6184_v25 = vld [vmem:[#allocation109_spill] sm:$0xff] }
 0x322   :  { %v1136_v55 = vsel %vm728_vm7, %v3300_v26, %v3301_v49  ;;  %v3295_v15 = vunpack.i.l.bf16 %v3294_v22  ;;  %v6180_v0 = vld [vmem:[#allocation28_spill] sm:$0xff]  ;;  %v1594_v7 = vmul.f32 %v5444_v40, %v1584_v12  ;;  %v1537_v49 = vmul.f32 %v5334_v16, %v1527_v38  ;;  %v6186_v33 = vld [vmem:[#allocation95_spill] sm:$0xff] }
 0x323   :  { %v1572_v34 = vadd.f32 %v1568_v10, %v1544_v37  ;;  %v1490_v28 = vadd.f32 %v5413_v21, %v1462_v3  ;;  %v1543_v1 = vadd.f32 %v1539_v4, %v1515_v41  ;;  %v1397_v21 = vmul.f32 %v5384_v11, %v1387_v36  ;;  %1153 = vst [vmem:[#allocation3 + $0x338] sm:$0xff] %v1136_v55  ;;  %v6181_v4 = vld [vmem:[#allocation153_spill] sm:$0xff]  ;;  %v6182_v43 = vld [vmem:[#allocation164_spill] sm:$0xff] }
 0x324   :  { %v1377_v37 = vadd.f32 %v1373_v53, %v1349_v35  ;;  %v1595_v18 = vadd.f32 %v1591_v23, %v6181_v4  ;;  %v1132_v46 = vsel %vm728_vm7, %v3295_v15, %v3296_v44  ;;  %v1760_v26 = vmul.f32 %v5402_v45, %v1750_v62  ;;  %v1721_v35 = vld [vmem:[#allocation3 + $0x2c7] sm:$0xff]  ;;  %v1724_v12 = vld [vmem:[#allocation3 + $0x2ef] sm:$0xff] }
 0x325   :  { %v1600_v50 = vadd.f32 %v1596_v20, %v1572_v34  ;;  %v1518_v63 = vadd.f32 %v6180_v0, %v1490_v28  ;;  %v1571_v48 = vadd.f32 %v1567_v29, %v1543_v1  ;;  %v1401_v56 = vadd.f32 %v1397_v21, %v6182_v43  ;;  %1149 = vst [vmem:[#allocation3 + $0x318] sm:$0xff] %v1132_v46  ;;  %v1555_v44 = vld [vmem:[#allocation3 + $0x326] sm:$0xff]  ;;  %v1752_v55 = vld [vmem:[#allocation3 + $0x32f] sm:$0xff] }
 0x326   :  { %v3310_v34 = vunpack.i.l.bf16 %v3309_v8  ;;  %v1598_v2 = vadd.f32 %v1594_v7, %v4986_v58  ;;  %v1736_v41 = vadd.f32 %v5429_v42, %v6184_v25  ;;  %v1749_v47 = vld [vmem:[#allocation3 + $0x307] sm:$0xff]  ;;  %v1731_v61 = vmul.f32 %v5354_v59, %v1721_v35 }
 0x327   :  { %v1628_v10 = vadd.f32 %v5072_v6, %v1600_v50  ;;  %v1546_v30 = vadd.f32 %v1542_v39, %v1518_v63  ;;  %v3311_v6 = vunpack.i.h.bf16 %v3309_v8  ;;  %v1599_v11 = vadd.f32 %v1595_v18, %v1571_v48  ;;  %v6185_v50 = vld [vmem:[#allocation23_spill] sm:$0xff]  ;;  %v6188_v1 = vld [vmem:[#allocation132_spill] sm:$0xff] }
 0x328   :  { %v1405_v53 = vadd.f32 %v1401_v56, %v1377_v37  ;;  %v6187_v42 = vld [vmem:[#allocation115_spill] sm:$0xff]  ;;  %v1764_v36 = vadd.f32 %v1760_v26, %v6188_v1  ;;  %v1734_v62 = vmul.f32 %v5354_v59, %v1724_v12  ;;  %v6189_v7 = vld [vmem:[#allocation156_spill] sm:$0xff] }
 0x329   :  { %v1656_v22 = vadd.f32 %v5230_v54, %v1628_v10  ;;  %v1574_v3 = vadd.f32 %v1570_v9, %v1546_v30  ;;  %v6183_v54 = vld [vmem:[#allocation91_spill] sm:$0xff]  ;;  %v1627_v16 = vadd.f32 %v5069_v27, %v1599_v11  ;;  %v1193_v23 = vsel %vm786_vm8, %v3310_v34, %v3311_v6  ;;  %v6191_v18 = vld [vmem:[#allocation12_spill] sm:$0xff] }
 0x32a   :  { %v1485_v39 = vadd.f32 %v5396_v52, %v6183_v54  ;;  %v1433_v58 = vadd.f32 %v5123_v32, %v1405_v53  ;;  %1210 = vst [vmem:[#allocation3 + $0x378] sm:$0xff] %v1193_v23  ;;  %v1682_v52 = vadd.f32 %v5407_v17, %v6186_v33  ;;  %v1541_v27 = vadd.f32 %v1537_v49, %v6187_v42  ;;  %v1777_v8 = vld [vmem:[#allocation3 + $0x347] sm:$0xff]  ;;  %v6197_v54 = vld [vmem:[#allocation29_spill] sm:$0xff]  ;;  %v6201_v42 = vld [vmem:[#allocation166_spill] sm:$0xff] }
 0x32b   :  { %v1684_v20 = vadd.f32 %v5375_v57, %v1656_v22  ;;  %v1788_v57 = vmul.f32 %v5447_v14, %v1778_v31  ;;  %v1602_v9 = vadd.f32 %v1598_v2, %v1574_v3  ;;  %v1655_v29 = vadd.f32 %v5225_v51, %v1627_v16  ;;  %v1583_v51 = vld [vmem:[#allocation3 + $0x366] sm:$0xff]  ;;  %v1780_v22 = vld [vmem:[#allocation3 + $0x36f] sm:$0xff] }
 0x32c   :  { %v1461_v32 = vadd.f32 %v5291_v19, %v1433_v58  ;;  %v1565_v17 = vmul.f32 %v5399_v5, %v1555_v44  ;;  %v1759_v10 = vmul.f32 %v5402_v45, %v1749_v47  ;;  %v1762_v19 = vmul.f32 %v5402_v45, %v1752_v55  ;;  %v6193_v49 = vld [vmem:[#allocation119_spill] sm:$0xff]  ;;  %v6196_v2 = vld [vmem:[#allocation17_spill] sm:$0xff]  ;;  %v6199_v44 = vld [vmem:[#allocation154_spill] sm:$0xff] }
 0x32d   :  { %v1712_v28 = vadd.f32 %v6185_v50, %v1684_v20  ;;  %v1630_v38 = vadd.f32 %v5153_v24, %v1602_v9  ;;  %v1683_v0 = vadd.f32 %v5362_v60, %v1655_v29  ;;  %v1792_v21 = vadd.f32 %v1788_v57, %v6189_v7  ;;  %v6190_v24 = vld [vmem:[#allocation106_spill] sm:$0xff]  ;;  %v6192_v60 = vld [vmem:[#allocation13_spill] sm:$0xff]  ;;  %v6195_v11 = vld [vmem:[#allocation131_spill] sm:$0xff] }
 0x32e   :  { %v1489_v48 = vadd.f32 %v1485_v39, %v1461_v32  ;;  %v1735_v4 = vadd.f32 %v1731_v61, %v6190_v24  ;;  %v1787_v5 = vmul.f32 %v5447_v14, %v1777_v8  ;;  %v1593_v6 = vmul.f32 %v5444_v40, %v1583_v51  ;;  %v2057_v20 = vld [vmem:[#allocation3 + $0x249] sm:$0xff]  ;;  %v2058_v50 = vld [vmem:[#allocation3 + $0x251] sm:$0xff]  ;;  %v6200_v9 = vld [vmem:[#allocation63_spill] sm:$0xff] }
 0x32f   :  { %v1740_v15 = vadd.f32 %v1736_v41, %v1712_v28  ;;  %v1658_v37 = vadd.f32 %v5311_v13, %v1630_v38  ;;  %v1711_v46 = vadd.f32 %v6191_v18, %v1683_v0  ;;  %v1738_v26 = vadd.f32 %v1734_v62, %v6193_v49  ;;  %v6194_v13 = vld [vmem:[#allocation144_spill] sm:$0xff]  ;;  %v6198_v40 = vld [vmem:[#allocation149_spill] sm:$0xff]  ;;  %v6206_v7 = vld [vmem:[#allocation186_spill] sm:$0xff] }
 0x330   :  { %v1517_v56 = vadd.f32 %v6192_v60, %v1489_v48  ;;  %v1569_v31 = vadd.f32 %v1565_v17, %v6194_v13  ;;  %v1763_v34 = vadd.f32 %v1759_v10, %v6195_v11  ;;  %v1667_v3 = vld [vmem:[#allocation3 + $0x267] sm:$0xff]  ;;  %v1790_v25 = vmul.f32 %v5447_v14, %v1780_v22  ;;  %v6202_v29 = vld [vmem:[#allocation185_spill] sm:$0xff] }
 0x331   :  { %v1768_v63 = vadd.f32 %v1764_v36, %v1740_v15  ;;  %v1686_v43 = vadd.f32 %v1682_v52, %v1658_v37  ;;  %v1739_v35 = vadd.f32 %v1735_v4, %v1711_v46  ;;  %v5527_v16 = vstv %s5498_s9  ;;  %v2253_v28 = vld [vmem:[#allocation3 + $0x24a] sm:$0xff]  ;;  %v6203_v36 = vld [vmem:[#allocation47_spill] sm:$0xff]  ;;  %v2254_v8 = vld [vmem:[#allocation3 + $0x252] sm:$0xff] }
 0x332   :  { %v1545_v41 = vadd.f32 %v1541_v27, %v1517_v56  ;;  %v1766_v23 = vadd.f32 %v1762_v19, %v6198_v40  ;;  %v1791_v47 = vadd.f32 %v1787_v5, %v6199_v44  ;;  %v2449_v57 = vld [vmem:[#allocation3 + $0x24b] sm:$0xff]  ;;  %v1597_v61 = vadd.f32 %v1593_v6, %v6201_v42  ;;  %v6207_v37 = vld [vmem:[#allocation187_spill] sm:$0xff]  ;;  %v2450_v19 = vld [vmem:[#allocation3 + $0x253] sm:$0xff] }
 0x333   :  { %v1796_v30 = vadd.f32 %v1792_v21, %v1768_v63  ;;  %v1714_v39 = vadd.f32 %v6197_v54, %v1686_v43  ;;  %v1767_v12 = vadd.f32 %v1763_v34, %v1739_v35  ;;  %v2067_v1 = vmul.f32 %v6202_v29, %v2057_v20  ;;  %v1723_v38 = vld [vmem:[#allocation3 + $0x2e7] sm:$0xff]  ;;  %v6204_v32 = vld [vmem:[#allocation125_spill] sm:$0xff]  ;;  %v6215_v20 = vld [vmem:[#allocation174_spill] sm:$0xff] }
 0x334   :  { %v1573_v52 = vadd.f32 %v1569_v31, %v1545_v41  ;;  %v1677_v27 = vmul.f32 %v6203_v36, %v1667_v3  ;;  %v5536_v55 = vstv %s5509_s10  ;;  %v6205_v10 = vld [vmem:[#allocation168_spill] sm:$0xff]  ;;  %v2068_v63 = vmul.f32 %v6202_v29, %v2058_v50  ;;  %v6208_v24 = vld [vmem:[#allocation19_spill] sm:$0xff]  ;;  %v6210_v22 = vld [vmem:[#allocation21_spill] sm:$0xff] }
 0x335   :  { %v1824_v53 = vadd.f32 %v6196_v2, %v1796_v30  ;;  %v1742_v33 = vadd.f32 %v1738_v26, %v1714_v39  ;;  %v1795_v15 = vadd.f32 %v1791_v47, %v1767_v12  ;;  %v1794_v0 = vadd.f32 %v1790_v25, %v6205_v10  ;;  %v1751_v18 = vld [vmem:[#allocation3 + $0x327] sm:$0xff]  ;;  %v6213_v31 = vld [vmem:[#allocation58_spill] sm:$0xff]  ;;  %v6214_v34 = vld [vmem:[#allocation93_spill] sm:$0xff] }
 0x336   :  { %v1601_v51 = vadd.f32 %v1597_v61, %v1573_v52  ;;  %v2263_v21 = vmul.f32 %v6206_v7, %v2253_v28  ;;  %v2459_v48 = vmul.f32 %v6207_v37, %v2449_v57  ;;  %v6209_v46 = vld [vmem:[#allocation60_spill] sm:$0xff]  ;;  %v6211_v60 = vld [vmem:[#allocation183_spill] sm:$0xff]  ;;  %v2264_v26 = vmul.f32 %v6206_v7, %v2254_v8  ;;  %v6223_v52 = vld [vmem:[#allocation82_spill] sm:$0xff] }
 0x337   :  { %v1852_v58 = vadd.f32 %v6200_v9, %v1824_v53  ;;  %v1770_v17 = vadd.f32 %v1766_v23, %v1742_v33  ;;  %v1823_v4 = vadd.f32 %v6208_v24, %v1795_v15  ;;  %v1984_v5 = vmul.f32 %v5536_v55, %v6209_v46  ;;  %v6212_v6 = vld [vmem:[#allocation80_spill] sm:$0xff]  ;;  %v6216_v2 = vld [vmem:[#allocation39_spill] sm:$0xff]  ;;  %v6219_v23 = vld [vmem:[#allocation114_spill] sm:$0xff] }
 0x338   :  { %v1629_v56 = vadd.f32 %v6211_v60, %v1601_v51  ;;  %v5549_v49 = vadd.f32 %v2067_v1, %v6212_v6  ;;  %v1733_v13 = vmul.f32 %v5354_v59, %v1723_v38  ;;  %v1681_v35 = vadd.f32 %v1677_v27, %v6214_v34  ;;  %v6217_v54 = vld [vmem:[#allocation64_spill] sm:$0xff]  ;;  %v6218_v25 = vld [vmem:[#allocation83_spill] sm:$0xff]  ;;  %v6222_v9 = vld [vmem:[#allocation81_spill] sm:$0xff] }
 0x339   :  { %v1880_v62 = vadd.f32 %v6204_v32, %v1852_v58  ;;  %v1798_v43 = vadd.f32 %v1794_v0, %v1770_v17  ;;  %v1851_v11 = vadd.f32 %v6213_v31, %v1823_v4  ;;  %v5561_v41 = vadd.f32 %v2263_v21, %v6218_v25  ;;  %v1779_v44 = vld [vmem:[#allocation3 + $0x367] sm:$0xff]  ;;  %v6225_v36 = vld [vmem:[#allocation66_spill] sm:$0xff]  ;;  %v6229_v51 = vld [vmem:[#allocation85_spill] sm:$0xff] }
 0x33a   :  { %v1657_v39 = vadd.f32 %v6217_v54, %v1629_v56  ;;  %v2460_v40 = vmul.f32 %v6207_v37, %v2450_v19  ;;  %v1761_v59 = vmul.f32 %v5402_v45, %v1751_v18  ;;  %v6220_v47 = vld [vmem:[#allocation151_spill] sm:$0xff]  ;;  %v6221_v28 = vld [vmem:[#allocation48_spill] sm:$0xff]  ;;  %v2072_v42 = vadd.f32 %v2068_v63, %v6223_v52  ;;  %v6228_v17 = vld [vmem:[#allocation14_spill] sm:$0xff] }
 0x33b   :  { %v1908_v30 = vadd.f32 %v6210_v22, %v1880_v62  ;;  %v1826_v53 = vadd.f32 %v6216_v2, %v1798_v43  ;;  %v1879_v12 = vadd.f32 %v6219_v23, %v1851_v11  ;;  %v1988_v50 = vadd.f32 %v1984_v5, %v6220_v47  ;;  %v6224_v61 = vld [vmem:[#allocation116_spill] sm:$0xff]  ;;  %v6226_v45 = vld [vmem:[#allocation7_spill] sm:$0xff]  ;;  %v2114_v62 = vld [vmem:[#allocation3 + $0x2d1] sm:$0xff] }
 0x33c   :  { %v1685_v33 = vadd.f32 %v1681_v35, %v1657_v39  ;;  %v1737_v1 = vadd.f32 %v1733_v13, %v6224_v61  ;;  %v1983_v27 = vmul.f32 %v5536_v55, %v6225_v36  ;;  %v6227_v38 = vld [vmem:[#allocation147_spill] sm:$0xff]  ;;  %v1789_v0 = vmul.f32 %v5447_v14, %v1779_v44  ;;  %v6230_v63 = vld [vmem:[#allocation84_spill] sm:$0xff]  ;;  %v6232_v18 = vld [vmem:[#allocation74_spill] sm:$0xff] }
 0x33d   :  { %v1936_v3 = vadd.f32 %v6215_v20, %v1908_v30  ;;  %v1854_v58 = vadd.f32 %v6222_v9, %v1826_v53  ;;  %v1907_v15 = vadd.f32 %v6226_v45, %v1879_v12  ;;  %v5582_v21 = vadd.f32 %v2264_v26, %v6229_v51  ;;  %v6231_v4 = vld [vmem:[#allocation155_spill] sm:$0xff]  ;;  %v6233_v5 = vld [vmem:[#allocation146_spill] sm:$0xff]  ;;  %v6238_v31 = vld [vmem:[#allocation188_spill] sm:$0xff] }
 0x33e   :  { %v1713_v10 = vadd.f32 %v6228_v17, %v1685_v33  ;;  %v5585_v24 = vadd.f32 %v2459_v48, %v6230_v63  ;;  %v1986_v46 = vmul.f32 %v5536_v55, %v6232_v18  ;;  %v1765_v22 = vadd.f32 %v1761_v59, %v6233_v5  ;;  %v6234_v30 = vld [vmem:[#allocation175_spill] sm:$0xff]  ;;  %v6235_v60 = vld [vmem:[#allocation30_spill] sm:$0xff]  ;;  %v6240_v2 = vld [vmem:[#allocation52_spill] sm:$0xff] }
 0x33f   :  { %v1964_v57 = vadd.f32 %v6221_v28, %v1936_v3  ;;  %v1882_v32 = vadd.f32 %v6227_v38, %v1854_v58  ;;  %v1935_v19 = vadd.f32 %v6231_v4, %v1907_v15  ;;  %v6236_v6 = vld [vmem:[#allocation86_spill] sm:$0xff]  ;;  %v6237_v13 = vld [vmem:[#allocation139_spill] sm:$0xff]  ;;  %v5603_v12 = vstv %s5555_s11  ;;  %v2255_v9 = vld [vmem:[#allocation3 + $0x26a] sm:$0xff] }
 0x340   :  { %v1741_v14 = vadd.f32 %v1737_v1, %v1713_v10  ;;  %v5594_v26 = vadd.f32 %v2460_v40, %v6236_v6  ;;  %v1987_v48 = vadd.f32 %v1983_v27, %v6237_v13  ;;  %v6239_v34 = vld [vmem:[#allocation67_spill] sm:$0xff]  ;;  %v2142_v20 = vld [vmem:[#allocation3 + $0x311] sm:$0xff]  ;;  %v5606_v40 = vstv %s5564_s28  ;;  %v2113_v58 = vld [vmem:[#allocation3 + $0x2c9] sm:$0xff] }
 0x341   :  { %v1992_v8 = vadd.f32 %v1988_v50, %v1964_v57  ;;  %v1910_v56 = vadd.f32 %v6235_v60, %v1882_v32  ;;  %v1963_v11 = vadd.f32 %v6238_v31, %v1935_v19  ;;  %v2124_v35 = vmul.f32 %v6239_v34, %v2114_v62  ;;  %v2060_v3 = vld [vmem:[#allocation3 + $0x271] sm:$0xff]  ;;  %v6241_v54 = vld [vmem:[#allocation179_spill] sm:$0xff]  ;;  %v2059_v57 = vld [vmem:[#allocation3 + $0x269] sm:$0xff] }
 0x342   :  { %v1769_v25 = vadd.f32 %v1765_v22, %v1741_v14  ;;  %v6242_v59 = vld [vmem:[#allocation167_spill] sm:$0xff]  ;;  %v6243_v47 = vld [vmem:[#allocation162_spill] sm:$0xff]  ;;  %v2152_v36 = vmul.f32 %v5603_v12, %v2142_v20  ;;  %v2070_v27 = vmul.f32 %v6202_v29, %v2060_v3  ;;  %v5613_v45 = vstv %s5573_s12  ;;  %v6246_v38 = vld [vmem:[#allocation101_spill] sm:$0xff] }
 0x343   :  { %v2020_v43 = vadd.f32 %v6234_v30, %v1992_v8  ;;  %v1938_v39 = vadd.f32 %v6241_v54, %v1910_v56  ;;  %v1793_v23 = vadd.f32 %v1789_v0, %v6242_v59  ;;  %v1991_v44 = vadd.f32 %v1987_v48, %v1963_v11  ;;  %v2170_v28 = vld [vmem:[#allocation3 + $0x351] sm:$0xff]  ;;  %v2141_v62 = vld [vmem:[#allocation3 + $0x309] sm:$0xff]  ;;  %v6251_v14 = vld [vmem:[#allocation87_spill] sm:$0xff] }
 0x344   :  { %v1990_v50 = vadd.f32 %v1986_v46, %v6243_v47  ;;  %v6244_v33 = vld [vmem:[#allocation50_spill] sm:$0xff]  ;;  %v2128_v32 = vadd.f32 %v2124_v35, %v6246_v38  ;;  %v6247_v0 = vld [vmem:[#allocation24_spill] sm:$0xff]  ;;  %v2069_v19 = vmul.f32 %v6202_v29, %v2059_v57  ;;  %v5622_v18 = vmul.f32 %v6206_v7, %v2255_v9  ;;  %v6255_v54 = vld [vmem:[#allocation145_spill] sm:$0xff] }
 0x345   :  { %v2048_v53 = vadd.f32 %v6240_v2, %v2020_v43  ;;  %v1966_v52 = vadd.f32 %v6244_v33, %v1938_v39  ;;  %v1797_v1 = vadd.f32 %v1793_v23, %v1769_v25  ;;  %v6245_v15 = vld [vmem:[#allocation178_spill] sm:$0xff]  ;;  %v2123_v46 = vmul.f32 %v6239_v34, %v2113_v58  ;;  %v2169_v30 = vld [vmem:[#allocation3 + $0x349] sm:$0xff]  ;;  %v6256_v25 = vld [vmem:[#allocation159_spill] sm:$0xff] }
 0x346   :  { %v2019_v8 = vadd.f32 %v6245_v15, %v1991_v44  ;;  %v2116_v10 = vld [vmem:[#allocation3 + $0x2f1] sm:$0xff]  ;;  %v6252_v13 = vld [vmem:[#allocation136_spill] sm:$0xff]  ;;  %v2151_v35 = vmul.f32 %v5603_v12, %v2141_v62 }
 0x347   :  { %v2076_v61 = vadd.f32 %v2072_v42, %v2048_v53  ;;  %v1994_v17 = vadd.f32 %v1990_v50, %v1966_v52  ;;  %v6248_v63 = vld [vmem:[#allocation38_spill] sm:$0xff]  ;;  %v2180_v42 = vmul.f32 %v5613_v45, %v2170_v28  ;;  %v2156_v48 = vadd.f32 %v2152_v36, %v6252_v13  ;;  %v6254_v2 = vld [vmem:[#allocation53_spill] sm:$0xff]  ;;  %v6259_v57 = vld [vmem:[#allocation20_spill] sm:$0xff] }
 0x348   :  { %v1825_v4 = vadd.f32 %v6248_v63, %v1797_v1  ;;  %v6249_v5 = vld [vmem:[#allocation54_spill] sm:$0xff]  ;;  %v2126_v20 = vmul.f32 %v6239_v34, %v2116_v10  ;;  %v2179_v50 = vmul.f32 %v5613_v45, %v2169_v30  ;;  %v6258_v28 = vld [vmem:[#allocation69_spill] sm:$0xff]  ;;  %v6261_v15 = vld [vmem:[#allocation96_spill] sm:$0xff] }
 0x349   :  { %v2104_v51 = vadd.f32 %v6247_v0, %v2076_v61  ;;  %v2047_v22 = vadd.f32 %v6249_v5, %v2019_v8  ;;  %v6250_v43 = vld [vmem:[#allocation42_spill] sm:$0xff]  ;;  %v2184_v59 = vadd.f32 %v2180_v42, %v6256_v25  ;;  %v6260_v61 = vld [vmem:[#allocation8_spill] sm:$0xff]  ;;  %v2073_v8 = vadd.f32 %v2069_v19, %v6261_v15  ;;  %v6262_v38 = vld [vmem:[#allocation133_spill] sm:$0xff] }
 0x34a   :  { %v2022_v60 = vadd.f32 %v6250_v43, %v1994_v17  ;;  %v1853_v6 = vadd.f32 %v6251_v14, %v1825_v4  ;;  %v6253_v31 = vld [vmem:[#allocation98_spill] sm:$0xff]  ;;  %v6265_v4 = vld [vmem:[#allocation173_spill] sm:$0xff] }
 0x34b   :  { %v2132_v56 = vadd.f32 %v2128_v32, %v2104_v51  ;;  %v2074_v11 = vadd.f32 %v2070_v27, %v6253_v31  ;;  %v2075_v29 = vadd.f32 %v5549_v49, %v2047_v22  ;;  %v2144_v3 = vld [vmem:[#allocation3 + $0x331] sm:$0xff]  ;;  %v1985_v49 = vmul.f32 %v5536_v55, %v6258_v28  ;;  %v6264_v55 = vld [vmem:[#allocation32_spill] sm:$0xff]  ;;  %v6270_v31 = vld [vmem:[#allocation51_spill] sm:$0xff] }
 0x34c   :  { %v2050_v53 = vadd.f32 %v6254_v2, %v2022_v60  ;;  %v1881_v39 = vadd.f32 %v6255_v54, %v1853_v6  ;;  %v6257_v44 = vld [vmem:[#allocation110_spill] sm:$0xff]  ;;  %v2154_v36 = vmul.f32 %v5603_v12, %v2144_v3  ;;  %v2155_v32 = vadd.f32 %v2151_v35, %v6262_v38  ;;  %v2309_v51 = vld [vmem:[#allocation3 + $0x2ca] sm:$0xff] }
 0x34d   :  { %v2160_v23 = vadd.f32 %v2156_v48, %v2132_v56  ;;  %v2127_v47 = vadd.f32 %v2123_v46, %v6257_v44  ;;  %v2103_v9 = vadd.f32 %v6259_v57, %v2075_v29  ;;  %v2172_v58 = vld [vmem:[#allocation3 + $0x371] sm:$0xff]  ;;  %v6266_v46 = vld [vmem:[#allocation176_spill] sm:$0xff]  ;;  %v5669_v57 = vstv %s5639_s26 }
 0x34e   :  { %v2078_v33 = vadd.f32 %v2074_v11, %v2050_v53  ;;  %v2310_v52 = vld [vmem:[#allocation3 + $0x2d2] sm:$0xff]  ;;  %v1909_v1 = vadd.f32 %v6260_v61, %v1881_v39  ;;  %v2182_v30 = vmul.f32 %v5613_v45, %v2172_v58  ;;  %v6269_v6 = vld [vmem:[#allocation68_spill] sm:$0xff] }
 0x34f   :  { %v2188_v27 = vadd.f32 %v2184_v59, %v2160_v23  ;;  %v6263_v62 = vld [vmem:[#allocation122_spill] sm:$0xff]  ;;  %v2131_v10 = vadd.f32 %v2127_v47, %v2103_v9  ;;  %v6267_v43 = vld [vmem:[#allocation157_spill] sm:$0xff]  ;;  %v2320_v13 = vmul.f32 %v6269_v6, %v2310_v52  ;;  %v6271_v35 = vld [vmem:[#allocation140_spill] sm:$0xff]  ;;  %v2319_v53 = vmul.f32 %v6269_v6, %v2309_v51 }
 0x350   :  { %v2130_v17 = vadd.f32 %v2126_v20, %v6263_v62  ;;  %v2256_v0 = vld [vmem:[#allocation3 + $0x272] sm:$0xff]  ;;  %v2106_v63 = vadd.f32 %v6264_v55, %v2078_v33  ;;  %v1937_v42 = vadd.f32 %v6265_v4, %v1909_v1  ;;  %v2183_v60 = vadd.f32 %v2179_v50, %v6267_v43  ;;  %v2115_v59 = vld [vmem:[#allocation3 + $0x2e9] sm:$0xff]  ;;  %v6273_v50 = vld [vmem:[#allocation171_spill] sm:$0xff] }
 0x351   :  { %v2216_v5 = vadd.f32 %v6266_v46, %v2188_v27  ;;  %v2338_v22 = vld [vmem:[#allocation3 + $0x312] sm:$0xff]  ;;  %v2159_v14 = vadd.f32 %v2155_v32, %v2131_v10  ;;  %v2158_v29 = vadd.f32 %v2154_v36, %v6271_v35  ;;  %v2266_v2 = vmul.f32 %v6206_v7, %v2256_v0  ;;  %v6275_v7 = vld [vmem:[#allocation180_spill] sm:$0xff]  ;;  %v6278_v62 = vld [vmem:[#allocation99_spill] sm:$0xff] }
 0x352   :  { %v6268_v56 = vld [vmem:[#allocation165_spill] sm:$0xff]  ;;  %v2134_v48 = vadd.f32 %v2130_v17, %v2106_v63  ;;  %v1965_v11 = vadd.f32 %v6270_v31, %v1937_v42  ;;  %v2348_v39 = vmul.f32 %v5606_v40, %v2338_v22  ;;  %v2186_v28 = vadd.f32 %v2182_v30, %v6273_v50  ;;  %v6274_v9 = vld [vmem:[#allocation102_spill] sm:$0xff]  ;;  %v6279_v10 = vld [vmem:[#allocation111_spill] sm:$0xff] }
 0x353   :  { %v1989_v19 = vadd.f32 %v1985_v49, %v6268_v56  ;;  %v6272_v20 = vld [vmem:[#allocation49_spill] sm:$0xff]  ;;  %v2187_v25 = vadd.f32 %v2183_v60, %v2159_v14  ;;  %v5666_v49 = vstv %s5633_s13  ;;  %v2324_v58 = vadd.f32 %v2320_v13, %v6274_v9  ;;  %v6277_v38 = vld [vmem:[#allocation26_spill] sm:$0xff]  ;;  %v6280_v55 = vld [vmem:[#allocation55_spill] sm:$0xff] }
 0x354   :  { %v2244_v3 = vadd.f32 %v6272_v20, %v2216_v5  ;;  %v2366_v54 = vld [vmem:[#allocation3 + $0x352] sm:$0xff]  ;;  %v2162_v44 = vadd.f32 %v2158_v29, %v2134_v48  ;;  %v2337_v52 = vld [vmem:[#allocation3 + $0x30a] sm:$0xff]  ;;  %v2270_v17 = vadd.f32 %v2266_v2, %v6278_v62  ;;  %v2323_v0 = vadd.f32 %v2319_v53, %v6279_v10  ;;  %v6281_v46 = vld [vmem:[#allocation59_spill] sm:$0xff] }
 0x355   :  { %v1993_v23 = vadd.f32 %v1989_v19, %v1965_v11  ;;  %v2215_v33 = vadd.f32 %v6275_v7, %v2187_v25  ;;  %v2143_v61 = vld [vmem:[#allocation3 + $0x329] sm:$0xff]  ;;  %v2312_v1 = vld [vmem:[#allocation3 + $0x2f2] sm:$0xff]  ;;  %v2376_v15 = vmul.f32 %v5669_v57, %v2366_v54  ;;  %v2125_v51 = vmul.f32 %v6239_v34, %v2115_v59 }
 0x356   :  { %v2272_v47 = vadd.f32 %v5582_v21, %v2244_v3  ;;  %v6276_v36 = vld [vmem:[#allocation41_spill] sm:$0xff]  ;;  %v2190_v21 = vadd.f32 %v2186_v28, %v2162_v44  ;;  %v6283_v60 = vld [vmem:[#allocation44_spill] sm:$0xff]  ;;  %v2347_v19 = vmul.f32 %v5606_v40, %v2337_v52  ;;  %v2153_v14 = vmul.f32 %v5603_v12, %v2143_v61  ;;  %v6287_v25 = vld [vmem:[#allocation34_spill] sm:$0xff] }
 0x357   :  { %v2021_v27 = vadd.f32 %v6276_v36, %v1993_v23  ;;  %v2243_v63 = vadd.f32 %v6280_v55, %v2215_v33  ;;  %v2365_v4 = vld [vmem:[#allocation3 + $0x34a] sm:$0xff]  ;;  %v2322_v13 = vmul.f32 %v6269_v6, %v2312_v1  ;;  %v2340_v48 = vld [vmem:[#allocation3 + $0x332] sm:$0xff]  ;;  %v6288_v44 = vld [vmem:[#allocation27_spill] sm:$0xff] }
 0x358   :  { %v2300_v32 = vadd.f32 %v6277_v38, %v2272_v47  ;;  %v2171_v42 = vld [vmem:[#allocation3 + $0x369] sm:$0xff]  ;;  %v2218_v56 = vadd.f32 %v6283_v60, %v2190_v21  ;;  %v2375_v54 = vmul.f32 %v5669_v57, %v2365_v4  ;;  %v2368_v12 = vld [vmem:[#allocation3 + $0x372] sm:$0xff]  ;;  %v6291_v33 = vld [vmem:[#allocation123_spill] sm:$0xff] }
 0x359   :  { %v2049_v5 = vadd.f32 %v6281_v46, %v2021_v27  ;;  %v6282_v30 = vld [vmem:[#allocation137_spill] sm:$0xff]  ;;  %v2271_v34 = vadd.f32 %v5561_v41, %v2243_v63  ;;  %v6284_v11 = vld [vmem:[#allocation160_spill] sm:$0xff]  ;;  %v6289_v28 = vld [vmem:[#allocation134_spill] sm:$0xff]  ;;  %v2326_v52 = vadd.f32 %v2322_v13, %v6291_v33  ;;  %v2378_v62 = vmul.f32 %v5669_v57, %v2368_v12 }
 0x35a   :  { %v2328_v22 = vadd.f32 %v2324_v58, %v2300_v32  ;;  %v2352_v43 = vadd.f32 %v2348_v39, %v6282_v30  ;;  %v2380_v35 = vadd.f32 %v2376_v15, %v6284_v11  ;;  %v6285_v20 = vld [vmem:[#allocation57_spill] sm:$0xff]  ;;  %v6286_v2 = vld [vmem:[#allocation120_spill] sm:$0xff]  ;;  %v2181_v39 = vmul.f32 %v5613_v45, %v2171_v42  ;;  %v6290_v58 = vld [vmem:[#allocation150_spill] sm:$0xff] }
 0x35b   :  { %v2077_v31 = vadd.f32 %v2073_v8, %v2049_v5  ;;  %v2246_v3 = vadd.f32 %v6285_v20, %v2218_v56  ;;  %v2129_v53 = vadd.f32 %v2125_v51, %v6286_v2  ;;  %v2299_v59 = vadd.f32 %v6287_v25, %v2271_v34  ;;  %v2506_v23 = vld [vmem:[#allocation3 + $0x2d3] sm:$0xff]  ;;  %v2505_v36 = vld [vmem:[#allocation3 + $0x2cb] sm:$0xff] }
 0x35c   :  { %v2356_v29 = vadd.f32 %v2352_v43, %v2328_v22  ;;  %v2350_v8 = vmul.f32 %v5606_v40, %v2340_v48  ;;  %v2351_v9 = vadd.f32 %v2347_v19, %v6289_v28  ;;  %v2157_v7 = vadd.f32 %v2153_v14, %v6290_v58  ;;  %v2452_v1 = vld [vmem:[#allocation3 + $0x273] sm:$0xff]  ;;  %v2311_v13 = vld [vmem:[#allocation3 + $0x2ea] sm:$0xff] }
 0x35d   :  { %v2105_v41 = vadd.f32 %v6288_v44, %v2077_v31  ;;  %v2274_v50 = vadd.f32 %v2270_v17, %v2246_v3  ;;  %v2327_v61 = vadd.f32 %v2323_v0, %v2299_v59  ;;  %v6292_v27 = vld [vmem:[#allocation177_spill] sm:$0xff]  ;;  %v6294_v10 = vld [vmem:[#allocation158_spill] sm:$0xff]  ;;  %v2516_v63 = vmul.f32 %v5527_v16, %v2506_v23  ;;  %v6298_v34 = vld [vmem:[#allocation172_spill] sm:$0xff] }
 0x35e   :  { %v2384_v47 = vadd.f32 %v2380_v35, %v2356_v29  ;;  %v2534_v38 = vld [vmem:[#allocation3 + $0x313] sm:$0xff]  ;;  %v2379_v51 = vadd.f32 %v2375_v54, %v6294_v10  ;;  %v2462_v43 = vmul.f32 %v6207_v37, %v2452_v1  ;;  %v2515_v60 = vmul.f32 %v5527_v16, %v2505_v36  ;;  %v2533_v12 = vld [vmem:[#allocation3 + $0x30b] sm:$0xff] }
 0x35f   :  { %v2133_v45 = vadd.f32 %v2129_v53, %v2105_v41  ;;  %v6293_v32 = vld [vmem:[#allocation33_spill] sm:$0xff]  ;;  %v2355_v4 = vadd.f32 %v2351_v9, %v2327_v61  ;;  %v2544_v19 = vmul.f32 %v5666_v49, %v2534_v38  ;;  %v2382_v31 = vadd.f32 %v2378_v62, %v6298_v34  ;;  %v6302_v41 = vld [vmem:[#allocation31_spill] sm:$0xff]  ;;  %v6305_v9 = vld [vmem:[#allocation112_spill] sm:$0xff] }
 0x360   :  { %v2412_v15 = vadd.f32 %v6292_v27, %v2384_v47  ;;  %v2302_v21 = vadd.f32 %v6293_v32, %v2274_v50  ;;  %v6295_v17 = vld [vmem:[#allocation169_spill] sm:$0xff]  ;;  %v5716_v3 = vstv %s5690_s14  ;;  %v6303_v47 = vld [vmem:[#allocation43_spill] sm:$0xff]  ;;  %v6304_v50 = vld [vmem:[#allocation100_spill] sm:$0xff]  ;;  %v2321_v58 = vmul.f32 %v6269_v6, %v2311_v13 }
 0x361   :  { %v2185_v55 = vadd.f32 %v2181_v39, %v6295_v17  ;;  %v6296_v42 = vld [vmem:[#allocation141_spill] sm:$0xff]  ;;  %v2161_v30 = vadd.f32 %v2157_v7, %v2133_v45  ;;  %v2383_v14 = vadd.f32 %v2379_v51, %v2355_v4  ;;  %v2466_v28 = vadd.f32 %v2462_v43, %v6304_v50  ;;  %v6306_v7 = vld [vmem:[#allocation56_spill] sm:$0xff]  ;;  %v6307_v1 = vld [vmem:[#allocation138_spill] sm:$0xff] }
 0x362   :  { %v2354_v0 = vadd.f32 %v2350_v8, %v6296_v42  ;;  %v2330_v46 = vadd.f32 %v2326_v52, %v2302_v21  ;;  %v6297_v5 = vld [vmem:[#allocation61_spill] sm:$0xff]  ;;  %v2548_v36 = vadd.f32 %v2544_v19, %v6307_v1  ;;  %v6308_v45 = vld [vmem:[#allocation46_spill] sm:$0xff]  ;;  %v2543_v21 = vmul.f32 %v5666_v49, %v2533_v12  ;;  %v6311_v4 = vld [vmem:[#allocation163_spill] sm:$0xff] }
 0x363   :  { %v2440_v22 = vadd.f32 %v6297_v5, %v2412_v15  ;;  %v2562_v56 = vld [vmem:[#allocation3 + $0x353] sm:$0xff]  ;;  %v2189_v35 = vadd.f32 %v2185_v55, %v2161_v30  ;;  %v2339_v25 = vld [vmem:[#allocation3 + $0x32a] sm:$0xff] }
 0x364   :  { %v2358_v48 = vadd.f32 %v2354_v0, %v2330_v46  ;;  %v6299_v29 = vld [vmem:[#allocation97_spill] sm:$0xff]  ;;  %v2572_v23 = vmul.f32 %v5716_v3, %v2562_v56  ;;  %v2349_v62 = vmul.f32 %v5606_v40, %v2339_v25  ;;  %v6310_v17 = vld [vmem:[#allocation62_spill] sm:$0xff]  ;;  %v6318_v25 = vld [vmem:[#allocation35_spill] sm:$0xff] }
 0x365   :  { %v2468_v11 = vadd.f32 %v5594_v26, %v2440_v22  ;;  %v2269_v20 = vadd.f32 %v5622_v18, %v6299_v29  ;;  %v6300_v2 = vld [vmem:[#allocation105_spill] sm:$0xff]  ;;  %v2217_v26 = vadd.f32 %v6303_v47, %v2189_v35  ;;  %v2519_v18 = vadd.f32 %v2515_v60, %v6305_v9  ;;  %v6313_v60 = vld [vmem:[#allocation36_spill] sm:$0xff] }
 0x366   :  { %v2520_v53 = vadd.f32 %v2516_v63, %v6300_v2  ;;  %v6301_v54 = vld [vmem:[#allocation181_spill] sm:$0xff]  ;;  %v2386_v44 = vadd.f32 %v2382_v31, %v2358_v48  ;;  %v2576_v42 = vadd.f32 %v2572_v23, %v6311_v4  ;;  %v6315_v31 = vld [vmem:[#allocation135_spill] sm:$0xff]  ;;  %v6316_v35 = vld [vmem:[#allocation152_spill] sm:$0xff] }
 0x367   :  { %v2411_v39 = vadd.f32 %v6301_v54, %v2383_v14  ;;  %v2508_v59 = vld [vmem:[#allocation3 + $0x2f3] sm:$0xff]  ;;  %v2496_v8 = vadd.f32 %v6302_v41, %v2468_v11  ;;  %v2561_v52 = vld [vmem:[#allocation3 + $0x34b] sm:$0xff]  ;;  %v2547_v11 = vadd.f32 %v2543_v21, %v6315_v31  ;;  %v2353_v29 = vadd.f32 %v2349_v62, %v6316_v35 }
 0x368   :  { %v2367_v61 = vld [vmem:[#allocation3 + $0x36a] sm:$0xff]  ;;  %v2414_v27 = vadd.f32 %v6308_v45, %v2386_v44  ;;  %v2518_v10 = vmul.f32 %v5527_v16, %v2508_v59  ;;  %v2536_v51 = vld [vmem:[#allocation3 + $0x333] sm:$0xff]  ;;  %v2571_v22 = vmul.f32 %v5716_v3, %v2561_v52 }
 0x369   :  { %v2439_v33 = vadd.f32 %v6306_v7, %v2411_v39  ;;  %v2524_v15 = vadd.f32 %v2520_v53, %v2496_v8  ;;  %v6309_v38 = vld [vmem:[#allocation65_spill] sm:$0xff]  ;;  %v2377_v30 = vmul.f32 %v5669_v57, %v2367_v61  ;;  %v2546_v14 = vmul.f32 %v5666_v49, %v2536_v51  ;;  %v6320_v8 = vld [vmem:[#allocation182_spill] sm:$0xff] }
 0x36a   :  { %v2245_v32 = vadd.f32 %v6309_v38, %v2217_v26  ;;  %v2442_v55 = vadd.f32 %v6310_v17, %v2414_v27  ;;  %v6312_v46 = vld [vmem:[#allocation121_spill] sm:$0xff] }
 0x36b   :  { %v2467_v6 = vadd.f32 %v5585_v24, %v2439_v33  ;;  %v2552_v63 = vadd.f32 %v2548_v36, %v2524_v15  ;;  %v2325_v5 = vadd.f32 %v2321_v58, %v6312_v46  ;;  %v2564_v43 = vld [vmem:[#allocation3 + $0x373] sm:$0xff]  ;;  %v2423_v19 = vld [vmem:[#allocation3 + $0x22b] sm:$0xff] }
 0x36c   :  { %v2273_v0 = vadd.f32 %v2269_v20, %v2245_v32  ;;  %v2560_v56 = vld [vmem:[#allocation3 + $0x1b3] sm:$0xff]  ;;  %v2470_v13 = vadd.f32 %v2466_v28, %v2442_v55  ;;  %v6317_v20 = vld [vmem:[#allocation124_spill] sm:$0xff]  ;;  %v2574_v39 = vmul.f32 %v5716_v3, %v2564_v43  ;;  %v2433_v47 = vmul.f32 %v6320_v8, %v2423_v19 }
 0x36d   :  { %v2495_v40 = vadd.f32 %v6313_v60, %v2467_v6  ;;  %v5741_v24 = vadd.f32 %v2576_v42, %v2552_v63  ;;  %v6314_v48 = vld [vmem:[#allocation37_spill] sm:$0xff]  ;;  %v2522_v2 = vadd.f32 %v2518_v10, %v6317_v20  ;;  %v6322_v58 = vld [vmem:[#allocation170_spill] sm:$0xff]  ;;  %v6324_v36 = vld [vmem:[#allocation40_spill] sm:$0xff] }
 0x36e   :  { %v2301_v34 = vadd.f32 %v6314_v48, %v2273_v0  ;;  %v2419_v57 = vld [vmem:[#allocation3 + $0x6b] sm:$0xff]  ;;  %v2498_v59 = vadd.f32 %v6318_v25, %v2470_v13  ;;  %v2381_v7 = vadd.f32 %v2377_v30, %v6322_v58  ;;  %v6329_v60 = vld [vmem:[#allocation15_spill] sm:$0xff] }
 0x36f   :  { %v2523_v53 = vadd.f32 %v2519_v18, %v2495_v40  ;;  %v2451_v54 = vld [vmem:[#allocation3 + $0x26b] sm:$0xff]  ;;  %v2643_v12 = vrot.slane %v5741_v24, 1  ;;  %v6323_v18 = vld [vmem:[#allocation142_spill] sm:$0xff]  ;;  %v2428_v45 = vmul.f32 %v6324_v36, %v2419_v57  ;;  %v2683_v36 = vrot.slane %v5741_v24, 6 }
 0x370   :  { %v2329_v23 = vadd.f32 %v2325_v5, %v2301_v34  ;;  %v6319_v44 = vld [vmem:[#allocation129_spill] sm:$0xff]  ;;  %v2550_v33 = vadd.f32 %v2546_v14, %v6323_v18  ;;  %v2526_v52 = vadd.f32 %v2522_v2, %v2498_v59  ;;  %v2461_v27 = vmul.f32 %v6207_v37, %v2451_v54  ;;  %v6326_v32 = vld [vmem:[#allocation184_spill] sm:$0xff] }
 0x371   :  { %v2569_v41 = vmul.f32 %v6319_v44, %v2560_v56  ;;  %v2551_v26 = vadd.f32 %v2547_v11, %v2523_v53  ;;  %v6321_v50 = vld [vmem:[#allocation161_spill] sm:$0xff]  ;;  %2645 = vrot.lane.b32.xlu0 %v2643_v12, %s3376_s22  ;;  %v6328_v42 = vld [vmem:[#allocation16_spill] sm:$0xff]  ;;  %v2437_v46 = vadd.f32 %v2433_v47, %v2428_v45  ;;  %v2651_v12 = vrot.slane %v5741_v24, 2 }
 0x372   :  { %v2575_v28 = vadd.f32 %v2571_v22, %v6321_v50  ;;  %v2447_v9 = vld [vmem:[#allocation3 + $0xab] sm:$0xff]  ;;  %v2357_v61 = vadd.f32 %v2353_v29, %v2329_v23  ;;  %v2554_v62 = vadd.f32 %v2550_v33, %v2526_v52  ;;  %v2675_v33 = vrot.slane %v5741_v24, 5 }
 0x373   :  { %v2479_v1 = vld [vmem:[#allocation3 + $0x2ab] sm:$0xff]  ;;  %v2578_v10 = vadd.f32 %v2574_v39, %v2569_v41  ;;  %v2691_v45 = vrot.slane %v5741_v24, 7 }
 0x374   :  { %v5758_v15 = vadd.f32 %v2575_v28, %v2551_v26  ;;  %v6325_v38 = vld [vmem:[#allocation45_spill] sm:$0xff]  ;;  %v2385_v51 = vadd.f32 %v2381_v7, %v2357_v61  ;;  %v2489_v0 = vmul.f32 %v6328_v42, %v2479_v1  ;;  %v6330_v11 = vld [vmem:[#allocation88_spill] sm:$0xff] }
 0x375   :  { %v2409_v21 = vadd.f32 %v6326_v32, %v6325_v38  ;;  %v2475_v6 = vld [vmem:[#allocation3 + $0xeb] sm:$0xff]  ;;  %v5765_v5 = vadd.f32 %v2578_v10, %v2554_v62 }
 0x376   :  { %v6327_v17 = vld [vmem:[#allocation73_spill] sm:$0xff]  ;;  %v2585_v4 = vrot.slane %v5758_v15, 1  ;;  %v2484_v40 = vmul.f32 %v6329_v60, %v2475_v6  ;;  %v2593_v50 = vrot.slane %v5758_v15, 2  ;;  %v2601_v7 = vrot.slane %v5758_v15, 3 }
 0x377   :  { %v2456_v55 = vmul.f32 %v6327_v17, %v2447_v9  ;;  %v2507_v63 = vld [vmem:[#allocation3 + $0x2eb] sm:$0xff]  ;;  %v2413_v37 = vadd.f32 %v2409_v21, %v2385_v51  ;;  %v2644_v19 = vrot.slane %v5765_v5, 1  ;;  %v2652_v14 = vrot.slane %v5765_v5, 2 }
 0x378   :  { %v2503_v22 = vld [vmem:[#allocation3 + $0x12b] sm:$0xff]  ;;  %2587 = vrot.lane.b32.xlu2 %v2585_v4, %s3376_s22  ;;  %v2517_v56 = vmul.f32 %v5527_v16, %v2507_v63  ;;  %v2493_v31 = vadd.f32 %v2489_v0, %v2484_v40  ;;  %v6331_v16 = vld [vmem:[#allocation94_spill] sm:$0xff]  ;;  %v2660_v8 = vrot.slane %v5765_v5, 3  ;;  %v2668_v58 = vrot.slane %v5765_v5, 4 }
 0x379   :  { %v2465_v30 = vadd.f32 %v2461_v27, %v2456_v55  ;;  %v2535_v43 = vld [vmem:[#allocation3 + $0x32b] sm:$0xff]  ;;  %v2441_v13 = vadd.f32 %v2437_v46, %v2413_v37  ;;  %v2512_v35 = vmul.f32 %v6330_v11, %v2503_v22  ;;  %2647 = vrot.lane.b32.xlu1 %v2644_v19, %s3376_s22  ;;  %2655 = vrot.lane.b32.xlu0 %v2652_v14, %s3375_s21  ;;  %v2609_v18 = vrot.slane %v5758_v15, 4 }
 0x37a   :  { %v2531_v48 = vld [vmem:[#allocation3 + $0x16b] sm:$0xff]  ;;  %v2545_v29 = vmul.f32 %v5666_v49, %v2535_v43  ;;  %v2676_v52 = vrot.slane %v5765_v5, 5  ;;  %v2684_v61 = vrot.slane %v5765_v5, 6  ;;  %v2617_v27 = vrot.slane %v5758_v15, 5 }
 0x37b   :  { %v2563_v34 = vld [vmem:[#allocation3 + $0x36b] sm:$0xff]  ;;  %v2469_v20 = vadd.f32 %v2465_v30, %v2441_v13  ;;  %v2521_v53 = vadd.f32 %v2517_v56, %v2512_v35  ;;  %v2540_v57 = vmul.f32 %v6331_v16, %v2531_v48  ;;  %v2692_v21 = vrot.slane %v5765_v5, 7 }
 0x37c   :  { %v2559_v2 = vld [vmem:[#allocation3 + $0x1ab] sm:$0xff]  ;;  %v2573_v54 = vmul.f32 %v5716_v3, %v2563_v34  ;;  %v2659_v3 = vrot.slane %v5741_v24, 3  ;;  %v2625_v62 = vrot.slane %v5758_v15, 6  ;;  %v2633_v10 = vrot.slane %v5758_v15, 7 }
 0x37d   :  { %v2497_v39 = vadd.f32 %v2493_v31, %v2469_v20  ;;  %v2568_v25 = vmul.f32 %v6319_v44, %v2559_v2  ;;  %v2549_v59 = vadd.f32 %v2545_v29, %v2540_v57  ;;  %v2667_v44 = vrot.slane %v5741_v24, 4 }
 0x37f   :  { %v2525_v23 = vadd.f32 %v2521_v53, %v2497_v39  ;;  %v2577_v41 = vadd.f32 %v2573_v54, %v2568_v25 }
 0x380   :  { %2653 = vrot.lane.b32.xlu2 %v2651_v12, %s3375_s21 }
 0x381   :  { %v2553_v49 = vadd.f32 %v2549_v59, %v2525_v23  ;;  %2663 = vrot.lane.b32.xlu0 %v2660_v8, %s3374_s20 }
 0x383   :  { %v5782_v47 = vadd.f32 %v2577_v41, %v2553_v49 }
 0x385   :  { %v2586_v26 = vrot.slane %v5782_v47, 1  ;;  %v2594_v28 = vrot.slane %v5782_v47, 2  ;;  %v2602_v9 = vrot.slane %v5782_v47, 3  ;;  %v2610_v1 = vrot.slane %v5782_v47, 4 }
 0x386   :  { %v2618_v38 = vrot.slane %v5782_v47, 5  ;;  %v2626_v32 = vrot.slane %v5782_v47, 6  ;;  %v2634_v51 = vrot.slane %v5782_v47, 7 }
 0x387   :  { %2589 = vrot.lane.b32.xlu1 %v2586_v26, %s3376_s22 }
 0x388   :  { %2661 = vrot.lane.b32.xlu2 %v2659_v3, %s3374_s20 }
 0x389   :  { %2669 = vrot.lane.b32.xlu0 %v2667_v44, %s3373_s19 }
 0x38f   :  { %2595 = vrot.lane.b32.xlu1 %v2593_v50, %s3375_s21 }
 0x390   :  { %2597 = vrot.lane.b32.xlu2 %v2594_v28, %s3375_s21 }
 0x391   :  { %2605 = vrot.lane.b32.xlu0 %v2602_v9, %s3374_s20 }
 0x397   :  { %2671 = vrot.lane.b32.xlu1 %v2668_v58, %s3373_s19 }
 0x398   :  { %2603 = vrot.lane.b32.xlu2 %v2601_v7, %s3374_s20 }
 0x399   :  { %2611 = vrot.lane.b32.xlu0 %v2609_v18, %s3373_s19 }
 0x39f   :  { %2677 = vrot.lane.b32.xlu1 %v2675_v33, %s3372_s18 }
 0x3a0   :  { %2679 = vrot.lane.b32.xlu2 %v2676_v52, %s3372_s18 }
 0x3a1   :  { %2687 = vrot.lane.b32.xlu0 %v2684_v61, %s3371_s17 }
 0x3a7   :  { %2613 = vrot.lane.b32.xlu1 %v2610_v1, %s3373_s19 }
 0x3a8   :  { %2685 = vrot.lane.b32.xlu2 %v2683_v36, %s3371_s17 }
 0x3a9   :  { %2693 = vrot.lane.b32.xlu0 %v2691_v45, %s3370_s0 }
 0x3af   :  { %2619 = vrot.lane.b32.xlu1 %v2617_v27, %s3372_s18 }
 0x3b0   :  { %2621 = vrot.lane.b32.xlu2 %v2618_v38, %s3372_s18 }
 0x3b1   :  { %2629 = vrot.lane.b32.xlu0 %v2626_v32, %s3371_s17 }
 0x3b7   :  { %2695 = vrot.lane.b32.xlu1 %v2692_v21, %s3370_s0 }
 0x3b8   :  { %2627 = vrot.lane.b32.xlu2 %v2625_v62, %s3371_s17 }
 0x3bf   :  { %2635 = vrot.lane.b32.xlu1 %v2633_v10, %s3370_s0 }
 0x3c0   :  { %2637 = vrot.lane.b32.xlu2 %v2634_v51, %s3370_s0 }
 0x3d2   :  { %v2588_v6 = vpop.permute.xlu2 %2587 }
 0x3d3   :  { %v2700_v9 = vsel %vm2699_vm9, %v5758_v15, %v2588_v6 }
 0x3da   :  { %v2654_v17 = vpop.permute.xlu2 %2653 }
 0x3e2   :  { %v2662_v55 = vpop.permute.xlu2 %2661 }
 0x3e3   :  { %v2646_v63 = vpop.permute.xlu0 %2645 }
 0x3e4   :  { %v2720_v48 = vsel %vm2699_vm9, %v5741_v24, %v2646_v63 }
 0x3e5   :  { %v2722_v31 = vsel %vm2702_vm10, %v2720_v48, %v2654_v17 }
 0x3e6   :  { %v2724_v35 = vsel %vm2705_vm11, %v2722_v31, %v2662_v55 }
 0x3ea   :  { %v2598_v4 = vpop.permute.xlu2 %2597 }
 0x3eb   :  { %v2656_v42 = vpop.permute.xlu0 %2655  ;;  %v2648_v0 = vpop.permute.xlu1 %2647 }
 0x3ec   :  { %v2721_v25 = vsel %vm2699_vm9, %v5765_v5, %v2648_v0 }
 0x3ed   :  { %v2723_v41 = vsel %vm2702_vm10, %v2721_v25, %v2656_v42 }
 0x3f2   :  { %v2604_v46 = vpop.permute.xlu2 %2603 }
 0x3f3   :  { %v2664_v37 = vpop.permute.xlu0 %2663 }
 0x3f4   :  { %v2725_v8 = vsel %vm2705_vm11, %v2723_v41, %v2664_v37 }
 0x3f9   :  { %v2590_v22 = vpop.permute.xlu1 %2589 }
 0x3fa   :  { %v2680_v43 = vpop.permute.xlu2 %2679  ;;  %v2701_v24 = vsel %vm2699_vm9, %v5782_v47, %v2590_v22 }
 0x3fb   :  { %v2670_v30 = vpop.permute.xlu0 %2669  ;;  %v2704_v12 = vsel %vm2702_vm10, %v2701_v24, %v2598_v4 }
 0x3fc   :  { %v2726_v29 = vsel %vm2708_vm12, %v2724_v35, %v2670_v30 }
 0x401   :  { %v2596_v60 = vpop.permute.xlu1 %2595 }
 0x402   :  { %v2686_v56 = vpop.permute.xlu2 %2685  ;;  %v2703_v18 = vsel %vm2702_vm10, %v2700_v9, %v2596_v60 }
 0x403   :  { %v2606_v40 = vpop.permute.xlu0 %2605  ;;  %v2706_v36 = vsel %vm2705_vm11, %v2703_v18, %v2604_v46 }
 0x404   :  { %v2707_v59 = vsel %vm2705_vm11, %v2704_v12, %v2606_v40 }
 0x409   :  { %v2672_v19 = vpop.permute.xlu1 %2671 }
 0x40a   :  { %v2622_v34 = vpop.permute.xlu2 %2621  ;;  %v2727_v3 = vsel %vm2708_vm12, %v2725_v8, %v2672_v19 }
 0x40b   :  { %v2612_v14 = vpop.permute.xlu0 %2611  ;;  %v2729_v33 = vsel %vm2711_vm13, %v2727_v3, %v2680_v43 }
 0x40c   :  { %v2709_v15 = vsel %vm2708_vm12, %v2706_v36, %v2612_v14 }
 0x411   :  { %v2678_v13 = vpop.permute.xlu1 %2677 }
 0x412   :  { %v2728_v2 = vsel %vm2711_vm13, %v2726_v29, %v2678_v13  ;;  %v2628_v53 = vpop.permute.xlu2 %2627 }
 0x413   :  { %v2688_v11 = vpop.permute.xlu0 %2687  ;;  %v2730_v57 = vsel %vm2714_vm14, %v2728_v2, %v2686_v56 }
 0x414   :  { %v2731_v61 = vsel %vm2714_vm14, %v2729_v33, %v2688_v11 }
 0x419   :  { %v2614_v20 = vpop.permute.xlu1 %2613 }
 0x41a   :  { %v2710_v49 = vsel %vm2708_vm12, %v2707_v59, %v2614_v20  ;;  %v2638_v44 = vpop.permute.xlu2 %2637 }
 0x41b   :  { %v2694_v16 = vpop.permute.xlu0 %2693  ;;  %v2713_v26 = vsel %vm2711_vm13, %v2710_v49, %v2622_v34 }
 0x41c   :  { %v2732_v54 = vsel %vm2717_vm15, %v2730_v57, %v2694_v16 }
 0x41d   :  { %v2933_v39 = vmul.f32 -1.442695, %v2732_v54 }
 0x41f   :  { %3314 = vpow2.f32 %v2933_v39 }
 0x421   :  { %v2620_v23 = vpop.permute.xlu1 %2619 }
 0x422   :  { %v2712_v27 = vsel %vm2711_vm13, %v2709_v15, %v2620_v23 }
 0x423   :  { %v2630_v47 = vpop.permute.xlu0 %2629  ;;  %v2715_v21 = vsel %vm2714_vm14, %v2712_v27, %v2628_v53 }
 0x424   :  { %v2716_v50 = vsel %vm2714_vm14, %v2713_v26, %v2630_v47 }
 0x425   :  { %v3315_v28 = vpop.eup %3314  ;;  %v2719_v5 = vsel %vm2717_vm15, %v2716_v50, %v2638_v44  ;;  %v2811_v50 = vld [vmem:[%s5890_s1 + $0x8] sm:$0xff] }
 0x426   :  { %v5852_v58 = vadd.f32 1.0, %v3315_v28  ;;  %v2934_v7 = vmul.f32 -1.442695, %v2719_v5 }
 0x428   :  { %3316 = vpow2.f32 %v2934_v7  ;;  %v2776_v31 = vand.u32 2147483648, %v5852_v58  ;;  %vm2770_vm6 = vweird.f32 %v5852_v58  ;;  %v2774_v29 = vand.u32 2147483647, %v5852_v58 }
 0x429   :  { %v2696_v52 = vpop.permute.xlu1 %2695  ;;  %3318 = vrcp.f32 %v5852_v58 }
 0x42a   :  { %v2733_v1 = vsel %vm2717_vm15, %v2731_v61, %v2696_v52  ;;  %v2777_v25 = vor.u32 1.1754944e-38, %v2776_v31  ;;  %vm2775_vm12 = vcmp.eq.f32.partialorder %v2774_v29, 8.507059e+37 }
 0x42b   :  { %v2935_v45 = vmul.f32 -1.442695, %v2733_v1  ;;  %v2810_v1 = vld [vmem:[%s5890_s1] sm:$0xff] }
 0x42d   :  { %3320 = vpow2.f32 %v2935_v45 }
 0x42e   :  { %v3317_v38 = vpop.eup %3316 }
 0x42f   :  { %v3319_v62 = vpop.eup %3318  ;;  %v2748_v10 = vadd.f32 1.0, %v3317_v38 }
 0x430   :  { %v2766_v55 = vmul.f32 %v3319_v62, %v5852_v58  ;;  %vm2771_vm2 = vweird.f32 %v3319_v62 }
 0x431   :  { %v2636_v32 = vpop.permute.xlu1 %2635  ;;  %3322 = vrcp.f32 %v2748_v10  ;;  %v2791_v56 = vand.u32 2147483648, %v2748_v10  ;;  %v2789_v19 = vand.u32 2147483647, %v2748_v10  ;;  %vm2785_vm3 = vweird.f32 %v2748_v10  ;;  %vm5869_vm7 = vmor %vm2770_vm6, %vm2771_vm2 }
 0x432   :  { %v2718_v51 = vsel %vm2717_vm15, %v2715_v21, %v2636_v32  ;;  %v2767_v4 = vsub.f32 1.0, %v2766_v55 }
 0x433   :  { %v2932_v6 = vmul.f32 -1.442695, %v2718_v51  ;;  %v3321_v17 = vpop.eup %3320  ;;  %v2792_v2 = vor.u32 1.1754944e-38, %v2791_v56  ;;  %vm2790_vm8 = vcmp.eq.f32.partialorder %v2789_v19, 8.507059e+37 }
 0x434   :  { %v2749_v63 = vadd.f32 1.0, %v3321_v17  ;;  %v2768_v30 = vmul.f32 %v3319_v62, %v2767_v4 }
 0x435   :  { %3324 = vpow2.f32 %v2932_v6 }
 0x436   :  { %3326 = vrcp.f32 %v2749_v63  ;;  %v2769_v13 = vadd.f32 %v3319_v62, %v2768_v30  ;;  %v2806_v34 = vand.u32 2147483648, %v2749_v63  ;;  %v2804_v35 = vand.u32 2147483647, %v2749_v63 }
 0x437   :  { %v3323_v42 = vpop.eup %3322  ;;  %vm2800_vm9 = vweird.f32 %v2749_v63 }
 0x438   :  { %v2781_v46 = vmul.f32 %v3323_v42, %v2748_v10  ;;  %vm2786_vm1 = vweird.f32 %v3323_v42  ;;  %v2773_v57 = vsel %vm5869_vm7, %v3319_v62, %v2769_v13  ;;  %v2807_v39 = vor.u32 1.1754944e-38, %v2806_v34 }
 0x439   :  { %vm2787_vm4 = vmor %vm2785_vm3, %vm2786_vm1  ;;  %vm2805_vm11 = vcmp.eq.f32.partialorder %v2804_v35, 8.507059e+37  ;;  %v2778_v41 = vsel %vm2775_vm12, %v2777_v25, %v2773_v57 }
 0x43a   :  { %v2782_v43 = vsub.f32 1.0, %v2781_v46  ;;  %v2813_v5 = vperm.slane %v2778_v41, 0 }
 0x43b   :  { %v3325_v0 = vpop.eup %3324 }
 0x43c   :  { %v2746_v37 = vadd.f32 1.0, %v3325_v0  ;;  %v3327_v22 = vpop.eup %3326  ;;  %v2783_v40 = vmul.f32 %v3323_v42, %v2782_v43  ;;  %v2820_v61 = vrot.slane %v2813_v5, 4 }
 0x43d   :  { %v2796_v60 = vmul.f32 %v3327_v22, %v2749_v63  ;;  %vm2801_vm5 = vweird.f32 %v3327_v22 }
 0x43e   :  { %3328 = vrcp.f32 %v2746_v37  ;;  %v2784_v48 = vadd.f32 %v3323_v42, %v2783_v40  ;;  %vm2802_vm10 = vmor %vm2800_vm9, %vm2801_vm5  ;;  %v2761_v26 = vand.u32 2147483648, %v2746_v37  ;;  %v2759_v44 = vand.u32 2147483647, %v2746_v37 }
 0x43f   :  { %v2797_v14 = vsub.f32 1.0, %v2796_v60  ;;  %vm2755_vm14 = vweird.f32 %v2746_v37 }
 0x440   :  { %v2788_v20 = vsel %vm2787_vm4, %v3323_v42, %v2784_v48  ;;  %v2762_v7 = vor.u32 1.1754944e-38, %v2761_v26  ;;  %vm2760_vm1 = vcmp.eq.f32.partialorder %v2759_v44, 8.507059e+37 }
 0x441   :  { %v2798_v11 = vmul.f32 %v3327_v22, %v2797_v14  ;;  %v2793_v54 = vsel %vm2790_vm8, %v2792_v2, %v2788_v20 }
 0x442   :  { %v2814_v8 = vperm.slane %v2793_v54, 0 }
 0x443   :  { %v2799_v16 = vadd.f32 %v3327_v22, %v2798_v11 }
 0x444   :  { %v3329_v53 = vpop.eup %3328 }
 0x445   :  { %v2751_v12 = vmul.f32 %v3329_v53, %v2746_v37  ;;  %v2803_v59 = vsel %vm2802_vm10, %v3327_v22, %v2799_v16  ;;  %vm2756_vm13 = vweird.f32 %v3329_v53 }
 0x446   :  { %v2808_v23 = vsel %vm2805_vm11, %v2807_v39, %v2803_v59  ;;  %vm2757_vm15 = vmor %vm2755_vm14, %vm2756_vm13 }
 0x447   :  { %v2752_v49 = vsub.f32 1.0, %v2751_v12  ;;  %v2815_v47 = vperm.slane %v2808_v23, 0 }
 0x449   :  { %v2753_v3 = vmul.f32 %v3329_v53, %v2752_v49  ;;  %v2821_v28 = vrot.slane %v2815_v47, 4 }
 0x44b   :  { %v2754_v9 = vadd.f32 %v3329_v53, %v2753_v3  ;;  %v2823_v58 = vsel %vm39_vm0, %v2814_v8, %v2821_v28 }
 0x44c   :  { %v2827_v18 = vmul.f32 %v2823_v58, %v2811_v50 }
 0x44d   :  { %v2758_v33 = vsel %vm2757_vm15, %v3329_v53, %v2754_v9 }
 0x44e   :  { %v2763_v52 = vsel %vm2760_vm1, %v2762_v7, %v2758_v33  ;;  %2829 = vst [vmem:[%s5891_s2 + $0x8] sm:$0xff] %v2827_v18 }
 0x44f   :  { %v2812_v36 = vperm.slane %v2763_v52, 0 }
 0x451   :  { %v2822_v45 = vsel %vm39_vm0, %v2812_v36, %v2820_v61 }
 0x452   :  { %v2826_v15 = vmul.f32 %v2822_v45, %v2810_v1 }
 0x454   :  { %2828 = vst [vmem:[%s5891_s2] sm:$0xff] %v2826_v15 }
 0x455   :  { %2834 = vsyncpa [#allocation5], 1 }

</bundles_post_ra>
